<compile_context>
chip_gen: v6e
topology: v6e:2x2x1
jax: 0.10.0
libtpu: 0.0.40
codegen_flags: <defaults>
</compile_context>

<pallas_src>
import numpy as np
import jax
import jax.numpy as jnp
from jax.experimental import pallas as pl
from jax.experimental.pallas import tpu as pltpu


# ---------------------------------------------------------------------------
# Fused Pallas kernel: num_layers spectral layers + linear head in one call
# ---------------------------------------------------------------------------

def _make_fused_kernel(num_layers, f_max):
    def kernel(x0_ref, ut_ref, u_ref, theta_ref, w_ref, b_ref, out_ref, x_scr):
        layer = pl.program_id(0)

        # First grid step: load the (padded) input activation into the VMEM carry.
        @pl.when(layer == 0)
        def _init():
            x_scr[...] = x0_ref[...]

        x = x_scr[...]                                                    # (N, F_max)

        # Spectral transform: x_hat = U^T @ x   (MXU; U^T precomputed on host)
        x_hat = jnp.dot(ut_ref[...], x, preferred_element_type=jnp.float32)

        # Per-node filter: y_hat[n] = x_hat[n] @ Theta[n]  == einsum('ni,nio->no')
        # Theta stored as (Fin, N, Fout): Fin-step FMA over lane-dense (N, Fout) tiles.
        acc = x_hat[:, 0:1] * theta_ref[0]
        for i in range(1, f_max):
            acc = acc + x_hat[:, i:i + 1] * theta_ref[i]                  # (N, F_max)

        # Inverse spectral transform: y = U @ y_hat   (MXU)
        y = jnp.dot(u_ref[...], acc, preferred_element_type=jnp.float32)  # (N, F_max)

        # ReLU + carry to next layer (dropout is identity in eval mode).
        @pl.when(layer < num_layers - 1)
        def _carry():
            x_scr[...] = jnp.maximum(y, 0.0)

        # Fused FC head epilogue on the last layer step.
        @pl.when(layer == num_layers - 1)
        def _epilogue():
            logits = jnp.dot(y, w_ref[...], preferred_element_type=jnp.float32)  # (N, C)
            out_ref[...] = logits + b_ref[...]        # (1, C) sublane-broadcast bias add

    return kernel


def fused_forward(x0, u_t, u, theta_stack, w_fc, b_row):
    """x0:(N,F_max) u_t/u:(N,N) theta_stack:(L,F_max,N,F_max) w_fc:(F_max,C) b_row:(1,C)"""
    num_layers, f_max, N, _ = theta_stack.shape
    num_classes = w_fc.shape[1]

    return pl.pallas_call(
        _make_fused_kernel(num_layers, f_max),
        out_shape=jax.ShapeDtypeStruct((N, num_classes), jnp.float32),
        grid_spec=pltpu.PrefetchScalarGridSpec(
            num_scalar_prefetch=0,
            grid=(num_layers,),
            in_specs=[
                pl.BlockSpec((N, f_max), lambda l: (0, 0)),                     # x0   (resident)
                pl.BlockSpec((N, N), lambda l: (0, 0)),                         # U^T  (resident)
                pl.BlockSpec((N, N), lambda l: (0, 0)),                         # U    (resident)
                pl.BlockSpec((None, f_max, N, f_max), lambda l: (l, 0, 0, 0)),  # Theta[l] (dbl-buf)
                pl.BlockSpec((f_max, num_classes), lambda l: (0, 0)),           # W_fc (resident)
                pl.BlockSpec((1, num_classes), lambda l: (0, 0)),               # bias (resident)
            ],
            out_specs=pl.BlockSpec((N, num_classes), lambda l: (0, 0)),
            scratch_shapes=[pltpu.VMEM((N, f_max), jnp.float32)],               # activation carry
        ),
        compiler_params=pltpu.CompilerParams(dimension_semantics=("arbitrary",)),
    )(x0, u_t, u, theta_stack, w_fc, b_row)


# ---------------------------------------------------------------------------
# Model glue: parameter construction + one-time packing + forward wrapper
# ---------------------------------------------------------------------------

def compute_normalized_laplacian(adj):
    N = adj.shape[0]
    degrees = adj.sum(axis=1)
    eps = 1e-10
    d_inv_sqrt = np.power(degrees + eps, -0.5)
    d_inv_sqrt[np.isinf(d_inv_sqrt)] = 0.0
    D_inv_sqrt = np.diag(d_inv_sqrt)
    return np.eye(N) - D_inv_sqrt @ adj @ D_inv_sqrt


def build_params(key, N, in_features, hidden_features, num_classes, num_layers):
    # Synthetic deterministic adjacency (symmetric, no self loops).
    k_adj, k_theta, k_w, k_b = jax.random.split(key, 4)
    probs = np.array(jax.random.uniform(k_adj, (N, N)))
    A = (np.triu(probs, 1) < 0.1).astype(np.float32)
    A = A + A.T

    # Shared spectral basis U (L is symmetric -> eigh; module casts eig output to f32).
    L = compute_normalized_laplacian(A)
    _, U = np.linalg.eigh(L)
    U = jnp.asarray(U, dtype=jnp.float32)

    # Theta parameters per layer (torch.randn(N, f_in, f_out)).
    dims = [(in_features, hidden_features)]
    dims += [(hidden_features, hidden_features)] * (num_layers - 2)
    dims += [(hidden_features, hidden_features)]
    theta_keys = jax.random.split(k_theta, len(dims))
    thetas = [
        jax.random.normal(tk, (N, fi, fo), dtype=jnp.float32)
        for tk, (fi, fo) in zip(theta_keys, dims)
    ]

    # Linear head (stored pre-transposed as (hidden, num_classes)), bias as (C,).
    bound = 1.0 / np.sqrt(hidden_features)
    w_fc = jax.random.uniform(
        k_w, (hidden_features, num_classes), minval=-bound, maxval=bound, dtype=jnp.float32
    )
    b_fc = jax.random.uniform(
        k_b, (num_classes,), minval=-bound, maxval=bound, dtype=jnp.float32
    )
    return U, thetas, w_fc, b_fc


def pack_params(U, thetas, w_fc, b_fc):
    """One-time host-side packing into kernel-ready layouts (done outside the forward)."""
    f_max = max(max(t.shape[1] for t in thetas), max(t.shape[2] for t in thetas))

    # Theta: (N, Fin, Fout) -> (Fin, N, Fout), zero-padded to (F_max, N, F_max), stacked.
    stacked = []
    for t in thetas:
        fi, fo = t.shape[1], t.shape[2]
        tt = jnp.transpose(t, (1, 0, 2))
        tt = jnp.pad(tt, ((0, f_max - fi), (0, 0), (0, f_max - fo)))
        stacked.append(tt)
    theta_stack = jnp.stack(stacked, axis=0).astype(jnp.float32)

    w_pad = jnp.pad(w_fc.astype(jnp.float32), ((0, f_max - w_fc.shape[0]), (0, 0)))
    b_row = jnp.reshape(b_fc.astype(jnp.float32), (1, -1))
    u = U.astype(jnp.float32)
    u_t = jnp.asarray(np.ascontiguousarray(np.array(u).T))  # precomputed once; no in-kernel vxpose
    return u, u_t, theta_stack, w_pad, b_row


@jax.jit
def deep_spectral_gnn_forward(x, u, u_t, theta_stack, w_fc, b_row):
    """Pad x to the uniform feature width and run the fused kernel."""
    f_max = theta_stack.shape[1]
    x0 = jnp.pad(x.astype(jnp.float32), ((0, 0), (0, f_max - x.shape[1])))
    logits = fused_forward(x0, u_t, u, theta_stack, w_fc, b_row)
    return jnp.squeeze(logits)  # no-op for (N, C) with C > 1, matches torch .squeeze()


def reference_forward(x, U, thetas, w_fc, b_fc):
    n_layers = len(thetas)
    for i, theta in enumerate(thetas):
        x_hat = U.T @ x
        y_hat = jnp.einsum('ni,nio->no', x_hat, theta)
        x = U @ y_hat
        if i != n_layers - 1:
            x = jnp.maximum(x, 0.0)
    return jnp.squeeze(x @ w_fc + b_fc)


# ---------------------------------------------------------------------------

if __name__ == "__main__":
    N = 128              # number of graph nodes (sublane-aligned)
    in_features = 16
    hidden_features = 32
    num_classes = 2
    num_layers = 3

    key = jax.random.PRNGKey(0)
    k_params, k_x = jax.random.split(key)

    U, thetas, w_fc, b_fc = build_params(
        k_params, N, in_features, hidden_features, num_classes, num_layers
    )
    x = jax.random.normal(k_x, (N, in_features), dtype=jnp.float32)

    u, u_t, theta_stack, w_pad, b_row = pack_params(U, thetas, w_fc, b_fc)

    logits = deep_spectral_gnn_forward(x, u, u_t, theta_stack, w_pad, b_row)
    logits = jax.block_until_ready(logits)

    ref = jax.block_until_ready(reference_forward(x, U, thetas, w_fc, b_fc))
    assert logits.shape == (N, num_classes), logits.shape
    assert np.allclose(np.array(logits), np.array(ref), rtol=1e-3, atol=1e-3)

    print("KERNEL_OK")
</pallas_src>

<mosaic_0001>
module attributes {stable_mosaic.version = 11 : i64} {
  func.func @kernel(%arg0: i32, %arg1: memref<128x32xf32, #tpu.memory_space<vmem>>, %arg2: memref<128x128xf32, #tpu.memory_space<vmem>>, %arg3: memref<128x128xf32, #tpu.memory_space<vmem>>, %arg4: memref<1x32x128x32xf32, #tpu.memory_space<vmem>>, %arg5: memref<32x2xf32, #tpu.memory_space<vmem>>, %arg6: memref<1x2xf32, #tpu.memory_space<vmem>>, %arg7: memref<128x2xf32, #tpu.memory_space<vmem>>, %arg8: memref<128x32xf32, #tpu.memory_space<vmem>>) attributes {dimension_semantics = [#tpu.dimension_semantics<arbitrary>], iteration_bounds = array<i64: 3>, scalar_prefetch = 0 : i64, scratch_operands = 1 : i64, tpu.core_type = #tpu.core_type<tc>, window_params = [{pipeline_mode = #tpu.pipeline_mode<synchronous>, transform_indices = @transform_0, window_bounds = array<i64: 128, 32>}, {pipeline_mode = #tpu.pipeline_mode<synchronous>, transform_indices = @transform_1, window_bounds = array<i64: 128, 128>}, {pipeline_mode = #tpu.pipeline_mode<synchronous>, transform_indices = @transform_2, window_bounds = array<i64: 128, 128>}, {transform_indices = @transform_3, window_bounds = array<i64: 1, 32, 128, 32>}, {pipeline_mode = #tpu.pipeline_mode<synchronous>, transform_indices = @transform_4, window_bounds = array<i64: 32, 2>}, {pipeline_mode = #tpu.pipeline_mode<synchronous>, transform_indices = @transform_5, window_bounds = array<i64: 1, 2>}, {pipeline_mode = #tpu.pipeline_mode<synchronous>, transform_indices = @transform_6, window_bounds = array<i64: 128, 2>}]} {
    %c0_i32 = arith.constant 0 : i32
    %0 = arith.cmpi eq, %arg0, %c0_i32 : i32
    %1 = arith.extui %0 : i1 to i32
    %c0_i32_0 = arith.constant 0 : i32
    %2 = arith.cmpi ne, %1, %c0_i32_0 : i32
    scf.if %2 {
      %c0_107 = arith.constant 0 : index
      %c0_108 = arith.constant 0 : index
      %205 = vector.load %arg1[%c0_107, %c0_108] : memref<128x32xf32, #tpu.memory_space<vmem>>, vector<128x32xf32>
      %c0_109 = arith.constant 0 : index
      %c0_110 = arith.constant 0 : index
      %206 = vector.load %arg8[%c0_109, %c0_110] : memref<128x32xf32, #tpu.memory_space<vmem>>, vector<128x32xf32>
      tpu.vector_store %arg8[%c0_109, %c0_110], %205 {strides = array<i32>} : memref<128x32xf32, #tpu.memory_space<vmem>>, vector<128x32xf32>,
    } else {
    }
    %c0 = arith.constant 0 : index
    %c0_1 = arith.constant 0 : index
    %3 = vector.load %arg8[%c0, %c0_1] : memref<128x32xf32, #tpu.memory_space<vmem>>, vector<128x32xf32>
    %c0_2 = arith.constant 0 : index
    %c0_3 = arith.constant 0 : index
    %4 = vector.load %arg2[%c0_2, %c0_3] : memref<128x128xf32, #tpu.memory_space<vmem>>, vector<128x128xf32>
    %cst = arith.constant dense<0.000000e+00> : vector<128x32xf32>
    %5 = tpu.matmul %4, %3, %cst {dimension_numbers = #tpu.dot_dimension_numbers<[1], [0], [0], [1], [0, 0, 1, 1], [], []>} : vector<128x128xf32>, vector<128x32xf32>, vector<128x32xf32> -> vector<128x32xf32>
    %6 = vector.extract_strided_slice %5 {offsets = [0, 0], sizes = [128, 1], strides = [1, 1]} : vector<128x32xf32> to vector<128x1xf32>
    %c0_4 = arith.constant 0 : index
    %c0_5 = arith.constant 0 : index
    %c0_6 = arith.constant 0 : index
    %c0_7 = arith.constant 0 : index
    %7 = vector.load %arg4[%c0_4, %c0_5, %c0_6, %c0_7] : memref<1x32x128x32xf32, #tpu.memory_space<vmem>>, vector<1x1x128x32xf32>
    %8 = vector.shape_cast %7 : vector<1x1x128x32xf32> to vector<128x32xf32>
    %9 = vector.broadcast %6 : vector<128x1xf32> to vector<128x32xf32>
    %10 = arith.mulf %9, %8 : vector<128x32xf32>
    %11 = vector.extract_strided_slice %5 {offsets = [0, 1], sizes = [128, 1], strides = [1, 1]} : vector<128x32xf32> to vector<128x1xf32>
    %c0_8 = arith.constant 0 : index
    %c1 = arith.constant 1 : index
    %c0_9 = arith.constant 0 : index
    %c0_10 = arith.constant 0 : index
    %12 = vector.load %arg4[%c0_8, %c1, %c0_9, %c0_10] : memref<1x32x128x32xf32, #tpu.memory_space<vmem>>, vector<1x1x128x32xf32>
    %13 = vector.shape_cast %12 : vector<1x1x128x32xf32> to vector<128x32xf32>
    %14 = vector.broadcast %11 : vector<128x1xf32> to vector<128x32xf32>
    %15 = arith.mulf %14, %13 : vector<128x32xf32>
    %16 = arith.addf %10, %15 : vector<128x32xf32>
    %17 = vector.extract_strided_slice %5 {offsets = [0, 2], sizes = [128, 1], strides = [1, 1]} : vector<128x32xf32> to vector<128x1xf32>
    %c0_11 = arith.constant 0 : index
    %c2 = arith.constant 2 : index
    %c0_12 = arith.constant 0 : index
    %c0_13 = arith.constant 0 : index
    %18 = vector.load %arg4[%c0_11, %c2, %c0_12, %c0_13] : memref<1x32x128x32xf32, #tpu.memory_space<vmem>>, vector<1x1x128x32xf32>
    %19 = vector.shape_cast %18 : vector<1x1x128x32xf32> to vector<128x32xf32>
    %20 = vector.broadcast %17 : vector<128x1xf32> to vector<128x32xf32>
    %21 = arith.mulf %20, %19 : vector<128x32xf32>
    %22 = arith.addf %16, %21 : vector<128x32xf32>
    %23 = vector.extract_strided_slice %5 {offsets = [0, 3], sizes = [128, 1], strides = [1, 1]} : vector<128x32xf32> to vector<128x1xf32>
    %c0_14 = arith.constant 0 : index
    %c3 = arith.constant 3 : index
    %c0_15 = arith.constant 0 : index
    %c0_16 = arith.constant 0 : index
    %24 = vector.load %arg4[%c0_14, %c3, %c0_15, %c0_16] : memref<1x32x128x32xf32, #tpu.memory_space<vmem>>, vector<1x1x128x32xf32>
    %25 = vector.shape_cast %24 : vector<1x1x128x32xf32> to vector<128x32xf32>
    %26 = vector.broadcast %23 : vector<128x1xf32> to vector<128x32xf32>
    %27 = arith.mulf %26, %25 : vector<128x32xf32>
    %28 = arith.addf %22, %27 : vector<128x32xf32>
    %29 = vector.extract_strided_slice %5 {offsets = [0, 4], sizes = [128, 1], strides = [1, 1]} : vector<128x32xf32> to vector<128x1xf32>
    %c0_17 = arith.constant 0 : index
    %c4 = arith.constant 4 : index
    %c0_18 = arith.constant 0 : index
    %c0_19 = arith.constant 0 : index
    %30 = vector.load %arg4[%c0_17, %c4, %c0_18, %c0_19] : memref<1x32x128x32xf32, #tpu.memory_space<vmem>>, vector<1x1x128x32xf32>
    %31 = vector.shape_cast %30 : vector<1x1x128x32xf32> to vector<128x32xf32>
    %32 = vector.broadcast %29 : vector<128x1xf32> to vector<128x32xf32>
    %33 = arith.mulf %32, %31 : vector<128x32xf32>
    %34 = arith.addf %28, %33 : vector<128x32xf32>
    %35 = vector.extract_strided_slice %5 {offsets = [0, 5], sizes = [128, 1], strides = [1, 1]} : vector<128x32xf32> to vector<128x1xf32>
    %c0_20 = arith.constant 0 : index
    %c5 = arith.constant 5 : index
    %c0_21 = arith.constant 0 : index
    %c0_22 = arith.constant 0 : index
    %36 = vector.load %arg4[%c0_20, %c5, %c0_21, %c0_22] : memref<1x32x128x32xf32, #tpu.memory_space<vmem>>, vector<1x1x128x32xf32>
    %37 = vector.shape_cast %36 : vector<1x1x128x32xf32> to vector<128x32xf32>
    %38 = vector.broadcast %35 : vector<128x1xf32> to vector<128x32xf32>
    %39 = arith.mulf %38, %37 : vector<128x32xf32>
    %40 = arith.addf %34, %39 : vector<128x32xf32>
    %41 = vector.extract_strided_slice %5 {offsets = [0, 6], sizes = [128, 1], strides = [1, 1]} : vector<128x32xf32> to vector<128x1xf32>
    %c0_23 = arith.constant 0 : index
    %c6 = arith.constant 6 : index
    %c0_24 = arith.constant 0 : index
    %c0_25 = arith.constant 0 : index
    %42 = vector.load %arg4[%c0_23, %c6, %c0_24, %c0_25] : memref<1x32x128x32xf32, #tpu.memory_space<vmem>>, vector<1x1x128x32xf32>
    %43 = vector.shape_cast %42 : vector<1x1x128x32xf32> to vector<128x32xf32>
    %44 = vector.broadcast %41 : vector<128x1xf32> to vector<128x32xf32>
    %45 = arith.mulf %44, %43 : vector<128x32xf32>
    %46 = arith.addf %40, %45 : vector<128x32xf32>
    %47 = vector.extract_strided_slice %5 {offsets = [0, 7], sizes = [128, 1], strides = [1, 1]} : vector<128x32xf32> to vector<128x1xf32>
    %c0_26 = arith.constant 0 : index
    %c7 = arith.constant 7 : index
    %c0_27 = arith.constant 0 : index
    %c0_28 = arith.constant 0 : index
    %48 = vector.load %arg4[%c0_26, %c7, %c0_27, %c0_28] : memref<1x32x128x32xf32, #tpu.memory_space<vmem>>, vector<1x1x128x32xf32>
    %49 = vector.shape_cast %48 : vector<1x1x128x32xf32> to vector<128x32xf32>
    %50 = vector.broadcast %47 : vector<128x1xf32> to vector<128x32xf32>
    %51 = arith.mulf %50, %49 : vector<128x32xf32>
    %52 = arith.addf %46, %51 : vector<128x32xf32>
    %53 = vector.extract_strided_slice %5 {offsets = [0, 8], sizes = [128, 1], strides = [1, 1]} : vector<128x32xf32> to vector<128x1xf32>
    %c0_29 = arith.constant 0 : index
    %c8 = arith.constant 8 : index
    %c0_30 = arith.constant 0 : index
    %c0_31 = arith.constant 0 : index
    %54 = vector.load %arg4[%c0_29, %c8, %c0_30, %c0_31] : memref<1x32x128x32xf32, #tpu.memory_space<vmem>>, vector<1x1x128x32xf32>
    %55 = vector.shape_cast %54 : vector<1x1x128x32xf32> to vector<128x32xf32>
    %56 = vector.broadcast %53 : vector<128x1xf32> to vector<128x32xf32>
    %57 = arith.mulf %56, %55 : vector<128x32xf32>
    %58 = arith.addf %52, %57 : vector<128x32xf32>
    %59 = vector.extract_strided_slice %5 {offsets = [0, 9], sizes = [128, 1], strides = [1, 1]} : vector<128x32xf32> to vector<128x1xf32>
    %c0_32 = arith.constant 0 : index
    %c9 = arith.constant 9 : index
    %c0_33 = arith.constant 0 : index
    %c0_34 = arith.constant 0 : index
    %60 = vector.load %arg4[%c0_32, %c9, %c0_33, %c0_34] : memref<1x32x128x32xf32, #tpu.memory_space<vmem>>, vector<1x1x128x32xf32>
    %61 = vector.shape_cast %60 : vector<1x1x128x32xf32> to vector<128x32xf32>
    %62 = vector.broadcast %59 : vector<128x1xf32> to vector<128x32xf32>
    %63 = arith.mulf %62, %61 : vector<128x32xf32>
    %64 = arith.addf %58, %63 : vector<128x32xf32>
    %65 = vector.extract_strided_slice %5 {offsets = [0, 10], sizes = [128, 1], strides = [1, 1]} : vector<128x32xf32> to vector<128x1xf32>
    %c0_35 = arith.constant 0 : index
    %c10 = arith.constant 10 : index
    %c0_36 = arith.constant 0 : index
    %c0_37 = arith.constant 0 : index
    %66 = vector.load %arg4[%c0_35, %c10, %c0_36, %c0_37] : memref<1x32x128x32xf32, #tpu.memory_space<vmem>>, vector<1x1x128x32xf32>
    %67 = vector.shape_cast %66 : vector<1x1x128x32xf32> to vector<128x32xf32>
    %68 = vector.broadcast %65 : vector<128x1xf32> to vector<128x32xf32>
    %69 = arith.mulf %68, %67 : vector<128x32xf32>
    %70 = arith.addf %64, %69 : vector<128x32xf32>
    %71 = vector.extract_strided_slice %5 {offsets = [0, 11], sizes = [128, 1], strides = [1, 1]} : vector<128x32xf32> to vector<128x1xf32>
    %c0_38 = arith.constant 0 : index
    %c11 = arith.constant 11 : index
    %c0_39 = arith.constant 0 : index
    %c0_40 = arith.constant 0 : index
    %72 = vector.load %arg4[%c0_38, %c11, %c0_39, %c0_40] : memref<1x32x128x32xf32, #tpu.memory_space<vmem>>, vector<1x1x128x32xf32>
    %73 = vector.shape_cast %72 : vector<1x1x128x32xf32> to vector<128x32xf32>
    %74 = vector.broadcast %71 : vector<128x1xf32> to vector<128x32xf32>
    %75 = arith.mulf %74, %73 : vector<128x32xf32>
    %76 = arith.addf %70, %75 : vector<128x32xf32>
    %77 = vector.extract_strided_slice %5 {offsets = [0, 12], sizes = [128, 1], strides = [1, 1]} : vector<128x32xf32> to vector<128x1xf32>
    %c0_41 = arith.constant 0 : index
    %c12 = arith.constant 12 : index
    %c0_42 = arith.constant 0 : index
    %c0_43 = arith.constant 0 : index
    %78 = vector.load %arg4[%c0_41, %c12, %c0_42, %c0_43] : memref<1x32x128x32xf32, #tpu.memory_space<vmem>>, vector<1x1x128x32xf32>
    %79 = vector.shape_cast %78 : vector<1x1x128x32xf32> to vector<128x32xf32>
    %80 = vector.broadcast %77 : vector<128x1xf32> to vector<128x32xf32>
    %81 = arith.mulf %80, %79 : vector<128x32xf32>
    %82 = arith.addf %76, %81 : vector<128x32xf32>
    %83 = vector.extract_strided_slice %5 {offsets = [0, 13], sizes = [128, 1], strides = [1, 1]} : vector<128x32xf32> to vector<128x1xf32>
    %c0_44 = arith.constant 0 : index
    %c13 = arith.constant 13 : index
    %c0_45 = arith.constant 0 : index
    %c0_46 = arith.constant 0 : index
    %84 = vector.load %arg4[%c0_44, %c13, %c0_45, %c0_46] : memref<1x32x128x32xf32, #tpu.memory_space<vmem>>, vector<1x1x128x32xf32>
    %85 = vector.shape_cast %84 : vector<1x1x128x32xf32> to vector<128x32xf32>
    %86 = vector.broadcast %83 : vector<128x1xf32> to vector<128x32xf32>
    %87 = arith.mulf %86, %85 : vector<128x32xf32>
    %88 = arith.addf %82, %87 : vector<128x32xf32>
    %89 = vector.extract_strided_slice %5 {offsets = [0, 14], sizes = [128, 1], strides = [1, 1]} : vector<128x32xf32> to vector<128x1xf32>
    %c0_47 = arith.constant 0 : index
    %c14 = arith.constant 14 : index
    %c0_48 = arith.constant 0 : index
    %c0_49 = arith.constant 0 : index
    %90 = vector.load %arg4[%c0_47, %c14, %c0_48, %c0_49] : memref<1x32x128x32xf32, #tpu.memory_space<vmem>>, vector<1x1x128x32xf32>
    %91 = vector.shape_cast %90 : vector<1x1x128x32xf32> to vector<128x32xf32>
    %92 = vector.broadcast %89 : vector<128x1xf32> to vector<128x32xf32>
    %93 = arith.mulf %92, %91 : vector<128x32xf32>
    %94 = arith.addf %88, %93 : vector<128x32xf32>
    %95 = vector.extract_strided_slice %5 {offsets = [0, 15], sizes = [128, 1], strides = [1, 1]} : vector<128x32xf32> to vector<128x1xf32>
    %c0_50 = arith.constant 0 : index
    %c15 = arith.constant 15 : index
    %c0_51 = arith.constant 0 : index
    %c0_52 = arith.constant 0 : index
    %96 = vector.load %arg4[%c0_50, %c15, %c0_51, %c0_52] : memref<1x32x128x32xf32, #tpu.memory_space<vmem>>, vector<1x1x128x32xf32>
    %97 = vector.shape_cast %96 : vector<1x1x128x32xf32> to vector<128x32xf32>
    %98 = vector.broadcast %95 : vector<128x1xf32> to vector<128x32xf32>
    %99 = arith.mulf %98, %97 : vector<128x32xf32>
    %100 = arith.addf %94, %99 : vector<128x32xf32>
    %101 = vector.extract_strided_slice %5 {offsets = [0, 16], sizes = [128, 1], strides = [1, 1]} : vector<128x32xf32> to vector<128x1xf32>
    %c0_53 = arith.constant 0 : index
    %c16 = arith.constant 16 : index
    %c0_54 = arith.constant 0 : index
    %c0_55 = arith.constant 0 : index
    %102 = vector.load %arg4[%c0_53, %c16, %c0_54, %c0_55] : memref<1x32x128x32xf32, #tpu.memory_space<vmem>>, vector<1x1x128x32xf32>
    %103 = vector.shape_cast %102 : vector<1x1x128x32xf32> to vector<128x32xf32>
    %104 = vector.broadcast %101 : vector<128x1xf32> to vector<128x32xf32>
    %105 = arith.mulf %104, %103 : vector<128x32xf32>
    %106 = arith.addf %100, %105 : vector<128x32xf32>
    %107 = vector.extract_strided_slice %5 {offsets = [0, 17], sizes = [128, 1], strides = [1, 1]} : vector<128x32xf32> to vector<128x1xf32>
    %c0_56 = arith.constant 0 : index
    %c17 = arith.constant 17 : index
    %c0_57 = arith.constant 0 : index
    %c0_58 = arith.constant 0 : index
    %108 = vector.load %arg4[%c0_56, %c17, %c0_57, %c0_58] : memref<1x32x128x32xf32, #tpu.memory_space<vmem>>, vector<1x1x128x32xf32>
    %109 = vector.shape_cast %108 : vector<1x1x128x32xf32> to vector<128x32xf32>
    %110 = vector.broadcast %107 : vector<128x1xf32> to vector<128x32xf32>
    %111 = arith.mulf %110, %109 : vector<128x32xf32>
    %112 = arith.addf %106, %111 : vector<128x32xf32>
    %113 = vector.extract_strided_slice %5 {offsets = [0, 18], sizes = [128, 1], strides = [1, 1]} : vector<128x32xf32> to vector<128x1xf32>
    %c0_59 = arith.constant 0 : index
    %c18 = arith.constant 18 : index
    %c0_60 = arith.constant 0 : index
    %c0_61 = arith.constant 0 : index
    %114 = vector.load %arg4[%c0_59, %c18, %c0_60, %c0_61] : memref<1x32x128x32xf32, #tpu.memory_space<vmem>>, vector<1x1x128x32xf32>
    %115 = vector.shape_cast %114 : vector<1x1x128x32xf32> to vector<128x32xf32>
    %116 = vector.broadcast %113 : vector<128x1xf32> to vector<128x32xf32>
    %117 = arith.mulf %116, %115 : vector<128x32xf32>
    %118 = arith.addf %112, %117 : vector<128x32xf32>
    %119 = vector.extract_strided_slice %5 {offsets = [0, 19], sizes = [128, 1], strides = [1, 1]} : vector<128x32xf32> to vector<128x1xf32>
    %c0_62 = arith.constant 0 : index
    %c19 = arith.constant 19 : index
    %c0_63 = arith.constant 0 : index
    %c0_64 = arith.constant 0 : index
    %120 = vector.load %arg4[%c0_62, %c19, %c0_63, %c0_64] : memref<1x32x128x32xf32, #tpu.memory_space<vmem>>, vector<1x1x128x32xf32>
    %121 = vector.shape_cast %120 : vector<1x1x128x32xf32> to vector<128x32xf32>
    %122 = vector.broadcast %119 : vector<128x1xf32> to vector<128x32xf32>
    %123 = arith.mulf %122, %121 : vector<128x32xf32>
    %124 = arith.addf %118, %123 : vector<128x32xf32>
    %125 = vector.extract_strided_slice %5 {offsets = [0, 20], sizes = [128, 1], strides = [1, 1]} : vector<128x32xf32> to vector<128x1xf32>
    %c0_65 = arith.constant 0 : index
    %c20 = arith.constant 20 : index
    %c0_66 = arith.constant 0 : index
    %c0_67 = arith.constant 0 : index
    %126 = vector.load %arg4[%c0_65, %c20, %c0_66, %c0_67] : memref<1x32x128x32xf32, #tpu.memory_space<vmem>>, vector<1x1x128x32xf32>
    %127 = vector.shape_cast %126 : vector<1x1x128x32xf32> to vector<128x32xf32>
    %128 = vector.broadcast %125 : vector<128x1xf32> to vector<128x32xf32>
    %129 = arith.mulf %128, %127 : vector<128x32xf32>
    %130 = arith.addf %124, %129 : vector<128x32xf32>
    %131 = vector.extract_strided_slice %5 {offsets = [0, 21], sizes = [128, 1], strides = [1, 1]} : vector<128x32xf32> to vector<128x1xf32>
    %c0_68 = arith.constant 0 : index
    %c21 = arith.constant 21 : index
    %c0_69 = arith.constant 0 : index
    %c0_70 = arith.constant 0 : index
    %132 = vector.load %arg4[%c0_68, %c21, %c0_69, %c0_70] : memref<1x32x128x32xf32, #tpu.memory_space<vmem>>, vector<1x1x128x32xf32>
    %133 = vector.shape_cast %132 : vector<1x1x128x32xf32> to vector<128x32xf32>
    %134 = vector.broadcast %131 : vector<128x1xf32> to vector<128x32xf32>
    %135 = arith.mulf %134, %133 : vector<128x32xf32>
    %136 = arith.addf %130, %135 : vector<128x32xf32>
    %137 = vector.extract_strided_slice %5 {offsets = [0, 22], sizes = [128, 1], strides = [1, 1]} : vector<128x32xf32> to vector<128x1xf32>
    %c0_71 = arith.constant 0 : index
    %c22 = arith.constant 22 : index
    %c0_72 = arith.constant 0 : index
    %c0_73 = arith.constant 0 : index
    %138 = vector.load %arg4[%c0_71, %c22, %c0_72, %c0_73] : memref<1x32x128x32xf32, #tpu.memory_space<vmem>>, vector<1x1x128x32xf32>
    %139 = vector.shape_cast %138 : vector<1x1x128x32xf32> to vector<128x32xf32>
    %140 = vector.broadcast %137 : vector<128x1xf32> to vector<128x32xf32>
    %141 = arith.mulf %140, %139 : vector<128x32xf32>
    %142 = arith.addf %136, %141 : vector<128x32xf32>
    %143 = vector.extract_strided_slice %5 {offsets = [0, 23], sizes = [128, 1], strides = [1, 1]} : vector<128x32xf32> to vector<128x1xf32>
    %c0_74 = arith.constant 0 : index
    %c23 = arith.constant 23 : index
    %c0_75 = arith.constant 0 : index
    %c0_76 = arith.constant 0 : index
    %144 = vector.load %arg4[%c0_74, %c23, %c0_75, %c0_76] : memref<1x32x128x32xf32, #tpu.memory_space<vmem>>, vector<1x1x128x32xf32>
    %145 = vector.shape_cast %144 : vector<1x1x128x32xf32> to vector<128x32xf32>
    %146 = vector.broadcast %143 : vector<128x1xf32> to vector<128x32xf32>
    %147 = arith.mulf %146, %145 : vector<128x32xf32>
    %148 = arith.addf %142, %147 : vector<128x32xf32>
    %149 = vector.extract_strided_slice %5 {offsets = [0, 24], sizes = [128, 1], strides = [1, 1]} : vector<128x32xf32> to vector<128x1xf32>
    %c0_77 = arith.constant 0 : index
    %c24 = arith.constant 24 : index
    %c0_78 = arith.constant 0 : index
    %c0_79 = arith.constant 0 : index
    %150 = vector.load %arg4[%c0_77, %c24, %c0_78, %c0_79] : memref<1x32x128x32xf32, #tpu.memory_space<vmem>>, vector<1x1x128x32xf32>
    %151 = vector.shape_cast %150 : vector<1x1x128x32xf32> to vector<128x32xf32>
    %152 = vector.broadcast %149 : vector<128x1xf32> to vector<128x32xf32>
    %153 = arith.mulf %152, %151 : vector<128x32xf32>
    %154 = arith.addf %148, %153 : vector<128x32xf32>
    %155 = vector.extract_strided_slice %5 {offsets = [0, 25], sizes = [128, 1], strides = [1, 1]} : vector<128x32xf32> to vector<128x1xf32>
    %c0_80 = arith.constant 0 : index
    %c25 = arith.constant 25 : index
    %c0_81 = arith.constant 0 : index
    %c0_82 = arith.constant 0 : index
    %156 = vector.load %arg4[%c0_80, %c25, %c0_81, %c0_82] : memref<1x32x128x32xf32, #tpu.memory_space<vmem>>, vector<1x1x128x32xf32>
    %157 = vector.shape_cast %156 : vector<1x1x128x32xf32> to vector<128x32xf32>
    %158 = vector.broadcast %155 : vector<128x1xf32> to vector<128x32xf32>
    %159 = arith.mulf %158, %157 : vector<128x32xf32>
    %160 = arith.addf %154, %159 : vector<128x32xf32>
    %161 = vector.extract_strided_slice %5 {offsets = [0, 26], sizes = [128, 1], strides = [1, 1]} : vector<128x32xf32> to vector<128x1xf32>
    %c0_83 = arith.constant 0 : index
    %c26 = arith.constant 26 : index
    %c0_84 = arith.constant 0 : index
    %c0_85 = arith.constant 0 : index
    %162 = vector.load %arg4[%c0_83, %c26, %c0_84, %c0_85] : memref<1x32x128x32xf32, #tpu.memory_space<vmem>>, vector<1x1x128x32xf32>
    %163 = vector.shape_cast %162 : vector<1x1x128x32xf32> to vector<128x32xf32>
    %164 = vector.broadcast %161 : vector<128x1xf32> to vector<128x32xf32>
    %165 = arith.mulf %164, %163 : vector<128x32xf32>
    %166 = arith.addf %160, %165 : vector<128x32xf32>
    %167 = vector.extract_strided_slice %5 {offsets = [0, 27], sizes = [128, 1], strides = [1, 1]} : vector<128x32xf32> to vector<128x1xf32>
    %c0_86 = arith.constant 0 : index
    %c27 = arith.constant 27 : index
    %c0_87 = arith.constant 0 : index
    %c0_88 = arith.constant 0 : index
    %168 = vector.load %arg4[%c0_86, %c27, %c0_87, %c0_88] : memref<1x32x128x32xf32, #tpu.memory_space<vmem>>, vector<1x1x128x32xf32>
    %169 = vector.shape_cast %168 : vector<1x1x128x32xf32> to vector<128x32xf32>
    %170 = vector.broadcast %167 : vector<128x1xf32> to vector<128x32xf32>
    %171 = arith.mulf %170, %169 : vector<128x32xf32>
    %172 = arith.addf %166, %171 : vector<128x32xf32>
    %173 = vector.extract_strided_slice %5 {offsets = [0, 28], sizes = [128, 1], strides = [1, 1]} : vector<128x32xf32> to vector<128x1xf32>
    %c0_89 = arith.constant 0 : index
    %c28 = arith.constant 28 : index
    %c0_90 = arith.constant 0 : index
    %c0_91 = arith.constant 0 : index
    %174 = vector.load %arg4[%c0_89, %c28, %c0_90, %c0_91] : memref<1x32x128x32xf32, #tpu.memory_space<vmem>>, vector<1x1x128x32xf32>
    %175 = vector.shape_cast %174 : vector<1x1x128x32xf32> to vector<128x32xf32>
    %176 = vector.broadcast %173 : vector<128x1xf32> to vector<128x32xf32>
    %177 = arith.mulf %176, %175 : vector<128x32xf32>
    %178 = arith.addf %172, %177 : vector<128x32xf32>
    %179 = vector.extract_strided_slice %5 {offsets = [0, 29], sizes = [128, 1], strides = [1, 1]} : vector<128x32xf32> to vector<128x1xf32>
    %c0_92 = arith.constant 0 : index
    %c29 = arith.constant 29 : index
    %c0_93 = arith.constant 0 : index
    %c0_94 = arith.constant 0 : index
    %180 = vector.load %arg4[%c0_92, %c29, %c0_93, %c0_94] : memref<1x32x128x32xf32, #tpu.memory_space<vmem>>, vector<1x1x128x32xf32>
    %181 = vector.shape_cast %180 : vector<1x1x128x32xf32> to vector<128x32xf32>
    %182 = vector.broadcast %179 : vector<128x1xf32> to vector<128x32xf32>
    %183 = arith.mulf %182, %181 : vector<128x32xf32>
    %184 = arith.addf %178, %183 : vector<128x32xf32>
    %185 = vector.extract_strided_slice %5 {offsets = [0, 30], sizes = [128, 1], strides = [1, 1]} : vector<128x32xf32> to vector<128x1xf32>
    %c0_95 = arith.constant 0 : index
    %c30 = arith.constant 30 : index
    %c0_96 = arith.constant 0 : index
    %c0_97 = arith.constant 0 : index
    %186 = vector.load %arg4[%c0_95, %c30, %c0_96, %c0_97] : memref<1x32x128x32xf32, #tpu.memory_space<vmem>>, vector<1x1x128x32xf32>
    %187 = vector.shape_cast %186 : vector<1x1x128x32xf32> to vector<128x32xf32>
    %188 = vector.broadcast %185 : vector<128x1xf32> to vector<128x32xf32>
    %189 = arith.mulf %188, %187 : vector<128x32xf32>
    %190 = arith.addf %184, %189 : vector<128x32xf32>
    %191 = vector.extract_strided_slice %5 {offsets = [0, 31], sizes = [128, 1], strides = [1, 1]} : vector<128x32xf32> to vector<128x1xf32>
    %c0_98 = arith.constant 0 : index
    %c31 = arith.constant 31 : index
    %c0_99 = arith.constant 0 : index
    %c0_100 = arith.constant 0 : index
    %192 = vector.load %arg4[%c0_98, %c31, %c0_99, %c0_100] : memref<1x32x128x32xf32, #tpu.memory_space<vmem>>, vector<1x1x128x32xf32>
    %193 = vector.shape_cast %192 : vector<1x1x128x32xf32> to vector<128x32xf32>
    %194 = vector.broadcast %191 : vector<128x1xf32> to vector<128x32xf32>
    %195 = arith.mulf %194, %193 : vector<128x32xf32>
    %196 = arith.addf %190, %195 : vector<128x32xf32>
    %c0_101 = arith.constant 0 : index
    %c0_102 = arith.constant 0 : index
    %197 = vector.load %arg3[%c0_101, %c0_102] : memref<128x128xf32, #tpu.memory_space<vmem>>, vector<128x128xf32>
    %cst_103 = arith.constant dense<0.000000e+00> : vector<128x32xf32>
    %198 = tpu.matmul %197, %196, %cst_103 {dimension_numbers = #tpu.dot_dimension_numbers<[1], [0], [0], [1], [0, 0, 1, 1], [], []>} : vector<128x128xf32>, vector<128x32xf32>, vector<128x32xf32> -> vector<128x32xf32>
    %c2_i32 = arith.constant 2 : i32
    %199 = arith.cmpi slt, %arg0, %c2_i32 : i32
    %200 = arith.extui %199 : i1 to i32
    %c0_i32_104 = arith.constant 0 : i32
    %201 = arith.cmpi ne, %200, %c0_i32_104 : i32
    scf.if %201 {
      %cst_107 = arith.constant 0.000000e+00 : f32
      %205 = vector.broadcast %cst_107 : f32 to vector<128x32xf32>
      %206 = arith.maximumf %198, %205 : vector<128x32xf32>
      %c0_108 = arith.constant 0 : index
      %c0_109 = arith.constant 0 : index
      %207 = vector.load %arg8[%c0_108, %c0_109] : memref<128x32xf32, #tpu.memory_space<vmem>>, vector<128x32xf32>
      tpu.vector_store %arg8[%c0_108, %c0_109], %206 {strides = array<i32>} : memref<128x32xf32, #tpu.memory_space<vmem>>, vector<128x32xf32>,
    } else {
    }
    %c2_i32_105 = arith.constant 2 : i32
    %202 = arith.cmpi eq, %arg0, %c2_i32_105 : i32
    %203 = arith.extui %202 : i1 to i32
    %c0_i32_106 = arith.constant 0 : i32
    %204 = arith.cmpi ne, %203, %c0_i32_106 : i32
    scf.if %204 {
      %c0_107 = arith.constant 0 : index
      %c0_108 = arith.constant 0 : index
      %205 = vector.load %arg5[%c0_107, %c0_108] : memref<32x2xf32, #tpu.memory_space<vmem>>, vector<32x2xf32>
      %cst_109 = arith.constant dense<0.000000e+00> : vector<128x2xf32>
      %206 = tpu.matmul %198, %205, %cst_109 {dimension_numbers = #tpu.dot_dimension_numbers<[1], [0], [0], [1], [0, 0, 1, 1], [], []>} : vector<128x32xf32>, vector<32x2xf32>, vector<128x2xf32> -> vector<128x2xf32>
      %c0_110 = arith.constant 0 : index
      %c0_111 = arith.constant 0 : index
      %207 = vector.load %arg6[%c0_110, %c0_111] : memref<1x2xf32, #tpu.memory_space<vmem>>, vector<1x2xf32>
      %208 = vector.broadcast %207 : vector<1x2xf32> to vector<128x2xf32>
      %209 = arith.addf %206, %208 : vector<128x2xf32>
      %c0_112 = arith.constant 0 : index
      %c0_113 = arith.constant 0 : index
      %210 = vector.load %arg7[%c0_112, %c0_113] : memref<128x2xf32, #tpu.memory_space<vmem>>, vector<128x2xf32>
      tpu.vector_store %arg7[%c0_112, %c0_113], %209 {strides = array<i32>} : memref<128x2xf32, #tpu.memory_space<vmem>>, vector<128x2xf32>,
    } else {
    }
    return
  }
  func.func @transform_0(%arg0: i32) -> (i32, i32) {
    %c0_i32 = arith.constant 0 : i32
    %c0_i32_0 = arith.constant 0 : i32
    %c0_i32_1 = arith.constant 0 : i32
    return %c0_i32, %c0_i32_0 : i32, i32
  }
  func.func @transform_1(%arg0: i32) -> (i32, i32) {
    %c0_i32 = arith.constant 0 : i32
    %c0_i32_0 = arith.constant 0 : i32
    %c0_i32_1 = arith.constant 0 : i32
    return %c0_i32, %c0_i32_0 : i32, i32
  }
  func.func @transform_2(%arg0: i32) -> (i32, i32) {
    %c0_i32 = arith.constant 0 : i32
    %c0_i32_0 = arith.constant 0 : i32
    %c0_i32_1 = arith.constant 0 : i32
    return %c0_i32, %c0_i32_0 : i32, i32
  }
  func.func @transform_3(%arg0: i32) -> (i32, i32, i32, i32) {
    %c0_i32 = arith.constant 0 : i32
    %c0_i32_0 = arith.constant 0 : i32
    %c0_i32_1 = arith.constant 0 : i32
    %c0_i32_2 = arith.constant 0 : i32
    return %arg0, %c0_i32, %c0_i32_0, %c0_i32_1 : i32, i32, i32, i32
  }
  func.func @transform_4(%arg0: i32) -> (i32, i32) {
    %c0_i32 = arith.constant 0 : i32
    %c0_i32_0 = arith.constant 0 : i32
    %c0_i32_1 = arith.constant 0 : i32
    return %c0_i32, %c0_i32_0 : i32, i32
  }
  func.func @transform_5(%arg0: i32) -> (i32, i32) {
    %c0_i32 = arith.constant 0 : i32
    %c0_i32_0 = arith.constant 0 : i32
    %c0_i32_1 = arith.constant 0 : i32
    return %c0_i32, %c0_i32_0 : i32, i32
  }
  func.func @transform_6(%arg0: i32) -> (i32, i32) {
    %c0_i32 = arith.constant 0 : i32
    %c0_i32_0 = arith.constant 0 : i32
    %c0_i32_1 = arith.constant 0 : i32
    return %c0_i32, %c0_i32_0 : i32, i32
  }
}

</mosaic_0001>

<bundles_post_ra>
// kernel: deep_spectral_gnn_forward.1
= control target key start
LH: loop header
LB: loop body
LE: loop exit
PB: predicated region body
PF: predicated region fallthrough
CT: control target
= control target key end

     0   :  { %s5613_s21 = smov 0   ;;  %s8741_s0 = inlined_call_operand.vmem [shape: f32[128,32], index: 0, kind: input, shape index: {}]   ;;  %s8742_s1 = inlined_call_operand.vmem [shape: f32[128,128], index: 1, kind: input, shape index: {}]   ;;  %s8743_s2 = inlined_call_operand.vmem [shape: f32[128,128], index: 2, kind: input, shape index: {}]   ;;  %s8744_s3 = inlined_call_operand.vmem [shape: f32[3,32,128,32], index: 3, kind: input, shape index: {}]   ;;  %s8745_s4 = inlined_call_operand.vmem [shape: f32[32,2], index: 4, kind: input, shape index: {}]   ;;  %s8746_s5 = inlined_call_operand.vmem [shape: f32[1,2], index: 5, kind: input, shape index: {}]   ;;  %s8747_s6 = inlined_call_operand.vmem [shape: f32[128,2], index: 6, kind: output, shape index: {}]  }
   0x1 LB: > { %s5619_s22 = sadd.s32 4294967295, %s5544_s21   ;;  %p4521_p0 = scmp.ge.s32.totalorder %s5544_s21, 1  ;;  %s5544_s21 = sphi %s5613_s21, %s16_s21  }
   0x2   : > { %p207_p1 = scmp.lt.s32.totalorder %s5544_s21, 4 }
   0x4   : > { %p208_p2 = pnand %p4521_p0, %p207_p1 }
   0x6   : > { %211 = sbr.rel (%p208_p2) target bundleno = 2133 (0x855), region = 44 }
   0xb   : > { %p232_p3 = scmp.lt.s32.totalorder %s5619_s22, 2  ;;  %p4524_p4 = scmp.ne.s32.totalorder %s5619_s22, 0 }
   0xd   : > { %s233_s23 = scalar_select %p232_p3, %s5619_s22, 2 }
   0xe   : > { %240 = sbr.rel (%p4524_p4) target bundleno = 28 (0x1c), region = 48 }
   0xf   : > { %s5042_s24 = sshll.u32 %s233_s23, 12 }
  0x10   : > { %s5628_s27 = scalar_lea.vmem %s8744_s3, %s5042_s24 }
  0x13   : > { %v241_v0 = vld [vmem:[%s8741_s0] sm:$0xff]  ;;  %vm257_vm0 = vcmask 261120   ;;  %v242_v1 = vld [vmem:[%s8741_s0 + $0x8] sm:$0xff]  ;;  %v243_v2 = vld [vmem:[%s8741_s0 + $0x10] sm:$0xff] }
  0x14   : > { %258 = vst.msk [vmem:[#allocation2] sm:$0xff] %vm257_vm0, %v241_v0  ;;  %259 = vst.msk [vmem:[#allocation2 + $0x8] sm:$0xff] %vm257_vm0, %v242_v1  ;;  %v244_v3 = vld [vmem:[%s8741_s0 + $0x18] sm:$0xff]  ;;  %v245_v4 = vld [vmem:[%s8741_s0 + $0x20] sm:$0xff] }
  0x15   : > { %260 = vst.msk [vmem:[#allocation2 + $0x10] sm:$0xff] %vm257_vm0, %v243_v2  ;;  %v246_v5 = vld [vmem:[%s8741_s0 + $0x28] sm:$0xff]  ;;  %261 = vst.msk [vmem:[#allocation2 + $0x18] sm:$0xff] %vm257_vm0, %v244_v3  ;;  %v247_v6 = vld [vmem:[%s8741_s0 + $0x30] sm:$0xff] }
  0x16   : > { %262 = vst.msk [vmem:[#allocation2 + $0x20] sm:$0xff] %vm257_vm0, %v245_v4  ;;  %263 = vst.msk [vmem:[#allocation2 + $0x28] sm:$0xff] %vm257_vm0, %v246_v5  ;;  %v248_v7 = vld [vmem:[%s8741_s0 + $0x38] sm:$0xff]  ;;  %v249_v8 = vld [vmem:[%s8741_s0 + $0x40] sm:$0xff] }
  0x17   : > { %264 = vst.msk [vmem:[#allocation2 + $0x30] sm:$0xff] %vm257_vm0, %v247_v6  ;;  %265 = vst.msk [vmem:[#allocation2 + $0x38] sm:$0xff] %vm257_vm0, %v248_v7  ;;  %v250_v9 = vld [vmem:[%s8741_s0 + $0x48] sm:$0xff]  ;;  %v251_v10 = vld [vmem:[%s8741_s0 + $0x50] sm:$0xff] }
  0x18   : > { %266 = vst.msk [vmem:[#allocation2 + $0x40] sm:$0xff] %vm257_vm0, %v249_v8  ;;  %v252_v11 = vld [vmem:[%s8741_s0 + $0x58] sm:$0xff]  ;;  %267 = vst.msk [vmem:[#allocation2 + $0x48] sm:$0xff] %vm257_vm0, %v250_v9  ;;  %v253_v12 = vld [vmem:[%s8741_s0 + $0x60] sm:$0xff] }
  0x19   : > { %268 = vst.msk [vmem:[#allocation2 + $0x50] sm:$0xff] %vm257_vm0, %v251_v10  ;;  %269 = vst.msk [vmem:[#allocation2 + $0x58] sm:$0xff] %vm257_vm0, %v252_v11  ;;  %v254_v13 = vld [vmem:[%s8741_s0 + $0x68] sm:$0xff]  ;;  %v255_v14 = vld [vmem:[%s8741_s0 + $0x70] sm:$0xff] }
  0x1a   : > { %270 = vst.msk [vmem:[#allocation2 + $0x60] sm:$0xff] %vm257_vm0, %v253_v12  ;;  %271 = vst.msk [vmem:[#allocation2 + $0x68] sm:$0xff] %vm257_vm0, %v254_v13  ;;  %v256_v15 = vld [vmem:[%s8741_s0 + $0x78] sm:$0xff] }
  0x1b   : > { %272 = vst.msk [vmem:[#allocation2 + $0x70] sm:$0xff] %vm257_vm0, %v255_v14  ;;  %273 = vst.msk [vmem:[#allocation2 + $0x78] sm:$0xff] %vm257_vm0, %v256_v15 }
  0x1c PF: > { %v8760_v18 = vmov 1   ;;  %v8762_v20 = vmov 0   ;;  %v290_v22 = vld [vmem:[%s8742_s1] sm:$0xff]  ;;  %v277_v31 = vld [vmem:[#allocation2 + $0x18] sm:$0xff]  ;;  %v276_v32 = vld [vmem:[#allocation2 + $0x10] sm:$0xff]  ;;  %v8754_v51 = vmov 3  }
  0x1d   : > { %5320 = vset.pattern.permute.xlu1 %v8760_v18  ;;  %5319 = vset.pattern.permute.xlu0 %v8762_v20  ;;  %v279_v29 = vld [vmem:[#allocation2 + $0x28] sm:$0xff]  ;;  %v278_v30 = vld [vmem:[#allocation2 + $0x20] sm:$0xff]  ;;  %v292_v36 = vld [vmem:[%s8742_s1 + $0x10] sm:$0xff]  ;;  %v8750_v52 = vmov 2   ;;  %v8758_v53 = vmov 5   ;;  %v8752_v54 = vmov 4  }
  0x1e   : > { %5159 = vmatprep.mubr.f32.mxu0 %v290_v22  ;;  %v281_v27 = vld [vmem:[#allocation2 + $0x38] sm:$0xff]  ;;  %v280_v28 = vld [vmem:[#allocation2 + $0x30] sm:$0xff]  ;;  %v275_v33 = vld [vmem:[#allocation2 + $0x8] sm:$0xff]  ;;  %v8748_v55 = vmov 7   ;;  %v8756_v56 = vmov 6   ;;  %p5021_p5 = scmp.ge.s32.totalorder %s5619_s22, 2 }
  0x1f   : > { %v283_v25 = vld [vmem:[#allocation2 + $0x48] sm:$0xff]  ;;  %v282_v26 = vld [vmem:[#allocation2 + $0x40] sm:$0xff]  ;;  %v293_v37 = vld [vmem:[%s8742_s1 + $0x18] sm:$0xff] }
  0x20   : > { %v285_v23 = vld [vmem:[#allocation2 + $0x58] sm:$0xff]  ;;  %v284_v24 = vld [vmem:[#allocation2 + $0x50] sm:$0xff]  ;;  %v274_v34 = vld [vmem:[#allocation2] sm:$0xff] }
  0x21   : > { %v287_v19 = vld [vmem:[#allocation2 + $0x68] sm:$0xff]  ;;  %v286_v21 = vld [vmem:[#allocation2 + $0x60] sm:$0xff]  ;;  %v296_v40 = vld [vmem:[%s8742_s1 + $0x30] sm:$0xff] }
  0x22   : > { %v289_v16 = vld [vmem:[#allocation2 + $0x78] sm:$0xff]  ;;  %v288_v17 = vld [vmem:[#allocation2 + $0x70] sm:$0xff]  ;;  %v291_v35 = vld [vmem:[%s8742_s1 + $0x8] sm:$0xff] }
  0x23   : > { %5127 = vmatprep.subr.mxu0 %v289_v16  ;;  %v294_v38 = vld [vmem:[%s8742_s1 + $0x20] sm:$0xff]  ;;  %v295_v39 = vld [vmem:[%s8742_s1 + $0x28] sm:$0xff]  ;;  %v297_v41 = vld [vmem:[%s8742_s1 + $0x38] sm:$0xff] }
  0x24   : > { %5128 = vmatpush3.msra.mxu0 %v289_v16  ;;  %v298_v42 = vld [vmem:[%s8742_s1 + $0x40] sm:$0xff]  ;;  %v299_v43 = vld [vmem:[%s8742_s1 + $0x48] sm:$0xff]  ;;  %v300_v44 = vld [vmem:[%s8742_s1 + $0x50] sm:$0xff] }
  0x25   : > { %5129 = vmatprep.subr.mxu0 %v288_v17  ;;  %v301_v45 = vld [vmem:[%s8742_s1 + $0x58] sm:$0xff]  ;;  %v302_v46 = vld [vmem:[%s8742_s1 + $0x60] sm:$0xff]  ;;  %v303_v47 = vld [vmem:[%s8742_s1 + $0x68] sm:$0xff] }
  0x26   : > { %5130 = vmatpush3.msra.mxu0 %v288_v17  ;;  %v304_v48 = vld [vmem:[%s8742_s1 + $0x70] sm:$0xff]  ;;  %v305_v49 = vld [vmem:[%s8742_s1 + $0x78] sm:$0xff] }
  0x27   : > { %5131 = vmatprep.subr.mxu0 %v287_v19 }
  0x28   : > { %5132 = vmatpush3.msra.mxu0 %v287_v19 }
  0x29   : > { %5133 = vmatprep.subr.mxu0 %v286_v21 }
  0x2a   : > { %5134 = vmatpush3.msra.mxu0 %v286_v21 }
  0x2b   : > { %5135 = vmatprep.subr.mxu0 %v285_v23 }
  0x2c   : > { %5136 = vmatpush3.msra.mxu0 %v285_v23 }
  0x2d   : > { %5137 = vmatprep.subr.mxu0 %v284_v24 }
  0x2e   : > { %5138 = vmatpush3.msra.mxu0 %v284_v24 }
  0x2f   : > { %5139 = vmatprep.subr.mxu0 %v283_v25 }
  0x30   : > { %5140 = vmatpush3.msra.mxu0 %v283_v25 }
  0x31   : > { %5141 = vmatprep.subr.mxu0 %v282_v26 }
  0x32   : > { %5142 = vmatpush3.msra.mxu0 %v282_v26 }
  0x33   : > { %5143 = vmatprep.subr.mxu0 %v281_v27 }
  0x34   : > { %5144 = vmatpush3.msra.mxu0 %v281_v27 }
  0x35   : > { %5145 = vmatprep.subr.mxu0 %v280_v28 }
  0x36   : > { %5146 = vmatpush3.msra.mxu0 %v280_v28 }
  0x37   : > { %5147 = vmatprep.subr.mxu0 %v279_v29 }
  0x38   : > { %5148 = vmatpush3.msra.mxu0 %v279_v29 }
  0x39   : > { %5149 = vmatprep.subr.mxu0 %v278_v30 }
  0x3a   : > { %5150 = vmatpush3.msra.mxu0 %v278_v30 }
  0x3b   : > { %5151 = vmatprep.subr.mxu0 %v277_v31 }
  0x3c   : > { %5152 = vmatpush3.msra.mxu0 %v277_v31 }
  0x3d   : > { %5153 = vmatprep.subr.mxu0 %v276_v32 }
  0x3e   : > { %5154 = vmatpush3.msra.mxu0 %v276_v32 }
  0x3f   : > { %5155 = vmatprep.subr.mxu0 %v275_v33 }
  0x40   : > { %5156 = vmatpush3.msra.mxu0 %v275_v33 }
  0x41   : > { %5157 = vmatprep.subr.mxu0 %v274_v34 }
  0x42   : > { %5158 = vmatpush3.msra.mxu0 %v274_v34 }
  0x43   : > { %5160 = vmatmul.mubr.f32.vlgmr.msra.gmra.mxu0 %v291_v35 }
  0x44   : > { %5162 = vmatprep.mubr.f32.mxu0 %v292_v36 }
  0x47   : > { %5163 = vmatmul.mubr.f32.gmra.mxu0 %v293_v37 }
  0x48   : > { %5165 = vmatprep.mubr.f32.mxu0 %v294_v38 }
  0x4b   : > { %5166 = vmatmul.mubr.f32.gmra.mxu0 %v295_v39 }
  0x4c   : > { %5168 = vmatprep.mubr.f32.mxu0 %v296_v40 }
  0x4f   : > { %5169 = vmatmul.mubr.f32.gmra.mxu0 %v297_v41 }
  0x50   : > { %5171 = vmatprep.mubr.f32.mxu0 %v298_v42 }
  0x53   : > { %5172 = vmatmul.mubr.f32.gmra.mxu0 %v299_v43 }
  0x54   : > { %5174 = vmatprep.mubr.f32.mxu0 %v300_v44 }
  0x57   : > { %5175 = vmatmul.mubr.f32.gmra.mxu0 %v301_v45 }
  0x58   : > { %5177 = vmatprep.mubr.f32.mxu0 %v302_v46 }
  0x5b   : > { %5178 = vmatmul.mubr.f32.gmra.mxu0 %v303_v47 }
  0x5c   : > { %5180 = vmatprep.mubr.f32.mxu0 %v304_v48 }
  0x5f   : > { %5181 = vmatmul.mubr.f32.gmra.mxu0 %v305_v49 }
 0x103   : > { %v5745_v50 = vpop.f32.mrf.mxu0 }
 0x104   : > { %8807 = vst [vmem:[#allocation3_spill] sm:$0xff] %v5745_v50  ;;  %585 = vperm.xlu1 %5320, %v5745_v50   ;;  %474 = vperm.xlu0 %5319, %v5745_v50  }
 0x105   : > { %v5761_v57 = vpop.f32.mrf.mxu0 }
 0x106   : > { %8808 = vst [vmem:[#allocation4_spill] sm:$0xff] %v5761_v57 }
 0x107   : > { %v5775_v58 = vpop.f32.mrf.mxu0 }
 0x108   : > { %5322 = vset.pattern.permute.xlu1 %v8754_v51  ;;  %5321 = vset.pattern.permute.xlu0 %v8750_v52  ;;  %8809 = vst [vmem:[#allocation5_spill] sm:$0xff] %v5775_v58 }
 0x109   : > { %811 = vperm.xlu1 %5322, %v5745_v50   ;;  %698 = vperm.xlu0 %5321, %v5745_v50   ;;  %v5793_v59 = vpop.f32.mrf.mxu0 }
 0x10a   : > { %8810 = vst [vmem:[#allocation6_spill] sm:$0xff] %v5793_v59 }
 0x10b   : > { %v5803_v60 = vpop.f32.mrf.mxu0 }
 0x10d   : > { %5324 = vset.pattern.permute.xlu1 %v8758_v53  ;;  %5323 = vset.pattern.permute.xlu0 %v8752_v54  ;;  %v5821_v61 = vpop.f32.mrf.mxu0 }
 0x10e   : > { %1037 = vperm.xlu1 %5324, %v5745_v50   ;;  %924 = vperm.xlu0 %5323, %v5745_v50   ;;  %8811 = vst [vmem:[#allocation7_spill] sm:$0xff] %v5821_v61 }
 0x10f   : > { %v5839_v62 = vpop.f32.mrf.mxu0 }
 0x110   : > { %8812 = vst [vmem:[#allocation8_spill] sm:$0xff] %v5839_v62 }
 0x111   : > { %v5857_v63 = vpop.f32.mrf.mxu0 }
 0x112   : > { %5326 = vset.pattern.permute.xlu1 %v8748_v55  ;;  %5325 = vset.pattern.permute.xlu0 %v8756_v56  ;;  %8813 = vst [vmem:[#allocation9_spill] sm:$0xff] %v5857_v63 }
 0x113   : > { %1263 = vperm.xlu1 %5326, %v5745_v50   ;;  %1150 = vperm.xlu0 %5325, %v5745_v50   ;;  %v5891_v8 = vpop.f32.mrf.mxu0 }
 0x115   : > { %v5925_v17 = vpop.f32.mrf.mxu0 }
 0x117   : > { %5329 = vset.pattern.permute.xlu1 %v8750_v52  ;;  %5327 = vset.pattern.permute.xlu0 %v8762_v20  ;;  %v5959_v28 = vpop.f32.mrf.mxu0 }
 0x118   : > { %694 = vperm.xlu1 %5329, %v5761_v57   ;;  %469 = vperm.xlu0 %5327, %v5761_v57  }
 0x119   : > { %v5985_v35 = vpop.f32.mrf.mxu0 }
 0x11a   : > { %8838 = vst [vmem:[#allocation34_spill] sm:$0xff] %v5985_v35 }
 0x11b   : > { %v6019_v44 = vpop.f32.mrf.mxu0 }
 0x11c   : > { %5331 = vset.pattern.permute.xlu1 %v8752_v54  ;;  %5328 = vset.pattern.permute.xlu0 %v8760_v18 }
 0x11d   : > { %920 = vperm.xlu1 %5331, %v5761_v57   ;;  %581 = vperm.xlu0 %5328, %v5761_v57  }
 0x121   : > { %5333 = vset.pattern.permute.xlu1 %v8756_v56  ;;  %5330 = vset.pattern.permute.xlu0 %v8754_v51 }
 0x122   : > { %1146 = vperm.xlu1 %5333, %v5761_v57   ;;  %807 = vperm.xlu0 %5330, %v5761_v57  }
 0x126   : > { %5335 = vset.pattern.permute.xlu1 %v8762_v20  ;;  %5332 = vset.pattern.permute.xlu0 %v8758_v53 }
 0x127   : > { %1033 = vperm.xlu0 %5332, %v5761_v57   ;;  %484 = vperm.xlu1 %5335, %v5775_v58  }
 0x12b   : > { %5334 = vset.pattern.permute.xlu0 %v8748_v55  ;;  %5337 = vset.pattern.permute.xlu1 %v8750_v52 }
 0x12c   : > { %1259 = vperm.xlu0 %5334, %v5761_v57   ;;  %706 = vperm.xlu1 %5337, %v5775_v58  }
 0x130   : > { %5336 = vset.pattern.permute.xlu0 %v8760_v18  ;;  %5339 = vset.pattern.permute.xlu1 %v8752_v54 }
 0x131   : > { %593 = vperm.xlu0 %5336, %v5775_v58   ;;  %932 = vperm.xlu1 %5339, %v5775_v58  }
 0x135   : > { %5338 = vset.pattern.permute.xlu0 %v8754_v51  ;;  %5341 = vset.pattern.permute.xlu1 %v8756_v56 }
 0x136   : > { %819 = vperm.xlu0 %5338, %v5775_v58   ;;  %1158 = vperm.xlu1 %5341, %v5775_v58  }
 0x13a   : > { %5340 = vset.pattern.permute.xlu0 %v8758_v53  ;;  %5343 = vset.pattern.permute.xlu1 %v8762_v20 }
 0x13b   : > { %1045 = vperm.xlu0 %5340, %v5775_v58   ;;  %479 = vperm.xlu1 %5343, %v5793_v59  }
 0x13f   : > { %5342 = vset.pattern.permute.xlu0 %v8748_v55  ;;  %5344 = vset.pattern.permute.xlu1 %v8760_v18 }
 0x140   : > { %1271 = vperm.xlu0 %5342, %v5775_v58   ;;  %589 = vperm.xlu1 %5344, %v5793_v59  }
 0x144   : > { %5352 = vset.pattern.permute.xlu0 %v8760_v18  ;;  %5345 = vset.pattern.permute.xlu1 %v8750_v52 }
 0x145   : > { %702 = vperm.xlu1 %5345, %v5793_v59   ;;  %601 = vperm.xlu0 %5352, %v5803_v60  }
 0x149   : > { %5346 = vset.pattern.permute.xlu1 %v8754_v51  ;;  %5354 = vset.pattern.permute.xlu0 %v8754_v51 }
 0x14a   : > { %815 = vperm.xlu1 %5346, %v5793_v59   ;;  %827 = vperm.xlu0 %5354, %v5803_v60  }
 0x14e   : > { %5347 = vset.pattern.permute.xlu1 %v8752_v54  ;;  %5356 = vset.pattern.permute.xlu0 %v8758_v53 }
 0x14f   : > { %928 = vperm.xlu1 %5347, %v5793_v59   ;;  %1053 = vperm.xlu0 %5356, %v5803_v60  }
 0x153   : > { %5348 = vset.pattern.permute.xlu1 %v8758_v53  ;;  %5358 = vset.pattern.permute.xlu0 %v8748_v55 }
 0x154   : > { %1041 = vperm.xlu1 %5348, %v5793_v59   ;;  %1279 = vperm.xlu0 %5358, %v5803_v60  }
 0x158   : > { %5349 = vset.pattern.permute.xlu1 %v8756_v56  ;;  %5359 = vset.pattern.permute.xlu0 %v8762_v20 }
 0x159   : > { %1154 = vperm.xlu1 %5349, %v5793_v59   ;;  %489 = vperm.xlu0 %5359, %v5821_v61  }
 0x15d   : > { %5350 = vset.pattern.permute.xlu1 %v8748_v55  ;;  %5361 = vset.pattern.permute.xlu0 %v8750_v52 }
 0x15e   : > { %1267 = vperm.xlu1 %5350, %v5793_v59   ;;  %710 = vperm.xlu0 %5361, %v5821_v61  }
 0x162   : > { %5351 = vset.pattern.permute.xlu1 %v8762_v20  ;;  %5363 = vset.pattern.permute.xlu0 %v8752_v54 }
 0x163   : > { %494 = vperm.xlu1 %5351, %v5803_v60   ;;  %936 = vperm.xlu0 %5363, %v5821_v61  }
 0x167   : > { %5353 = vset.pattern.permute.xlu1 %v8750_v52  ;;  %5365 = vset.pattern.permute.xlu0 %v8756_v56 }
 0x168   : > { %714 = vperm.xlu1 %5353, %v5803_v60   ;;  %1162 = vperm.xlu0 %5365, %v5821_v61  }
 0x16c   : > { %5355 = vset.pattern.permute.xlu1 %v8752_v54  ;;  %5368 = vset.pattern.permute.xlu0 %v8760_v18 }
 0x16d   : > { %940 = vperm.xlu1 %5355, %v5803_v60   ;;  %609 = vperm.xlu0 %5368, %v5839_v62  }
 0x171   : > { %5357 = vset.pattern.permute.xlu1 %v8756_v56  ;;  %5370 = vset.pattern.permute.xlu0 %v8754_v51 }
 0x172   : > { %1166 = vperm.xlu1 %5357, %v5803_v60   ;;  %835 = vperm.xlu0 %5370, %v5839_v62  }
 0x176   : > { %5360 = vset.pattern.permute.xlu1 %v8760_v18  ;;  %5372 = vset.pattern.permute.xlu0 %v8758_v53 }
 0x177   : > { %597 = vperm.xlu1 %5360, %v5821_v61   ;;  %1061 = vperm.xlu0 %5372, %v5839_v62  }
 0x17b   : > { %5362 = vset.pattern.permute.xlu1 %v8754_v51  ;;  %5374 = vset.pattern.permute.xlu0 %v8748_v55 }
 0x17c   : > { %823 = vperm.xlu1 %5362, %v5821_v61   ;;  %1287 = vperm.xlu0 %5374, %v5839_v62  }
 0x17f   : > { %v5859_v0 = vpop.permute.xlu1 %585  ;;  %v5861_v1 = vpop.permute.xlu0 %474 }
 0x180   : > { %8814 = vst [vmem:[#allocation10_spill] sm:$0xff] %v5859_v0  ;;  %8815 = vst [vmem:[#allocation11_spill] sm:$0xff] %v5861_v1  ;;  %5364 = vset.pattern.permute.xlu1 %v8758_v53  ;;  %5375 = vset.pattern.permute.xlu0 %v8762_v20 }
 0x181   : > { %1049 = vperm.xlu1 %5364, %v5821_v61   ;;  %499 = vperm.xlu0 %5375, %v5857_v63  }
 0x184   : > { %v5867_v2 = vpop.permute.xlu1 %811  ;;  %v5869_v3 = vpop.permute.xlu0 %698 }
 0x185   : > { %8816 = vst [vmem:[#allocation12_spill] sm:$0xff] %v5867_v2  ;;  %8817 = vst [vmem:[#allocation13_spill] sm:$0xff] %v5869_v3  ;;  %5366 = vset.pattern.permute.xlu1 %v8748_v55  ;;  %5377 = vset.pattern.permute.xlu0 %v8750_v52  ;;  %v8848_v3 = vmov 7  }
 0x186   : > { %1275 = vperm.xlu1 %5366, %v5821_v61   ;;  %718 = vperm.xlu0 %5377, %v5857_v63  }
 0x189   : > { %v5875_v4 = vpop.permute.xlu1 %1037  ;;  %v5877_v5 = vpop.permute.xlu0 %924 }
 0x18a   : > { %8818 = vst [vmem:[#allocation14_spill] sm:$0xff] %v5875_v4  ;;  %8819 = vst [vmem:[#allocation15_spill] sm:$0xff] %v5877_v5  ;;  %5367 = vset.pattern.permute.xlu1 %v8762_v20  ;;  %5379 = vset.pattern.permute.xlu0 %v8752_v54  ;;  %v8847_v5 = vmov 4  }
 0x18b   : > { %504 = vperm.xlu1 %5367, %v5839_v62   ;;  %944 = vperm.xlu0 %5379, %v5857_v63  }
 0x18e   : > { %v5883_v6 = vpop.permute.xlu1 %1263  ;;  %v5885_v7 = vpop.permute.xlu0 %1150 }
 0x18f   : > { %8820 = vst [vmem:[#allocation16_spill] sm:$0xff] %v5883_v6  ;;  %8821 = vst [vmem:[#allocation17_spill] sm:$0xff] %v5885_v7  ;;  %5369 = vset.pattern.permute.xlu1 %v8750_v52  ;;  %5381 = vset.pattern.permute.xlu0 %v8756_v56  ;;  %v8843_v6 = vmov 3   ;;  %v8844_v7 = vmov 2  }
 0x190   : > { %722 = vperm.xlu1 %5369, %v5839_v62   ;;  %1170 = vperm.xlu0 %5381, %v5857_v63  }
 0x193   : > { %v5893_v9 = vpop.permute.xlu1 %694  ;;  %v5895_v10 = vpop.permute.xlu0 %469 }
 0x194   : > { %8822 = vst [vmem:[#allocation18_spill] sm:$0xff] %v5893_v9  ;;  %8823 = vst [vmem:[#allocation19_spill] sm:$0xff] %v5895_v10  ;;  %5371 = vset.pattern.permute.xlu1 %v8752_v54  ;;  %5384 = vset.pattern.permute.xlu0 %v8760_v18 }
 0x195   : > { %948 = vperm.xlu1 %5371, %v5839_v62   ;;  %617 = vperm.xlu0 %5384, %v5891_v8  }
 0x198   : > { %v5901_v11 = vpop.permute.xlu1 %920  ;;  %v5903_v12 = vpop.permute.xlu0 %581 }
 0x199   : > { %8824 = vst [vmem:[#allocation20_spill] sm:$0xff] %v5901_v11  ;;  %8825 = vst [vmem:[#allocation21_spill] sm:$0xff] %v5903_v12  ;;  %5373 = vset.pattern.permute.xlu1 %v8756_v56  ;;  %5386 = vset.pattern.permute.xlu0 %v8754_v51 }
 0x19a   : > { %1174 = vperm.xlu1 %5373, %v5839_v62   ;;  %843 = vperm.xlu0 %5386, %v5891_v8  }
 0x19d   : > { %v5909_v13 = vpop.permute.xlu1 %1146  ;;  %v5911_v14 = vpop.permute.xlu0 %807 }
 0x19e   : > { %8826 = vst [vmem:[#allocation22_spill] sm:$0xff] %v5909_v13  ;;  %8827 = vst [vmem:[#allocation23_spill] sm:$0xff] %v5911_v14  ;;  %5376 = vset.pattern.permute.xlu1 %v8760_v18  ;;  %5388 = vset.pattern.permute.xlu0 %v8758_v53  ;;  %v8852_v13 = vmov 1  }
 0x19f   : > { %605 = vperm.xlu1 %5376, %v5857_v63   ;;  %1069 = vperm.xlu0 %5388, %v5891_v8  }
 0x1a2   : > { %v5917_v15 = vpop.permute.xlu0 %1033  ;;  %v5919_v16 = vpop.permute.xlu1 %484 }
 0x1a3   : > { %8828 = vst [vmem:[#allocation24_spill] sm:$0xff] %v5917_v15  ;;  %8829 = vst [vmem:[#allocation25_spill] sm:$0xff] %v5919_v16  ;;  %5378 = vset.pattern.permute.xlu1 %v8754_v51  ;;  %5390 = vset.pattern.permute.xlu0 %v8748_v55 }
 0x1a4   : > { %831 = vperm.xlu1 %5378, %v5857_v63   ;;  %1295 = vperm.xlu0 %5390, %v5891_v8  }
 0x1a7   : > { %v5927_v19 = vpop.permute.xlu0 %1259  ;;  %v5929_v21 = vpop.permute.xlu1 %706 }
 0x1a8   : > { %8830 = vst [vmem:[#allocation26_spill] sm:$0xff] %v5927_v19  ;;  %8831 = vst [vmem:[#allocation27_spill] sm:$0xff] %v5929_v21  ;;  %5380 = vset.pattern.permute.xlu1 %v8758_v53  ;;  %5391 = vset.pattern.permute.xlu0 %v8762_v20 }
 0x1a9   : > { %1057 = vperm.xlu1 %5380, %v5857_v63   ;;  %509 = vperm.xlu0 %5391, %v5925_v17  }
 0x1ac   : > { %v5935_v22 = vpop.permute.xlu0 %593  ;;  %v5937_v23 = vpop.permute.xlu1 %932 }
 0x1ad   : > { %8832 = vst [vmem:[#allocation28_spill] sm:$0xff] %v5935_v22  ;;  %8833 = vst [vmem:[#allocation29_spill] sm:$0xff] %v5937_v23  ;;  %5382 = vset.pattern.permute.xlu1 %v8748_v55  ;;  %5393 = vset.pattern.permute.xlu0 %v8750_v52 }
 0x1ae   : > { %1283 = vperm.xlu1 %5382, %v5857_v63   ;;  %726 = vperm.xlu0 %5393, %v5925_v17  }
 0x1b1   : > { %v5943_v24 = vpop.permute.xlu0 %819  ;;  %v5945_v25 = vpop.permute.xlu1 %1158 }
 0x1b2   : > { %8834 = vst [vmem:[#allocation30_spill] sm:$0xff] %v5943_v24  ;;  %8835 = vst [vmem:[#allocation31_spill] sm:$0xff] %v5945_v25  ;;  %5383 = vset.pattern.permute.xlu1 %v8762_v20  ;;  %5395 = vset.pattern.permute.xlu0 %v8752_v54  ;;  %v8849_v25 = vmov 6  }
 0x1b3   : > { %514 = vperm.xlu1 %5383, %v5891_v8   ;;  %952 = vperm.xlu0 %5395, %v5925_v17  }
 0x1b6   : > { %v5951_v26 = vpop.permute.xlu0 %1045  ;;  %v5953_v27 = vpop.permute.xlu1 %479 }
 0x1b7   : > { %8836 = vst [vmem:[#allocation32_spill] sm:$0xff] %v5951_v26  ;;  %5385 = vset.pattern.permute.xlu1 %v8750_v52  ;;  %5397 = vset.pattern.permute.xlu0 %v8756_v56  ;;  %v8851_v26 = vmov 0  }
 0x1b8   : > { %730 = vperm.xlu1 %5385, %v5891_v8   ;;  %1178 = vperm.xlu0 %5397, %v5925_v17  }
 0x1bb   : > { %v5961_v29 = vpop.permute.xlu1 %589  ;;  %v5963_v30 = vpop.permute.xlu0 %1271 }
 0x1bc   : > { %8837 = vst [vmem:[#allocation33_spill] sm:$0xff] %v5963_v30  ;;  %5387 = vset.pattern.permute.xlu1 %v8752_v54  ;;  %5400 = vset.pattern.permute.xlu0 %v8760_v18 }
 0x1bd   : > { %956 = vperm.xlu1 %5387, %v5891_v8   ;;  %625 = vperm.xlu0 %5400, %v5959_v28  }
 0x1c0   : > { %v5969_v31 = vpop.permute.xlu1 %702  ;;  %v5971_v32 = vpop.permute.xlu0 %601 }
 0x1c1   : > { %5389 = vset.pattern.permute.xlu1 %v8756_v56  ;;  %5402 = vset.pattern.permute.xlu0 %v8754_v51 }
 0x1c2   : > { %1182 = vperm.xlu1 %5389, %v5891_v8   ;;  %851 = vperm.xlu0 %5402, %v5959_v28  }
 0x1c5   : > { %v5977_v33 = vpop.permute.xlu1 %815  ;;  %v5979_v34 = vpop.permute.xlu0 %827 }
 0x1c6   : > { %5392 = vset.pattern.permute.xlu1 %v8760_v18  ;;  %5404 = vset.pattern.permute.xlu0 %v8758_v53 }
 0x1c7   : > { %613 = vperm.xlu1 %5392, %v5925_v17   ;;  %1077 = vperm.xlu0 %5404, %v5959_v28  }
 0x1ca   : > { %v5987_v36 = vpop.permute.xlu1 %928  ;;  %v5989_v37 = vpop.permute.xlu0 %1053 }
 0x1cb   : > { %5394 = vset.pattern.permute.xlu1 %v8754_v51  ;;  %5406 = vset.pattern.permute.xlu0 %v8762_v20 }
 0x1cc   : > { %839 = vperm.xlu1 %5394, %v5925_v17   ;;  %519 = vperm.xlu0 %5406, %v5985_v35  }
 0x1cf   : > { %v5995_v38 = vpop.permute.xlu1 %1041  ;;  %v5997_v39 = vpop.permute.xlu0 %1279 }
 0x1d0   : > { %5396 = vset.pattern.permute.xlu1 %v8758_v53  ;;  %5408 = vset.pattern.permute.xlu0 %v8750_v52 }
 0x1d1   : > { %1065 = vperm.xlu1 %5396, %v5925_v17   ;;  %734 = vperm.xlu0 %5408, %v5985_v35  }
 0x1d4   : > { %v6003_v40 = vpop.permute.xlu1 %1154  ;;  %v6005_v41 = vpop.permute.xlu0 %489 }
 0x1d5   : > { %5398 = vset.pattern.permute.xlu1 %v8748_v55  ;;  %5410 = vset.pattern.permute.xlu0 %v8752_v54 }
 0x1d6   : > { %1291 = vperm.xlu1 %5398, %v5925_v17   ;;  %960 = vperm.xlu0 %5410, %v5985_v35  }
 0x1d9   : > { %v6011_v42 = vpop.permute.xlu1 %1267  ;;  %v6013_v43 = vpop.permute.xlu0 %710 }
 0x1da   : > { %5399 = vset.pattern.permute.xlu1 %v8762_v20  ;;  %5412 = vset.pattern.permute.xlu0 %v8756_v56 }
 0x1db   : > { %524 = vperm.xlu1 %5399, %v5959_v28   ;;  %1186 = vperm.xlu0 %5412, %v5985_v35  }
 0x1de   : > { %v6021_v45 = vpop.permute.xlu1 %494  ;;  %v6023_v46 = vpop.permute.xlu0 %936 }
 0x1df   : > { %5401 = vset.pattern.permute.xlu1 %v8750_v52  ;;  %5415 = vset.pattern.permute.xlu0 %v8760_v18  ;;  %v6045_v52 = vpop.f32.mrf.mxu0 }
 0x1e0   : > { %738 = vperm.xlu1 %5401, %v5959_v28   ;;  %633 = vperm.xlu0 %5415, %v6019_v44   ;;  %8840 = vst [vmem:[#allocation36_spill] sm:$0xff] %v6045_v52 }
 0x1e1   : > { %v6079_v1 = vpop.f32.mrf.mxu0 }
 0x1e2   : > { %8850 = vst [vmem:[#allocation40_spill] sm:$0xff] %v6079_v1 }
 0x1e3   : > { %v6029_v47 = vpop.permute.xlu1 %714  ;;  %v6031_v48 = vpop.permute.xlu0 %1162 }
 0x1e4   : > { %5403 = vset.pattern.permute.xlu1 %v8752_v54  ;;  %5417 = vset.pattern.permute.xlu0 %v8754_v51  ;;  %v6105_v21 = vpop.f32.mrf.mxu0 }
 0x1e5   : > { %964 = vperm.xlu1 %5403, %v5959_v28   ;;  %859 = vperm.xlu0 %5417, %v6019_v44   ;;  %8856 = vst [vmem:[#allocation44_spill] sm:$0xff] %v6105_v21 }
 0x1e8   : > { %v6037_v49 = vpop.permute.xlu1 %940  ;;  %v6039_v55 = vpop.permute.xlu0 %609 }
 0x1e9   : > { %8839 = vst [vmem:[#allocation35_spill] sm:$0xff] %v6039_v55  ;;  %5405 = vset.pattern.permute.xlu1 %v8756_v56  ;;  %5419 = vset.pattern.permute.xlu0 %v8758_v53 }
 0x1ea   : > { %1190 = vperm.xlu1 %5405, %v5959_v28   ;;  %1085 = vperm.xlu0 %5419, %v6019_v44  }
 0x1ed   : > { %v6047_v54 = vpop.permute.xlu1 %1166  ;;  %v6049_v51 = vpop.permute.xlu0 %835 }
 0x1ee   : > { %8841 = vst [vmem:[#allocation37_spill] sm:$0xff] %v6049_v51  ;;  %5407 = vset.pattern.permute.xlu1 %v8760_v18  ;;  %5421 = vset.pattern.permute.xlu0 %v8762_v20  ;;  %v8846_v20 = vmov 5  }
 0x1ef   : > { %621 = vperm.xlu1 %5407, %v5985_v35   ;;  %529 = vperm.xlu0 %5421, %v6045_v52  }
 0x1f2   : > { %v6055_v56 = vpop.permute.xlu1 %597  ;;  %v6057_v53 = vpop.permute.xlu0 %1061 }
 0x1f3   : > { %8842 = vst [vmem:[#allocation38_spill] sm:$0xff] %v6057_v53  ;;  %5409 = vset.pattern.permute.xlu1 %v8843_v6  ;;  %5423 = vset.pattern.permute.xlu0 %v8844_v7 }
 0x1f4   : > { %847 = vperm.xlu1 %5409, %v5985_v35   ;;  %742 = vperm.xlu0 %5423, %v6045_v52  }
 0x1f7   : > { %v6063_v4 = vpop.permute.xlu1 %823  ;;  %v6065_v18 = vpop.permute.xlu0 %1287 }
 0x1f8   : > { %8845 = vst [vmem:[#allocation39_spill] sm:$0xff] %v6065_v18  ;;  %5411 = vset.pattern.permute.xlu1 %v8846_v20  ;;  %5425 = vset.pattern.permute.xlu0 %v8847_v5 }
 0x1f9   : > { %1073 = vperm.xlu1 %5411, %v5985_v35   ;;  %968 = vperm.xlu0 %5425, %v6045_v52  }
 0x1fc   : > { %v6071_v2 = vpop.permute.xlu1 %1049  ;;  %v6073_v30 = vpop.permute.xlu0 %499 }
 0x1fd   : > { %5413 = vset.pattern.permute.xlu1 %v8848_v3  ;;  %5427 = vset.pattern.permute.xlu0 %v8849_v25 }
 0x1fe   : > { %1299 = vperm.xlu1 %5413, %v5985_v35   ;;  %1194 = vperm.xlu0 %5427, %v6045_v52  }
 0x201   : > { %v6081_v0 = vpop.permute.xlu1 %1275  ;;  %v6083_v19 = vpop.permute.xlu0 %718 }
 0x202   : > { %5414 = vset.pattern.permute.xlu1 %v8851_v26  ;;  %5429 = vset.pattern.permute.xlu0 %v8852_v13 }
 0x203   : > { %534 = vperm.xlu1 %5414, %v6019_v44   ;;  %641 = vperm.xlu0 %5429, %v6079_v1  }
 0x206   : > { %v6089_v23 = vpop.permute.xlu1 %504  ;;  %v6091_v15 = vpop.permute.xlu0 %944 }
 0x207   : > { %8853 = vst [vmem:[#allocation41_spill] sm:$0xff] %v6089_v23  ;;  %5416 = vset.pattern.permute.xlu1 %v8844_v7  ;;  %5431 = vset.pattern.permute.xlu0 %v8843_v6 }
 0x208   : > { %746 = vperm.xlu1 %5416, %v6019_v44   ;;  %867 = vperm.xlu0 %5431, %v6079_v1  }
 0x20b   : > { %v6097_v24 = vpop.permute.xlu1 %722  ;;  %v6099_v11 = vpop.permute.xlu0 %1170 }
 0x20c   : > { %8854 = vst [vmem:[#allocation42_spill] sm:$0xff] %v6097_v24  ;;  %8855 = vst [vmem:[#allocation43_spill] sm:$0xff] %v6099_v11  ;;  %5418 = vset.pattern.permute.xlu1 %v8847_v5  ;;  %5433 = vset.pattern.permute.xlu0 %v8846_v20 }
 0x20d   : > { %972 = vperm.xlu1 %5418, %v6019_v44   ;;  %1093 = vperm.xlu0 %5433, %v6079_v1  }
 0x210   : > { %v6107_v16 = vpop.permute.xlu1 %948  ;;  %v6109_v14 = vpop.permute.xlu0 %617 }
 0x211   : > { %8857 = vst [vmem:[#allocation45_spill] sm:$0xff] %v6107_v16  ;;  %8858 = vst [vmem:[#allocation46_spill] sm:$0xff] %v6109_v14  ;;  %5420 = vset.pattern.permute.xlu1 %v8849_v25  ;;  %5435 = vset.pattern.permute.xlu0 %v8851_v26 }
 0x212   : > { %1198 = vperm.xlu1 %5420, %v6019_v44   ;;  %539 = vperm.xlu0 %5435, %v6105_v21  }
 0x215   : > { %v6115_v22 = vpop.permute.xlu1 %1174  ;;  %v6117_v9 = vpop.permute.xlu0 %843 }
 0x216   : > { %8859 = vst [vmem:[#allocation47_spill] sm:$0xff] %v6115_v22  ;;  %8860 = vst [vmem:[#allocation48_spill] sm:$0xff] %v6117_v9  ;;  %5422 = vset.pattern.permute.xlu1 %v8852_v13  ;;  %5437 = vset.pattern.permute.xlu0 %v8844_v7 }
 0x217   : > { %629 = vperm.xlu1 %5422, %v6045_v52   ;;  %750 = vperm.xlu0 %5437, %v6105_v21  }
 0x21a   : > { %v6123_v10 = vpop.permute.xlu1 %605  ;;  %v6125_v12 = vpop.permute.xlu0 %1069 }
 0x21b   : > { %8861 = vst [vmem:[#allocation49_spill] sm:$0xff] %v6125_v12  ;;  %5424 = vset.pattern.permute.xlu1 %v8843_v6  ;;  %5439 = vset.pattern.permute.xlu0 %v8847_v5 }
 0x21c   : > { %855 = vperm.xlu1 %5424, %v6045_v52   ;;  %976 = vperm.xlu0 %5439, %v6105_v21  }
 0x21f   : > { %v6131_v18 = vpop.permute.xlu1 %831  ;;  %v6133_v22 = vpop.permute.xlu0 %1295 }
 0x220   : > { %8862 = vst [vmem:[#allocation50_spill] sm:$0xff] %v6133_v22  ;;  %5426 = vset.pattern.permute.xlu1 %v8846_v20  ;;  %5441 = vset.pattern.permute.xlu0 %v8849_v25 }
 0x221   : > { %1081 = vperm.xlu1 %5426, %v6045_v52   ;;  %1202 = vperm.xlu0 %5441, %v6105_v21  }
 0x224   : > { %v6139_v53 = vpop.permute.xlu1 %1057  ;;  %v6141_v16 = vpop.permute.xlu0 %509 }
 0x225   : > { %8863 = vst [vmem:[#allocation51_spill] sm:$0xff] %v6139_v53  ;;  %5428 = vset.pattern.permute.xlu1 %v8851_v26  ;;  %5442 = vset.pattern.permute.xlu0 %v8848_v3  ;;  %v5554_v26 = vmov 8  }
 0x226   : > { %544 = vperm.xlu1 %5428, %v6079_v1   ;;  %1303 = vperm.xlu0 %5442, %v5959_v28  }
 0x229   : > { %v6147_v51 = vpop.permute.xlu1 %1283  ;;  %v6149_v24 = vpop.permute.xlu0 %726 }
 0x22a   : > { %8864 = vst [vmem:[#allocation52_spill] sm:$0xff] %v6147_v51  ;;  %5430 = vset.pattern.permute.xlu1 %v8844_v7  ;;  %1311 = vperm.xlu0 %5442, %v6019_v44  }
 0x22b   : > { %754 = vperm.xlu1 %5430, %v6079_v1  }
 0x22e   : > { %v6154_v23 = vpop.permute.xlu1 %514  ;;  %v6156_v55 = vpop.permute.xlu0 %952  ;;  %1319 = vperm.xlu0 %5442, %v6079_v1  }
 0x22f   : > { %8865 = vst [vmem:[#allocation53_spill] sm:$0xff] %v6154_v23  ;;  %8866 = vst [vmem:[#allocation54_spill] sm:$0xff] %v6156_v55  ;;  %5432 = vset.pattern.permute.xlu1 %v8847_v5 }
 0x230   : > { %980 = vperm.xlu1 %5432, %v6079_v1  }
 0x232   : > { %5445 = vset.pattern.permute.xlu0 %v5554_v26 }
 0x233   : > { %v6161_v22 = vpop.permute.xlu1 %730  ;;  %1376 = vperm.xlu0 %5445, %v5745_v50   ;;  %v6164_v7 = vpop.permute.xlu0 %1178 }
 0x234   : > { %8867 = vst [vmem:[#allocation55_spill] sm:$0xff] %v6161_v22  ;;  %8868 = vst [vmem:[#allocation56_spill] sm:$0xff] %v6164_v7  ;;  %5434 = vset.pattern.permute.xlu1 %v8849_v25 }
 0x235   : > { %1206 = vperm.xlu1 %5434, %v6079_v1  }
 0x237   : > { %1388 = vperm.xlu0 %5445, %v5821_v61  }
 0x238   : > { %v6169_v12 = vpop.permute.xlu1 %956  ;;  %v6171_v9 = vpop.permute.xlu0 %625 }
 0x239   : > { %8869 = vst [vmem:[#allocation57_spill] sm:$0xff] %v6169_v12  ;;  %5436 = vset.pattern.permute.xlu1 %v8852_v13 }
 0x23a   : > { %637 = vperm.xlu1 %5436, %v6105_v21  }
 0x23b   : > { %1396 = vperm.xlu0 %5445, %v5857_v63  }
 0x23d   : > { %v6176_v5 = vpop.permute.xlu1 %1182  ;;  %v6178_v22 = vpop.permute.xlu0 %851 }
 0x23e   : > { %8870 = vst [vmem:[#allocation58_spill] sm:$0xff] %v6176_v5  ;;  %8871 = vst [vmem:[#allocation59_spill] sm:$0xff] %v6178_v22  ;;  %5438 = vset.pattern.permute.xlu1 %v8843_v6 }
 0x23f   : > { %863 = vperm.xlu1 %5438, %v6105_v21   ;;  %1404 = vperm.xlu0 %5445, %v5925_v17  }
 0x242   : > { %v6183_v25 = vpop.permute.xlu1 %613  ;;  %v6185_v12 = vpop.permute.xlu0 %1077 }
 0x243   : > { %8872 = vst [vmem:[#allocation60_spill] sm:$0xff] %v6185_v12  ;;  %5440 = vset.pattern.permute.xlu1 %v8846_v20  ;;  %1412 = vperm.xlu0 %5445, %v5985_v35   ;;  %v5555_v20 = vmov 9  }
 0x244   : > { %1089 = vperm.xlu1 %5440, %v6105_v21  }
 0x247   : > { %v6190_v13 = vpop.permute.xlu1 %839  ;;  %1420 = vperm.xlu0 %5445, %v6045_v52   ;;  %v6193_v5 = vpop.permute.xlu0 %519 }
 0x248   : > { %5443 = vset.pattern.permute.xlu1 %v8848_v3 }
 0x249   : > { %1307 = vperm.xlu1 %5443, %v6045_v52  }
 0x24b   : > { %1428 = vperm.xlu0 %5445, %v6105_v21  }
 0x24c   : > { %v6198_v6 = vpop.permute.xlu1 %1065  ;;  %v6200_v12 = vpop.permute.xlu0 %734 }
 0x24d   : > { %8873 = vst [vmem:[#allocation61_spill] sm:$0xff] %v6198_v6  ;;  %1315 = vperm.xlu1 %5443, %v6105_v21  }
 0x24f   : > { %5446 = vset.pattern.permute.xlu0 %v5555_v20 }
 0x250   : > { %1485 = vperm.xlu0 %5446, %v5761_v57  }
 0x251   : > { %v6204_v7 = vpop.permute.xlu1 %1291  ;;  %5444 = vset.pattern.permute.xlu1 %v5554_v26  ;;  %v6206_v23 = vpop.permute.xlu0 %960 }
 0x252   : > { %8874 = vst [vmem:[#allocation62_spill] sm:$0xff] %v6204_v7  ;;  %8875 = vst [vmem:[#allocation63_spill] sm:$0xff] %v6206_v23  ;;  %1372 = vperm.xlu1 %5444, %v5761_v57  }
 0x254   : > { %1497 = vperm.xlu0 %5446, %v5775_v58  }
 0x256   : > { %v6210_v3 = vpop.permute.xlu1 %524  ;;  %1380 = vperm.xlu1 %5444, %v5793_v59   ;;  %v6213_v51 = vpop.permute.xlu0 %1186 }
 0x257   : > { %8876 = vst [vmem:[#allocation64_spill] sm:$0xff] %v6213_v51 }
 0x258   : > { %1505 = vperm.xlu0 %5446, %v5803_v60  }
 0x25a   : > { %1384 = vperm.xlu1 %5444, %v5775_v58  }
 0x25b   : > { %v6217_v14 = vpop.permute.xlu1 %738  ;;  %v6219_v7 = vpop.permute.xlu0 %633 }
 0x25c   : > { %8877 = vst [vmem:[#allocation65_spill] sm:$0xff] %v6219_v7  ;;  %1513 = vperm.xlu0 %5446, %v5839_v62  }
 0x25e   : > { %1392 = vperm.xlu1 %5444, %v5803_v60  }
 0x260   : > { %v6223_v26 = vpop.permute.xlu1 %964  ;;  %1521 = vperm.xlu0 %5446, %v5891_v8   ;;  %v6226_v23 = vpop.permute.xlu0 %859 }
 0x261   : > { %8878 = vst [vmem:[#allocation66_spill] sm:$0xff] %v6223_v26  ;;  %8879 = vst [vmem:[#allocation67_spill] sm:$0xff] %v6226_v23 }
 0x262   : > { %1400 = vperm.xlu1 %5444, %v5839_v62  }
 0x264   : > { %1529 = vperm.xlu0 %5446, %v5959_v28  }
 0x265   : > { %v6230_v51 = vpop.permute.xlu1 %1190  ;;  %v6232_v6 = vpop.permute.xlu0 %1085 }
 0x266   : > { %8880 = vst [vmem:[#allocation68_spill] sm:$0xff] %v6230_v51  ;;  %8881 = vst [vmem:[#allocation69_spill] sm:$0xff] %v6232_v6  ;;  %1408 = vperm.xlu1 %5444, %v5891_v8   ;;  %v5556_v51 = vmov 10  }
 0x268   : > { %1537 = vperm.xlu0 %5446, %v6019_v44  }
 0x26a   : > { %v6236_v22 = vpop.permute.xlu1 %621  ;;  %1416 = vperm.xlu1 %5444, %v5959_v28   ;;  %v6239_v26 = vpop.permute.xlu0 %529 }
 0x26b   : > { %8882 = vst [vmem:[#allocation70_spill] sm:$0xff] %v6239_v26 }
 0x26c   : > { %1545 = vperm.xlu0 %5446, %v6079_v1  }
 0x26e   : > { %1424 = vperm.xlu1 %5444, %v6019_v44  }
 0x26f   : > { %v6243_v23 = vpop.permute.xlu1 %847  ;;  %v6245_v11 = vpop.permute.xlu0 %742 }
 0x270   : > { %8883 = vst [vmem:[#allocation71_spill] sm:$0xff] %v6243_v23  ;;  %8884 = vst [vmem:[#allocation72_spill] sm:$0xff] %v6245_v11  ;;  %5449 = vset.pattern.permute.xlu0 %v5556_v51 }
 0x271   : > { %1602 = vperm.xlu0 %5449, %v5745_v50  }
 0x272   : > { %1432 = vperm.xlu1 %5444, %v6079_v1  }
 0x274   : > { %v6249_v6 = vpop.permute.xlu1 %1073  ;;  %v6251_v55 = vpop.permute.xlu0 %968 }
 0x275   : > { %8885 = vst [vmem:[#allocation73_spill] sm:$0xff] %v6249_v6  ;;  %8886 = vst [vmem:[#allocation74_spill] sm:$0xff] %v6251_v55  ;;  %1614 = vperm.xlu0 %5449, %v5821_v61  }
 0x276   : > { %5447 = vset.pattern.permute.xlu1 %v5555_v20 }
 0x277   : > { %1489 = vperm.xlu1 %5447, %v5745_v50  }
 0x279   : > { %v6255_v26 = vpop.permute.xlu1 %1299  ;;  %1622 = vperm.xlu0 %5449, %v5857_v63   ;;  %v6258_v11 = vpop.permute.xlu0 %1194 }
 0x27a   : > { %8887 = vst [vmem:[#allocation75_spill] sm:$0xff] %v6255_v26  ;;  %8888 = vst [vmem:[#allocation76_spill] sm:$0xff] %v6258_v11 }
 0x27b   : > { %1493 = vperm.xlu1 %5447, %v5793_v59  }
 0x27d   : > { %1630 = vperm.xlu0 %5449, %v5925_v17  }
 0x27e   : > { %v6262_v23 = vpop.permute.xlu1 %534  ;;  %v6264_v6 = vpop.permute.xlu0 %641 }
 0x27f   : > { %8889 = vst [vmem:[#allocation77_spill] sm:$0xff] %v6262_v23  ;;  %8890 = vst [vmem:[#allocation78_spill] sm:$0xff] %v6264_v6  ;;  %1501 = vperm.xlu1 %5447, %v5821_v61   ;;  %v5557_v23 = vmov 11  }
 0x281   : > { %1638 = vperm.xlu0 %5449, %v5985_v35  }
 0x283   : > { %v6268_v20 = vpop.permute.xlu1 %746  ;;  %1509 = vperm.xlu1 %5447, %v5857_v63   ;;  %v6271_v26 = vpop.permute.xlu0 %867 }
 0x284   : > { %8891 = vst [vmem:[#allocation79_spill] sm:$0xff] %v6268_v20  ;;  %8892 = vst [vmem:[#allocation80_spill] sm:$0xff] %v6271_v26 }
 0x285   : > { %1646 = vperm.xlu0 %5449, %v6045_v52  }
 0x287   : > { %1517 = vperm.xlu1 %5447, %v5925_v17  }
 0x288   : > { %v6275_v11 = vpop.permute.xlu1 %972  ;;  %v6277_v55 = vpop.permute.xlu0 %1093 }
 0x289   : > { %8893 = vst [vmem:[#allocation81_spill] sm:$0xff] %v6275_v11  ;;  %8894 = vst [vmem:[#allocation82_spill] sm:$0xff] %v6277_v55  ;;  %1654 = vperm.xlu0 %5449, %v6105_v21  }
 0x28b   : > { %1525 = vperm.xlu1 %5447, %v5985_v35  }
 0x28d   : > { %v6281_v6 = vpop.permute.xlu1 %1198  ;;  %5450 = vset.pattern.permute.xlu0 %v5557_v23  ;;  %v6283_v20 = vpop.permute.xlu0 %539 }
 0x28e   : > { %8895 = vst [vmem:[#allocation83_spill] sm:$0xff] %v6281_v6  ;;  %8896 = vst [vmem:[#allocation84_spill] sm:$0xff] %v6283_v20  ;;  %1711 = vperm.xlu0 %5450, %v5761_v57  }
 0x28f   : > { %1533 = vperm.xlu1 %5447, %v6045_v52  }
 0x292   : > { %v6287_v26 = vpop.permute.xlu1 %629  ;;  %1723 = vperm.xlu0 %5450, %v5775_v58   ;;  %v6290_v11 = vpop.permute.xlu0 %750 }
 0x293   : > { %8897 = vst [vmem:[#allocation85_spill] sm:$0xff] %v6290_v11  ;;  %1541 = vperm.xlu1 %5447, %v6105_v21  }
 0x296   : > { %1731 = vperm.xlu0 %5450, %v5803_v60  }
 0x297   : > { %v6294_v55 = vpop.permute.xlu1 %855  ;;  %5448 = vset.pattern.permute.xlu1 %v5556_v51  ;;  %v6296_v6 = vpop.permute.xlu0 %976 }
 0x298   : > { %8898 = vst [vmem:[#allocation86_spill] sm:$0xff] %v6294_v55  ;;  %8899 = vst [vmem:[#allocation87_spill] sm:$0xff] %v6296_v6  ;;  %1598 = vperm.xlu1 %5448, %v5761_v57  }
 0x29a   : > { %1739 = vperm.xlu0 %5450, %v5839_v62  }
 0x29c   : > { %v6300_v20 = vpop.permute.xlu1 %1081  ;;  %1606 = vperm.xlu1 %5448, %v5793_v59   ;;  %v6303_v7 = vpop.permute.xlu0 %1202 }
 0x29d   : > { %8900 = vst [vmem:[#allocation88_spill] sm:$0xff] %v6300_v20  ;;  %8901 = vst [vmem:[#allocation89_spill] sm:$0xff] %v6303_v7 }
 0x29e   : > { %1747 = vperm.xlu0 %5450, %v5891_v8  }
 0x2a0   : > { %1610 = vperm.xlu1 %5448, %v5775_v58  }
 0x2a1   : > { %v6307_v11 = vpop.permute.xlu1 %544  ;;  %v6309_v55 = vpop.permute.xlu0 %1303 }
 0x2a2   : > { %8902 = vst [vmem:[#allocation90_spill] sm:$0xff] %v6307_v11  ;;  %8903 = vst [vmem:[#allocation91_spill] sm:$0xff] %v6309_v55  ;;  %1755 = vperm.xlu0 %5450, %v5959_v28   ;;  %v5558_v55 = vmov 12  }
 0x2a4   : > { %1618 = vperm.xlu1 %5448, %v5803_v60  }
 0x2a5   : > { %v6313_v51 = vpop.permute.xlu0 %1311 }
 0x2a6   : > { %8904 = vst [vmem:[#allocation92_spill] sm:$0xff] %v6313_v51  ;;  %v6315_v6 = vpop.permute.xlu1 %754  ;;  %1763 = vperm.xlu0 %5450, %v6019_v44  }
 0x2a7   : > { %8905 = vst [vmem:[#allocation93_spill] sm:$0xff] %v6315_v6 }
 0x2a8   : > { %1626 = vperm.xlu1 %5448, %v5839_v62  }
 0x2a9   : > { %v6319_v7 = vpop.permute.xlu0 %1319 }
 0x2aa   : > { %8906 = vst [vmem:[#allocation94_spill] sm:$0xff] %v6319_v7  ;;  %1771 = vperm.xlu0 %5450, %v6079_v1  }
 0x2ab   : > { %v6322_v20 = vpop.permute.xlu1 %980 }
 0x2ac   : > { %8907 = vst [vmem:[#allocation95_spill] sm:$0xff] %v6322_v20  ;;  %1634 = vperm.xlu1 %5448, %v5891_v8  }
 0x2ae   : > { %5453 = vset.pattern.permute.xlu0 %v5558_v55  ;;  %v6325_v11 = vpop.permute.xlu0 %1376 }
 0x2af   : > { %8908 = vst [vmem:[#allocation96_spill] sm:$0xff] %v6325_v11  ;;  %1828 = vperm.xlu0 %5453, %v5745_v50  }
 0x2b0   : > { %v6328_v51 = vpop.permute.xlu1 %1206  ;;  %1642 = vperm.xlu1 %5448, %v5959_v28  }
 0x2b1   : > { %8909 = vst [vmem:[#allocation97_spill] sm:$0xff] %v6328_v51 }
 0x2b2   : > { %v6331_v6 = vpop.permute.xlu0 %1388 }
 0x2b3   : > { %8910 = vst [vmem:[#allocation98_spill] sm:$0xff] %v6331_v6  ;;  %1840 = vperm.xlu0 %5453, %v5821_v61  }
 0x2b4   : > { %1650 = vperm.xlu1 %5448, %v6019_v44  }
 0x2b5   : > { %v6335_v7 = vpop.permute.xlu1 %637 }
 0x2b6   : > { %8911 = vst [vmem:[#allocation99_spill] sm:$0xff] %v6335_v7  ;;  %v6337_v20 = vpop.permute.xlu0 %1396 }
 0x2b7   : > { %8912 = vst [vmem:[#allocation100_spill] sm:$0xff] %v6337_v20  ;;  %1848 = vperm.xlu0 %5453, %v5857_v63  }
 0x2b8   : > { %1658 = vperm.xlu1 %5448, %v6079_v1  }
 0x2ba   : > { %v6341_v11 = vpop.permute.xlu1 %863  ;;  %v6343_v53 = vpop.permute.xlu0 %1404 }
 0x2bb   : > { %8913 = vst [vmem:[#allocation101_spill] sm:$0xff] %v6341_v11  ;;  %8914 = vst [vmem:[#allocation102_spill] sm:$0xff] %v6343_v53  ;;  %1856 = vperm.xlu0 %5453, %v5925_v17  }
 0x2bc   : > { %5451 = vset.pattern.permute.xlu1 %v5557_v23 }
 0x2bd   : > { %1715 = vperm.xlu1 %5451, %v5745_v50  }
 0x2be   : > { %v6347_v51 = vpop.permute.xlu0 %1412 }
 0x2bf   : > { %8915 = vst [vmem:[#allocation103_spill] sm:$0xff] %v6347_v51  ;;  %v6349_v6 = vpop.permute.xlu1 %1089  ;;  %1864 = vperm.xlu0 %5453, %v5985_v35  }
 0x2c0   : > { %8916 = vst [vmem:[#allocation104_spill] sm:$0xff] %v6349_v6  ;;  %v5559_v6 = vmov 13  }
 0x2c1   : > { %1719 = vperm.xlu1 %5451, %v5793_v59  }
 0x2c2   : > { %v6353_v20 = vpop.permute.xlu0 %1420 }
 0x2c3   : > { %8917 = vst [vmem:[#allocation105_spill] sm:$0xff] %v6353_v20  ;;  %1872 = vperm.xlu0 %5453, %v6045_v52  }
 0x2c4   : > { %v6356_v11 = vpop.permute.xlu1 %1307 }
 0x2c5   : > { %8918 = vst [vmem:[#allocation106_spill] sm:$0xff] %v6356_v11  ;;  %1727 = vperm.xlu1 %5451, %v5821_v61  }
 0x2c6   : > { %v6359_v53 = vpop.permute.xlu0 %1428 }
 0x2c7   : > { %8919 = vst [vmem:[#allocation107_spill] sm:$0xff] %v6359_v53  ;;  %1880 = vperm.xlu0 %5453, %v6105_v21  }
 0x2c8   : > { %v6362_v23 = vpop.permute.xlu1 %1315 }
 0x2c9   : > { %8920 = vst [vmem:[#allocation108_spill] sm:$0xff] %v6362_v23  ;;  %1735 = vperm.xlu1 %5451, %v5857_v63  }
 0x2cb   : > { %5454 = vset.pattern.permute.xlu0 %v5559_v6  ;;  %v6365_v51 = vpop.permute.xlu0 %1485 }
 0x2cc   : > { %8921 = vst [vmem:[#allocation109_spill] sm:$0xff] %v6365_v51  ;;  %1937 = vperm.xlu0 %5454, %v5761_v57  }
 0x2cd   : > { %1743 = vperm.xlu1 %5451, %v5925_v17   ;;  %v6369_v20 = vpop.permute.xlu1 %1372 }
 0x2ce   : > { %8922 = vst [vmem:[#allocation110_spill] sm:$0xff] %v6369_v20 }
 0x2cf   : > { %v6371_v11 = vpop.permute.xlu0 %1497 }
 0x2d0   : > { %8923 = vst [vmem:[#allocation111_spill] sm:$0xff] %v6371_v11  ;;  %1949 = vperm.xlu0 %5454, %v5775_v58  }
 0x2d1   : > { %1751 = vperm.xlu1 %5451, %v5985_v35   ;;  %v6375_v53 = vpop.permute.xlu1 %1380 }
 0x2d2   : > { %8924 = vst [vmem:[#allocation112_spill] sm:$0xff] %v6375_v53 }
 0x2d3   : > { %v6377_v23 = vpop.permute.xlu0 %1505 }
 0x2d4   : > { %8925 = vst [vmem:[#allocation113_spill] sm:$0xff] %v6377_v23  ;;  %1957 = vperm.xlu0 %5454, %v5803_v60  }
 0x2d5   : > { %1759 = vperm.xlu1 %5451, %v6045_v52   ;;  %v6381_v51 = vpop.permute.xlu1 %1384 }
 0x2d6   : > { %8926 = vst [vmem:[#allocation114_spill] sm:$0xff] %v6381_v51 }
 0x2d7   : > { %v6383_v7 = vpop.permute.xlu0 %1513 }
 0x2d8   : > { %8927 = vst [vmem:[#allocation115_spill] sm:$0xff] %v6383_v7  ;;  %1965 = vperm.xlu0 %5454, %v5839_v62  }
 0x2d9   : > { %1767 = vperm.xlu1 %5451, %v6105_v21   ;;  %v6387_v11 = vpop.permute.xlu1 %1392 }
 0x2da   : > { %8928 = vst [vmem:[#allocation116_spill] sm:$0xff] %v6387_v11 }
 0x2db   : > { %v6389_v20 = vpop.permute.xlu0 %1521 }
 0x2dc   : > { %8929 = vst [vmem:[#allocation117_spill] sm:$0xff] %v6389_v20  ;;  %1973 = vperm.xlu0 %5454, %v5891_v8  }
 0x2dd   : > { %5452 = vset.pattern.permute.xlu1 %v5558_v55  ;;  %v6392_v23 = vpop.permute.xlu1 %1400 }
 0x2de   : > { %8930 = vst [vmem:[#allocation118_spill] sm:$0xff] %v6392_v23  ;;  %1824 = vperm.xlu1 %5452, %v5761_v57  }
 0x2df   : > { %v6395_v53 = vpop.permute.xlu0 %1529 }
 0x2e0   : > { %8931 = vst [vmem:[#allocation119_spill] sm:$0xff] %v6395_v53  ;;  %1981 = vperm.xlu0 %5454, %v5959_v28   ;;  %v5560_v53 = vmov 14  }
 0x2e1   : > { %v6398_v51 = vpop.permute.xlu1 %1408 }
 0x2e2   : > { %8932 = vst [vmem:[#allocation120_spill] sm:$0xff] %v6398_v51  ;;  %1832 = vperm.xlu1 %5452, %v5793_v59  }
 0x2e3   : > { %v6401_v7 = vpop.permute.xlu0 %1537 }
 0x2e4   : > { %8933 = vst [vmem:[#allocation121_spill] sm:$0xff] %v6401_v7  ;;  %1989 = vperm.xlu0 %5454, %v6019_v44  }
 0x2e5   : > { %v6404_v20 = vpop.permute.xlu1 %1416 }
 0x2e6   : > { %8934 = vst [vmem:[#allocation122_spill] sm:$0xff] %v6404_v20  ;;  %1836 = vperm.xlu1 %5452, %v5775_v58  }
 0x2e7   : > { %v6407_v55 = vpop.permute.xlu0 %1545 }
 0x2e8   : > { %8935 = vst [vmem:[#allocation123_spill] sm:$0xff] %v6407_v55  ;;  %1997 = vperm.xlu0 %5454, %v6079_v1  }
 0x2e9   : > { %v6410_v23 = vpop.permute.xlu1 %1424 }
 0x2ea   : > { %8936 = vst [vmem:[#allocation124_spill] sm:$0xff] %v6410_v23  ;;  %1844 = vperm.xlu1 %5452, %v5803_v60  }
 0x2ec   : > { %5457 = vset.pattern.permute.xlu0 %v5560_v53  ;;  %v6413_v51 = vpop.permute.xlu0 %1602 }
 0x2ed   : > { %8937 = vst [vmem:[#allocation125_spill] sm:$0xff] %v6413_v51  ;;  %v6415_v11 = vpop.permute.xlu1 %1432  ;;  %2054 = vperm.xlu0 %5457, %v5745_v50  }
 0x2ee   : > { %8938 = vst [vmem:[#allocation126_spill] sm:$0xff] %v6415_v11  ;;  %1852 = vperm.xlu1 %5452, %v5839_v62  }
 0x2f0   : > { %v6419_v7 = vpop.permute.xlu0 %1614 }
 0x2f1   : > { %8939 = vst [vmem:[#allocation127_spill] sm:$0xff] %v6419_v7  ;;  %2066 = vperm.xlu0 %5457, %v5821_v61  }
 0x2f2   : > { %1860 = vperm.xlu1 %5452, %v5891_v8   ;;  %v6423_v55 = vpop.permute.xlu1 %1489 }
 0x2f3   : > { %8940 = vst [vmem:[#allocation128_spill] sm:$0xff] %v6423_v55 }
 0x2f4   : > { %v6425_v23 = vpop.permute.xlu0 %1622 }
 0x2f5   : > { %8941 = vst [vmem:[#allocation129_spill] sm:$0xff] %v6425_v23  ;;  %2074 = vperm.xlu0 %5457, %v5857_v63  }
 0x2f6   : > { %1868 = vperm.xlu1 %5452, %v5959_v28   ;;  %v6429_v51 = vpop.permute.xlu1 %1493 }
 0x2f7   : > { %8942 = vst [vmem:[#allocation130_spill] sm:$0xff] %v6429_v51 }
 0x2f8   : > { %v6431_v11 = vpop.permute.xlu0 %1630 }
 0x2f9   : > { %8943 = vst [vmem:[#allocation131_spill] sm:$0xff] %v6431_v11  ;;  %2082 = vperm.xlu0 %5457, %v5925_v17  }
 0x2fa   : > { %1876 = vperm.xlu1 %5452, %v6019_v44   ;;  %v6435_v7 = vpop.permute.xlu1 %1501 }
 0x2fb   : > { %8944 = vst [vmem:[#allocation132_spill] sm:$0xff] %v6435_v7  ;;  %v8764_v7 = vmov 15  }
 0x2fc   : > { %v6437_v20 = vpop.permute.xlu0 %1638 }
 0x2fd   : > { %8945 = vst [vmem:[#allocation133_spill] sm:$0xff] %v6437_v20  ;;  %2090 = vperm.xlu0 %5457, %v5985_v35  }
 0x2fe   : > { %1884 = vperm.xlu1 %5452, %v6079_v1   ;;  %v6441_v55 = vpop.permute.xlu1 %1509 }
 0x2ff   : > { %8946 = vst [vmem:[#allocation134_spill] sm:$0xff] %v6441_v55 }
 0x300   : > { %v6443_v23 = vpop.permute.xlu0 %1646 }
 0x301   : > { %8947 = vst [vmem:[#allocation135_spill] sm:$0xff] %v6443_v23  ;;  %2098 = vperm.xlu0 %5457, %v6045_v52  }
 0x302   : > { %5455 = vset.pattern.permute.xlu1 %v5559_v6  ;;  %v6446_v11 = vpop.permute.xlu1 %1517 }
 0x303   : > { %8948 = vst [vmem:[#allocation136_spill] sm:$0xff] %v6446_v11  ;;  %1941 = vperm.xlu1 %5455, %v5745_v50  }
 0x304   : > { %v6449_v51 = vpop.permute.xlu0 %1654 }
 0x305   : > { %8949 = vst [vmem:[#allocation137_spill] sm:$0xff] %v6449_v51  ;;  %2106 = vperm.xlu0 %5457, %v6105_v21  }
 0x306   : > { %v6452_v20 = vpop.permute.xlu1 %1525 }
 0x307   : > { %8950 = vst [vmem:[#allocation138_spill] sm:$0xff] %v6452_v20  ;;  %1945 = vperm.xlu1 %5455, %v5793_v59  }
 0x309   : > { %5458 = vset.pattern.permute.xlu0 %v8764_v7  ;;  %v6456_v55 = vpop.permute.xlu0 %1711 }
 0x30a   : > { %8951 = vst [vmem:[#allocation139_spill] sm:$0xff] %v6456_v55  ;;  %v6458_v23 = vpop.permute.xlu1 %1533  ;;  %2163 = vperm.xlu0 %5458, %v5761_v57  }
 0x30b   : > { %8952 = vst [vmem:[#allocation140_spill] sm:$0xff] %v6458_v23  ;;  %1953 = vperm.xlu1 %5455, %v5821_v61  }
 0x30d   : > { %v6462_v6 = vpop.permute.xlu0 %1723 }
 0x30e   : > { %8953 = vst [vmem:[#allocation141_spill] sm:$0xff] %v6462_v6  ;;  %v6464_v51 = vpop.permute.xlu1 %1541  ;;  %2175 = vperm.xlu0 %5458, %v5775_v58  }
 0x30f   : > { %8954 = vst [vmem:[#allocation142_spill] sm:$0xff] %v6464_v51  ;;  %1961 = vperm.xlu1 %5455, %v5857_v63  }
 0x311   : > { %v6468_v20 = vpop.permute.xlu0 %1731 }
 0x312   : > { %8955 = vst [vmem:[#allocation143_spill] sm:$0xff] %v6468_v20  ;;  %2183 = vperm.xlu0 %5458, %v5803_v60  }
 0x313   : > { %1969 = vperm.xlu1 %5455, %v5925_v17   ;;  %v6472_v7 = vpop.permute.xlu1 %1598 }
 0x314   : > { %8956 = vst [vmem:[#allocation144_spill] sm:$0xff] %v6472_v7 }
 0x315   : > { %v6474_v55 = vpop.permute.xlu0 %1739 }
 0x316   : > { %8957 = vst [vmem:[#allocation145_spill] sm:$0xff] %v6474_v55  ;;  %2191 = vperm.xlu0 %5458, %v5839_v62  }
 0x317   : > { %1977 = vperm.xlu1 %5455, %v5985_v35   ;;  %v6478_v6 = vpop.permute.xlu1 %1606 }
 0x318   : > { %8958 = vst [vmem:[#allocation146_spill] sm:$0xff] %v6478_v6 }
 0x319   : > { %v6480_v51 = vpop.permute.xlu0 %1747 }
 0x31a   : > { %8959 = vst [vmem:[#allocation147_spill] sm:$0xff] %v6480_v51  ;;  %2199 = vperm.xlu0 %5458, %v5891_v8  }
 0x31b   : > { %1985 = vperm.xlu1 %5455, %v6045_v52   ;;  %v6484_v20 = vpop.permute.xlu1 %1610 }
 0x31c   : > { %8960 = vst [vmem:[#allocation148_spill] sm:$0xff] %v6484_v20 }
 0x31d   : > { %v6486_v23 = vpop.permute.xlu0 %1755 }
 0x31e   : > { %8961 = vst [vmem:[#allocation149_spill] sm:$0xff] %v6486_v23  ;;  %2207 = vperm.xlu0 %5458, %v5959_v28   ;;  %v8765_v23 = vmov 16  }
 0x31f   : > { %1993 = vperm.xlu1 %5455, %v6105_v21   ;;  %v6490_v7 = vpop.permute.xlu1 %1618 }
 0x320   : > { %8962 = vst [vmem:[#allocation150_spill] sm:$0xff] %v6490_v7 }
 0x321   : > { %v6492_v55 = vpop.permute.xlu0 %1763 }
 0x322   : > { %8963 = vst [vmem:[#allocation151_spill] sm:$0xff] %v6492_v55  ;;  %2215 = vperm.xlu0 %5458, %v6019_v44  }
 0x323   : > { %5456 = vset.pattern.permute.xlu1 %v5560_v53  ;;  %v6495_v51 = vpop.permute.xlu1 %1626 }
 0x324   : > { %8964 = vst [vmem:[#allocation152_spill] sm:$0xff] %v6495_v51  ;;  %2050 = vperm.xlu1 %5456, %v5761_v57  }
 0x325   : > { %v6498_v6 = vpop.permute.xlu0 %1771 }
 0x326   : > { %8965 = vst [vmem:[#allocation153_spill] sm:$0xff] %v6498_v6  ;;  %2223 = vperm.xlu0 %5458, %v6079_v1  }
 0x327   : > { %v6501_v20 = vpop.permute.xlu1 %1634 }
 0x328   : > { %8966 = vst [vmem:[#allocation154_spill] sm:$0xff] %v6501_v20  ;;  %2058 = vperm.xlu1 %5456, %v5793_v59  }
 0x32a   : > { %5461 = vset.pattern.permute.xlu0 %v8765_v23  ;;  %v6505_v7 = vpop.permute.xlu0 %1828 }
 0x32b   : > { %8967 = vst [vmem:[#allocation155_spill] sm:$0xff] %v6505_v7  ;;  %v6507_v55 = vpop.permute.xlu1 %1642  ;;  %2280 = vperm.xlu0 %5461, %v5745_v50  }
 0x32c   : > { %8968 = vst [vmem:[#allocation156_spill] sm:$0xff] %v6507_v55  ;;  %2062 = vperm.xlu1 %5456, %v5775_v58  }
 0x32e   : > { %v6511_v53 = vpop.permute.xlu0 %1840 }
 0x32f   : > { %8969 = vst [vmem:[#allocation157_spill] sm:$0xff] %v6511_v53  ;;  %v6513_v51 = vpop.permute.xlu1 %1650  ;;  %2292 = vperm.xlu0 %5461, %v5821_v61  }
 0x330   : > { %8970 = vst [vmem:[#allocation158_spill] sm:$0xff] %v6513_v51  ;;  %2070 = vperm.xlu1 %5456, %v5803_v60  }
 0x332   : > { %v6517_v20 = vpop.permute.xlu0 %1848 }
 0x333   : > { %8971 = vst [vmem:[#allocation159_spill] sm:$0xff] %v6517_v20  ;;  %v6519_v6 = vpop.permute.xlu1 %1658  ;;  %2300 = vperm.xlu0 %5461, %v5857_v63  }
 0x334   : > { %8972 = vst [vmem:[#allocation160_spill] sm:$0xff] %v6519_v6  ;;  %2078 = vperm.xlu1 %5456, %v5839_v62  }
 0x336   : > { %v6523_v23 = vpop.permute.xlu0 %1856 }
 0x337   : > { %8973 = vst [vmem:[#allocation161_spill] sm:$0xff] %v6523_v23  ;;  %2308 = vperm.xlu0 %5461, %v5925_v17  }
 0x338   : > { %2086 = vperm.xlu1 %5456, %v5891_v8   ;;  %v6527_v7 = vpop.permute.xlu1 %1715 }
 0x339   : > { %8974 = vst [vmem:[#allocation162_spill] sm:$0xff] %v6527_v7 }
 0x33a   : > { %v6529_v53 = vpop.permute.xlu0 %1864 }
 0x33b   : > { %8975 = vst [vmem:[#allocation163_spill] sm:$0xff] %v6529_v53  ;;  %2316 = vperm.xlu0 %5461, %v5985_v35   ;;  %v8766_v53 = vmov 17  }
 0x33c   : > { %2094 = vperm.xlu1 %5456, %v5959_v28   ;;  %v6533_v20 = vpop.permute.xlu1 %1719 }
 0x33d   : > { %8976 = vst [vmem:[#allocation164_spill] sm:$0xff] %v6533_v20 }
 0x33e   : > { %v6535_v6 = vpop.permute.xlu0 %1872 }
 0x33f   : > { %8977 = vst [vmem:[#allocation165_spill] sm:$0xff] %v6535_v6  ;;  %2324 = vperm.xlu0 %5461, %v6045_v52   ;;  %v8982_v6 = vmov 15  }
 0x340   : > { %2102 = vperm.xlu1 %5456, %v6019_v44   ;;  %v6539_v23 = vpop.permute.xlu1 %1727 }
 0x341   : > { %8978 = vst [vmem:[#allocation166_spill] sm:$0xff] %v6539_v23 }
 0x342   : > { %v6541_v51 = vpop.permute.xlu0 %1880 }
 0x343   : > { %8979 = vst [vmem:[#allocation167_spill] sm:$0xff] %v6541_v51  ;;  %2332 = vperm.xlu0 %5461, %v6105_v21  }
 0x344   : > { %2110 = vperm.xlu1 %5456, %v6079_v1   ;;  %v6545_v7 = vpop.permute.xlu1 %1735 }
 0x345   : > { %8980 = vst [vmem:[#allocation168_spill] sm:$0xff] %v6545_v7 }
 0x347   : > { %5462 = vset.pattern.permute.xlu0 %v8766_v53  ;;  %v6548_v20 = vpop.permute.xlu0 %1937 }
 0x348   : > { %8981 = vst [vmem:[#allocation169_spill] sm:$0xff] %v6548_v20  ;;  %5459 = vset.pattern.permute.xlu1 %v8982_v6  ;;  %v6551_v55 = vpop.permute.xlu1 %1743  ;;  %2389 = vperm.xlu0 %5462, %v5761_v57  }
 0x349   : > { %8983 = vst [vmem:[#allocation170_spill] sm:$0xff] %v6551_v55  ;;  %2167 = vperm.xlu1 %5459, %v5745_v50  }
 0x34b   : > { %v6555_v51 = vpop.permute.xlu0 %1949 }
 0x34c   : > { %8984 = vst [vmem:[#allocation171_spill] sm:$0xff] %v6555_v51  ;;  %v6557_v23 = vpop.permute.xlu1 %1751  ;;  %2401 = vperm.xlu0 %5462, %v5775_v58  }
 0x34d   : > { %8985 = vst [vmem:[#allocation172_spill] sm:$0xff] %v6557_v23  ;;  %2171 = vperm.xlu1 %5459, %v5793_v59  }
 0x34f   : > { %v6561_v7 = vpop.permute.xlu0 %1957 }
 0x350   : > { %8986 = vst [vmem:[#allocation173_spill] sm:$0xff] %v6561_v7  ;;  %v6563_v53 = vpop.permute.xlu1 %1759  ;;  %2409 = vperm.xlu0 %5462, %v5803_v60  }
 0x351   : > { %8987 = vst [vmem:[#allocation174_spill] sm:$0xff] %v6563_v53  ;;  %2179 = vperm.xlu1 %5459, %v5821_v61  }
 0x353   : > { %v6567_v6 = vpop.permute.xlu0 %1965 }
 0x354   : > { %8988 = vst [vmem:[#allocation175_spill] sm:$0xff] %v6567_v6  ;;  %v6569_v20 = vpop.permute.xlu1 %1767  ;;  %2417 = vperm.xlu0 %5462, %v5839_v62  }
 0x355   : > { %8989 = vst [vmem:[#allocation176_spill] sm:$0xff] %v6569_v20  ;;  %2187 = vperm.xlu1 %5459, %v5857_v63  }
 0x357   : > { %v6573_v51 = vpop.permute.xlu0 %1973 }
 0x358   : > { %8990 = vst [vmem:[#allocation177_spill] sm:$0xff] %v6573_v51  ;;  %2425 = vperm.xlu0 %5462, %v5891_v8  }
 0x359   : > { %2195 = vperm.xlu1 %5459, %v5925_v17   ;;  %v6577_v7 = vpop.permute.xlu1 %1824 }
 0x35a   : > { %8991 = vst [vmem:[#allocation178_spill] sm:$0xff] %v6577_v7 }
 0x35b   : > { %v6579_v53 = vpop.permute.xlu0 %1981 }
 0x35c   : > { %8992 = vst [vmem:[#allocation179_spill] sm:$0xff] %v6579_v53  ;;  %2433 = vperm.xlu0 %5462, %v5959_v28   ;;  %v8767_v53 = vmov 18  }
 0x35d   : > { %2203 = vperm.xlu1 %5459, %v5985_v35   ;;  %v6583_v6 = vpop.permute.xlu1 %1832 }
 0x35e   : > { %8993 = vst [vmem:[#allocation180_spill] sm:$0xff] %v6583_v6 }
 0x35f   : > { %v6585_v20 = vpop.permute.xlu0 %1989 }
 0x360   : > { %8994 = vst [vmem:[#allocation181_spill] sm:$0xff] %v6585_v20  ;;  %2441 = vperm.xlu0 %5462, %v6019_v44   ;;  %v8999_v20 = vmov 16  }
 0x361   : > { %2211 = vperm.xlu1 %5459, %v6045_v52   ;;  %v6589_v51 = vpop.permute.xlu1 %1836 }
 0x362   : > { %8995 = vst [vmem:[#allocation182_spill] sm:$0xff] %v6589_v51 }
 0x363   : > { %v6591_v23 = vpop.permute.xlu0 %1997 }
 0x364   : > { %8996 = vst [vmem:[#allocation183_spill] sm:$0xff] %v6591_v23  ;;  %2449 = vperm.xlu0 %5462, %v6079_v1  }
 0x365   : > { %2219 = vperm.xlu1 %5459, %v6105_v21   ;;  %v6595_v7 = vpop.permute.xlu1 %1844 }
 0x366   : > { %8997 = vst [vmem:[#allocation184_spill] sm:$0xff] %v6595_v7 }
 0x368   : > { %5465 = vset.pattern.permute.xlu0 %v8767_v53  ;;  %v6598_v6 = vpop.permute.xlu0 %2054 }
 0x369   : > { %8998 = vst [vmem:[#allocation185_spill] sm:$0xff] %v6598_v6  ;;  %5460 = vset.pattern.permute.xlu1 %v8999_v20  ;;  %v6601_v55 = vpop.permute.xlu1 %1852  ;;  %2506 = vperm.xlu0 %5465, %v5745_v50  }
 0x36a   : > { %9000 = vst [vmem:[#allocation186_spill] sm:$0xff] %v6601_v55  ;;  %2276 = vperm.xlu1 %5460, %v5761_v57  }
 0x36c   : > { %v6605_v51 = vpop.permute.xlu0 %2066 }
 0x36d   : > { %9001 = vst [vmem:[#allocation187_spill] sm:$0xff] %v6605_v51  ;;  %v6607_v23 = vpop.permute.xlu1 %1860  ;;  %2518 = vperm.xlu0 %5465, %v5821_v61   ;;  %v9018_v51 = vmov 17  }
 0x36e   : > { %9002 = vst [vmem:[#allocation188_spill] sm:$0xff] %v6607_v23  ;;  %2284 = vperm.xlu1 %5460, %v5793_v59  }
 0x370   : > { %v6611_v7 = vpop.permute.xlu0 %2074 }
 0x371   : > { %9003 = vst [vmem:[#allocation189_spill] sm:$0xff] %v6611_v7  ;;  %v6613_v53 = vpop.permute.xlu1 %1868  ;;  %2526 = vperm.xlu0 %5465, %v5857_v63  }
 0x372   : > { %9004 = vst [vmem:[#allocation190_spill] sm:$0xff] %v6613_v53  ;;  %2288 = vperm.xlu1 %5460, %v5775_v58  }
 0x374   : > { %v6617_v20 = vpop.permute.xlu0 %2082 }
 0x375   : > { %9005 = vst [vmem:[#allocation191_spill] sm:$0xff] %v6617_v20  ;;  %v6619_v6 = vpop.permute.xlu1 %1876  ;;  %2534 = vperm.xlu0 %5465, %v5925_v17  }
 0x376   : > { %9006 = vst [vmem:[#allocation192_spill] sm:$0xff] %v6619_v6  ;;  %2296 = vperm.xlu1 %5460, %v5803_v60  }
 0x378   : > { %v6623_v55 = vpop.permute.xlu0 %2090 }
 0x379   : > { %9007 = vst [vmem:[#allocation193_spill] sm:$0xff] %v6623_v55  ;;  %v6625_v23 = vpop.permute.xlu1 %1884  ;;  %2542 = vperm.xlu0 %5465, %v5985_v35  }
 0x37a   : > { %9008 = vst [vmem:[#allocation194_spill] sm:$0xff] %v6625_v23  ;;  %2304 = vperm.xlu1 %5460, %v5839_v62   ;;  %v8768_v23 = vmov 19  }
 0x37c   : > { %v6629_v53 = vpop.permute.xlu0 %2098 }
 0x37d   : > { %9009 = vst [vmem:[#allocation195_spill] sm:$0xff] %v6629_v53  ;;  %2550 = vperm.xlu0 %5465, %v6045_v52  }
 0x37e   : > { %2312 = vperm.xlu1 %5460, %v5891_v8   ;;  %v6633_v20 = vpop.permute.xlu1 %1941 }
 0x37f   : > { %9010 = vst [vmem:[#allocation196_spill] sm:$0xff] %v6633_v20 }
 0x380   : > { %v6635_v6 = vpop.permute.xlu0 %2106 }
 0x381   : > { %9011 = vst [vmem:[#allocation197_spill] sm:$0xff] %v6635_v6  ;;  %2558 = vperm.xlu0 %5465, %v6105_v21  }
 0x382   : > { %2320 = vperm.xlu1 %5460, %v5959_v28   ;;  %v6639_v55 = vpop.permute.xlu1 %1945 }
 0x383   : > { %9012 = vst [vmem:[#allocation198_spill] sm:$0xff] %v6639_v55 }
 0x385   : > { %5466 = vset.pattern.permute.xlu0 %v8768_v23  ;;  %v6642_v7 = vpop.permute.xlu0 %2163 }
 0x386   : > { %9013 = vst [vmem:[#allocation199_spill] sm:$0xff] %v6642_v7  ;;  %2328 = vperm.xlu1 %5460, %v6019_v44   ;;  %v6645_v53 = vpop.permute.xlu1 %1953  ;;  %2615 = vperm.xlu0 %5466, %v5761_v57  }
 0x387   : > { %9014 = vst [vmem:[#allocation200_spill] sm:$0xff] %v6645_v53 }
 0x389   : > { %v6648_v20 = vpop.permute.xlu0 %2175 }
 0x38a   : > { %9015 = vst [vmem:[#allocation201_spill] sm:$0xff] %v6648_v20  ;;  %2336 = vperm.xlu1 %5460, %v6079_v1   ;;  %v6651_v6 = vpop.permute.xlu1 %1961  ;;  %2627 = vperm.xlu0 %5466, %v5775_v58  }
 0x38b   : > { %9016 = vst [vmem:[#allocation202_spill] sm:$0xff] %v6651_v6 }
 0x38d   : > { %v6654_v55 = vpop.permute.xlu0 %2183 }
 0x38e   : > { %9017 = vst [vmem:[#allocation203_spill] sm:$0xff] %v6654_v55  ;;  %5463 = vset.pattern.permute.xlu1 %v9018_v51  ;;  %v6657_v23 = vpop.permute.xlu1 %1969  ;;  %2635 = vperm.xlu0 %5466, %v5803_v60  }
 0x38f   : > { %9019 = vst [vmem:[#allocation204_spill] sm:$0xff] %v6657_v23  ;;  %2393 = vperm.xlu1 %5463, %v5745_v50   ;;  %v9035_v23 = vmov 18  }
 0x391   : > { %v6661_v7 = vpop.permute.xlu0 %2191 }
 0x392   : > { %9020 = vst [vmem:[#allocation205_spill] sm:$0xff] %v6661_v7  ;;  %v6663_v53 = vpop.permute.xlu1 %1977  ;;  %2643 = vperm.xlu0 %5466, %v5839_v62  }
 0x393   : > { %9021 = vst [vmem:[#allocation206_spill] sm:$0xff] %v6663_v53  ;;  %2397 = vperm.xlu1 %5463, %v5793_v59  }
 0x395   : > { %v6667_v20 = vpop.permute.xlu0 %2199 }
 0x396   : > { %9022 = vst [vmem:[#allocation207_spill] sm:$0xff] %v6667_v20  ;;  %v6669_v6 = vpop.permute.xlu1 %1985  ;;  %2651 = vperm.xlu0 %5466, %v5891_v8  }
 0x397   : > { %9023 = vst [vmem:[#allocation208_spill] sm:$0xff] %v6669_v6  ;;  %2405 = vperm.xlu1 %5463, %v5821_v61  }
 0x399   : > { %v6673_v51 = vpop.permute.xlu0 %2207 }
 0x39a   : > { %9024 = vst [vmem:[#allocation209_spill] sm:$0xff] %v6673_v51  ;;  %v6675_v55 = vpop.permute.xlu1 %1993  ;;  %2659 = vperm.xlu0 %5466, %v5959_v28  }
 0x39b   : > { %9025 = vst [vmem:[#allocation210_spill] sm:$0xff] %v6675_v55  ;;  %2413 = vperm.xlu1 %5463, %v5857_v63   ;;  %v8769_v55 = vmov 20  }
 0x39d   : > { %v6679_v7 = vpop.permute.xlu0 %2215 }
 0x39e   : > { %9026 = vst [vmem:[#allocation211_spill] sm:$0xff] %v6679_v7  ;;  %2667 = vperm.xlu0 %5466, %v6019_v44  }
 0x39f   : > { %2421 = vperm.xlu1 %5463, %v5925_v17   ;;  %v6683_v20 = vpop.permute.xlu1 %2050 }
 0x3a0   : > { %9027 = vst [vmem:[#allocation212_spill] sm:$0xff] %v6683_v20 }
 0x3a1   : > { %v6685_v6 = vpop.permute.xlu0 %2223 }
 0x3a2   : > { %9028 = vst [vmem:[#allocation213_spill] sm:$0xff] %v6685_v6  ;;  %2675 = vperm.xlu0 %5466, %v6079_v1  }
 0x3a3   : > { %2429 = vperm.xlu1 %5463, %v5985_v35   ;;  %v6689_v51 = vpop.permute.xlu1 %2058 }
 0x3a4   : > { %9029 = vst [vmem:[#allocation214_spill] sm:$0xff] %v6689_v51 }
 0x3a6   : > { %5469 = vset.pattern.permute.xlu0 %v8769_v55  ;;  %v6692_v53 = vpop.permute.xlu0 %2280 }
 0x3a7   : > { %9030 = vst [vmem:[#allocation215_spill] sm:$0xff] %v6692_v53  ;;  %2437 = vperm.xlu1 %5463, %v6045_v52   ;;  %v6695_v7 = vpop.permute.xlu1 %2062  ;;  %2732 = vperm.xlu0 %5469, %v5745_v50  }
 0x3a8   : > { %9031 = vst [vmem:[#allocation216_spill] sm:$0xff] %v6695_v7 }
 0x3aa   : > { %v6698_v20 = vpop.permute.xlu0 %2292 }
 0x3ab   : > { %9032 = vst [vmem:[#allocation217_spill] sm:$0xff] %v6698_v20  ;;  %2445 = vperm.xlu1 %5463, %v6105_v21   ;;  %v6701_v6 = vpop.permute.xlu1 %2070  ;;  %2744 = vperm.xlu0 %5469, %v5821_v61  }
 0x3ac   : > { %9033 = vst [vmem:[#allocation218_spill] sm:$0xff] %v6701_v6 }
 0x3ae   : > { %v6704_v51 = vpop.permute.xlu0 %2300 }
 0x3af   : > { %9034 = vst [vmem:[#allocation219_spill] sm:$0xff] %v6704_v51  ;;  %5464 = vset.pattern.permute.xlu1 %v9035_v23  ;;  %v6707_v55 = vpop.permute.xlu1 %2078  ;;  %2752 = vperm.xlu0 %5469, %v5857_v63  }
 0x3b0   : > { %9036 = vst [vmem:[#allocation220_spill] sm:$0xff] %v6707_v55  ;;  %2502 = vperm.xlu1 %5464, %v5761_v57  }
 0x3b2   : > { %v6711_v53 = vpop.permute.xlu0 %2308 }
 0x3b3   : > { %9037 = vst [vmem:[#allocation221_spill] sm:$0xff] %v6711_v53  ;;  %v6713_v7 = vpop.permute.xlu1 %2086  ;;  %2760 = vperm.xlu0 %5469, %v5925_v17  }
 0x3b4   : > { %9038 = vst [vmem:[#allocation222_spill] sm:$0xff] %v6713_v7  ;;  %2510 = vperm.xlu1 %5464, %v5793_v59  }
 0x3b6   : > { %v6717_v6 = vpop.permute.xlu0 %2316 }
 0x3b7   : > { %9039 = vst [vmem:[#allocation223_spill] sm:$0xff] %v6717_v6  ;;  %v6719_v20 = vpop.permute.xlu1 %2094  ;;  %2768 = vperm.xlu0 %5469, %v5985_v35  }
 0x3b8   : > { %9040 = vst [vmem:[#allocation224_spill] sm:$0xff] %v6719_v20  ;;  %2514 = vperm.xlu1 %5464, %v5775_v58   ;;  %v8770_v20 = vmov 21  }
 0x3ba   : > { %v6723_v23 = vpop.permute.xlu0 %2324 }
 0x3bb   : > { %9041 = vst [vmem:[#allocation225_spill] sm:$0xff] %v6723_v23  ;;  %v6725_v55 = vpop.permute.xlu1 %2102  ;;  %2776 = vperm.xlu0 %5469, %v6045_v52  }
 0x3bc   : > { %9042 = vst [vmem:[#allocation226_spill] sm:$0xff] %v6725_v55  ;;  %2522 = vperm.xlu1 %5464, %v5803_v60  }
 0x3be   : > { %v6729_v7 = vpop.permute.xlu0 %2332 }
 0x3bf   : > { %9043 = vst [vmem:[#allocation227_spill] sm:$0xff] %v6729_v7  ;;  %v6731_v53 = vpop.permute.xlu1 %2110  ;;  %2784 = vperm.xlu0 %5469, %v6105_v21  }
 0x3c0   : > { %9044 = vst [vmem:[#allocation228_spill] sm:$0xff] %v6731_v53  ;;  %2530 = vperm.xlu1 %5464, %v5839_v62  }
 0x3c3   : > { %5470 = vset.pattern.permute.xlu0 %v8770_v20  ;;  %v6736_v6 = vpop.permute.xlu0 %2389 }
 0x3c4   : > { %9045 = vst [vmem:[#allocation229_spill] sm:$0xff] %v6736_v6  ;;  %2538 = vperm.xlu1 %5464, %v5891_v8   ;;  %v6739_v55 = vpop.permute.xlu1 %2167  ;;  %2841 = vperm.xlu0 %5470, %v5761_v57  }
 0x3c5   : > { %9046 = vst [vmem:[#allocation230_spill] sm:$0xff] %v6739_v55 }
 0x3c7   : > { %v6742_v23 = vpop.permute.xlu0 %2401 }
 0x3c8   : > { %9047 = vst [vmem:[#allocation231_spill] sm:$0xff] %v6742_v23  ;;  %2546 = vperm.xlu1 %5464, %v5959_v28   ;;  %v6745_v7 = vpop.permute.xlu1 %2171  ;;  %2853 = vperm.xlu0 %5470, %v5775_v58  }
 0x3c9   : > { %9048 = vst [vmem:[#allocation232_spill] sm:$0xff] %v6745_v7  ;;  %v9054_v7 = vmov 19  }
 0x3cb   : > { %v6748_v53 = vpop.permute.xlu0 %2409 }
 0x3cc   : > { %9049 = vst [vmem:[#allocation233_spill] sm:$0xff] %v6748_v53  ;;  %2554 = vperm.xlu1 %5464, %v6019_v44   ;;  %v6751_v20 = vpop.permute.xlu1 %2179  ;;  %2861 = vperm.xlu0 %5470, %v5803_v60  }
 0x3cd   : > { %9050 = vst [vmem:[#allocation234_spill] sm:$0xff] %v6751_v20 }
 0x3cf   : > { %v6754_v6 = vpop.permute.xlu0 %2417 }
 0x3d0   : > { %9051 = vst [vmem:[#allocation235_spill] sm:$0xff] %v6754_v6  ;;  %2562 = vperm.xlu1 %5464, %v6079_v1   ;;  %v6757_v55 = vpop.permute.xlu1 %2187  ;;  %2869 = vperm.xlu0 %5470, %v5839_v62  }
 0x3d1   : > { %9052 = vst [vmem:[#allocation236_spill] sm:$0xff] %v6757_v55 }
 0x3d3   : > { %v6760_v23 = vpop.permute.xlu0 %2425 }
 0x3d4   : > { %9053 = vst [vmem:[#allocation237_spill] sm:$0xff] %v6760_v23  ;;  %5467 = vset.pattern.permute.xlu1 %v9054_v7  ;;  %v6763_v51 = vpop.permute.xlu1 %2195  ;;  %2877 = vperm.xlu0 %5470, %v5891_v8  }
 0x3d5   : > { %9055 = vst [vmem:[#allocation238_spill] sm:$0xff] %v6763_v51  ;;  %2619 = vperm.xlu1 %5467, %v5745_v50  }
 0x3d7   : > { %v6767_v53 = vpop.permute.xlu0 %2433 }
 0x3d8   : > { %9056 = vst [vmem:[#allocation239_spill] sm:$0xff] %v6767_v53  ;;  %v6769_v20 = vpop.permute.xlu1 %2203  ;;  %2885 = vperm.xlu0 %5470, %v5959_v28   ;;  %v8771_v53 = vmov 22  }
 0x3d9   : > { %9057 = vst [vmem:[#allocation240_spill] sm:$0xff] %v6769_v20  ;;  %2623 = vperm.xlu1 %5467, %v5793_v59  }
 0x3db   : > { %v6773_v6 = vpop.permute.xlu0 %2441 }
 0x3dc   : > { %9058 = vst [vmem:[#allocation241_spill] sm:$0xff] %v6773_v6  ;;  %v6775_v55 = vpop.permute.xlu1 %2211  ;;  %2893 = vperm.xlu0 %5470, %v6019_v44  }
 0x3dd   : > { %9059 = vst [vmem:[#allocation242_spill] sm:$0xff] %v6775_v55  ;;  %2631 = vperm.xlu1 %5467, %v5821_v61  }
 0x3df   : > { %v6779_v7 = vpop.permute.xlu0 %2449 }
 0x3e0   : > { %9060 = vst [vmem:[#allocation243_spill] sm:$0xff] %v6779_v7  ;;  %v6781_v23 = vpop.permute.xlu1 %2219  ;;  %2901 = vperm.xlu0 %5470, %v6079_v1  }
 0x3e1   : > { %9061 = vst [vmem:[#allocation244_spill] sm:$0xff] %v6781_v23  ;;  %2639 = vperm.xlu1 %5467, %v5857_v63  }
 0x3e4   : > { %5473 = vset.pattern.permute.xlu0 %v8771_v53  ;;  %v6786_v20 = vpop.permute.xlu0 %2506 }
 0x3e5   : > { %9062 = vst [vmem:[#allocation245_spill] sm:$0xff] %v6786_v20  ;;  %2647 = vperm.xlu1 %5467, %v5925_v17   ;;  %v6789_v6 = vpop.permute.xlu1 %2276  ;;  %2958 = vperm.xlu0 %5473, %v5745_v50  }
 0x3e6   : > { %9063 = vst [vmem:[#allocation246_spill] sm:$0xff] %v6789_v6 }
 0x3e8   : > { %v6792_v55 = vpop.permute.xlu0 %2518 }
 0x3e9   : > { %9064 = vst [vmem:[#allocation247_spill] sm:$0xff] %v6792_v55  ;;  %2655 = vperm.xlu1 %5467, %v5985_v35   ;;  %v6795_v7 = vpop.permute.xlu1 %2284  ;;  %2970 = vperm.xlu0 %5473, %v5821_v61  }
 0x3ea   : > { %9065 = vst [vmem:[#allocation248_spill] sm:$0xff] %v6795_v7  ;;  %v9071_v7 = vmov 20  }
 0x3ec   : > { %v6798_v23 = vpop.permute.xlu0 %2526 }
 0x3ed   : > { %9066 = vst [vmem:[#allocation249_spill] sm:$0xff] %v6798_v23  ;;  %2663 = vperm.xlu1 %5467, %v6045_v52   ;;  %v6801_v53 = vpop.permute.xlu1 %2288  ;;  %2978 = vperm.xlu0 %5473, %v5857_v63  }
 0x3ee   : > { %9067 = vst [vmem:[#allocation250_spill] sm:$0xff] %v6801_v53 }
 0x3f0   : > { %v6804_v20 = vpop.permute.xlu0 %2534 }
 0x3f1   : > { %9068 = vst [vmem:[#allocation251_spill] sm:$0xff] %v6804_v20  ;;  %2671 = vperm.xlu1 %5467, %v6105_v21   ;;  %v6807_v6 = vpop.permute.xlu1 %2296  ;;  %2986 = vperm.xlu0 %5473, %v5925_v17  }
 0x3f2   : > { %9069 = vst [vmem:[#allocation252_spill] sm:$0xff] %v6807_v6 }
 0x3f4   : > { %v6810_v55 = vpop.permute.xlu0 %2542 }
 0x3f5   : > { %9070 = vst [vmem:[#allocation253_spill] sm:$0xff] %v6810_v55  ;;  %5468 = vset.pattern.permute.xlu1 %v9071_v7  ;;  %v6813_v51 = vpop.permute.xlu1 %2304  ;;  %2994 = vperm.xlu0 %5473, %v5985_v35  }
 0x3f6   : > { %9072 = vst [vmem:[#allocation254_spill] sm:$0xff] %v6813_v51  ;;  %2728 = vperm.xlu1 %5468, %v5761_v57   ;;  %v8772_v51 = vmov 23  }
 0x3f8   : > { %v6817_v53 = vpop.permute.xlu0 %2550 }
 0x3f9   : > { %9073 = vst [vmem:[#allocation255_spill] sm:$0xff] %v6817_v53  ;;  %v6819_v23 = vpop.permute.xlu1 %2312  ;;  %3002 = vperm.xlu0 %5473, %v6045_v52  }
 0x3fa   : > { %9074 = vst [vmem:[#allocation256_spill] sm:$0xff] %v6819_v23  ;;  %2736 = vperm.xlu1 %5468, %v5793_v59  }
 0x3fc   : > { %v6823_v6 = vpop.permute.xlu0 %2558 }
 0x3fd   : > { %9075 = vst [vmem:[#allocation257_spill] sm:$0xff] %v6823_v6  ;;  %v6825_v20 = vpop.permute.xlu1 %2320  ;;  %3010 = vperm.xlu0 %5473, %v6105_v21  }
 0x3fe   : > { %9076 = vst [vmem:[#allocation258_spill] sm:$0xff] %v6825_v20  ;;  %2740 = vperm.xlu1 %5468, %v5775_v58  }
 0x401   : > { %v6829_v7 = vpop.permute.xlu1 %2328  ;;  %5474 = vset.pattern.permute.xlu0 %v8772_v51  ;;  %v6832_v53 = vpop.permute.xlu0 %2615 }
 0x402   : > { %9077 = vst [vmem:[#allocation259_spill] sm:$0xff] %v6829_v7  ;;  %9078 = vst [vmem:[#allocation260_spill] sm:$0xff] %v6832_v53  ;;  %2748 = vperm.xlu1 %5468, %v5803_v60   ;;  %3067 = vperm.xlu0 %5474, %v5761_v57  }
 0x405   : > { %v6836_v23 = vpop.permute.xlu1 %2336  ;;  %v6838_v6 = vpop.permute.xlu0 %2627 }
 0x406   : > { %9079 = vst [vmem:[#allocation261_spill] sm:$0xff] %v6836_v23  ;;  %9080 = vst [vmem:[#allocation262_spill] sm:$0xff] %v6838_v6  ;;  %2756 = vperm.xlu1 %5468, %v5839_v62   ;;  %3079 = vperm.xlu0 %5474, %v5775_v58  }
 0x409   : > { %v6842_v20 = vpop.permute.xlu0 %2635 }
 0x40a   : > { %9081 = vst [vmem:[#allocation263_spill] sm:$0xff] %v6842_v20  ;;  %2764 = vperm.xlu1 %5468, %v5891_v8   ;;  %v6845_v7 = vpop.permute.xlu1 %2393  ;;  %3087 = vperm.xlu0 %5474, %v5803_v60  }
 0x40b   : > { %9082 = vst [vmem:[#allocation264_spill] sm:$0xff] %v6845_v7 }
 0x40d   : > { %v6848_v51 = vpop.permute.xlu0 %2643 }
 0x40e   : > { %9083 = vst [vmem:[#allocation265_spill] sm:$0xff] %v6848_v51  ;;  %2772 = vperm.xlu1 %5468, %v5959_v28   ;;  %v6851_v53 = vpop.permute.xlu1 %2397  ;;  %3095 = vperm.xlu0 %5474, %v5839_v62  }
 0x40f   : > { %9084 = vst [vmem:[#allocation266_spill] sm:$0xff] %v6851_v53  ;;  %v9090_v53 = vmov 21  }
 0x411   : > { %v6854_v6 = vpop.permute.xlu0 %2651 }
 0x412   : > { %9085 = vst [vmem:[#allocation267_spill] sm:$0xff] %v6854_v6  ;;  %2780 = vperm.xlu1 %5468, %v6019_v44   ;;  %v6857_v23 = vpop.permute.xlu1 %2405  ;;  %3103 = vperm.xlu0 %5474, %v5891_v8  }
 0x413   : > { %9086 = vst [vmem:[#allocation268_spill] sm:$0xff] %v6857_v23 }
 0x415   : > { %v6860_v20 = vpop.permute.xlu0 %2659 }
 0x416   : > { %9087 = vst [vmem:[#allocation269_spill] sm:$0xff] %v6860_v20  ;;  %2788 = vperm.xlu1 %5468, %v6079_v1   ;;  %v6863_v7 = vpop.permute.xlu1 %2413  ;;  %3111 = vperm.xlu0 %5474, %v5959_v28  }
 0x417   : > { %9088 = vst [vmem:[#allocation270_spill] sm:$0xff] %v6863_v7  ;;  %v8773_v7 = vmov 24  }
 0x419   : > { %v6866_v51 = vpop.permute.xlu0 %2667 }
 0x41a   : > { %9089 = vst [vmem:[#allocation271_spill] sm:$0xff] %v6866_v51  ;;  %5471 = vset.pattern.permute.xlu1 %v9090_v53  ;;  %v6869_v55 = vpop.permute.xlu1 %2421  ;;  %3119 = vperm.xlu0 %5474, %v6019_v44  }
 0x41b   : > { %9091 = vst [vmem:[#allocation272_spill] sm:$0xff] %v6869_v55  ;;  %2845 = vperm.xlu1 %5471, %v5745_v50  }
 0x41d   : > { %v6873_v6 = vpop.permute.xlu0 %2675 }
 0x41e   : > { %9092 = vst [vmem:[#allocation273_spill] sm:$0xff] %v6873_v6  ;;  %v6875_v23 = vpop.permute.xlu1 %2429  ;;  %3127 = vperm.xlu0 %5474, %v6079_v1  }
 0x41f   : > { %9093 = vst [vmem:[#allocation274_spill] sm:$0xff] %v6875_v23  ;;  %2849 = vperm.xlu1 %5471, %v5793_v59  }
 0x422   : > { %v6879_v20 = vpop.permute.xlu1 %2437  ;;  %5477 = vset.pattern.permute.xlu0 %v8773_v7  ;;  %v6882_v53 = vpop.permute.xlu0 %2732 }
 0x423   : > { %9094 = vst [vmem:[#allocation275_spill] sm:$0xff] %v6879_v20  ;;  %9095 = vst [vmem:[#allocation276_spill] sm:$0xff] %v6882_v53  ;;  %2857 = vperm.xlu1 %5471, %v5821_v61   ;;  %3184 = vperm.xlu0 %5477, %v5745_v50  }
 0x426   : > { %v6886_v51 = vpop.permute.xlu1 %2445  ;;  %v6888_v6 = vpop.permute.xlu0 %2744 }
 0x427   : > { %9096 = vst [vmem:[#allocation277_spill] sm:$0xff] %v6886_v51  ;;  %9097 = vst [vmem:[#allocation278_spill] sm:$0xff] %v6888_v6  ;;  %2865 = vperm.xlu1 %5471, %v5857_v63   ;;  %3196 = vperm.xlu0 %5477, %v5821_v61  }
 0x42a   : > { %v6892_v23 = vpop.permute.xlu0 %2752 }
 0x42b   : > { %9098 = vst [vmem:[#allocation279_spill] sm:$0xff] %v6892_v23  ;;  %2873 = vperm.xlu1 %5471, %v5925_v17   ;;  %v6895_v20 = vpop.permute.xlu1 %2502  ;;  %3204 = vperm.xlu0 %5477, %v5857_v63  }
 0x42c   : > { %9099 = vst [vmem:[#allocation280_spill] sm:$0xff] %v6895_v20 }
 0x42e   : > { %v6898_v7 = vpop.permute.xlu0 %2760 }
 0x42f   : > { %9100 = vst [vmem:[#allocation281_spill] sm:$0xff] %v6898_v7  ;;  %2881 = vperm.xlu1 %5471, %v5985_v35   ;;  %v6901_v53 = vpop.permute.xlu1 %2510  ;;  %3212 = vperm.xlu0 %5477, %v5925_v17  }
 0x430   : > { %9101 = vst [vmem:[#allocation282_spill] sm:$0xff] %v6901_v53  ;;  %v9107_v53 = vmov 22  }
 0x432   : > { %v6904_v51 = vpop.permute.xlu0 %2768 }
 0x433   : > { %9102 = vst [vmem:[#allocation283_spill] sm:$0xff] %v6904_v51  ;;  %2889 = vperm.xlu1 %5471, %v6045_v52   ;;  %v6907_v6 = vpop.permute.xlu1 %2514  ;;  %3220 = vperm.xlu0 %5477, %v5985_v35   ;;  %v8774_v51 = vmov 25  }
 0x434   : > { %9103 = vst [vmem:[#allocation284_spill] sm:$0xff] %v6907_v6 }
 0x436   : > { %v6910_v23 = vpop.permute.xlu0 %2776 }
 0x437   : > { %9104 = vst [vmem:[#allocation285_spill] sm:$0xff] %v6910_v23  ;;  %2897 = vperm.xlu1 %5471, %v6105_v21   ;;  %v6913_v20 = vpop.permute.xlu1 %2522  ;;  %3228 = vperm.xlu0 %5477, %v6045_v52  }
 0x438   : > { %9105 = vst [vmem:[#allocation286_spill] sm:$0xff] %v6913_v20  ;;  %v8775_v20 = vmov 26  }
 0x43a   : > { %v6916_v7 = vpop.permute.xlu0 %2784 }
 0x43b   : > { %9106 = vst [vmem:[#allocation287_spill] sm:$0xff] %v6916_v7  ;;  %5472 = vset.pattern.permute.xlu1 %v9107_v53  ;;  %v6919_v55 = vpop.permute.xlu1 %2530  ;;  %3236 = vperm.xlu0 %5477, %v6105_v21  }
 0x43c   : > { %9108 = vst [vmem:[#allocation288_spill] sm:$0xff] %v6919_v55  ;;  %2954 = vperm.xlu1 %5472, %v5761_v57  }
 0x43f   : > { %v6923_v6 = vpop.permute.xlu1 %2538  ;;  %5478 = vset.pattern.permute.xlu0 %v8774_v51  ;;  %v6926_v23 = vpop.permute.xlu0 %2841 }
 0x440   : > { %9109 = vst [vmem:[#allocation289_spill] sm:$0xff] %v6923_v6  ;;  %9110 = vst [vmem:[#allocation290_spill] sm:$0xff] %v6926_v23  ;;  %2962 = vperm.xlu1 %5472, %v5793_v59   ;;  %3293 = vperm.xlu0 %5478, %v5761_v57  }
 0x443   : > { %v6930_v7 = vpop.permute.xlu1 %2546  ;;  %v6932_v53 = vpop.permute.xlu0 %2853 }
 0x444   : > { %9111 = vst [vmem:[#allocation291_spill] sm:$0xff] %v6930_v7  ;;  %9112 = vst [vmem:[#allocation292_spill] sm:$0xff] %v6932_v53  ;;  %2966 = vperm.xlu1 %5472, %v5775_v58   ;;  %3305 = vperm.xlu0 %5478, %v5775_v58  }
 0x447   : > { %v6936_v55 = vpop.permute.xlu1 %2554  ;;  %v6938_v6 = vpop.permute.xlu0 %2861 }
 0x448   : > { %9113 = vst [vmem:[#allocation293_spill] sm:$0xff] %v6936_v55  ;;  %9114 = vst [vmem:[#allocation294_spill] sm:$0xff] %v6938_v6  ;;  %2974 = vperm.xlu1 %5472, %v5803_v60   ;;  %3313 = vperm.xlu0 %5478, %v5803_v60  }
 0x44b   : > { %v6942_v51 = vpop.permute.xlu1 %2562  ;;  %v6944_v23 = vpop.permute.xlu0 %2869 }
 0x44c   : > { %9115 = vst [vmem:[#allocation295_spill] sm:$0xff] %v6942_v51  ;;  %9116 = vst [vmem:[#allocation296_spill] sm:$0xff] %v6944_v23  ;;  %2982 = vperm.xlu1 %5472, %v5839_v62   ;;  %3321 = vperm.xlu0 %5478, %v5839_v62  }
 0x44f   : > { %v6948_v53 = vpop.permute.xlu0 %2877 }
 0x450   : > { %9117 = vst [vmem:[#allocation297_spill] sm:$0xff] %v6948_v53  ;;  %2990 = vperm.xlu1 %5472, %v5891_v8   ;;  %v6951_v7 = vpop.permute.xlu1 %2619  ;;  %3329 = vperm.xlu0 %5478, %v5891_v8  }
 0x451   : > { %9118 = vst [vmem:[#allocation298_spill] sm:$0xff] %v6951_v7 }
 0x453   : > { %v6954_v55 = vpop.permute.xlu0 %2885 }
 0x454   : > { %9119 = vst [vmem:[#allocation299_spill] sm:$0xff] %v6954_v55  ;;  %2998 = vperm.xlu1 %5472, %v5959_v28   ;;  %v6957_v6 = vpop.permute.xlu1 %2623  ;;  %3337 = vperm.xlu0 %5478, %v5959_v28   ;;  %v9125_v55 = vmov 23  }
 0x455   : > { %9120 = vst [vmem:[#allocation300_spill] sm:$0xff] %v6957_v6 }
 0x457   : > { %v6960_v23 = vpop.permute.xlu0 %2893 }
 0x458   : > { %9121 = vst [vmem:[#allocation301_spill] sm:$0xff] %v6960_v23  ;;  %3006 = vperm.xlu1 %5472, %v6019_v44   ;;  %v6963_v51 = vpop.permute.xlu1 %2631  ;;  %3345 = vperm.xlu0 %5478, %v6019_v44  }
 0x459   : > { %9122 = vst [vmem:[#allocation302_spill] sm:$0xff] %v6963_v51 }
 0x45b   : > { %v6966_v53 = vpop.permute.xlu0 %2901 }
 0x45c   : > { %9123 = vst [vmem:[#allocation303_spill] sm:$0xff] %v6966_v53  ;;  %3014 = vperm.xlu1 %5472, %v6079_v1   ;;  %v6969_v7 = vpop.permute.xlu1 %2639  ;;  %3353 = vperm.xlu0 %5478, %v6079_v1  }
 0x45d   : > { %9124 = vst [vmem:[#allocation304_spill] sm:$0xff] %v6969_v7 }
 0x460   : > { %5475 = vset.pattern.permute.xlu1 %v9125_v55  ;;  %v6973_v6 = vpop.permute.xlu1 %2647  ;;  %5481 = vset.pattern.permute.xlu0 %v8775_v20  ;;  %v6976_v23 = vpop.permute.xlu0 %2958 }
 0x461   : > { %9126 = vst [vmem:[#allocation305_spill] sm:$0xff] %v6973_v6  ;;  %9127 = vst [vmem:[#allocation306_spill] sm:$0xff] %v6976_v23  ;;  %3071 = vperm.xlu1 %5475, %v5745_v50   ;;  %3410 = vperm.xlu0 %5481, %v5745_v50  }
 0x464   : > { %v6980_v53 = vpop.permute.xlu1 %2655  ;;  %v6982_v51 = vpop.permute.xlu0 %2970 }
 0x465   : > { %9128 = vst [vmem:[#allocation307_spill] sm:$0xff] %v6980_v53  ;;  %9129 = vst [vmem:[#allocation308_spill] sm:$0xff] %v6982_v51  ;;  %3075 = vperm.xlu1 %5475, %v5793_v59   ;;  %3422 = vperm.xlu0 %5481, %v5821_v61  }
 0x468   : > { %v6986_v55 = vpop.permute.xlu1 %2663  ;;  %v6988_v6 = vpop.permute.xlu0 %2978 }
 0x469   : > { %9130 = vst [vmem:[#allocation309_spill] sm:$0xff] %v6986_v55  ;;  %9131 = vst [vmem:[#allocation310_spill] sm:$0xff] %v6988_v6  ;;  %3083 = vperm.xlu1 %5475, %v5821_v61   ;;  %3430 = vperm.xlu0 %5481, %v5857_v63  }
 0x46c   : > { %v6992_v20 = vpop.permute.xlu1 %2671  ;;  %v6994_v23 = vpop.permute.xlu0 %2986 }
 0x46d   : > { %9132 = vst [vmem:[#allocation311_spill] sm:$0xff] %v6992_v20  ;;  %9133 = vst [vmem:[#allocation312_spill] sm:$0xff] %v6994_v23  ;;  %3091 = vperm.xlu1 %5475, %v5857_v63   ;;  %3438 = vperm.xlu0 %5481, %v5925_v17  }
 0x470   : > { %v6998_v51 = vpop.permute.xlu0 %2994 }
 0x471   : > { %9134 = vst [vmem:[#allocation313_spill] sm:$0xff] %v6998_v51  ;;  %3099 = vperm.xlu1 %5475, %v5925_v17   ;;  %v7001_v53 = vpop.permute.xlu1 %2728  ;;  %3446 = vperm.xlu0 %5481, %v5985_v35   ;;  %v8776_v51 = vmov 31  }
 0x472   : > { %9135 = vst [vmem:[#allocation314_spill] sm:$0xff] %v7001_v53 }
 0x474   : > { %v7004_v6 = vpop.permute.xlu0 %3002 }
 0x475   : > { %9136 = vst [vmem:[#allocation315_spill] sm:$0xff] %v7004_v6  ;;  %3107 = vperm.xlu1 %5475, %v5985_v35   ;;  %v7007_v55 = vpop.permute.xlu1 %2736  ;;  %3454 = vperm.xlu0 %5481, %v6045_v52  }
 0x476   : > { %9137 = vst [vmem:[#allocation316_spill] sm:$0xff] %v7007_v55  ;;  %v9142_v55 = vmov 24  }
 0x478   : > { %v7010_v20 = vpop.permute.xlu0 %3010 }
 0x479   : > { %9138 = vst [vmem:[#allocation317_spill] sm:$0xff] %v7010_v20  ;;  %3115 = vperm.xlu1 %5475, %v6045_v52   ;;  %v7013_v23 = vpop.permute.xlu1 %2740  ;;  %3466 = vperm.xlu0 %5481, %v6079_v1  }
 0x47a   : > { %9139 = vst [vmem:[#allocation318_spill] sm:$0xff] %v7013_v23  ;;  %v8778_v23 = vmov 27  }
 0x47d   : > { %3123 = vperm.xlu1 %5475, %v6105_v21   ;;  %v7017_v53 = vpop.permute.xlu1 %2748  ;;  %5493 = vset.pattern.permute.xlu0 %v8776_v51  ;;  %v7020_v6 = vpop.permute.xlu0 %3067 }
 0x47e   : > { %9140 = vst [vmem:[#allocation319_spill] sm:$0xff] %v7017_v53  ;;  %9141 = vst [vmem:[#allocation320_spill] sm:$0xff] %v7020_v6  ;;  %4027 = vperm.xlu0 %5493, %v6105_v21  }
 0x481   : > { %5476 = vset.pattern.permute.xlu1 %v9142_v55  ;;  %v7024_v20 = vpop.permute.xlu1 %2756  ;;  %v7026_v7 = vpop.permute.xlu0 %3079 }
 0x482   : > { %9143 = vst [vmem:[#allocation321_spill] sm:$0xff] %v7024_v20  ;;  %9144 = vst [vmem:[#allocation322_spill] sm:$0xff] %v7026_v7  ;;  %3180 = vperm.xlu1 %5476, %v5761_v57   ;;  %5494 = vset.pattern.permute.xlu0 %v8778_v23 }
 0x483   : > { %3579 = vperm.xlu0 %5494, %v6079_v1  }
 0x485   : > { %v7031_v53 = vpop.permute.xlu1 %2764  ;;  %v7033_v51 = vpop.permute.xlu0 %3087 }
 0x486   : > { %9145 = vst [vmem:[#allocation323_spill] sm:$0xff] %v7031_v53  ;;  %9146 = vst [vmem:[#allocation324_spill] sm:$0xff] %v7033_v51  ;;  %3188 = vperm.xlu1 %5476, %v5793_v59   ;;  %v9161_v51 = vmov 25  }
 0x487   : > { %3571 = vperm.xlu0 %5494, %v6019_v44  }
 0x489   : > { %v7037_v55 = vpop.permute.xlu1 %2772  ;;  %v7039_v6 = vpop.permute.xlu0 %3095 }
 0x48a   : > { %9147 = vst [vmem:[#allocation325_spill] sm:$0xff] %v7037_v55  ;;  %9148 = vst [vmem:[#allocation326_spill] sm:$0xff] %v7039_v6  ;;  %3192 = vperm.xlu1 %5476, %v5775_v58  }
 0x48b   : > { %3563 = vperm.xlu0 %5494, %v5959_v28  }
 0x48d   : > { %v7043_v7 = vpop.permute.xlu1 %2780  ;;  %v7045_v23 = vpop.permute.xlu0 %3103 }
 0x48e   : > { %9149 = vst [vmem:[#allocation327_spill] sm:$0xff] %v7043_v7  ;;  %9150 = vst [vmem:[#allocation328_spill] sm:$0xff] %v7045_v23  ;;  %3200 = vperm.xlu1 %5476, %v5803_v60  }
 0x48f   : > { %3551 = vperm.xlu0 %5494, %v5925_v17  }
 0x491   : > { %v7049_v20 = vpop.permute.xlu1 %2788  ;;  %v7051_v53 = vpop.permute.xlu0 %3111 }
 0x492   : > { %9151 = vst [vmem:[#allocation329_spill] sm:$0xff] %v7049_v20  ;;  %9152 = vst [vmem:[#allocation330_spill] sm:$0xff] %v7051_v53  ;;  %3208 = vperm.xlu1 %5476, %v5839_v62   ;;  %v8780_v20 = vmov 30  }
 0x493   : > { %3539 = vperm.xlu0 %5494, %v5803_v60  }
 0x495   : > { %v7055_v6 = vpop.permute.xlu0 %3119 }
 0x496   : > { %9153 = vst [vmem:[#allocation331_spill] sm:$0xff] %v7055_v6  ;;  %3216 = vperm.xlu1 %5476, %v5891_v8   ;;  %v7058_v55 = vpop.permute.xlu1 %2845 }
 0x497   : > { %9154 = vst [vmem:[#allocation332_spill] sm:$0xff] %v7058_v55  ;;  %3527 = vperm.xlu0 %5494, %v5793_v59  }
 0x499   : > { %v7061_v23 = vpop.permute.xlu0 %3127 }
 0x49a   : > { %9155 = vst [vmem:[#allocation333_spill] sm:$0xff] %v7061_v23  ;;  %3224 = vperm.xlu1 %5476, %v5959_v28   ;;  %v7064_v7 = vpop.permute.xlu1 %2849 }
 0x49b   : > { %9156 = vst [vmem:[#allocation334_spill] sm:$0xff] %v7064_v7  ;;  %5519 = vset.pattern.permute.xlu0 %v8780_v20 }
 0x49c   : > { %3914 = vperm.xlu0 %5519, %v6105_v21  }
 0x49e   : > { %3232 = vperm.xlu1 %5476, %v6019_v44   ;;  %v7069_v6 = vpop.permute.xlu1 %2857  ;;  %v7071_v53 = vpop.permute.xlu0 %3184 }
 0x49f   : > { %9157 = vst [vmem:[#allocation335_spill] sm:$0xff] %v7069_v6  ;;  %9158 = vst [vmem:[#allocation336_spill] sm:$0xff] %v7071_v53 }
 0x4a0   : > { %3902 = vperm.xlu0 %5519, %v5959_v28  }
 0x4a2   : > { %3240 = vperm.xlu1 %5476, %v6079_v1   ;;  %v7075_v55 = vpop.permute.xlu1 %2865  ;;  %v7077_v23 = vpop.permute.xlu0 %3196 }
 0x4a3   : > { %9159 = vst [vmem:[#allocation337_spill] sm:$0xff] %v7075_v55  ;;  %9160 = vst [vmem:[#allocation338_spill] sm:$0xff] %v7077_v23  ;;  %v8782_v55 = vmov 29  }
 0x4a4   : > { %3890 = vperm.xlu0 %5519, %v5925_v17  }
 0x4a6   : > { %5479 = vset.pattern.permute.xlu1 %v9161_v51  ;;  %v7081_v20 = vpop.permute.xlu1 %2873  ;;  %v7083_v7 = vpop.permute.xlu0 %3204 }
 0x4a7   : > { %9162 = vst [vmem:[#allocation339_spill] sm:$0xff] %v7081_v20  ;;  %9163 = vst [vmem:[#allocation340_spill] sm:$0xff] %v7083_v7  ;;  %3297 = vperm.xlu1 %5479, %v5745_v50   ;;  %v9178_v20 = vmov 26  }
 0x4a8   : > { %3878 = vperm.xlu0 %5519, %v5803_v60  }
 0x4aa   : > { %v7087_v53 = vpop.permute.xlu1 %2881  ;;  %v7089_v6 = vpop.permute.xlu0 %3212 }
 0x4ab   : > { %9164 = vst [vmem:[#allocation341_spill] sm:$0xff] %v7087_v53  ;;  %9165 = vst [vmem:[#allocation342_spill] sm:$0xff] %v7089_v6  ;;  %3301 = vperm.xlu1 %5479, %v5793_v59  }
 0x4ac   : > { %5522 = vset.pattern.permute.xlu0 %v8782_v55 }
 0x4ad   : > { %3805 = vperm.xlu0 %5522, %v6079_v1  }
 0x4ae   : > { %v7094_v51 = vpop.permute.xlu1 %2889  ;;  %v7096_v23 = vpop.permute.xlu0 %3220 }
 0x4af   : > { %9166 = vst [vmem:[#allocation343_spill] sm:$0xff] %v7094_v51  ;;  %9167 = vst [vmem:[#allocation344_spill] sm:$0xff] %v7096_v23  ;;  %3309 = vperm.xlu1 %5479, %v5821_v61   ;;  %v4530_v23 = vld [vmem:[%s5628_s27 + $0xa8] sm:$0xff]  ;;  %v455_v51 = vld [vmem:[%s5628_s27 + $0x20] sm:$0xff] }
 0x4b0   : > { %v551_v11 = vmul.f32 %v6005_v41, %v455_v51  ;;  %v453_v41 = vld [vmem:[%s5628_s27 + $0x10] sm:$0xff] }
 0x4b1   : > { %3801 = vperm.xlu0 %5522, %v6105_v21   ;;  %v4531_v51 = vld [vmem:[%s5628_s27 + $0xb0] sm:$0xff] }
 0x4b2   : > { %v7100_v7 = vpop.permute.xlu1 %2897  ;;  %v7102_v53 = vpop.permute.xlu0 %3228 }
 0x4b3   : > { %9168 = vst [vmem:[#allocation345_spill] sm:$0xff] %v7100_v7  ;;  %9169 = vst [vmem:[#allocation346_spill] sm:$0xff] %v7102_v53  ;;  %3317 = vperm.xlu1 %5479, %v5857_v63  }
 0x4b5   : > { %3789 = vperm.xlu0 %5522, %v5959_v28  }
 0x4b6   : > { %v7106_v55 = vpop.permute.xlu0 %3236 }
 0x4b7   : > { %9170 = vst [vmem:[#allocation347_spill] sm:$0xff] %v7106_v55  ;;  %3325 = vperm.xlu1 %5479, %v5925_v17   ;;  %v7109_v6 = vpop.permute.xlu1 %2954 }
 0x4b8   : > { %9171 = vst [vmem:[#allocation348_spill] sm:$0xff] %v7109_v6 }
 0x4b9   : > { %3777 = vperm.xlu0 %5522, %v5925_v17  }
 0x4bb   : > { %3333 = vperm.xlu1 %5479, %v5985_v35   ;;  %v7113_v61 = vpop.permute.xlu1 %2962  ;;  %v7115_v7 = vpop.permute.xlu0 %3293 }
 0x4bc   : > { %9172 = vst [vmem:[#allocation349_spill] sm:$0xff] %v7113_v61  ;;  %9173 = vst [vmem:[#allocation350_spill] sm:$0xff] %v7115_v7  ;;  %v4529_v61 = vld [vmem:[%s5628_s27 + $0xa0] sm:$0xff]  ;;  %v8790_v7 = vmov 28  }
 0x4bd   : > { %3765 = vperm.xlu0 %5522, %v5803_v60  }
 0x4bf   : > { %3341 = vperm.xlu1 %5479, %v6045_v52   ;;  %v7119_v55 = vpop.permute.xlu1 %2966  ;;  %v7121_v63 = vpop.permute.xlu0 %3305 }
 0x4c0   : > { %9174 = vst [vmem:[#allocation351_spill] sm:$0xff] %v7119_v55  ;;  %9175 = vst [vmem:[#allocation352_spill] sm:$0xff] %v7121_v63  ;;  %v456_v55 = vld [vmem:[%s5628_s27 + $0x28] sm:$0xff]  ;;  %v648_v63 = vmul.f32 %v4529_v61, %v6055_v56  ;;  %v4545_v56 = vld [vmem:[%s5628_s27 + $0x120] sm:$0xff] }
 0x4c1   : > { %3753 = vperm.xlu0 %5522, %v5793_v59   ;;  %v552_v52 = vmul.f32 %v6021_v45, %v456_v55  ;;  %v4527_v61 = vld [vmem:[%s5628_s27 + $0x90] sm:$0xff]  ;;  %v761_v45 = vmul.f32 %v4545_v56, %v6013_v43  ;;  %v650_v56 = vmul.f32 %v4531_v51, %v6123_v10 }
 0x4c2   : > { %v646_v50 = vmul.f32 %v4527_v61, %v5961_v29 }
 0x4c3   : > { %3349 = vperm.xlu1 %5479, %v6105_v21   ;;  %v7125_v6 = vpop.permute.xlu1 %2974  ;;  %v7127_v53 = vpop.permute.xlu0 %3313 }
 0x4c4   : > { %9176 = vst [vmem:[#allocation353_spill] sm:$0xff] %v7125_v6  ;;  %9177 = vst [vmem:[#allocation354_spill] sm:$0xff] %v7127_v53  ;;  %v4546_v6 = vld [vmem:[%s5628_s27 + $0x128] sm:$0xff] }
 0x4c5   : > { %5529 = vset.pattern.permute.xlu0 %v8790_v7  ;;  %v649_v7 = vmul.f32 %v4530_v23, %v5971_v32  ;;  %v4561_v32 = vld [vmem:[%s5628_s27 + $0x1a0] sm:$0xff]  ;;  %v4543_v23 = vld [vmem:[%s5628_s27 + $0x110] sm:$0xff] }
 0x4c6   : > { %3676 = vperm.xlu0 %5529, %v5959_v28   ;;  %v759_v29 = vmul.f32 %v4543_v23, %v5969_v31  ;;  %v4591_v31 = vld [vmem:[%s5628_s27 + $0x290] sm:$0xff] }
 0x4c7   : > { %5480 = vset.pattern.permute.xlu1 %v9178_v20  ;;  %v7137_v35 = vpop.permute.xlu1 %2982  ;;  %v7139_v53 = vpop.permute.xlu0 %3321  ;;  %v762_v20 = vmul.f32 %v4546_v6, %v6029_v47  ;;  %v665_v55 = vadd.f32 %v649_v7, %v552_v52  ;;  %v4562_v47 = vld [vmem:[%s5628_s27 + $0x1a8] sm:$0xff]  ;;  %v549_v52 = vmul.f32 %v5953_v27, %v453_v41  ;;  %v4533_v27 = vld [vmem:[%s5628_s27 + $0xc0] sm:$0xff] }
 0x4c8   : > { %9179 = vst [vmem:[#allocation355_spill] sm:$0xff] %v7137_v35  ;;  %9180 = vst [vmem:[#allocation356_spill] sm:$0xff] %v7139_v53  ;;  %3406 = vperm.xlu1 %5480, %v5761_v57   ;;  %v664_v53 = vadd.f32 %v648_v63, %v551_v11  ;;  %v4559_v63 = vld [vmem:[%s5628_s27 + $0x190] sm:$0xff]  ;;  %v4578_v7 = vld [vmem:[%s5628_s27 + $0x228] sm:$0xff]  ;;  %v875_v61 = vmul.f32 %v4562_v47, %v5979_v34 }
 0x4c9   : > { %v778_v11 = vadd.f32 %v762_v20, %v665_v55  ;;  %v872_v20 = vmul.f32 %v4559_v63, %v5977_v33  ;;  %v988_v10 = vmul.f32 %v4578_v7, %v6037_v49  ;;  %v4547_v34 = vld [vmem:[%s5628_s27 + $0x130] sm:$0xff]  ;;  %v459_v47 = vld [vmem:[%s5628_s27 + $0x40] sm:$0xff] }
 0x4ca   : > { %3664 = vperm.xlu0 %5529, %v5925_v17   ;;  %v777_v6 = vadd.f32 %v761_v45, %v664_v53  ;;  %v4575_v53 = vld [vmem:[%s5628_s27 + $0x210] sm:$0xff] }
 0x4cb   : > { %v7150_v35 = vpop.permute.xlu1 %2990  ;;  %v7152_v1 = vpop.permute.xlu0 %3329  ;;  %v891_v41 = vadd.f32 %v875_v61, %v778_v11  ;;  %v985_v51 = vmul.f32 %v4575_v53, %v5987_v36  ;;  %v4563_v11 = vld [vmem:[%s5628_s27 + $0x1b0] sm:$0xff]  ;;  %v763_v36 = vmul.f32 %v4547_v34, %v6083_v19  ;;  %v555_v53 = vmul.f32 %v6141_v16, %v459_v47  ;;  %v4626_v16 = vld [vmem:[%s5628_s27 + $0x3a8] sm:$0xff]  ;;  %v4565_v34 = vld [vmem:[%s5628_s27 + $0x1c0] sm:$0xff] }
 0x4cc   : > { %9181 = vst [vmem:[#allocation357_spill] sm:$0xff] %v7150_v35  ;;  %9182 = vst [vmem:[#allocation358_spill] sm:$0xff] %v7152_v1  ;;  %3414 = vperm.xlu1 %5480, %v5793_v59   ;;  %v874_v1 = vmul.f32 %v4561_v32, %v6063_v4  ;;  %v457_v35 = vld [vmem:[%s5628_s27 + $0x30] sm:$0xff]  ;;  %v662_v4 = vadd.f32 %v646_v50, %v549_v52  ;;  %v4577_v32 = vld [vmem:[%s5628_s27 + $0x220] sm:$0xff]  ;;  %v1098_v52 = vmul.f32 %v4591_v31, %v5995_v38 }
 0x4cd   : > { %v553_v45 = vmul.f32 %v6073_v30, %v457_v35  ;;  %v4593_v30 = vld [vmem:[%s5628_s27 + $0x2a0] sm:$0xff]  ;;  %v987_v63 = vmul.f32 %v4577_v32, %v6023_v46  ;;  %v1004_v7 = vadd.f32 %v988_v10, %v891_v41  ;;  %v876_v32 = vmul.f32 %v4563_v11, %v6131_v18  ;;  %v461_v41 = vld [vmem:[%s5628_s27 + $0x50] sm:$0xff] }
 0x4ce   : > { %3652 = vperm.xlu0 %5529, %v5803_v60   ;;  %v890_v23 = vadd.f32 %v874_v1, %v777_v6  ;;  %v775_v33 = vadd.f32 %v759_v29, %v662_v4  ;;  %v652_v1 = vmul.f32 %v4533_v27, %v6183_v25  ;;  %v4594_v6 = vld [vmem:[%s5628_s27 + $0x2a8] sm:$0xff]  ;;  %v4607_v29 = vld [vmem:[%s5628_s27 + $0x310] sm:$0xff]  ;;  %v1100_v46 = vmul.f32 %v4593_v30, %v6071_v2 }
 0x4cf   : > { %v7166_v21 = vpop.permute.xlu1 %2998  ;;  %v7168_v43 = vpop.permute.xlu0 %3337  ;;  %v666_v35 = vadd.f32 %v650_v56, %v553_v45  ;;  %v4535_v25 = vld [vmem:[%s5628_s27 + $0xd0] sm:$0xff]  ;;  %v4549_v45 = vld [vmem:[%s5628_s27 + $0x140] sm:$0xff]  ;;  %v1101_v2 = vmul.f32 %v4594_v6, %v5989_v37  ;;  %v1211_v27 = vmul.f32 %v4607_v29, %v6003_v40  ;;  %v4536_v40 = vld [vmem:[%s5628_s27 + $0xd8] sm:$0xff]  ;;  %v1327_v11 = vmul.f32 %v4626_v16, %v5997_v39 }
 0x4d0   : > { %9183 = vst [vmem:[#allocation359_spill] sm:$0xff] %v7166_v21  ;;  %9184 = vst [vmem:[#allocation360_spill] sm:$0xff] %v7168_v43  ;;  %3418 = vperm.xlu1 %5480, %v5775_v58   ;;  %v888_v49 = vadd.f32 %v872_v20, %v775_v33  ;;  %v1003_v56 = vadd.f32 %v987_v63, %v890_v23  ;;  %v4610_v20 = vld [vmem:[%s5628_s27 + $0x328] sm:$0xff]  ;;  %v668_v31 = vadd.f32 %v652_v1, %v555_v53  ;;  %v4609_v23 = vld [vmem:[%s5628_s27 + $0x320] sm:$0xff]  ;;  %v9189_v33 = vmov 31  }
 0x4d1   : > { %v779_v19 = vadd.f32 %v763_v36, %v666_v35  ;;  %v654_v18 = vmul.f32 %v4535_v25, %v6236_v22  ;;  %v1214_v30 = vmul.f32 %v4610_v20, %v6047_v54  ;;  %v4579_v37 = vld [vmem:[%s5628_s27 + $0x230] sm:$0xff]  ;;  %v765_v47 = vmul.f32 %v4549_v45, %v6149_v24  ;;  %v462_v63 = vld [vmem:[%s5628_s27 + $0x58] sm:$0xff]  ;;  %v4625_v1 = vld [vmem:[%s5628_s27 + $0x3a0] sm:$0xff] }
 0x4d2   : > { %3640 = vperm.xlu0 %5529, %v5793_v59   ;;  %v1001_v38 = vadd.f32 %v985_v51, %v888_v49  ;;  %v1117_v51 = vadd.f32 %v1101_v2, %v1004_v7  ;;  %v1116_v35 = vadd.f32 %v1100_v46, %v1003_v56  ;;  %v4623_v22 = vld [vmem:[%s5628_s27 + $0x390] sm:$0xff]  ;;  %v557_v54 = vmul.f32 %v6193_v5, %v461_v41  ;;  %v4552_v56 = vld [vmem:[%s5628_s27 + $0x158] sm:$0xff]  ;;  %v4537_v46 = vld [vmem:[%s5628_s27 + $0xe0] sm:$0xff] }
 0x4d3   : > { %v7185_v55 = vpop.permute.xlu1 %3006  ;;  %v7187_v50 = vpop.permute.xlu0 %3345  ;;  %v892_v49 = vadd.f32 %v876_v32, %v779_v19  ;;  %v1213_v29 = vmul.f32 %v4609_v23, %v6031_v48  ;;  %v781_v36 = vadd.f32 %v765_v47, %v668_v31  ;;  %v878_v39 = vmul.f32 %v4565_v34, %v6190_v13  ;;  %v4551_v7 = vld [vmem:[%s5628_s27 + $0x150] sm:$0xff]  ;;  %v4538_v20 = vld [vmem:[%s5628_s27 + $0xe8] sm:$0xff]  ;;  %v4581_v34 = vld [vmem:[%s5628_s27 + $0x240] sm:$0xff] }
 0x4d4   : > { %9185 = vst [vmem:[#allocation361_spill] sm:$0xff] %v7185_v55  ;;  %9186 = vst [vmem:[#allocation362_spill] sm:$0xff] %v7187_v50  ;;  %3426 = vperm.xlu1 %5480, %v5803_v60   ;;  %v1114_v10 = vadd.f32 %v1098_v52, %v1001_v38  ;;  %v989_v5 = vmul.f32 %v4579_v37, %v6091_v15  ;;  %v4595_v53 = vld [vmem:[%s5628_s27 + $0x2b0] sm:$0xff]  ;;  %v655_v25 = vmul.f32 %v4536_v40, %v6171_v9  ;;  %v464_v32 = vld [vmem:[%s5628_s27 + $0x68] sm:$0xff] }
 0x4d5   : > { %v558_v38 = vmul.f32 %v6210_v3, %v462_v63  ;;  %v670_v19 = vadd.f32 %v654_v18, %v557_v54  ;;  %v1324_v48 = vmul.f32 %v4623_v22, %v6011_v42  ;;  %v1230_v45 = vadd.f32 %v1214_v30, %v1117_v51  ;;  %v4567_v16 = vld [vmem:[%s5628_s27 + $0x1d0] sm:$0xff]  ;;  %v4554_v31 = vld [vmem:[%s5628_s27 + $0x168] sm:$0xff]  ;;  %v9196_v37 = vld [vmem:[#allocation71_spill] sm:$0xff] }
 0x4d6   : > { %3632 = vperm.xlu0 %5529, %v5761_v57   ;;  %v1227_v52 = vadd.f32 %v1211_v27, %v1114_v10  ;;  %v1229_v13 = vadd.f32 %v1213_v29, %v1116_v35  ;;  %v1326_v2 = vmul.f32 %v4625_v1, %v6081_v0  ;;  %v463_v27 = vld [vmem:[%s5628_s27 + $0x60] sm:$0xff]  ;;  %v1005_v15 = vadd.f32 %v989_v5, %v892_v49  ;;  %v9194_v18 = vld [vmem:[#allocation65_spill] sm:$0xff]  ;;  %v9197_v40 = vld [vmem:[#allocation70_spill] sm:$0xff] }
 0x4d7   : > { %v7204_v61 = vpop.permute.xlu1 %3014  ;;  %v7206_v4 = vpop.permute.xlu0 %3353  ;;  %v767_v9 = vmul.f32 %v4551_v7, %v6200_v12  ;;  %v768_v3 = vmul.f32 %v4552_v56, %v6217_v14  ;;  %v656_v41 = vmul.f32 %v4537_v46, %v6287_v26  ;;  %v9193_v10 = vld [vmem:[#allocation51_spill] sm:$0xff]  ;;  %v657_v51 = vmul.f32 %v4538_v20, %v9194_v18  ;;  %v9195_v12 = vld [vmem:[#allocation77_spill] sm:$0xff]  ;;  %v4568_v26 = vld [vmem:[%s5628_s27 + $0x1d8] sm:$0xff] }
 0x4d8   : > { %9187 = vst [vmem:[#allocation363_spill] sm:$0xff] %v7204_v61  ;;  %9188 = vst [vmem:[#allocation364_spill] sm:$0xff] %v7206_v4  ;;  %3434 = vperm.xlu1 %5480, %v5839_v62   ;;  %v1102_v23 = vmul.f32 %v4595_v53, %v9193_v10  ;;  %v560_v14 = vmul.f32 %v9195_v12, %v464_v32  ;;  %v4611_v30 = vld [vmem:[%s5628_s27 + $0x330] sm:$0xff]  ;;  %v671_v35 = vadd.f32 %v655_v25, %v558_v38  ;;  %v4597_v1 = vld [vmem:[%s5628_s27 + $0x2c0] sm:$0xff] }
 0x4d9   : > { %v880_v47 = vmul.f32 %v4567_v16, %v9196_v37  ;;  %v559_v63 = vmul.f32 %v9197_v40, %v463_v27  ;;  %v7268_v22 = vadd.f32 %v1324_v48, %v1227_v52  ;;  %v4553_v49 = vld [vmem:[%s5628_s27 + $0x160] sm:$0xff]  ;;  %v9199_v7 = vld [vmem:[#allocation54_spill] sm:$0xff]  ;;  %v4583_v46 = vld [vmem:[%s5628_s27 + $0x250] sm:$0xff] }
 0x4da   : > { %5532 = vset.pattern.permute.xlu0 %v9189_v33  ;;  %v9198_v54 = vld [vmem:[#allocation79_spill] sm:$0xff]  ;;  %v991_v56 = vmul.f32 %v4581_v34, %v9199_v7  ;;  %v784_v5 = vadd.f32 %v768_v3, %v671_v35  ;;  %v4540_v52 = vld [vmem:[%s5628_s27 + $0xf8] sm:$0xff]  ;;  %v4534_v16 = vld [vmem:[%s5628_s27 + $0xc8] sm:$0xff] }
 0x4db   : > { %4015 = vperm.xlu0 %5532, %v5959_v28   ;;  %v770_v29 = vmul.f32 %v4554_v31, %v9198_v54  ;;  %v672_v53 = vadd.f32 %v656_v41, %v559_v63  ;;  %v466_v25 = vld [vmem:[%s5628_s27 + $0x78] sm:$0xff]  ;;  %v9201_v32 = vld [vmem:[#allocation59_spill] sm:$0xff]  ;;  %v4570_v31 = vld [vmem:[%s5628_s27 + $0x1e8] sm:$0xff] }
 0x4dc   : > { %3442 = vperm.xlu1 %5480, %v5891_v8   ;;  %v7231_v24 = vpop.permute.xlu1 %3071  ;;  %v7233_v6 = vpop.permute.xlu0 %3410  ;;  %v881_v48 = vmul.f32 %v4568_v26, %v9201_v32  ;;  %v9203_v10 = vld [vmem:[#allocation72_spill] sm:$0xff]  ;;  %v4556_v18 = vld [vmem:[%s5628_s27 + $0x178] sm:$0xff]  ;;  %v4627_v12 = vld [vmem:[%s5628_s27 + $0x3b0] sm:$0xff] }
 0x4dd   : > { %9190 = vst [vmem:[#allocation365_spill] sm:$0xff] %v7231_v24  ;;  %9191 = vst [vmem:[#allocation366_spill] sm:$0xff] %v7233_v6  ;;  %v769_v34 = vmul.f32 %v4553_v49, %v9203_v10  ;;  %v9204_v35 = vld [vmem:[#allocation63_spill] sm:$0xff]  ;;  %v9205_v26 = vld [vmem:[#allocation78_spill] sm:$0xff] }
 0x4de   : > { %v9207_v40 = vld [vmem:[#allocation66_spill] sm:$0xff]  ;;  %v4539_v54 = vld [vmem:[%s5628_s27 + $0xf0] sm:$0xff]  ;;  %v9209_v7 = vld [vmem:[#allocation44_spill] sm:$0xff] }
 0x4df   : > { %4003 = vperm.xlu0 %5532, %v5925_v17   ;;  %v894_v17 = vadd.f32 %v878_v39, %v781_v36  ;;  %v7273_v36 = vadd.f32 %v1327_v11, %v1230_v45  ;;  %v7276_v39 = vadd.f32 %v1326_v2, %v1229_v13  ;;  %v4584_v45 = vld [vmem:[%s5628_s27 + $0x258] sm:$0xff]  ;;  %v673_v13 = vadd.f32 %v657_v51, %v560_v14  ;;  %v4569_v2 = vld [vmem:[%s5628_s27 + $0x1e0] sm:$0xff] }
 0x4e0   : > { %3450 = vperm.xlu1 %5480, %v5959_v28   ;;  %v7256_v42 = vpop.permute.xlu1 %3075  ;;  %v7258_v0 = vpop.permute.xlu0 %3422  ;;  %v783_v28 = vadd.f32 %v767_v9, %v670_v19  ;;  %v1118_v19 = vadd.f32 %v1102_v23, %v1005_v15  ;;  %v9202_v9 = vld [vmem:[#allocation61_spill] sm:$0xff]  ;;  %v659_v51 = vmul.f32 %v4540_v52, %v9205_v26  ;;  %v9206_v14 = vld [vmem:[#allocation90_spill] sm:$0xff]  ;;  %v785_v63 = vadd.f32 %v769_v34, %v672_v53  ;;  %v9211_v32 = vld [vmem:[#allocation67_spill] sm:$0xff] }
 0x4e1   : > { %9192 = vst [vmem:[#allocation367_spill] sm:$0xff] %v7256_v42  ;;  %v1007_v27 = vadd.f32 %v991_v56, %v894_v17  ;;  %v1104_v3 = vmul.f32 %v4597_v1, %v9202_v9  ;;  %v4599_v15 = vld [vmem:[%s5628_s27 + $0x2d0] sm:$0xff]  ;;  %v786_v23 = vadd.f32 %v770_v29, %v673_v13  ;;  %v562_v37 = vmul.f32 %v9206_v14, %v466_v25  ;;  %v9208_v1 = vld [vmem:[#allocation86_spill] sm:$0xff]  ;;  %v460_v25 = vld [vmem:[%s5628_s27 + $0x48] sm:$0xff] }
 0x4e2   : > { %v896_v41 = vadd.f32 %v880_v47, %v783_v28  ;;  %v897_v17 = vadd.f32 %v881_v48, %v784_v5  ;;  %v994_v28 = vmul.f32 %v4584_v45, %v9207_v40  ;;  %v4586_v47 = vld [vmem:[%s5628_s27 + $0x268] sm:$0xff]  ;;  %v882_v49 = vmul.f32 %v4569_v2, %v9208_v1  ;;  %v9212_v48 = vld [vmem:[#allocation93_spill] sm:$0xff]  ;;  %v4600_v10 = vld [vmem:[%s5628_s27 + $0x2d8] sm:$0xff] }
 0x4e3   : > { %3991 = vperm.xlu0 %5532, %v5803_v60   ;;  %v9200_v60 = vld [vmem:[#allocation43_spill] sm:$0xff]  ;;  %v883_v53 = vmul.f32 %v4570_v31, %v9211_v32  ;;  %v772_v45 = vmul.f32 %v4556_v18, %v9212_v48  ;;  %v9213_v13 = vld [vmem:[#allocation52_spill] sm:$0xff]  ;;  %v1120_v34 = vadd.f32 %v1104_v3, %v1007_v27  ;;  %v9214_v26 = vld [vmem:[#allocation73_spill] sm:$0xff]  ;;  %v675_v31 = vadd.f32 %v659_v51, %v562_v37 }
 0x4e4   : > { %3458 = vperm.xlu1 %5480, %v6019_v44   ;;  %v7283_v11 = vpop.permute.xlu1 %3083  ;;  %v7285_v38 = vpop.permute.xlu0 %3430  ;;  %v1215_v20 = vmul.f32 %v4611_v30, %v9200_v60  ;;  %v993_v30 = vmul.f32 %v4583_v46, %v9204_v35  ;;  %v9210_v46 = vld [vmem:[#allocation46_spill] sm:$0xff]  ;;  %v4613_v60 = vld [vmem:[%s5628_s27 + $0x340] sm:$0xff]  ;;  %v1328_v2 = vmul.f32 %v4627_v12, %v9213_v13  ;;  %v4550_v9 = vld [vmem:[%s5628_s27 + $0x148] sm:$0xff]  ;;  %v1106_v14 = vmul.f32 %v4599_v15, %v9214_v26 }
 0x4e5   : > { %v7312_v5 = vmul.f32 %v4534_v16, %v9210_v46  ;;  %v465_v40 = vld [vmem:[%s5628_s27 + $0x70] sm:$0xff]  ;;  %v4629_v16 = vld [vmem:[%s5628_s27 + $0x3c0] sm:$0xff]  ;;  %v9218_v13 = vld [vmem:[#allocation56_spill] sm:$0xff]  ;;  %v898_v15 = vadd.f32 %v882_v49, %v785_v63  ;;  %v9219_v26 = vmov 27  }
 0x4e6   : > { %v1231_v52 = vadd.f32 %v1215_v20, %v1118_v19  ;;  %v1009_v35 = vadd.f32 %v993_v30, %v896_v41  ;;  %v4585_v1 = vld [vmem:[%s5628_s27 + $0x260] sm:$0xff]  ;;  %v899_v20 = vadd.f32 %v883_v53, %v786_v23  ;;  %v9215_v19 = vld [vmem:[#allocation81_spill] sm:$0xff]  ;;  %v1217_v27 = vmul.f32 %v4613_v60, %v9218_v13  ;;  %v4572_v30 = vld [vmem:[%s5628_s27 + $0x1f8] sm:$0xff] }
 0x4e7   : > { %3983 = vperm.xlu0 %5532, %v5775_v58   ;;  %v996_v46 = vmul.f32 %v4586_v47, %v9215_v19  ;;  %v9216_v32 = vld [vmem:[#allocation99_spill] sm:$0xff]  ;;  %v9217_v12 = vld [vmem:[#allocation53_spill] sm:$0xff]  ;;  %v1010_v41 = vadd.f32 %v994_v28, %v897_v17  ;;  %v4616_v53 = vld [vmem:[%s5628_s27 + $0x358] sm:$0xff]  ;;  %v788_v17 = vadd.f32 %v772_v45, %v675_v31 }
 0x4e8   : > { %3462 = vperm.xlu1 %5480, %v9209_v7   ;;  %v7307_v29 = vpop.permute.xlu1 %3091  ;;  %v7309_v56 = vpop.permute.xlu0 %3438  ;;  %v658_v18 = vmul.f32 %v4539_v54, %v9216_v32  ;;  %v556_v48 = vmul.f32 %v9217_v12, %v460_v25  ;;  %v4615_v3 = vld [vmem:[%s5628_s27 + $0x350] sm:$0xff]  ;;  %v9220_v37 = vld [vmem:[#allocation55_spill] sm:$0xff]  ;;  %v9221_v54 = vld [vmem:[#allocation60_spill] sm:$0xff]  ;;  %v1233_v28 = vadd.f32 %v1217_v27, %v1120_v34  ;;  %v1122_v13 = vadd.f32 %v1106_v14, %v1009_v35 }
 0x4e9   : > { %v766_v47 = vmul.f32 %v4550_v9, %v9220_v37  ;;  %v1107_v25 = vmul.f32 %v4600_v10, %v9221_v54  ;;  %v9222_v60 = vld [vmem:[#allocation84_spill] sm:$0xff]  ;;  %v4601_v32 = vld [vmem:[%s5628_s27 + $0x2e0] sm:$0xff]  ;;  %v9223_v63 = vld [vmem:[#allocation62_spill] sm:$0xff]  ;;  %v1012_v57 = vadd.f32 %v996_v46, %v899_v20 }
 0x4ea   : > { %v561_v19 = vmul.f32 %v9222_v60, %v465_v40  ;;  %v1330_v49 = vmul.f32 %v4629_v16, %v9223_v63  ;;  %v4602_v12 = vld [vmem:[%s5628_s27 + $0x2e8] sm:$0xff]  ;;  %v9224_v6 = vld [vmem:[#allocation74_spill] sm:$0xff]  ;;  %v4631_v54 = vld [vmem:[%s5628_s27 + $0x3d0] sm:$0xff] }
 0x4eb   : > { %3979 = vperm.xlu0 %5532, %v5793_v59   ;;  %v995_v24 = vmul.f32 %v4585_v1, %v9224_v6  ;;  %v4555_v59 = vld [vmem:[%s5628_s27 + $0x170] sm:$0xff]  ;;  %v4588_v9 = vld [vmem:[%s5628_s27 + $0x278] sm:$0xff]  ;;  %v9225_v37 = vld [vmem:[#allocation64_spill] sm:$0xff]  ;;  %v1123_v58 = vadd.f32 %v1107_v25, %v1010_v41 }
 0x4ec   : > { %5482 = vset.pattern.permute.xlu1 %v9219_v26  ;;  %v7333_v23 = vpop.permute.xlu1 %3099  ;;  %v7335_v51 = vpop.permute.xlu0 %3446  ;;  %v1219_v10 = vmul.f32 %v4615_v3, %v9225_v37  ;;  %v9226_v40 = vld [vmem:[#allocation80_spill] sm:$0xff]  ;;  %v674_v45 = vadd.f32 %v658_v18, %v561_v19  ;;  %v9227_v31 = vld [vmem:[#allocation3_spill] sm:$0xff]  ;;  %v4571_v1 = vld [vmem:[%s5628_s27 + $0x1f0] sm:$0xff]  ;;  %v9233_v19 = vmov 28  }
 0x4ed   : > { %3575 = vperm.xlu1 %5482, %v9209_v7   ;;  %v885_v60 = vmul.f32 %v4572_v30, %v9226_v40  ;;  %v9228_v34 = vld [vmem:[#allocation68_spill] sm:$0xff]  ;;  %v1011_v35 = vadd.f32 %v995_v24, %v898_v15  ;;  %v9230_v20 = vld [vmem:[#allocation69_spill] sm:$0xff]  ;;  %v9232_v25 = vld [vmem:[#allocation95_spill] sm:$0xff]  ;;  %v1344_v24 = vadd.f32 %v1328_v2, %v1231_v52  ;;  %v669_v15 = vadd.f32 %v7312_v5, %v556_v48 }
 0x4ee   : > { %v1220_v27 = vmul.f32 %v4616_v53, %v9228_v34  ;;  %v4618_v16 = vld [vmem:[%s5628_s27 + $0x368] sm:$0xff]  ;;  %v1109_v46 = vmul.f32 %v4602_v12, %v9230_v20  ;;  %v9231_v18 = vld [vmem:[#allocation85_spill] sm:$0xff]  ;;  %v998_v53 = vmul.f32 %v4588_v9, %v9232_v25  ;;  %v9234_v37 = vld [vmem:[#allocation75_spill] sm:$0xff] }
 0x4ef   : > { %3975 = vperm.xlu0 %5532, %v9227_v31   ;;  %v9229_v14 = vld [vmem:[#allocation88_spill] sm:$0xff]  ;;  %v771_v41 = vmul.f32 %v4555_v59, %v9231_v18  ;;  %v901_v30 = vadd.f32 %v885_v60, %v788_v17  ;;  %v1332_v40 = vmul.f32 %v4631_v54, %v9234_v37  ;;  %v4617_v34 = vld [vmem:[%s5628_s27 + $0x360] sm:$0xff]  ;;  %v4643_v18 = vld [vmem:[%s5628_s27 + $0x430] sm:$0xff]  ;;  %v7375_v48 = vadd.f32 %v766_v47, %v669_v15 }
 0x4f0   : > { %v1108_v6 = vmul.f32 %v4601_v32, %v9229_v14  ;;  %v7356_v63 = vpop.permute.xlu1 %3107  ;;  %v7358_v3 = vpop.permute.xlu0 %3454  ;;  %v1235_v32 = vadd.f32 %v1219_v10, %v1122_v13  ;;  %v4632_v14 = vld [vmem:[%s5628_s27 + $0x3d8] sm:$0xff]  ;;  %v4634_v12 = vld [vmem:[%s5628_s27 + $0x3e8] sm:$0xff]  ;;  %v1125_v59 = vadd.f32 %v1109_v46, %v1012_v57  ;;  %v9236_v17 = vld [vmem:[#allocation83_spill] sm:$0xff]  ;;  %v1346_v13 = vadd.f32 %v1330_v49, %v1233_v28 }
 0x4f1   : > { %5483 = vset.pattern.permute.xlu1 %v9233_v19  ;;  %v9235_v20 = vld [vmem:[#allocation40_spill] sm:$0xff]  ;;  %v1222_v9 = vmul.f32 %v4618_v16, %v9236_v17  ;;  %v4641_v60 = vld [vmem:[%s5628_s27 + $0x420] sm:$0xff]  ;;  %v787_v25 = vadd.f32 %v771_v41, %v674_v45  ;;  %v9237_v52 = vld [vmem:[#allocation101_spill] sm:$0xff]  ;;  %9238 = vst [vmem:[#allocation51_spill] sm:$0xff] %v7375_v48  ;;  %v1236_v10 = vadd.f32 %v1220_v27, %v1123_v58 }
 0x4f2   : > { %3692 = vperm.xlu1 %5483, %v9235_v20   ;;  %v884_v5 = vmul.f32 %v4571_v1, %v9237_v52  ;;  %v4645_v2 = vld [vmem:[%s5628_s27 + $0x440] sm:$0xff]  ;;  %v4604_v54 = vld [vmem:[%s5628_s27 + $0x2f8] sm:$0xff]  ;;  %v1124_v37 = vadd.f32 %v1108_v6, %v1011_v35  ;;  %v9240_v16 = vld [vmem:[#allocation76_spill] sm:$0xff]  ;;  %v1014_v47 = vadd.f32 %v998_v53, %v901_v30  ;;  %v1348_v49 = vadd.f32 %v1332_v40, %v1235_v32 }
 0x4f3   : > { %v4633_v31 = vld [vmem:[%s5628_s27 + $0x3e0] sm:$0xff]  ;;  %v1221_v45 = vmul.f32 %v4617_v34, %v9240_v16  ;;  %v4587_v41 = vld [vmem:[%s5628_s27 + $0x270] sm:$0xff]  ;;  %v9242_v52 = vld [vmem:[#allocation92_spill] sm:$0xff]  ;;  %v1238_v34 = vadd.f32 %v1222_v9, %v1125_v59 }
 0x4f4   : > { %v7379_v57 = vpop.permute.xlu1 %3115  ;;  %v7381_v46 = vpop.permute.xlu0 %3466  ;;  %v9241_v17 = vld [vmem:[#allocation91_spill] sm:$0xff]  ;;  %v1335_v4 = vmul.f32 %v4634_v12, %v9242_v52  ;;  %v4642_v58 = vld [vmem:[%s5628_s27 + $0x428] sm:$0xff]  ;;  %v4648_v28 = vld [vmem:[%s5628_s27 + $0x458] sm:$0xff]  ;;  %v900_v53 = vadd.f32 %v884_v5, %v787_v25 }
 0x4f5   : > { %9239 = vst [vmem:[#allocation65_spill] sm:$0xff] %v7381_v46  ;;  %v1333_v1 = vmul.f32 %v4632_v14, %v9241_v17  ;;  %v9243_v27 = vld [vmem:[#allocation98_spill] sm:$0xff]  ;;  %v9244_v6 = vld [vmem:[#allocation100_spill] sm:$0xff]  ;;  %v4657_v50 = vld [vmem:[%s5628_s27 + $0x4a0] sm:$0xff] }
 0x4f6   : > { %v1439_v35 = vmul.f32 %v4641_v60, %v9243_v27  ;;  %v1441_v15 = vmul.f32 %v4643_v18, %v9244_v6  ;;  %v9245_v61 = vld [vmem:[#allocation102_spill] sm:$0xff]  ;;  %3688 = vperm.xlu1 %5483, %v9209_v7   ;;  %v9248_v32 = vld [vmem:[#allocation87_spill] sm:$0xff]  ;;  %v4647_v60 = vld [vmem:[%s5628_s27 + $0x450] sm:$0xff]  ;;  %v1237_v18 = vadd.f32 %v1221_v45, %v1124_v37 }
 0x4f7   : > { %v1443_v46 = vmul.f32 %v4645_v2, %v9245_v61  ;;  %v9246_v14 = vld [vmem:[#allocation82_spill] sm:$0xff]  ;;  %v997_v40 = vmul.f32 %v4587_v41, %v9248_v32  ;;  %v4603_v52 = vld [vmem:[%s5628_s27 + $0x2f0] sm:$0xff]  ;;  %v9249_v27 = vld [vmem:[#allocation116_spill] sm:$0xff]  ;;  %v1349_v9 = vadd.f32 %v1333_v1, %v1236_v10 }
 0x4f8   : > { %v1111_v12 = vmul.f32 %v4604_v54, %v9246_v14  ;;  %v4620_v30 = vld [vmem:[%s5628_s27 + $0x378] sm:$0xff]  ;;  %v1440_v61 = vmul.f32 %v4642_v58, %v9249_v27  ;;  %v7402_v59 = vpop.permute.xlu1 %3123  ;;  %v1351_v54 = vadd.f32 %v1335_v4, %v1238_v34  ;;  %v4649_v25 = vld [vmem:[%s5628_s27 + $0x460] sm:$0xff]  ;;  %v4658_v5 = vld [vmem:[%s5628_s27 + $0x4a8] sm:$0xff] }
 0x4f9   : > { %v9247_v16 = vld [vmem:[#allocation106_spill] sm:$0xff]  ;;  %9251 = vst [vmem:[#allocation77_spill] sm:$0xff] %v7402_v59  ;;  %v9252_v41 = vld [vmem:[#allocation132_spill] sm:$0xff]  ;;  %v7410_v45 = vpop.permute.xlu0 %4027  ;;  %v9254_v58 = vld [vmem:[#allocation97_spill] sm:$0xff]  ;;  %v1459_v10 = vadd.f32 %v1443_v46, %v1346_v13 }
 0x4fa   : > { %v1334_v17 = vmul.f32 %v4633_v31, %v9247_v16  ;;  %v9250_v2 = vld [vmem:[#allocation122_spill] sm:$0xff]  ;;  %v7404_v6 = vadd.f32 %v1111_v12, %v1014_v47  ;;  %v4639_v31 = vld [vmem:[%s5628_s27 + $0x410] sm:$0xff]  ;;  %v1552_v37 = vmul.f32 %v4657_v50, %v9252_v41  ;;  %9253 = vst [vmem:[#allocation71_spill] sm:$0xff] %v7410_v45  ;;  %v7413_v14 = vmul.f32 %v4620_v30, %v9254_v58  ;;  %v4650_v1 = vld [vmem:[%s5628_s27 + $0x468] sm:$0xff] }
 0x4fb   : > { %v1446_v7 = vmul.f32 %v4648_v28, %v9250_v2  ;;  %v1455_v28 = vadd.f32 %v1439_v35, %v7276_v39  ;;  %v1457_v16 = vadd.f32 %v1441_v15, %v1344_v24  ;;  %v4664_v4 = vld [vmem:[%s5628_s27 + $0x4d8] sm:$0xff]  ;;  %v4659_v47 = vld [vmem:[%s5628_s27 + $0x4b0] sm:$0xff]  ;;  %5484 = vset.pattern.permute.xlu1 %v9219_v26  ;;  %v9255_v34 = vld [vmem:[#allocation103_spill] sm:$0xff]  ;;  %v7421_v12 = vadd.f32 %v997_v40, %v900_v53 }
 0x4fc   : > { %v1445_v50 = vmul.f32 %v4647_v60, %v9255_v34  ;;  %v9256_v32 = vld [vmem:[#allocation104_spill] sm:$0xff]  ;;  %v1350_v30 = vadd.f32 %v1334_v17, %v1237_v18  ;;  %v4661_v2 = vld [vmem:[%s5628_s27 + $0x4c0] sm:$0xff]  ;;  %v4663_v39 = vld [vmem:[%s5628_s27 + $0x4d0] sm:$0xff]  ;;  %v1456_v58 = vadd.f32 %v1440_v61, %v7273_v36 }
 0x4fd   : > { %v7424_v27 = vmul.f32 %v4603_v52, %v9256_v32  ;;  %v4665_v24 = vld [vmem:[%s5628_s27 + $0x4e0] sm:$0xff]  ;;  %v9257_v13 = vld [vmem:[#allocation36_spill] sm:$0xff]  ;;  %v9258_v46 = vld [vmem:[#allocation105_spill] sm:$0xff]  ;;  %v1462_v45 = vadd.f32 %v1446_v7, %v1349_v9  ;;  %v1568_v32 = vadd.f32 %v1552_v37, %v1455_v28  ;;  %v7439_v48 = vpop.permute.xlu1 %3180 }
 0x4fe   : > { %3567 = vperm.xlu1 %5484, %v9257_v13   ;;  %v1447_v35 = vmul.f32 %v4649_v25, %v9258_v46  ;;  %v9259_v15 = vld [vmem:[#allocation112_spill] sm:$0xff]  ;;  %v4673_v60 = vld [vmem:[%s5628_s27 + $0x520] sm:$0xff]  ;;  %v9260_v40 = vld [vmem:[#allocation113_spill] sm:$0xff]  ;;  %9263 = vst [vmem:[#allocation70_spill] sm:$0xff] %v7439_v48 }
 0x4ff   : > { %v1437_v41 = vmul.f32 %v4639_v31, %v9259_v15  ;;  %v4689_v53 = vld [vmem:[%s5628_s27 + $0x5a0] sm:$0xff]  ;;  %v1553_v52 = vmul.f32 %v4658_v5, %v9260_v40  ;;  %v4666_v17 = vld [vmem:[%s5628_s27 + $0x4e8] sm:$0xff]  ;;  %v9262_v59 = vld [vmem:[#allocation134_spill] sm:$0xff]  ;;  %v7446_v40 = vpop.permute.xlu0 %3579 }
 0x500   : > { %v9261_v18 = vld [vmem:[#allocation124_spill] sm:$0xff]  ;;  %v1554_v43 = vmul.f32 %v4659_v47, %v9262_v59  ;;  %v9264_v25 = vld [vmem:[#allocation119_spill] sm:$0xff]  ;;  %v4675_v36 = vld [vmem:[%s5628_s27 + $0x530] sm:$0xff]  ;;  %9268 = vst [vmem:[#allocation79_spill] sm:$0xff] %v7446_v40 }
 0x501   : > { %v1448_v34 = vmul.f32 %v4650_v1, %v9261_v18  ;;  %v1559_v31 = vmul.f32 %v4664_v4, %v9264_v25  ;;  %v9265_v61 = vld [vmem:[#allocation136_spill] sm:$0xff]  ;;  %v9266_v9 = vld [vmem:[#allocation138_spill] sm:$0xff]  ;;  %v1461_v1 = vadd.f32 %v1445_v50, %v1348_v49  ;;  %v9269_v37 = vld [vmem:[#allocation127_spill] sm:$0xff]  ;;  %v1463_v18 = vadd.f32 %v1447_v35, %v1350_v30 }
 0x502   : > { %v1556_v7 = vmul.f32 %v4661_v2, %v9265_v61  ;;  %v1558_v46 = vmul.f32 %v4663_v39, %v9266_v9  ;;  %v9267_v15 = vld [vmem:[#allocation140_spill] sm:$0xff]  ;;  %v1665_v28 = vmul.f32 %v4673_v60, %v9269_v37  ;;  %v4655_v59 = vld [vmem:[%s5628_s27 + $0x490] sm:$0xff]  ;;  %v4677_v47 = vld [vmem:[%s5628_s27 + $0x540] sm:$0xff]  ;;  %5485 = vset.pattern.permute.xlu1 %v9233_v19  ;;  %v1453_v2 = vadd.f32 %v1437_v41, %v7268_v22  ;;  %v7463_v41 = vpop.permute.xlu1 %3188 }
 0x503   : > { %v1560_v5 = vmul.f32 %v4665_v24, %v9267_v15  ;;  %v9270_v4 = vld [vmem:[#allocation166_spill] sm:$0xff]  ;;  %v9271_v39 = vld [vmem:[#allocation121_spill] sm:$0xff]  ;;  %v4681_v9 = vld [vmem:[%s5628_s27 + $0x560] sm:$0xff]  ;;  %v1569_v15 = vadd.f32 %v1553_v52, %v1456_v58  ;;  %v1575_v49 = vadd.f32 %v1559_v31, %v1462_v45  ;;  %3684 = vperm.xlu1 %5485, %v6019_v44   ;;  %v1464_v60 = vadd.f32 %v1448_v34, %v1351_v54  ;;  %v7468_v34 = vpop.permute.xlu0 %3571 }
 0x504   : > { %v1778_v25 = vmul.f32 %v4689_v53, %v9270_v4  ;;  %v1561_v61 = vmul.f32 %v4666_v17, %v9271_v39  ;;  %v4679_v24 = vld [vmem:[%s5628_s27 + $0x550] sm:$0xff]  ;;  %v1570_v37 = vadd.f32 %v1554_v43, %v1457_v16  ;;  %v4674_v53 = vld [vmem:[%s5628_s27 + $0x528] sm:$0xff]  ;;  %v4680_v4 = vld [vmem:[%s5628_s27 + $0x558] sm:$0xff]  ;;  %v1681_v22 = vadd.f32 %v1665_v28, %v1568_v32  ;;  %9273 = vst [vmem:[#allocation54_spill] sm:$0xff] %v7463_v41 }
 0x505   : > { %v4691_v50 = vld [vmem:[%s5628_s27 + $0x5b0] sm:$0xff]  ;;  %v4682_v48 = vld [vmem:[%s5628_s27 + $0x568] sm:$0xff]  ;;  %v9274_v17 = vld [vmem:[#allocation130_spill] sm:$0xff]  ;;  %v1572_v58 = vadd.f32 %v1556_v7, %v1459_v10  ;;  %v1574_v45 = vadd.f32 %v1558_v46, %v1461_v1  ;;  %v1576_v52 = vadd.f32 %v1560_v5, %v1463_v18  ;;  %9275 = vst [vmem:[#allocation43_spill] sm:$0xff] %v7468_v34  ;;  %v9283_v34 = vmov 30  }
 0x506   : > { %v9272_v30 = vld [vmem:[#allocation129_spill] sm:$0xff]  ;;  %v1550_v39 = vmul.f32 %v4655_v59, %v9274_v17  ;;  %v4705_v31 = vld [vmem:[%s5628_s27 + $0x620] sm:$0xff]  ;;  %v1794_v40 = vadd.f32 %v1778_v25, %v1681_v22  ;;  %v9278_v32 = vld [vmem:[#allocation168_spill] sm:$0xff]  ;;  %v1577_v22 = vadd.f32 %v1561_v61, %v1464_v60 }
 0x507   : > { %v1667_v35 = vmul.f32 %v4675_v36, %v9272_v30  ;;  %v4721_v54 = vld [vmem:[%s5628_s27 + $0x6a0] sm:$0xff]  ;;  %v9277_v36 = vld [vmem:[#allocation133_spill] sm:$0xff]  ;;  %v1780_v28 = vmul.f32 %v4691_v50, %v9278_v32  ;;  %v4690_v59 = vld [vmem:[%s5628_s27 + $0x5a8] sm:$0xff]  ;;  %5486 = vset.pattern.permute.xlu1 %v9283_v34 }
 0x508   : > { %v9276_v43 = vld [vmem:[#allocation131_spill] sm:$0xff]  ;;  %v1671_v30 = vmul.f32 %v4679_v24, %v9277_v36  ;;  %v9280_v10 = vld [vmem:[#allocation150_spill] sm:$0xff]  ;;  %v9281_v46 = vld [vmem:[#allocation156_spill] sm:$0xff]  ;;  %3918 = vperm.xlu1 %5486, %v9235_v20  }
 0x509   : > { %v1669_v16 = vmul.f32 %v4677_v47, %v9276_v43  ;;  %v9279_v55 = vld [vmem:[#allocation135_spill] sm:$0xff]  ;;  %v1666_v7 = vmul.f32 %v4674_v53, %v9280_v10  ;;  %v1672_v5 = vmul.f32 %v4680_v4, %v9281_v46  ;;  %v9282_v1 = vld [vmem:[#allocation158_spill] sm:$0xff]  ;;  %v4671_v47 = vld [vmem:[%s5628_s27 + $0x510] sm:$0xff]  ;;  %v7485_v53 = vpop.permute.xlu1 %3192 }
 0x50a   : > { %v1673_v21 = vmul.f32 %v4681_v9, %v9279_v55  ;;  %v1674_v18 = vmul.f32 %v4682_v48, %v9282_v1  ;;  %v4693_v17 = vld [vmem:[%s5628_s27 + $0x5c0] sm:$0xff]  ;;  %v4696_v24 = vld [vmem:[%s5628_s27 + $0x5d8] sm:$0xff]  ;;  %v9284_v25 = vld [vmem:[#allocation157_spill] sm:$0xff]  ;;  %v1683_v55 = vadd.f32 %v1667_v35, %v1570_v37  ;;  %9286 = vst [vmem:[#allocation59_spill] sm:$0xff] %v7485_v53  ;;  %v1566_v48 = vadd.f32 %v1550_v39, %v1453_v2 }
 0x50b   : > { %v1891_v50 = vmul.f32 %v4705_v31, %v9284_v25  ;;  %v9285_v9 = vld [vmem:[#allocation200_spill] sm:$0xff]  ;;  %v4707_v36 = vld [vmem:[%s5628_s27 + $0x630] sm:$0xff]  ;;  %v1685_v32 = vadd.f32 %v1669_v16, %v1572_v58  ;;  %v1687_v10 = vadd.f32 %v1671_v30, %v1574_v45  ;;  %v7490_v31 = vpop.permute.xlu0 %3563  ;;  %v9288_v61 = vld [vmem:[#allocation143_spill] sm:$0xff]  ;;  %v1682_v58 = vadd.f32 %v1666_v7, %v1569_v15 }
 0x50c   : > { %v2004_v43 = vmul.f32 %v4721_v54, %v9285_v9  ;;  %v4698_v4 = vld [vmem:[%s5628_s27 + $0x5e8] sm:$0xff]  ;;  %v1689_v46 = vadd.f32 %v1673_v21, %v1576_v52  ;;  %v4723_v1 = vld [vmem:[%s5628_s27 + $0x6b0] sm:$0xff]  ;;  %9287 = vst [vmem:[#allocation61_spill] sm:$0xff] %v7490_v31  ;;  %v1779_v60 = vmul.f32 %v4690_v59, %v9288_v61  ;;  %v1796_v37 = vadd.f32 %v1780_v28, %v1683_v55  ;;  %v9289_v54 = vld [vmem:[#allocation170_spill] sm:$0xff] }
 0x50d   : > { %v4687_v35 = vld [vmem:[%s5628_s27 + $0x590] sm:$0xff]  ;;  %v1782_v25 = vmul.f32 %v4693_v17, %v9289_v54  ;;  %v4697_v53 = vld [vmem:[%s5628_s27 + $0x5e0] sm:$0xff]  ;;  %v1907_v2 = vadd.f32 %v1891_v50, %v1794_v40  ;;  %v9290_v39 = vld [vmem:[#allocation146_spill] sm:$0xff]  ;;  %v1688_v45 = vadd.f32 %v1672_v5, %v1575_v49  ;;  %v1690_v16 = vadd.f32 %v1674_v18, %v1577_v22  ;;  %5487 = vset.pattern.permute.xlu1 %v9233_v19  ;;  %v7504_v40 = vpop.permute.xlu1 %3200 }
 0x50e   : > { %v4695_v9 = vld [vmem:[%s5628_s27 + $0x5d0] sm:$0xff]  ;;  %v1663_v62 = vmul.f32 %v4671_v47, %v9290_v39  ;;  %v4737_v21 = vld [vmem:[%s5628_s27 + $0x720] sm:$0xff]  ;;  %v9293_v55 = vld [vmem:[#allocation202_spill] sm:$0xff]  ;;  %9294 = vst [vmem:[#allocation72_spill] sm:$0xff] %v7504_v40  ;;  %3680 = vperm.xlu1 %5487, %v9257_v13  }
 0x50f   : > { %v4753_v52 = vld [vmem:[%s5628_s27 + $0x7a0] sm:$0xff]  ;;  %v9291_v30 = vld [vmem:[#allocation149_spill] sm:$0xff]  ;;  %v2020_v28 = vadd.f32 %v2004_v43, %v1907_v2  ;;  %v2006_v17 = vmul.f32 %v4723_v1, %v9293_v55  ;;  %v9296_v7 = vld [vmem:[#allocation164_spill] sm:$0xff]  ;;  %v7513_v43 = vpop.permute.xlu0 %3551  ;;  %v1798_v54 = vadd.f32 %v1782_v25, %v1685_v32  ;;  %v1795_v55 = vadd.f32 %v1779_v60, %v1682_v58 }
 0x510   : > { %v1785_v31 = vmul.f32 %v4696_v24, %v9291_v30  ;;  %v9292_v59 = vld [vmem:[#allocation159_spill] sm:$0xff]  ;;  %v1776_v5 = vmul.f32 %v4687_v35, %v9296_v7  ;;  %v9297_v18 = vld [vmem:[#allocation172_spill] sm:$0xff]  ;;  %v9298_v22 = vld [vmem:[#allocation174_spill] sm:$0xff] }
 0x511   : > { %v1893_v61 = vmul.f32 %v4707_v36, %v9292_v59  ;;  %v9295_v47 = vld [vmem:[#allocation151_spill] sm:$0xff]  ;;  %v1784_v50 = vmul.f32 %v4695_v9, %v9297_v18  ;;  %v1786_v24 = vmul.f32 %v4697_v53, %v9298_v22  ;;  %v4711_v1 = vld [vmem:[%s5628_s27 + $0x650] sm:$0xff]  ;;  %v9300_v30 = vld [vmem:[#allocation234_spill] sm:$0xff]  ;;  %v1679_v59 = vadd.f32 %v1663_v62, %v1566_v48  ;;  %v7530_v60 = vpop.permute.xlu1 %3208 }
 0x512   : > { %v1787_v15 = vmul.f32 %v4698_v4, %v9295_v47  ;;  %v4709_v49 = vld [vmem:[%s5628_s27 + $0x640] sm:$0xff]  ;;  %v2230_v35 = vmul.f32 %v4753_v52, %v9300_v30  ;;  %v4739_v47 = vld [vmem:[%s5628_s27 + $0x730] sm:$0xff]  ;;  %v7520_v53 = vadd.f32 %v1785_v31, %v1688_v45  ;;  %v4706_v25 = vld [vmem:[%s5628_s27 + $0x628] sm:$0xff]  ;;  %9303 = vst [vmem:[#allocation63_spill] sm:$0xff] %v7530_v60 }
 0x513   : > { %v4725_v36 = vld [vmem:[%s5628_s27 + $0x6c0] sm:$0xff]  ;;  %v1909_v39 = vadd.f32 %v1893_v61, %v1796_v37  ;;  %v4755_v18 = vld [vmem:[%s5628_s27 + $0x7b0] sm:$0xff]  ;;  %v1792_v45 = vadd.f32 %v1776_v5, %v1679_v59  ;;  %v1800_v61 = vadd.f32 %v1784_v50, %v1687_v10  ;;  %v7536_v30 = vpop.permute.xlu0 %3539  ;;  %v9310_v5 = vld [vmem:[#allocation180_spill] sm:$0xff] }
 0x514   : > { %v9299_v2 = vld [vmem:[#allocation187_spill] sm:$0xff]  ;;  %v7522_v7 = vadd.f32 %v1787_v15, %v1690_v16  ;;  %v9301_v22 = vld [vmem:[#allocation161_spill] sm:$0xff]  ;;  %v1802_v16 = vadd.f32 %v1786_v24, %v1689_v46  ;;  %9306 = vst [vmem:[#allocation78_spill] sm:$0xff] %v7536_v30  ;;  %v9311_v24 = vld [vmem:[#allocation184_spill] sm:$0xff] }
 0x515   : > { %v2117_v4 = vmul.f32 %v4737_v21, %v9299_v2  ;;  %v4713_v9 = vld [vmem:[%s5628_s27 + $0x660] sm:$0xff]  ;;  %v1895_v40 = vmul.f32 %v4709_v49, %v9301_v22  ;;  %v4703_v32 = vld [vmem:[%s5628_s27 + $0x610] sm:$0xff]  ;;  %v2022_v37 = vadd.f32 %v2006_v17, %v1909_v39  ;;  %v9302_v21 = vld [vmem:[#allocation204_spill] sm:$0xff]  ;;  %v9305_v2 = vmov 29  }
 0x516   : > { %v2008_v52 = vmul.f32 %v4725_v36, %v9302_v21  ;;  %v4727_v62 = vld [vmem:[%s5628_s27 + $0x6d0] sm:$0xff]  ;;  %v9304_v58 = vld [vmem:[#allocation163_spill] sm:$0xff]  ;;  %5488 = vset.pattern.permute.xlu1 %v9305_v2  ;;  %v4722_v17 = vld [vmem:[%s5628_s27 + $0x6a8] sm:$0xff]  ;;  %v1889_v50 = vmul.f32 %v4703_v32, %v9310_v5  ;;  %v1892_v59 = vmul.f32 %v4706_v25, %v9311_v24 }
 0x517   : > { %v2133_v48 = vadd.f32 %v2117_v4, %v2020_v28  ;;  %v1897_v31 = vmul.f32 %v4711_v1, %v9304_v58  ;;  %v4769_v15 = vld [vmem:[%s5628_s27 + $0x820] sm:$0xff]  ;;  %v4728_v36 = vld [vmem:[%s5628_s27 + $0x6d8] sm:$0xff]  ;;  %v9307_v39 = vld [vmem:[#allocation189_spill] sm:$0xff]  ;;  %v1911_v4 = vadd.f32 %v1895_v40, %v1798_v54  ;;  %3797 = vperm.xlu1 %5488, %v6019_v44   ;;  %v7561_v41 = vpop.permute.xlu0 %3527 }
 0x518   : > { %v4785_v49 = vld [vmem:[%s5628_s27 + $0x8a0] sm:$0xff]  ;;  %v2119_v28 = vmul.f32 %v4739_v47, %v9307_v39  ;;  %v9308_v21 = vld [vmem:[#allocation236_spill] sm:$0xff]  ;;  %v9309_v10 = vld [vmem:[#allocation165_spill] sm:$0xff]  ;;  %9318 = vst [vmem:[#allocation66_spill] sm:$0xff] %v7561_v41 }
 0x519   : > { %v2246_v22 = vadd.f32 %v2230_v35, %v2133_v48  ;;  %v2232_v1 = vmul.f32 %v4755_v18, %v9308_v21  ;;  %v1899_v46 = vmul.f32 %v4713_v9, %v9309_v10  ;;  %v4741_v58 = vld [vmem:[%s5628_s27 + $0x740] sm:$0xff]  ;;  %v9312_v60 = vld [vmem:[#allocation206_spill] sm:$0xff]  ;;  %v2024_v40 = vadd.f32 %v2008_v52, %v1911_v4  ;;  %v9313_v35 = vld [vmem:[#allocation217_spill] sm:$0xff]  ;;  %v7552_v21 = vpop.permute.xlu1 %3216 }
 0x51a   : > { %v2010_v30 = vmul.f32 %v4727_v62, %v9312_v60  ;;  %v4757_v47 = vld [vmem:[%s5628_s27 + $0x7c0] sm:$0xff]  ;;  %v2343_v18 = vmul.f32 %v4769_v15, %v9313_v35  ;;  %v2135_v48 = vadd.f32 %v2119_v28, %v2022_v37  ;;  %v9314_v39 = vld [vmem:[#allocation268_spill] sm:$0xff]  ;;  %9315 = vst [vmem:[#allocation90_spill] sm:$0xff] %v7552_v21  ;;  %v9316_v32 = vld [vmem:[#allocation173_spill] sm:$0xff]  ;;  %v1913_v62 = vadd.f32 %v1897_v31, %v1800_v61 }
 0x51b   : > { %v4729_v54 = vld [vmem:[%s5628_s27 + $0x6e0] sm:$0xff]  ;;  %v2456_v9 = vmul.f32 %v4785_v49, %v9314_v39  ;;  %v2005_v10 = vmul.f32 %v4722_v17, %v9316_v32  ;;  %v4730_v24 = vld [vmem:[%s5628_s27 + $0x6e8] sm:$0xff]  ;;  %v1915_v60 = vadd.f32 %v1899_v46, %v1802_v16  ;;  %v4771_v52 = vld [vmem:[%s5628_s27 + $0x830] sm:$0xff]  ;;  %5489 = vset.pattern.permute.xlu1 %v9189_v33  ;;  %v7569_v31 = vadd.f32 %v1889_v50, %v1792_v45 }
 0x51c   : > { %v9317_v25 = vld [vmem:[#allocation179_spill] sm:$0xff]  ;;  %v4787_v4 = vld [vmem:[%s5628_s27 + $0x8b0] sm:$0xff]  ;;  %v4712_v37 = vld [vmem:[%s5628_s27 + $0x658] sm:$0xff]  ;;  %v2248_v35 = vadd.f32 %v2232_v1, %v2135_v48  ;;  %v1908_v61 = vadd.f32 %v1892_v59, %v1795_v55  ;;  %v2026_v16 = vadd.f32 %v2010_v30, %v1913_v62  ;;  %4031 = vperm.xlu1 %5489, %v9235_v20  }
 0x51d   : > { %v7556_v5 = vmul.f32 %v4728_v36, %v9317_v25  ;;  %v9319_v15 = vld [vmem:[#allocation191_spill] sm:$0xff]  ;;  %v4743_v28 = vld [vmem:[%s5628_s27 + $0x750] sm:$0xff]  ;;  %v9320_v39 = vld [vmem:[#allocation238_spill] sm:$0xff]  ;;  %v2359_v36 = vadd.f32 %v2343_v18, %v2246_v22  ;;  %v7578_v50 = vpop.permute.xlu1 %3224 }
 0x51e   : > { %v2121_v49 = vmul.f32 %v4741_v58, %v9319_v15  ;;  %v2234_v17 = vmul.f32 %v4757_v47, %v9320_v39  ;;  %v4759_v32 = vld [vmem:[%s5628_s27 + $0x7d0] sm:$0xff]  ;;  %v9321_v46 = vld [vmem:[#allocation208_spill] sm:$0xff]  ;;  %v4801_v21 = vld [vmem:[%s5628_s27 + $0x920] sm:$0xff]  ;;  %9324 = vst [vmem:[#allocation86_spill] sm:$0xff] %v7578_v50 }
 0x51f   : > { %v2012_v25 = vmul.f32 %v4729_v54, %v9321_v46  ;;  %v4817_v41 = vld [vmem:[%s5628_s27 + $0x9a0] sm:$0xff]  ;;  %v4714_v1 = vld [vmem:[%s5628_s27 + $0x668] sm:$0xff]  ;;  %v2472_v18 = vadd.f32 %v2456_v9, %v2359_v36  ;;  %v9323_v48 = vld [vmem:[#allocation270_spill] sm:$0xff] }
 0x520   : > { %v9322_v58 = vld [vmem:[#allocation219_spill] sm:$0xff]  ;;  %v2137_v22 = vadd.f32 %v2121_v49, %v2024_v40  ;;  %v2458_v45 = vmul.f32 %v4787_v4, %v9323_v48  ;;  %v9325_v55 = vld [vmem:[#allocation181_spill] sm:$0xff]  ;;  %v9326_v59 = vld [vmem:[#allocation190_spill] sm:$0xff]  ;;  %v7592_v48 = vpop.permute.xlu0 %3914  ;;  %5490 = vset.pattern.permute.xlu1 %v9219_v26 }
 0x521   : > { %v2345_v47 = vmul.f32 %v4771_v52, %v9322_v58  ;;  %v7581_v30 = vmul.f32 %v4730_v24, %v9325_v55  ;;  %v1898_v54 = vmul.f32 %v4712_v37, %v9326_v59  ;;  %v9327_v62 = vld [vmem:[#allocation193_spill] sm:$0xff]  ;;  %v4773_v39 = vld [vmem:[%s5628_s27 + $0x840] sm:$0xff]  ;;  %v9328_v20 = vld [vmem:[#allocation240_spill] sm:$0xff]  ;;  %9331 = vst [vmem:[#allocation44_spill] sm:$0xff] %v7592_v48  ;;  %v7595_v59 = vadd.f32 %v2005_v10, %v1908_v61  ;;  %v7605_v10 = vpop.permute.xlu1 %3232 }
 0x522   : > { %v2123_v15 = vmul.f32 %v4743_v28, %v9327_v62  ;;  %v2236_v46 = vmul.f32 %v4759_v32, %v9328_v20  ;;  %v4789_v42 = vld [vmem:[%s5628_s27 + $0x8c0] sm:$0xff]  ;;  %v2250_v9 = vadd.f32 %v2234_v17, %v2137_v22  ;;  %v9330_v24 = vld [vmem:[#allocation302_spill] sm:$0xff]  ;;  %v9332_v37 = vld [vmem:[#allocation192_spill] sm:$0xff]  ;;  %v2028_v28 = vadd.f32 %v2012_v25, %v1915_v60  ;;  %9336 = vst [vmem:[#allocation46_spill] sm:$0xff] %v7605_v10 }
 0x523   : > { %v4745_v40 = vld [vmem:[%s5628_s27 + $0x760] sm:$0xff]  ;;  %v2361_v36 = vadd.f32 %v2345_v47, %v2248_v35  ;;  %v2682_v58 = vmul.f32 %v4817_v41, %v9330_v24  ;;  %v1900_v55 = vmul.f32 %v4714_v1, %v9332_v37  ;;  %v4803_v32 = vld [vmem:[%s5628_s27 + $0x930] sm:$0xff]  ;;  %v9334_v41 = vld [vmem:[#allocation272_spill] sm:$0xff]  ;;  %v1914_v60 = vadd.f32 %v1898_v54, %v7520_v53 }
 0x524   : > { %v4761_v52 = vld [vmem:[%s5628_s27 + $0x7e0] sm:$0xff]  ;;  %v2139_v62 = vadd.f32 %v2123_v15, %v2026_v16  ;;  %v4819_v20 = vld [vmem:[%s5628_s27 + $0x9b0] sm:$0xff]  ;;  %v2460_v22 = vmul.f32 %v4789_v42, %v9334_v41  ;;  %v9335_v1 = vld [vmem:[#allocation34_spill] sm:$0xff]  ;;  %v7615_v10 = vpop.permute.xlu0 %3902 }
 0x525   : > { %v9329_v4 = vld [vmem:[#allocation247_spill] sm:$0xff]  ;;  %v9333_v17 = vld [vmem:[#allocation221_spill] sm:$0xff]  ;;  %v2474_v47 = vadd.f32 %v2458_v45, %v2361_v36  ;;  %3559 = vperm.xlu1 %5490, %v9335_v1   ;;  %v9338_v15 = vld [vmem:[#allocation242_spill] sm:$0xff]  ;;  %9341 = vst [vmem:[#allocation67_spill] sm:$0xff] %v7615_v10  ;;  %v1916_v53 = vadd.f32 %v1900_v55, %v7522_v7  ;;  %v7627_v7 = vpop.permute.xlu1 %3240 }
 0x526   : > { %v2569_v49 = vmul.f32 %v4801_v21, %v9329_v4  ;;  %v2347_v21 = vmul.f32 %v4773_v39, %v9333_v17  ;;  %v4775_v35 = vld [vmem:[%s5628_s27 + $0x850] sm:$0xff]  ;;  %v9337_v61 = vld [vmem:[#allocation195_spill] sm:$0xff]  ;;  %v2252_v25 = vadd.f32 %v2236_v46, %v2139_v62  ;;  %v2238_v39 = vmul.f32 %v4761_v52, %v9338_v15  ;;  %v9340_v41 = vld [vmem:[#allocation304_spill] sm:$0xff]  ;;  %9346 = vst [vmem:[#allocation93_spill] sm:$0xff] %v7627_v7 }
 0x527   : > { %v4791_v4 = vld [vmem:[%s5628_s27 + $0x8d0] sm:$0xff]  ;;  %v2125_v16 = vmul.f32 %v4745_v40, %v9337_v61  ;;  %v4833_v37 = vld [vmem:[%s5628_s27 + $0xa20] sm:$0xff]  ;;  %v2684_v48 = vmul.f32 %v4819_v20, %v9340_v41  ;;  %v9343_v52 = vld [vmem:[#allocation274_spill] sm:$0xff] }
 0x528   : > { %v2585_v24 = vadd.f32 %v2569_v49, %v2472_v18  ;;  %v4849_v45 = vld [vmem:[%s5628_s27 + $0xaa0] sm:$0xff]  ;;  %v4719_v42 = vld [vmem:[%s5628_s27 + $0x690] sm:$0xff]  ;;  %v2363_v49 = vadd.f32 %v2347_v21, %v2250_v9  ;;  %v2462_v61 = vmul.f32 %v4791_v4, %v9343_v52  ;;  %v9347_v55 = vld [vmem:[#allocation198_spill] sm:$0xff] }
 0x529   : > { %v9339_v36 = vld [vmem:[#allocation249_spill] sm:$0xff]  ;;  %v9342_v54 = vld [vmem:[#allocation223_spill] sm:$0xff]  ;;  %v2141_v46 = vadd.f32 %v2125_v16, %v2028_v28  ;;  %5491 = vset.pattern.permute.xlu1 %v9305_v2  ;;  %v2002_v28 = vmul.f32 %v4719_v42, %v9347_v55 }
 0x52a   : > { %v2571_v18 = vmul.f32 %v4803_v32, %v9339_v36  ;;  %v2698_v17 = vadd.f32 %v2682_v58, %v2585_v24  ;;  %v2349_v40 = vmul.f32 %v4775_v35, %v9342_v54  ;;  %v4805_v62 = vld [vmem:[%s5628_s27 + $0x940] sm:$0xff]  ;;  %v2476_v32 = vadd.f32 %v2460_v22, %v2363_v49  ;;  %v9344_v58 = vld [vmem:[#allocation278_spill] sm:$0xff]  ;;  %v4835_v22 = vld [vmem:[%s5628_s27 + $0xa30] sm:$0xff]  ;;  %3793 = vperm.xlu1 %5491, %v9257_v13  }
 0x52b   : > { %v4821_v15 = vld [vmem:[%s5628_s27 + $0x9c0] sm:$0xff]  ;;  %v2795_v21 = vmul.f32 %v4833_v37, %v9344_v58  ;;  %v7631_v35 = vadd.f32 %v7556_v5, %v1914_v60  ;;  %v2254_v4 = vadd.f32 %v2238_v39, %v2141_v46  ;;  %v4851_v37 = vld [vmem:[%s5628_s27 + $0xab0] sm:$0xff]  ;;  %v7640_v5 = vpop.permute.xlu0 %3890  ;;  %v7644_v39 = vadd.f32 %v7581_v30, %v1916_v53 }
 0x52c   : > { %v4777_v50 = vld [vmem:[%s5628_s27 + $0x860] sm:$0xff]  ;;  %v2587_v20 = vadd.f32 %v2571_v18, %v2474_v47  ;;  %v2365_v16 = vadd.f32 %v2349_v40, %v2252_v25  ;;  %v4807_v18 = vld [vmem:[%s5628_s27 + $0x950] sm:$0xff]  ;;  %9350 = vst [vmem:[#allocation52_spill] sm:$0xff] %v7640_v5  ;;  %v7654_v30 = vadd.f32 %v2002_v28, %v7569_v31  ;;  %v9358_v31 = vld [vmem:[#allocation308_spill] sm:$0xff] }
 0x52d   : > { %v4793_v9 = vld [vmem:[%s5628_s27 + $0x8e0] sm:$0xff]  ;;  %v9349_v41 = vld [vmem:[#allocation305_spill] sm:$0xff]  ;;  %v2811_v52 = vadd.f32 %v2795_v21, %v2698_v17 }
 0x52e   : > { %v9345_v24 = vld [vmem:[#allocation335_spill] sm:$0xff]  ;;  %v2700_v49 = vadd.f32 %v2684_v48, %v2587_v20  ;;  %v2686_v54 = vmul.f32 %v4821_v15, %v9349_v41  ;;  %v4823_v42 = vld [vmem:[%s5628_s27 + $0x9d0] sm:$0xff]  ;;  %v2478_v40 = vadd.f32 %v2462_v61, %v2365_v16  ;;  %v4754_v48 = vld [vmem:[%s5628_s27 + $0x7a8] sm:$0xff]  ;;  %5492 = vset.pattern.permute.xlu1 %v9283_v34 }
 0x52f   : > { %v2908_v36 = vmul.f32 %v4849_v45, %v9345_v24  ;;  %v9348_v47 = vld [vmem:[#allocation251_spill] sm:$0xff]  ;;  %v9351_v60 = vld [vmem:[#allocation225_spill] sm:$0xff]  ;;  %v4760_v15 = vld [vmem:[%s5628_s27 + $0x7d8] sm:$0xff]  ;;  %3910 = vperm.xlu1 %5492, %v6019_v44  }
 0x530   : > { %v2573_v45 = vmul.f32 %v4805_v62, %v9348_v47  ;;  %v2351_v25 = vmul.f32 %v4777_v50, %v9351_v60  ;;  %v9352_v46 = vld [vmem:[#allocation275_spill] sm:$0xff]  ;;  %v9354_v47 = vld [vmem:[#allocation337_spill] sm:$0xff] }
 0x531   : > { %v2464_v58 = vmul.f32 %v4793_v9, %v9352_v46  ;;  %v4865_v24 = vld [vmem:[%s5628_s27 + $0xb20] sm:$0xff]  ;;  %v2924_v55 = vadd.f32 %v2908_v36, %v2811_v52  ;;  %v2910_v50 = vmul.f32 %v4851_v37, %v9354_v47  ;;  %v9355_v53 = vld [vmem:[#allocation253_spill] sm:$0xff] }
 0x532   : > { %v4881_v62 = vld [vmem:[%s5628_s27 + $0xba0] sm:$0xff]  ;;  %v2589_v21 = vadd.f32 %v2573_v45, %v2476_v32  ;;  %v2575_v61 = vmul.f32 %v4807_v18, %v9355_v53  ;;  %v2367_v16 = vadd.f32 %v2351_v25, %v2254_v4  ;;  %v4738_v32 = vld [vmem:[%s5628_s27 + $0x728] sm:$0xff]  ;;  %v3021_v28 = vmul.f32 %v4865_v24, %v9358_v31  ;;  %v4867_v24 = vld [vmem:[%s5628_s27 + $0xb30] sm:$0xff] }
 0x533   : > { %v9353_v20 = vld [vmem:[#allocation279_spill] sm:$0xff]  ;;  %v3134_v18 = vmul.f32 %v4881_v62, %v7283_v11  ;;  %v4839_v62 = vld [vmem:[%s5628_s27 + $0xa50] sm:$0xff]  ;;  %5495 = vset.pattern.permute.xlu1 %v9219_v26 }
 0x534   : > { %v2797_v17 = vmul.f32 %v4835_v22, %v9353_v20  ;;  %v4837_v9 = vld [vmem:[%s5628_s27 + $0xa40] sm:$0xff]  ;;  %v7661_v22 = vpop.permute.xlu1 %3297  ;;  %v2702_v37 = vadd.f32 %v2686_v54, %v2589_v21  ;;  %v9361_v20 = vld [vmem:[#allocation209_spill] sm:$0xff]  ;;  %v2480_v53 = vadd.f32 %v2464_v58, %v2367_v16  ;;  %v2591_v54 = vadd.f32 %v2575_v61, %v2478_v40  ;;  %3555 = vperm.xlu1 %5495, %v5891_v8  }
 0x535   : > { %v9356_v41 = vld [vmem:[#allocation307_spill] sm:$0xff]  ;;  %9357 = vst [vmem:[#allocation73_spill] sm:$0xff] %v7661_v22  ;;  %v7675_v47 = vmul.f32 %v4760_v15, %v9361_v20  ;;  %v4883_v21 = vld [vmem:[%s5628_s27 + $0xbb0] sm:$0xff]  ;;  %v3037_v10 = vadd.f32 %v3021_v28, %v2924_v55 }
 0x536   : > { %v2688_v60 = vmul.f32 %v4823_v42, %v9356_v41  ;;  %v4853_v46 = vld [vmem:[%s5628_s27 + $0xac0] sm:$0xff]  ;;  %v2813_v4 = vadd.f32 %v2797_v17, %v2700_v49  ;;  %v7669_v42 = vpop.permute.xlu0 %3878  ;;  %v4735_v49 = vld [vmem:[%s5628_s27 + $0x710] sm:$0xff]  ;;  %v3136_v28 = vmul.f32 %v4883_v21, %v7307_v29  ;;  %v9372_v21 = vld [vmem:[#allocation338_spill] sm:$0xff] }
 0x537   : > { %v4809_v36 = vld [vmem:[%s5628_s27 + $0x960] sm:$0xff]  ;;  %9359 = vst [vmem:[#allocation81_spill] sm:$0xff] %v7669_v42  ;;  %v9362_v17 = vld [vmem:[#allocation281_spill] sm:$0xff]  ;;  %v3150_v55 = vadd.f32 %v3134_v18, %v3037_v10 }
 0x538   : > { %v4825_v45 = vld [vmem:[%s5628_s27 + $0x9e0] sm:$0xff]  ;;  %v2799_v11 = vmul.f32 %v4837_v9, %v9362_v17  ;;  %v2926_v41 = vadd.f32 %v2910_v50, %v2813_v4  ;;  %v4855_v7 = vld [vmem:[%s5628_s27 + $0xad0] sm:$0xff]  ;;  %v2704_v16 = vadd.f32 %v2688_v60, %v2591_v54  ;;  %v7689_v5 = vpop.permute.xlu1 %3301  ;;  %v9367_v9 = vld [vmem:[#allocation310_spill] sm:$0xff]  ;;  %5496 = vset.pattern.permute.xlu1 %v9233_v19 }
 0x539   : > { %v9360_v52 = vld [vmem:[#allocation203_spill] sm:$0xff]  ;;  %v9366_v40 = vld [vmem:[#allocation309_spill] sm:$0xff]  ;;  %v3023_v50 = vmul.f32 %v4867_v24, %v9367_v9  ;;  %3672 = vperm.xlu1 %5496, %v9335_v1  }
 0x53a   : > { %v7672_v25 = vmul.f32 %v4754_v48, %v9360_v52  ;;  %v9363_v31 = vld [vmem:[#allocation339_spill] sm:$0xff]  ;;  %v4762_v48 = vld [vmem:[%s5628_s27 + $0x7e8] sm:$0xff]  ;;  %v9364_v52 = vld [vmem:[#allocation218_spill] sm:$0xff]  ;;  %v2690_v61 = vmul.f32 %v4825_v45, %v9366_v40 }
 0x53b   : > { %v2912_v22 = vmul.f32 %v4853_v46, %v9363_v31  ;;  %v2118_v42 = vmul.f32 %v4738_v32, %v9364_v52  ;;  %v9365_v15 = vld [vmem:[#allocation255_spill] sm:$0xff]  ;;  %v2815_v46 = vadd.f32 %v2799_v11, %v2702_v37  ;;  %v9368_v32 = vld [vmem:[#allocation214_spill] sm:$0xff]  ;;  %v9370_v17 = vld [vmem:[#allocation341_spill] sm:$0xff]  ;;  %v7700_v37 = vpop.permute.xlu0 %3805 }
 0x53c   : > { %v2577_v58 = vmul.f32 %v4809_v36, %v9365_v15  ;;  %v4897_v20 = vld [vmem:[%s5628_s27 + $0xc20] sm:$0xff]  ;;  %v2115_v36 = vmul.f32 %v4735_v49, %v9368_v32  ;;  %v2914_v31 = vmul.f32 %v4855_v7, %v9370_v17  ;;  %v4871_v17 = vld [vmem:[%s5628_s27 + $0xb50] sm:$0xff] }
 0x53d   : > { %v4869_v4 = vld [vmem:[%s5628_s27 + $0xb40] sm:$0xff]  ;;  %v3247_v49 = vmul.f32 %v4897_v20, %v9372_v21  ;;  %v2928_v11 = vadd.f32 %v2912_v22, %v2815_v46  ;;  %v2134_v7 = vadd.f32 %v2118_v42, %v7595_v59  ;;  %v4887_v22 = vld [vmem:[%s5628_s27 + $0xbd0] sm:$0xff]  ;;  %5497 = vset.pattern.permute.xlu1 %v9283_v34 }
 0x53e   : > { %v9369_v60 = vld [vmem:[#allocation283_spill] sm:$0xff]  ;;  %v2593_v45 = vadd.f32 %v2577_v58, %v2480_v53  ;;  %v4899_v53 = vld [vmem:[%s5628_s27 + $0xc30] sm:$0xff]  ;;  %v9373_v58 = vld [vmem:[#allocation312_spill] sm:$0xff]  ;;  %v2131_v59 = vadd.f32 %v2115_v36, %v7654_v30  ;;  %3906 = vperm.xlu1 %5497, %v9257_v13  }
 0x53f   : > { %v2801_v54 = vmul.f32 %v4839_v62, %v9369_v60  ;;  %v4885_v52 = vld [vmem:[%s5628_s27 + $0xbc0] sm:$0xff]  ;;  %v3039_v62 = vadd.f32 %v3023_v50, %v2926_v41  ;;  %v3025_v40 = vmul.f32 %v4869_v4, %v9373_v58  ;;  %v3263_v46 = vadd.f32 %v3247_v49, %v3150_v55  ;;  %v9374_v42 = vld [vmem:[#allocation285_spill] sm:$0xff]  ;;  %v9375_v50 = vld [vmem:[#allocation340_spill] sm:$0xff] }
 0x540   : > { %v4913_v10 = vld [vmem:[%s5628_s27 + $0xca0] sm:$0xff]  ;;  %v2706_v15 = vadd.f32 %v2690_v61, %v2593_v45  ;;  %v3138_v20 = vmul.f32 %v4885_v52, %v7333_v23  ;;  %v4915_v45 = vld [vmem:[%s5628_s27 + $0xcb0] sm:$0xff]  ;;  %v4770_v55 = vld [vmem:[%s5628_s27 + $0x828] sm:$0xff] }
 0x541   : > { %v9371_v18 = vld [vmem:[#allocation211_spill] sm:$0xff]  ;;  %v2817_v9 = vadd.f32 %v2801_v54, %v2704_v16  ;;  %v3249_v16 = vmul.f32 %v4899_v53, %v9375_v50  ;;  %v7720_v54 = vpop.permute.xlu0 %3801  ;;  %v4751_v23 = vld [vmem:[%s5628_s27 + $0x790] sm:$0xff] }
 0x542   : > { %v7704_v29 = vmul.f32 %v4762_v48, %v9371_v18  ;;  %v4841_v24 = vld [vmem:[%s5628_s27 + $0xa60] sm:$0xff]  ;;  %v3310_v48 = vpop.permute.xlu1 %3309  ;;  %v3152_v18 = vadd.f32 %v3136_v28, %v3039_v62  ;;  %v4744_v28 = vld [vmem:[%s5628_s27 + $0x758] sm:$0xff]  ;;  %v9377_v21 = vld [vmem:[#allocation313_spill] sm:$0xff]  ;;  %5498 = vset.pattern.permute.xlu1 %v9189_v33 }
 0x543   : > { %v4857_v32 = vld [vmem:[%s5628_s27 + $0xae0] sm:$0xff]  ;;  %v3360_v41 = vmul.f32 %v4913_v10, %v3310_v48  ;;  %v2803_v61 = vmul.f32 %v4841_v24, %v9374_v42  ;;  %v2930_v4 = vadd.f32 %v2914_v31, %v2817_v9  ;;  %v3041_v10 = vadd.f32 %v3025_v40, %v2928_v11  ;;  %v4931_v58 = vld [vmem:[%s5628_s27 + $0xd30] sm:$0xff]  ;;  %4023 = vperm.xlu1 %5498, %v6019_v44  }
 0x544   : > { %v4929_v60 = vld [vmem:[%s5628_s27 + $0xd20] sm:$0xff]  ;;  %v2247_v31 = vadd.f32 %v7672_v25, %v2134_v7  ;;  %v3027_v49 = vmul.f32 %v4871_v17, %v9377_v21  ;;  %v3140_v9 = vmul.f32 %v4887_v22, %v7356_v63  ;;  %v4767_v42 = vld [vmem:[%s5628_s27 + $0x810] sm:$0xff]  ;;  %v3265_v40 = vadd.f32 %v3249_v16, %v3152_v18  ;;  %v9379_v25 = vld [vmem:[#allocation224_spill] sm:$0xff] }
 0x545   : > { %v9376_v52 = vld [vmem:[#allocation343_spill] sm:$0xff]  ;;  %v3473_v36 = vmul.f32 %v4929_v60, %v7258_v0  ;;  %v3376_v24 = vadd.f32 %v3360_v41, %v3263_v46  ;;  %v2819_v62 = vadd.f32 %v2803_v61, %v2706_v15  ;;  %v3154_v11 = vadd.f32 %v3138_v20, %v3041_v10  ;;  %v9380_v17 = vld [vmem:[#allocation232_spill] sm:$0xff]  ;;  %v7743_v50 = vpop.permute.xlu0 %3789  ;;  %v4783_v21 = vld [vmem:[%s5628_s27 + $0x890] sm:$0xff] }
 0x546   : > { %v2916_v30 = vmul.f32 %v4857_v32, %v9376_v52  ;;  %v4901_v53 = vld [vmem:[%s5628_s27 + $0xc40] sm:$0xff]  ;;  %v3318_v48 = vpop.permute.xlu1 %3317  ;;  %v4746_v32 = vld [vmem:[%s5628_s27 + $0x768] sm:$0xff]  ;;  %v2124_v7 = vmul.f32 %v4744_v28, %v9379_v25  ;;  %v2228_v15 = vmul.f32 %v4751_v23, %v9380_v17  ;;  %v3043_v63 = vadd.f32 %v3027_v49, %v2930_v4  ;;  %v9382_v20 = vld [vmem:[#allocation342_spill] sm:$0xff] }
 0x547   : > { %v4873_v0 = vld [vmem:[%s5628_s27 + $0xb60] sm:$0xff]  ;;  %v3362_v60 = vmul.f32 %v4915_v45, %v3318_v48  ;;  %v7737_v46 = vadd.f32 %v3473_v36, %v3376_v24  ;;  %v9381_v41 = vld [vmem:[#allocation252_spill] sm:$0xff]  ;;  %v3251_v18 = vmul.f32 %v4901_v53, %v9382_v20  ;;  %v4903_v45 = vld [vmem:[%s5628_s27 + $0xc50] sm:$0xff]  ;;  %v3475_v36 = vmul.f32 %v4931_v58, %v7285_v38  ;;  %5499 = vset.pattern.permute.xlu1 %v9233_v19 }
 0x548   : > { %v2344_v61 = vmul.f32 %v4770_v55, %v9381_v41  ;;  %v4889_v22 = vld [vmem:[%s5628_s27 + $0xbe0] sm:$0xff]  ;;  %v2932_v16 = vadd.f32 %v2916_v30, %v2819_v62  ;;  %v9383_v23 = vld [vmem:[#allocation226_spill] sm:$0xff]  ;;  %v4786_v10 = vld [vmem:[%s5628_s27 + $0x8a8] sm:$0xff]  ;;  %v3156_v17 = vadd.f32 %v3140_v9, %v3043_v63  ;;  %3668 = vperm.xlu1 %5499, %v5891_v8  }
 0x549   : > { %9378 = vst [vmem:[#allocation99_spill] sm:$0xff] %v7737_v46  ;;  %v4917_v52 = vld [vmem:[%s5628_s27 + $0xcc0] sm:$0xff]  ;;  %v3378_v28 = vadd.f32 %v3362_v60, %v3265_v40  ;;  %v2126_v55 = vmul.f32 %v4746_v32, %v9383_v23  ;;  %v9384_v4 = vld [vmem:[#allocation248_spill] sm:$0xff]  ;;  %v4799_v53 = vld [vmem:[%s5628_s27 + $0x910] sm:$0xff]  ;;  %v3142_v62 = vmul.f32 %v4889_v22, %v7379_v57  ;;  %v3267_v58 = vadd.f32 %v3251_v18, %v3154_v11  ;;  %v7765_v23 = vpop.permute.xlu0 %3777 }
 0x54a   : > { %v2341_v24 = vmul.f32 %v4767_v42, %v9384_v4  ;;  %v9385_v49 = vld [vmem:[#allocation315_spill] sm:$0xff]  ;;  %v3326_v30 = vpop.permute.xlu1 %3325  ;;  %v4802_v38 = vld [vmem:[%s5628_s27 + $0x928] sm:$0xff]  ;;  %v2244_v42 = vadd.f32 %v2228_v15, %v2131_v59  ;;  %v2360_v60 = vadd.f32 %v2344_v61, %v2247_v31  ;;  %v4919_v4 = vld [vmem:[%s5628_s27 + $0xcd0] sm:$0xff] }
 0x54b   : > { %v3029_v48 = vmul.f32 %v4873_v0, %v9385_v49  ;;  %v4933_v25 = vld [vmem:[%s5628_s27 + $0xd40] sm:$0xff]  ;;  %v3364_v40 = vmul.f32 %v4917_v52, %v3326_v30  ;;  %v7760_v32 = vadd.f32 %v3475_v36, %v3378_v28  ;;  %v9386_v0 = vld [vmem:[#allocation266_spill] sm:$0xff]  ;;  %v9387_v20 = vld [vmem:[#allocation344_spill] sm:$0xff] }
 0x54c   : > { %v2454_v41 = vmul.f32 %v4783_v21, %v9386_v0  ;;  %v3253_v9 = vmul.f32 %v4903_v45, %v9387_v20  ;;  %v4949_v63 = vld [vmem:[%s5628_s27 + $0xdc0] sm:$0xff]  ;;  %v9388_v49 = vld [vmem:[#allocation233_spill] sm:$0xff]  ;;  %v3477_v11 = vmul.f32 %v4933_v25, %v7309_v56  ;;  %v2357_v59 = vadd.f32 %v2341_v24, %v2244_v42  ;;  %v9389_v15 = vld [vmem:[#allocation282_spill] sm:$0xff]  ;;  %5500 = vset.pattern.permute.xlu1 %v9305_v2 }
 0x54d   : > { %v2457_v46 = vmul.f32 %v4786_v10, %v9388_v49  ;;  %v4815_v57 = vld [vmem:[%s5628_s27 + $0x990] sm:$0xff]  ;;  %v3045_v22 = vadd.f32 %v3029_v48, %v2932_v16  ;;  %v3380_v52 = vadd.f32 %v3364_v40, %v3267_v58  ;;  %v2567_v31 = vmul.f32 %v4799_v53, %v9389_v15  ;;  %v9390_v61 = vld [vmem:[#allocation286_spill] sm:$0xff]  ;;  %v4905_v18 = vld [vmem:[%s5628_s27 + $0xc60] sm:$0xff]  ;;  %v7782_v42 = vpop.permute.xlu0 %3765  ;;  %3785 = vperm.xlu1 %5500, %v9335_v1  }
 0x54e   : > { %v2570_v21 = vmul.f32 %v4802_v38, %v9390_v61  ;;  %v4935_v45 = vld [vmem:[%s5628_s27 + $0xd50] sm:$0xff]  ;;  %v3334_v36 = vpop.permute.xlu1 %3333  ;;  %v3269_v28 = vadd.f32 %v3253_v9, %v3156_v17  ;;  %v3590_v16 = vmul.f32 %v4949_v63, %v7513_v43  ;;  %v2140_v25 = vadd.f32 %v2124_v7, %v7631_v35  ;;  %v4776_v30 = vld [vmem:[%s5628_s27 + $0x858] sm:$0xff]  ;;  %v9391_v58 = vld [vmem:[#allocation300_spill] sm:$0xff] }
 0x54f   : > { %v4831_v10 = vld [vmem:[%s5628_s27 + $0xa10] sm:$0xff]  ;;  %v3158_v56 = vadd.f32 %v3142_v62, %v3045_v22  ;;  %v3493_v48 = vadd.f32 %v3477_v11, %v3380_v52  ;;  %v3366_v24 = vmul.f32 %v4919_v4, %v3334_v36  ;;  %v2470_v53 = vadd.f32 %v2454_v41, %v2357_v59  ;;  %v4921_v17 = vld [vmem:[%s5628_s27 + $0xce0] sm:$0xff]  ;;  %v4818_v62 = vld [vmem:[%s5628_s27 + $0x9a8] sm:$0xff] }
 0x550   : > { %v2473_v38 = vadd.f32 %v2457_v46, %v2360_v60  ;;  %v2680_v40 = vmul.f32 %v4815_v57, %v9391_v58  ;;  %v4834_v0 = vld [vmem:[%s5628_s27 + $0xa28] sm:$0xff]  ;;  %v4847_v43 = vld [vmem:[%s5628_s27 + $0xa90] sm:$0xff]  ;;  %v9392_v20 = vld [vmem:[#allocation346_spill] sm:$0xff]  ;;  %v3479_v44 = vmul.f32 %v4935_v45, %v7335_v51  ;;  %v2142_v35 = vadd.f32 %v2126_v55, %v7644_v39 }
 0x551   : > { %v3255_v9 = vmul.f32 %v4905_v18, %v9392_v20  ;;  %v3382_v63 = vadd.f32 %v3366_v24, %v3269_v28  ;;  %v7790_v4 = vadd.f32 %v3590_v16, %v3493_v48  ;;  %v4778_v46 = vld [vmem:[%s5628_s27 + $0x868] sm:$0xff]  ;;  %v2583_v7 = vadd.f32 %v2567_v31, %v2470_v53  ;;  %v4937_v57 = vld [vmem:[%s5628_s27 + $0xd60] sm:$0xff]  ;;  %v9394_v22 = vld [vmem:[#allocation258_spill] sm:$0xff]  ;;  %v7805_v28 = vpop.permute.xlu0 %3753  ;;  %5501 = vset.pattern.permute.xlu1 %v9189_v33 }
 0x552   : > { %v2586_v60 = vadd.f32 %v2570_v21, %v2473_v38  ;;  %v9393_v41 = vld [vmem:[#allocation316_spill] sm:$0xff]  ;;  %v3342_v11 = vpop.permute.xlu1 %3341  ;;  %v2350_v52 = vmul.f32 %v4776_v30, %v9394_v22  ;;  %v4863_v59 = vld [vmem:[%s5628_s27 + $0xb10] sm:$0xff]  ;;  %v9395_v39 = vld [vmem:[#allocation263_spill] sm:$0xff]  ;;  %v3481_v30 = vmul.f32 %v4937_v57, %v7358_v3  ;;  %v1240_v58 = vadd.f32 %v7413_v14, %v7404_v6  ;;  %4019 = vperm.xlu1 %5501, %v9257_v13  }
 0x553   : > { %v2793_v49 = vmul.f32 %v4831_v10, %v9393_v41  ;;  %v3271_v15 = vadd.f32 %v3255_v9, %v3158_v56  ;;  %v3368_v51 = vmul.f32 %v4921_v17, %v3342_v11  ;;  %v7799_v61 = vadd.f32 %v3479_v44, %v3382_v63  ;;  %v9396_v21 = vld [vmem:[#allocation319_spill] sm:$0xff]  ;;  %v9397_v45 = vld [vmem:[#allocation334_spill] sm:$0xff]  ;;  %v4619_v10 = vld [vmem:[%s5628_s27 + $0x370] sm:$0xff] }
 0x554   : > { %v2683_v55 = vmul.f32 %v4818_v62, %v9395_v39  ;;  %v2696_v31 = vadd.f32 %v2680_v40, %v2583_v7  ;;  %v2796_v18 = vmul.f32 %v4834_v0, %v9396_v21  ;;  %v2906_v36 = vmul.f32 %v4847_v43, %v9397_v45  ;;  %v9398_v16 = vld [vmem:[#allocation259_spill] sm:$0xff]  ;;  %v4879_v24 = vld [vmem:[%s5628_s27 + $0xb90] sm:$0xff]  ;;  %v4636_v38 = vld [vmem:[%s5628_s27 + $0x3f8] sm:$0xff] }
 0x555   : > { %v2253_v56 = vadd.f32 %v7675_v47, %v2140_v25  ;;  %v2352_v48 = vmul.f32 %v4778_v46, %v9398_v16  ;;  %v3384_v53 = vadd.f32 %v3368_v51, %v3271_v15  ;;  %v4792_v40 = vld [vmem:[%s5628_s27 + $0x8d8] sm:$0xff]  ;;  %v9399_v43 = vld [vmem:[#allocation349_spill] sm:$0xff]  ;;  %v1126_v20 = vadd.f32 %v7424_v27, %v7421_v12  ;;  %v4850_v44 = vld [vmem:[%s5628_s27 + $0xaa8] sm:$0xff]  ;;  %v7838_v39 = vpop.permute.xlu0 %3676 }
 0x556   : > { %v4808_v17 = vld [vmem:[%s5628_s27 + $0x958] sm:$0xff]  ;;  %v2809_v62 = vadd.f32 %v2793_v49, %v2696_v31  ;;  %v2699_v0 = vadd.f32 %v2683_v55, %v2586_v60  ;;  %v3019_v47 = vmul.f32 %v4863_v59, %v9399_v43  ;;  %v7818_v25 = vpop.permute.xlu1 %3349  ;;  %v2255_v3 = vadd.f32 %v7704_v29, %v2142_v35  ;;  %v4866_v63 = vld [vmem:[%s5628_s27 + $0xb28] sm:$0xff]  ;;  %v4895_v46 = vld [vmem:[%s5628_s27 + $0xc10] sm:$0xff]  ;;  %5502 = vset.pattern.permute.xlu1 %v9219_v26 }
 0x557   : > { %v2366_v9 = vadd.f32 %v2350_v52, %v2253_v56  ;;  %v7826_v6 = vadd.f32 %v3481_v30, %v3384_v53  ;;  %v9400_v14 = vld [vmem:[#allocation89_spill] sm:$0xff]  ;;  %v9401_v57 = vld [vmem:[#allocation367_spill] sm:$0xff]  ;;  %v9402_v12 = vld [vmem:[#allocation94_spill] sm:$0xff] }
 0x558   : > { %v1223_v7 = vmul.f32 %v4619_v10, %v9400_v14  ;;  %v4651_v60 = vld [vmem:[%s5628_s27 + $0x470] sm:$0xff]  ;;  %v2812_v41 = vadd.f32 %v2796_v18, %v2699_v0  ;;  %v2922_v49 = vadd.f32 %v2906_v36, %v2809_v62  ;;  %v3132_v11 = vmul.f32 %v4879_v24, %v9401_v57  ;;  %v9403_v29 = vld [vmem:[#allocation239_spill] sm:$0xff]  ;;  %v4794_v22 = vld [vmem:[%s5628_s27 + $0x8e8] sm:$0xff] }
 0x559   : > { %v1337_v27 = vmul.f32 %v4636_v38, %v9402_v12  ;;  %v2463_v35 = vmul.f32 %v4792_v40, %v9403_v29  ;;  %v2368_v52 = vadd.f32 %v2352_v48, %v2255_v3  ;;  %v9404_v59 = vld [vmem:[#allocation291_spill] sm:$0xff]  ;;  %v4911_v51 = vld [vmem:[%s5628_s27 + $0xc90] sm:$0xff]  ;;  %v4652_v31 = vld [vmem:[%s5628_s27 + $0x478] sm:$0xff]  ;;  %v3665_v29 = vpop.permute.xlu0 %3664 }
 0x55a   : > { %v2576_v15 = vmul.f32 %v4808_v17, %v9404_v59  ;;  %v4635_v55 = vld [vmem:[%s5628_s27 + $0x3f0] sm:$0xff]  ;;  %v4810_v21 = vld [vmem:[%s5628_s27 + $0x968] sm:$0xff]  ;;  %v9405_v18 = vld [vmem:[#allocation294_spill] sm:$0xff]  ;;  %v3035_v36 = vadd.f32 %v3019_v47, %v2922_v49  ;;  %v1239_v53 = vadd.f32 %v1223_v7, %v1126_v20  ;;  %v7850_v62 = vpop.permute.xlu1 %3406 }
 0x55b   : > { %v2909_v45 = vmul.f32 %v4850_v44, %v9405_v18  ;;  %v9406_v10 = vld [vmem:[#allocation353_spill] sm:$0xff]  ;;  %v9407_v16 = vld [vmem:[#allocation54_spill] sm:$0xff]  ;;  %v9408_v24 = vld [vmem:[#allocation107_spill] sm:$0xff]  ;;  %v1353_v38 = vadd.f32 %v1337_v27, %v1240_v58  ;;  %v2479_v17 = vadd.f32 %v2463_v35, %v2366_v9 }
 0x55c   : > { %v3022_v56 = vmul.f32 %v4866_v63, %v9406_v10  ;;  %v3245_v48 = vmul.f32 %v4895_v46, %v9407_v16  ;;  %v7847_v30 = vmul.f32 %v4651_v60, %v9408_v24  ;;  %v4824_v40 = vld [vmem:[%s5628_s27 + $0x9d8] sm:$0xff]  ;;  %v4965_v0 = vld [vmem:[%s5628_s27 + $0xe40] sm:$0xff]  ;;  %v9409_v43 = vld [vmem:[#allocation241_spill] sm:$0xff]  ;;  %v3148_v14 = vadd.f32 %v3132_v11, %v3035_v36 }
 0x55d   : > { %v2465_v3 = vmul.f32 %v4794_v22, %v9409_v43  ;;  %v4882_v47 = vld [vmem:[%s5628_s27 + $0xba8] sm:$0xff]  ;;  %v4840_v44 = vld [vmem:[%s5628_s27 + $0xa58] sm:$0xff]  ;;  %v2925_v63 = vadd.f32 %v2909_v45, %v2812_v41  ;;  %v3358_v60 = vmul.f32 %v4911_v51, %v7689_v5  ;;  %v2592_v57 = vadd.f32 %v2576_v15, %v2479_v17  ;;  %v9412_v9 = vld [vmem:[#allocation293_spill] sm:$0xff] }
 0x55e   : > { %v4898_v46 = vld [vmem:[%s5628_s27 + $0xc28] sm:$0xff]  ;;  %v9411_v58 = vld [vmem:[#allocation126_spill] sm:$0xff]  ;;  %v2578_v12 = vmul.f32 %v4810_v21, %v9412_v9  ;;  %v4981_v27 = vld [vmem:[%s5628_s27 + $0xec0] sm:$0xff]  ;;  %v3261_v59 = vadd.f32 %v3245_v48, %v3148_v14  ;;  %v3703_v5 = vmul.f32 %v4965_v0, %v3665_v29  ;;  %v3415_v16 = vpop.permute.xlu1 %3414  ;;  %v7878_v14 = vpop.permute.xlu0 %3652 }
 0x55f   : > { %v9410_v49 = vld [vmem:[#allocation108_spill] sm:$0xff]  ;;  %v1450_v7 = vmul.f32 %v4652_v31, %v9411_v58  ;;  %v4927_v35 = vld [vmem:[%s5628_s27 + $0xd10] sm:$0xff]  ;;  %v4668_v41 = vld [vmem:[%s5628_s27 + $0x4f8] sm:$0xff]  ;;  %v2481_v11 = vadd.f32 %v2465_v3, %v2368_v52  ;;  %v3038_v22 = vadd.f32 %v3022_v56, %v2925_v63  ;;  %v3816_v24 = vmul.f32 %v4981_v27, %v7765_v23 }
 0x560   : > { %v1336_v20 = vmul.f32 %v4635_v55, %v9410_v49  ;;  %v9413_v51 = vld [vmem:[#allocation269_spill] sm:$0xff]  ;;  %v9414_v55 = vld [vmem:[#allocation324_spill] sm:$0xff]  ;;  %v4997_v10 = vld [vmem:[%s5628_s27 + $0xf40] sm:$0xff]  ;;  %v3374_v48 = vadd.f32 %v3358_v60, %v3261_v59  ;;  %v3719_v13 = vadd.f32 %v3703_v5, %v7790_v4 }
 0x561   : > { %v2689_v15 = vmul.f32 %v4824_v40, %v9413_v51  ;;  %v3135_v31 = vmul.f32 %v4882_v47, %v9414_v55  ;;  %v9415_v21 = vld [vmem:[#allocation325_spill] sm:$0xff]  ;;  %v9416_v45 = vld [vmem:[#allocation72_spill] sm:$0xff]  ;;  %v3471_v40 = vmul.f32 %v4927_v35, %v3415_v16  ;;  %v9417_v0 = vld [vmem:[#allocation123_spill] sm:$0xff]  ;;  %v2594_v47 = vadd.f32 %v2578_v12, %v2481_v11 }
 0x562   : > { %v2802_v18 = vmul.f32 %v4840_v44, %v9415_v21  ;;  %v3248_v36 = vmul.f32 %v4898_v46, %v9416_v45  ;;  %v4826_v52 = vld [vmem:[%s5628_s27 + $0x9e8] sm:$0xff]  ;;  %v1352_v17 = vadd.f32 %v1336_v20, %v1239_v53  ;;  %v1563_v43 = vmul.f32 %v4668_v41, %v9417_v0  ;;  %v4667_v3 = vld [vmem:[%s5628_s27 + $0x4f0] sm:$0xff]  ;;  %v4684_v46 = vld [vmem:[%s5628_s27 + $0x578] sm:$0xff]  ;;  %v7889_v59 = vpop.permute.xlu1 %3418 }
 0x563   : > { %v4842_v56 = vld [vmem:[%s5628_s27 + $0xa68] sm:$0xff]  ;;  %v2705_v44 = vadd.f32 %v2689_v15, %v2592_v57  ;;  %v4943_v63 = vld [vmem:[%s5628_s27 + $0xd90] sm:$0xff]  ;;  %v4856_v49 = vld [vmem:[%s5628_s27 + $0xad8] sm:$0xff]  ;;  %v3151_v58 = vadd.f32 %v3135_v31, %v3038_v22  ;;  %v3832_v4 = vadd.f32 %v3816_v24, %v3719_v13  ;;  %v3487_v27 = vadd.f32 %v3471_v40, %v3374_v48  ;;  %v3641_v24 = vpop.permute.xlu0 %3640 }
 0x564   : > { %v4872_v60 = vld [vmem:[%s5628_s27 + $0xb58] sm:$0xff]  ;;  %v9418_v23 = vld [vmem:[#allocation52_spill] sm:$0xff]  ;;  %v1466_v53 = vadd.f32 %v1450_v7, %v1353_v38  ;;  %v9419_v20 = vld [vmem:[#allocation271_spill] sm:$0xff] }
 0x565   : > { %v3929_v9 = vmul.f32 %v4997_v10, %v9418_v23  ;;  %v2691_v12 = vmul.f32 %v4826_v52, %v9419_v20  ;;  %v2818_v57 = vadd.f32 %v2802_v18, %v2705_v44  ;;  %v9420_v29 = vld [vmem:[#allocation327_spill] sm:$0xff]  ;;  %v4914_v41 = vld [vmem:[%s5628_s27 + $0xca8] sm:$0xff]  ;;  %v4959_v22 = vld [vmem:[%s5628_s27 + $0xe10] sm:$0xff]  ;;  %v3264_v55 = vadd.f32 %v3248_v36, %v3151_v58 }
 0x566   : > { %v2804_v35 = vmul.f32 %v4842_v56, %v9420_v29  ;;  %v9421_v11 = vld [vmem:[#allocation8_spill] sm:$0xff]  ;;  %v4683_v5 = vld [vmem:[%s5628_s27 + $0x570] sm:$0xff]  ;;  %v9422_v51 = vld [vmem:[#allocation142_spill] sm:$0xff]  ;;  %v1465_v36 = vadd.f32 %v7847_v30, %v1352_v17  ;;  %v3427_v30 = vpop.permute.xlu1 %3426 }
 0x567   : > { %3547 = vperm.xlu1 %5502, %v9421_v11   ;;  %v1562_v15 = vmul.f32 %v4667_v3, %v9422_v51  ;;  %v9423_v31 = vld [vmem:[#allocation66_spill] sm:$0xff]  ;;  %v7895_v7 = vadd.f32 %v3929_v9, %v3832_v4  ;;  %v9424_v21 = vld [vmem:[#allocation160_spill] sm:$0xff]  ;;  %v9425_v45 = vld [vmem:[#allocation299_spill] sm:$0xff]  ;;  %v2707_v16 = vadd.f32 %v2691_v12, %v2594_v47  ;;  %v1579_v47 = vadd.f32 %v1563_v43, %v1466_v53 }
 0x568   : > { %v3584_v38 = vmul.f32 %v4943_v63, %v9423_v31  ;;  %v1676_v18 = vmul.f32 %v4684_v46, %v9424_v21  ;;  %v2915_v10 = vmul.f32 %v4856_v49, %v9425_v45  ;;  %v9426_v52 = vld [vmem:[#allocation359_spill] sm:$0xff]  ;;  %v4975_v48 = vld [vmem:[%s5628_s27 + $0xe90] sm:$0xff]  ;;  %v4930_v13 = vld [vmem:[%s5628_s27 + $0xd28] sm:$0xff]  ;;  %v3697_v63 = vmul.f32 %v4959_v22, %v3641_v24 }
 0x569   : > { %v3028_v56 = vmul.f32 %v4872_v60, %v9426_v52  ;;  %v4858_v40 = vld [vmem:[%s5628_s27 + $0xae8] sm:$0xff]  ;;  %v9427_v0 = vld [vmem:[#allocation354_spill] sm:$0xff]  ;;  %v9428_v46 = vld [vmem:[#allocation137_spill] sm:$0xff]  ;;  %v2820_v23 = vadd.f32 %v2804_v35, %v2707_v16  ;;  %v3474_v22 = vmul.f32 %v4930_v13, %v3427_v30  ;;  %v1578_v43 = vadd.f32 %v1562_v15, %v1465_v36 }
 0x56a   : > { %v3361_v3 = vmul.f32 %v4914_v41, %v9427_v0  ;;  %v3600_v44 = vadd.f32 %v3584_v38, %v3487_v27  ;;  %v1675_v49 = vmul.f32 %v4683_v5, %v9428_v46  ;;  %v4700_v58 = vld [vmem:[%s5628_s27 + $0x5f8] sm:$0xff]  ;;  %v2931_v9 = vadd.f32 %v2915_v10, %v2818_v57  ;;  %v4874_v60 = vld [vmem:[%s5628_s27 + $0xb68] sm:$0xff]  ;;  %v4699_v17 = vld [vmem:[%s5628_s27 + $0x5f0] sm:$0xff]  ;;  %v7928_v0 = vpop.permute.xlu1 %3434 }
 0x56b   : > { %v4946_v4 = vld [vmem:[%s5628_s27 + $0xda8] sm:$0xff]  ;;  %5503 = vset.pattern.permute.xlu1 %v9305_v2  ;;  %v4716_v20 = vld [vmem:[%s5628_s27 + $0x678] sm:$0xff]  ;;  %v3810_v27 = vmul.f32 %v4975_v48, %v7805_v28  ;;  %v1692_v53 = vadd.f32 %v1676_v18, %v1579_v47  ;;  %v9429_v57 = vld [vmem:[#allocation301_spill] sm:$0xff] }
 0x56c   : > { %v4888_v12 = vld [vmem:[%s5628_s27 + $0xbd8] sm:$0xff]  ;;  %v3713_v29 = vadd.f32 %v3697_v63, %v3600_v44  ;;  %v3377_v41 = vadd.f32 %v3361_v3, %v3264_v55  ;;  %3781 = vperm.xlu1 %5503, %v5891_v8   ;;  %v2917_v35 = vmul.f32 %v4858_v40, %v9429_v57  ;;  %v3044_v5 = vadd.f32 %v3028_v56, %v2931_v9  ;;  %v4962_v31 = vld [vmem:[%s5628_s27 + $0xe28] sm:$0xff]  ;;  %v9430_v21 = vld [vmem:[#allocation361_spill] sm:$0xff] }
 0x56d   : > { %v4904_v51 = vld [vmem:[%s5628_s27 + $0xc58] sm:$0xff]  ;;  %v4566_v38 = vld [vmem:[%s5628_s27 + $0x1c8] sm:$0xff]  ;;  %v3030_v45 = vmul.f32 %v4874_v60, %v9430_v21  ;;  %v9432_v52 = vld [vmem:[#allocation153_spill] sm:$0xff]  ;;  %v1691_v30 = vadd.f32 %v1675_v49, %v1578_v43 }
 0x56e   : > { %v9431_v10 = vld [vmem:[#allocation78_spill] sm:$0xff]  ;;  %v3490_v28 = vadd.f32 %v3474_v22, %v3377_v41  ;;  %v7921_v55 = vadd.f32 %v3810_v27, %v3713_v29  ;;  %v1789_v48 = vmul.f32 %v4700_v58, %v9432_v52  ;;  %v9433_v24 = vld [vmem:[#allocation176_spill] sm:$0xff]  ;;  %v2933_v44 = vadd.f32 %v2917_v35, %v2820_v23  ;;  %v4731_v23 = vld [vmem:[%s5628_s27 + $0x6f0] sm:$0xff] }
 0x56f   : > { %v3587_v16 = vmul.f32 %v4946_v4, %v9431_v10  ;;  %v1788_v15 = vmul.f32 %v4699_v17, %v9433_v24  ;;  %v9434_v18 = vld [vmem:[#allocation194_spill] sm:$0xff]  ;;  %v4978_v40 = vld [vmem:[%s5628_s27 + $0xea8] sm:$0xff]  ;;  %v3700_v58 = vmul.f32 %v4962_v31, %v7878_v14  ;;  %v4715_v4 = vld [vmem:[%s5628_s27 + $0x670] sm:$0xff]  ;;  %v7947_v10 = vpop.permute.xlu1 %3442 }
 0x570   : > { %v1902_v13 = vmul.f32 %v4716_v20, %v9434_v18  ;;  %v9435_v56 = vld [vmem:[#allocation330_spill] sm:$0xff]  ;;  %v4890_v3 = vld [vmem:[%s5628_s27 + $0xbe8] sm:$0xff]  ;;  %5504 = vset.pattern.permute.xlu1 %v9283_v34  ;;  %v1805_v17 = vadd.f32 %v1789_v48, %v1692_v53  ;;  %v3046_v41 = vadd.f32 %v3030_v45, %v2933_v44  ;;  %v3813_v14 = vmul.f32 %v4978_v40, %v7782_v42  ;;  %v9438_v35 = vld [vmem:[#allocation51_spill] sm:$0xff] }
 0x571   : > { %v3141_v36 = vmul.f32 %v4888_v12, %v9435_v56  ;;  %v9436_v63 = vld [vmem:[#allocation86_spill] sm:$0xff]  ;;  %v3603_v47 = vadd.f32 %v3587_v16, %v3490_v28  ;;  %v9437_v9 = vld [vmem:[#allocation48_spill] sm:$0xff]  ;;  %3898 = vperm.xlu1 %5504, %v9335_v1   ;;  %v9439_v43 = vld [vmem:[#allocation331_spill] sm:$0xff] }
 0x572   : > { %v3254_v46 = vmul.f32 %v4904_v51, %v9436_v63  ;;  %v879_v60 = vmul.f32 %v4566_v38, %v9437_v9  ;;  %v4906_v20 = vld [vmem:[%s5628_s27 + $0xc68] sm:$0xff]  ;;  %v4732_v27 = vld [vmem:[%s5628_s27 + $0x6f8] sm:$0xff]  ;;  %v1804_v38 = vadd.f32 %v1788_v15, %v1691_v30  ;;  %v1918_v49 = vadd.f32 %v1902_v13, %v1805_v17  ;;  %v9441_v45 = vld [vmem:[#allocation81_spill] sm:$0xff] }
 0x573   : > { %v4994_v12 = vld [vmem:[%s5628_s27 + $0xf28] sm:$0xff]  ;;  %v4748_v29 = vld [vmem:[%s5628_s27 + $0x778] sm:$0xff]  ;;  %v3157_v22 = vadd.f32 %v3141_v36, %v3044_v5  ;;  %v3716_v57 = vadd.f32 %v3700_v58, %v3603_v47  ;;  %v3143_v53 = vmul.f32 %v4890_v3, %v9439_v43  ;;  %v9442_v48 = vld [vmem:[#allocation167_spill] sm:$0xff] }
 0x574   : > { %v895_v51 = vadd.f32 %v879_v60, %v9438_v35  ;;  %v4582_v31 = vld [vmem:[%s5628_s27 + $0x248] sm:$0xff]  ;;  %v4920_v21 = vld [vmem:[%s5628_s27 + $0xcd8] sm:$0xff]  ;;  %v3926_v5 = vmul.f32 %v4994_v12, %v9441_v45  ;;  %v1901_v24 = vmul.f32 %v4715_v4, %v9442_v48  ;;  %v9443_v18 = vld [vmem:[#allocation183_spill] sm:$0xff] }
 0x575   : > { %v3270_v16 = vadd.f32 %v3254_v46, %v3157_v22  ;;  %v9440_v28 = vld [vmem:[#allocation46_spill] sm:$0xff]  ;;  %v3829_v42 = vadd.f32 %v3813_v14, %v3716_v57  ;;  %v2015_v56 = vmul.f32 %v4732_v27, %v9443_v18  ;;  %v9445_v36 = vld [vmem:[#allocation228_spill] sm:$0xff]  ;;  %5505 = vset.pattern.permute.xlu1 %v9219_v26  ;;  %v9446_v44 = vld [vmem:[#allocation57_spill] sm:$0xff]  ;;  %v3159_v47 = vadd.f32 %v3143_v53, %v3046_v41  ;;  %v3451_v27 = vpop.permute.xlu1 %3450 }
 0x576   : > { %v3256_v52 = vmul.f32 %v4906_v20, %v9440_v28  ;;  %v9444_v15 = vld [vmem:[#allocation210_spill] sm:$0xff]  ;;  %v2128_v40 = vmul.f32 %v4748_v29, %v9445_v36  ;;  %v992_v63 = vmul.f32 %v4582_v31, %v9446_v44  ;;  %v9447_v46 = vld [vmem:[#allocation360_spill] sm:$0xff]  ;;  %v9448_v9 = vld [vmem:[#allocation9_spill] sm:$0xff]  ;;  %v1917_v30 = vadd.f32 %v1901_v24, %v1804_v38 }
 0x577   : > { %v2014_v13 = vmul.f32 %v4731_v23, %v9444_v15  ;;  %v4936_v3 = vld [vmem:[%s5628_s27 + $0xd58] sm:$0xff]  ;;  %v3367_v58 = vmul.f32 %v4920_v21, %v9447_v46  ;;  %3543 = vperm.xlu1 %5505, %v9448_v9   ;;  %v7960_v60 = vadd.f32 %v3926_v5, %v3829_v42  ;;  %v4747_v4 = vld [vmem:[%s5628_s27 + $0x770] sm:$0xff]  ;;  %v2031_v17 = vadd.f32 %v2015_v56, %v1918_v49  ;;  %v4922_v20 = vld [vmem:[%s5628_s27 + $0xce8] sm:$0xff] }
 0x578   : > { %v4952_v12 = vld [vmem:[%s5628_s27 + $0xdd8] sm:$0xff]  ;;  %v4763_v29 = vld [vmem:[%s5628_s27 + $0x7f0] sm:$0xff]  ;;  %v3272_v14 = vadd.f32 %v3256_v52, %v3159_v47  ;;  %v3480_v41 = vmul.f32 %v4936_v3, %v3451_v27  ;;  %v4938_v53 = vld [vmem:[%s5628_s27 + $0xd68] sm:$0xff]  ;;  %v1008_v28 = vadd.f32 %v992_v63, %v895_v51 }
 0x579   : > { %v4764_v23 = vld [vmem:[%s5628_s27 + $0x7f8] sm:$0xff]  ;;  %v3383_v57 = vadd.f32 %v3367_v58, %v3270_v16  ;;  %v2030_v35 = vadd.f32 %v2014_v13, %v1917_v30  ;;  %v2144_v31 = vadd.f32 %v2128_v40, %v2031_v17  ;;  %v4598_v21 = vld [vmem:[%s5628_s27 + $0x2c8] sm:$0xff]  ;;  %v9450_v45 = vld [vmem:[#allocation61_spill] sm:$0xff]  ;;  %v3459_v51 = vpop.permute.xlu1 %3458 }
 0x57a   : > { %v4780_v22 = vld [vmem:[%s5628_s27 + $0x878] sm:$0xff]  ;;  %v3593_v5 = vmul.f32 %v4952_v12, %v9450_v45  ;;  %v9451_v48 = vld [vmem:[#allocation197_spill] sm:$0xff]  ;;  %v9453_v18 = vld [vmem:[#allocation244_spill] sm:$0xff]  ;;  %v3482_v58 = vmul.f32 %v4938_v53, %v3459_v51 }
 0x57b   : > { %v4968_v43 = vld [vmem:[%s5628_s27 + $0xe58] sm:$0xff]  ;;  %v3496_v42 = vadd.f32 %v3480_v41, %v3383_v57  ;;  %5506 = vset.pattern.permute.xlu1 %v9233_v19  ;;  %v2127_v52 = vmul.f32 %v4747_v4, %v9451_v48  ;;  %v9452_v16 = vld [vmem:[#allocation213_spill] sm:$0xff]  ;;  %v2240_v56 = vmul.f32 %v4763_v29, %v9453_v18  ;;  %v4954_v36 = vld [vmem:[%s5628_s27 + $0xde8] sm:$0xff] }
 0x57c   : > { %v9449_v38 = vld [vmem:[#allocation362_spill] sm:$0xff]  ;;  %v2241_v24 = vmul.f32 %v4764_v23, %v9452_v16  ;;  %v9454_v15 = vld [vmem:[#allocation261_spill] sm:$0xff]  ;;  %3660 = vperm.xlu1 %5506, %v9421_v11   ;;  %v4614_v3 = vld [vmem:[%s5628_s27 + $0x348] sm:$0xff]  ;;  %v3706_v44 = vmul.f32 %v4968_v43, %v7838_v39 }
 0x57d   : > { %v3369_v49 = vmul.f32 %v4922_v20, %v9449_v38  ;;  %v2354_v13 = vmul.f32 %v4780_v22, %v9454_v15  ;;  %v4984_v40 = vld [vmem:[%s5628_s27 + $0xed8] sm:$0xff]  ;;  %v3609_v63 = vadd.f32 %v3593_v5, %v3496_v42  ;;  %v9455_v47 = vld [vmem:[#allocation49_spill] sm:$0xff]  ;;  %v2143_v30 = vadd.f32 %v2127_v52, %v2030_v35  ;;  %v9456_v27 = vld [vmem:[#allocation43_spill] sm:$0xff]  ;;  %v7993_v35 = vpop.permute.xlu1 %3462 }
 0x57e   : > { %v1105_v4 = vmul.f32 %v4598_v21, %v9455_v47  ;;  %v2257_v17 = vadd.f32 %v2241_v24, %v2144_v31  ;;  %v5000_v20 = vld [vmem:[%s5628_s27 + $0xf58] sm:$0xff]  ;;  %v4779_v12 = vld [vmem:[%s5628_s27 + $0x870] sm:$0xff]  ;;  %v3595_v23 = vmul.f32 %v4954_v36, %v9456_v27  ;;  %v3819_v29 = vmul.f32 %v4984_v40, %v7743_v50  ;;  %v9458_v21 = vld [vmem:[#allocation67_spill] sm:$0xff] }
 0x57f   : > { %v3385_v46 = vadd.f32 %v3369_v49, %v3272_v14  ;;  %v3722_v22 = vadd.f32 %v3706_v44, %v3609_v63  ;;  %v9457_v41 = vld [vmem:[#allocation58_spill] sm:$0xff]  ;;  %v2256_v38 = vadd.f32 %v2240_v56, %v2143_v30  ;;  %v4795_v53 = vld [vmem:[%s5628_s27 + $0x8f0] sm:$0xff]  ;;  %v3932_v45 = vmul.f32 %v5000_v20, %v9458_v21  ;;  %v4630_v48 = vld [vmem:[%s5628_s27 + $0x3c8] sm:$0xff] }
 0x580   : > { %v1121_v39 = vadd.f32 %v1105_v4, %v1008_v28  ;;  %v1218_v43 = vmul.f32 %v4614_v3, %v9457_v41  ;;  %v4796_v14 = vld [vmem:[%s5628_s27 + $0x8f8] sm:$0xff]  ;;  %5507 = vset.pattern.permute.xlu1 %v9283_v34  ;;  %v2370_v31 = vadd.f32 %v2354_v13, %v2257_v17  ;;  %v9459_v28 = vld [vmem:[#allocation227_spill] sm:$0xff]  ;;  %v4646_v52 = vld [vmem:[%s5628_s27 + $0x448] sm:$0xff] }
 0x581   : > { %v3498_v57 = vadd.f32 %v3482_v58, %v3385_v46  ;;  %v4812_v49 = vld [vmem:[%s5628_s27 + $0x978] sm:$0xff]  ;;  %3894 = vperm.xlu1 %5507, %v5891_v8   ;;  %v3835_v5 = vadd.f32 %v3819_v29, %v3722_v22  ;;  %v2353_v42 = vmul.f32 %v4779_v12, %v9459_v28  ;;  %v9460_v16 = vld [vmem:[#allocation243_spill] sm:$0xff]  ;;  %v9461_v18 = vld [vmem:[#allocation277_spill] sm:$0xff]  ;;  %v8009_v63 = vpop.permute.xlu1 %3575 }
 0x582   : > { %v2467_v24 = vmul.f32 %v4796_v14, %v9460_v16  ;;  %v2466_v56 = vmul.f32 %v4795_v53, %v9461_v18  ;;  %v9462_v15 = vld [vmem:[#allocation295_spill] sm:$0xff]  ;;  %v1234_v40 = vadd.f32 %v1218_v43, %v1121_v39  ;;  %v4811_v51 = vld [vmem:[%s5628_s27 + $0x970] sm:$0xff]  ;;  %v9463_v46 = vld [vmem:[#allocation50_spill] sm:$0xff] }
 0x583   : > { %v7997_v50 = vadd.f32 %v3595_v23, %v3498_v57  ;;  %v2580_v13 = vmul.f32 %v4812_v49, %v9462_v15  ;;  %v8005_v36 = vadd.f32 %v3932_v45, %v3835_v5  ;;  %v2369_v3 = vadd.f32 %v2353_v42, %v2256_v38  ;;  %v9464_v47 = vld [vmem:[#allocation120_spill] sm:$0xff]  ;;  %v4828_v30 = vld [vmem:[%s5628_s27 + $0x9f8] sm:$0xff]  ;;  %v4827_v17 = vld [vmem:[%s5628_s27 + $0x9f0] sm:$0xff] }
 0x584   : > { %v2483_v44 = vadd.f32 %v2467_v24, %v2370_v31  ;;  %v1331_v58 = vmul.f32 %v4630_v48, %v9463_v46  ;;  %v1444_v4 = vmul.f32 %v4646_v52, %v9464_v47  ;;  %v4844_v20 = vld [vmem:[%s5628_s27 + $0xa78] sm:$0xff]  ;;  %v4662_v29 = vld [vmem:[%s5628_s27 + $0x4c8] sm:$0xff]  ;;  %v9465_v57 = vld [vmem:[#allocation257_spill] sm:$0xff] }
 0x585   : > { %5508 = vset.pattern.permute.xlu1 %v9189_v33  ;;  %v2482_v12 = vadd.f32 %v2466_v56, %v2369_v3  ;;  %v4678_v22 = vld [vmem:[%s5628_s27 + $0x548] sm:$0xff]  ;;  %v2579_v39 = vmul.f32 %v4811_v51, %v9465_v57  ;;  %v9466_v41 = vld [vmem:[#allocation273_spill] sm:$0xff]  ;;  %v9467_v14 = vld [vmem:[#allocation311_spill] sm:$0xff] }
 0x586   : > { %4011 = vperm.xlu1 %5508, %v9335_v1   ;;  %v2596_v27 = vadd.f32 %v2580_v13, %v2483_v44  ;;  %v1347_v23 = vadd.f32 %v1331_v58, %v1234_v40  ;;  %v2693_v43 = vmul.f32 %v4828_v30, %v9466_v41  ;;  %v2692_v38 = vmul.f32 %v4827_v17, %v9467_v14  ;;  %v9468_v53 = vld [vmem:[#allocation329_spill] sm:$0xff]  ;;  %v8024_v1 = vpop.permute.xlu1 %3692  ;;  %v9470_v48 = vld [vmem:[#allocation154_spill] sm:$0xff]  ;;  %v4694_v44 = vld [vmem:[%s5628_s27 + $0x5c8] sm:$0xff] }
 0x587   : > { %v2806_v49 = vmul.f32 %v4844_v20, %v9468_v53  ;;  %v4843_v21 = vld [vmem:[%s5628_s27 + $0xa70] sm:$0xff]  ;;  %v2595_v45 = vadd.f32 %v2579_v39, %v2482_v12  ;;  %v1670_v52 = vmul.f32 %v4678_v22, %v9470_v48  ;;  %v4860_v16 = vld [vmem:[%s5628_s27 + $0xaf8] sm:$0xff]  ;;  %v9471_v46 = vld [vmem:[#allocation287_spill] sm:$0xff] }
 0x588   : > { %v1460_v31 = vadd.f32 %v1444_v4, %v1347_v23  ;;  %v2709_v5 = vadd.f32 %v2693_v43, %v2596_v27  ;;  %v9469_v28 = vld [vmem:[#allocation117_spill] sm:$0xff]  ;;  %v4876_v18 = vld [vmem:[%s5628_s27 + $0xb78] sm:$0xff]  ;;  %v2805_v58 = vmul.f32 %v4843_v21, %v9471_v46  ;;  %v9472_v47 = vld [vmem:[#allocation303_spill] sm:$0xff] }
 0x589   : > { %v1557_v42 = vmul.f32 %v4662_v29, %v9469_v28  ;;  %v4859_v24 = vld [vmem:[%s5628_s27 + $0xaf0] sm:$0xff]  ;;  %v2708_v56 = vadd.f32 %v2692_v38, %v2595_v45  ;;  %v4532_v51 = vld [vmem:[%s5628_s27 + $0xb8] sm:$0xff]  ;;  %v2919_v4 = vmul.f32 %v4860_v16, %v9472_v47  ;;  %v9474_v20 = vld [vmem:[#allocation363_spill] sm:$0xff] }
 0x58a   : > { %5509 = vset.pattern.permute.xlu1 %v9233_v19  ;;  %v2822_v15 = vadd.f32 %v2806_v49, %v2709_v5  ;;  %v8033_v40 = vpop.permute.xlu1 %3688  ;;  %v458_v3 = vld [vmem:[%s5628_s27 + $0x38] sm:$0xff]  ;;  %v9473_v30 = vld [vmem:[#allocation345_spill] sm:$0xff]  ;;  %v3032_v12 = vmul.f32 %v4876_v18, %v9474_v20  ;;  %v4710_v23 = vld [vmem:[%s5628_s27 + $0x648] sm:$0xff] }
 0x58b   : > { %3656 = vperm.xlu1 %5509, %v9448_v9   ;;  %v1573_v13 = vadd.f32 %v1557_v42, %v1460_v31  ;;  %v2918_v17 = vmul.f32 %v4859_v24, %v9473_v30  ;;  %v4548_v29 = vld [vmem:[%s5628_s27 + $0x138] sm:$0xff]  ;;  %v4875_v22 = vld [vmem:[%s5628_s27 + $0xb70] sm:$0xff]  ;;  %v2821_v57 = vadd.f32 %v2805_v58, %v2708_v56  ;;  %v9475_v41 = vld [vmem:[#allocation35_spill] sm:$0xff] }
 0x58c   : > { %v2935_v39 = vadd.f32 %v2919_v4, %v2822_v15  ;;  %v651_v43 = vmul.f32 %v4532_v51, %v9475_v41  ;;  %v9476_v14 = vld [vmem:[#allocation41_spill] sm:$0xff]  ;;  %v9477_v53 = vld [vmem:[#allocation147_spill] sm:$0xff]  ;;  %v4892_v31 = vld [vmem:[%s5628_s27 + $0xbf8] sm:$0xff] }
 0x58d   : > { %v1686_v27 = vadd.f32 %v1670_v52, %v1573_v13  ;;  %v554_v38 = vmul.f32 %v9476_v14, %v458_v3  ;;  %v1783_v49 = vmul.f32 %v4694_v44, %v9477_v53  ;;  %v4891_v21 = vld [vmem:[%s5628_s27 + $0xbf0] sm:$0xff]  ;;  %v4908_v45 = vld [vmem:[%s5628_s27 + $0xc78] sm:$0xff]  ;;  %v9478_v5 = vld [vmem:[#allocation188_spill] sm:$0xff]  ;;  %v2934_v42 = vadd.f32 %v2918_v17, %v2821_v57 }
 0x58e   : > { %v1896_v28 = vmul.f32 %v4710_v23, %v9478_v5  ;;  %v3048_v48 = vadd.f32 %v3032_v12, %v2935_v39  ;;  %v8054_v52 = vpop.permute.xlu1 %3567  ;;  %v9479_v16 = vld [vmem:[#allocation42_spill] sm:$0xff]  ;;  %v9480_v56 = vld [vmem:[#allocation317_spill] sm:$0xff]  ;;  %v4726_v4 = vld [vmem:[%s5628_s27 + $0x6c8] sm:$0xff] }
 0x58f   : > { %5510 = vset.pattern.permute.xlu1 %v9305_v2  ;;  %v764_v24 = vmul.f32 %v4548_v29, %v9479_v16  ;;  %v1799_v18 = vadd.f32 %v1783_v49, %v1686_v27  ;;  %v3031_v15 = vmul.f32 %v4875_v22, %v9480_v56  ;;  %v9481_v13 = vld [vmem:[#allocation333_spill] sm:$0xff]  ;;  %v667_v47 = vadd.f32 %v651_v43, %v554_v38  ;;  %v4742_v30 = vld [vmem:[%s5628_s27 + $0x748] sm:$0xff]  ;;  %v4564_v17 = vld [vmem:[%s5628_s27 + $0x1b8] sm:$0xff] }
 0x590   : > { %3773 = vperm.xlu1 %5510, %v9421_v11   ;;  %v3145_v51 = vmul.f32 %v4892_v31, %v9481_v13  ;;  %v9482_v3 = vld [vmem:[#allocation77_spill] sm:$0xff]  ;;  %v4924_v22 = vld [vmem:[%s5628_s27 + $0xcf8] sm:$0xff]  ;;  %v9487_v5 = vld [vmem:[#allocation7_spill] sm:$0xff] }
 0x591   : > { %v3144_v44 = vmul.f32 %v4891_v21, %v9482_v3  ;;  %v9483_v46 = vld [vmem:[#allocation93_spill] sm:$0xff]  ;;  %v1912_v20 = vadd.f32 %v1896_v28, %v1799_v18  ;;  %v3047_v12 = vadd.f32 %v3031_v15, %v2934_v42  ;;  %v780_v23 = vadd.f32 %v764_v24, %v667_v47  ;;  %v4580_v41 = vld [vmem:[%s5628_s27 + $0x238] sm:$0xff]  ;;  %v4758_v28 = vld [vmem:[%s5628_s27 + $0x7c8] sm:$0xff] }
 0x592   : > { %v3258_v58 = vmul.f32 %v4908_v45, %v9483_v46  ;;  %v3161_v27 = vadd.f32 %v3145_v51, %v3048_v48  ;;  %v4907_v29 = vld [vmem:[%s5628_s27 + $0xc70] sm:$0xff]  ;;  %v8069_v39 = vpop.permute.xlu1 %3684  ;;  %v9488_v48 = vld [vmem:[#allocation347_spill] sm:$0xff]  ;;  %v9489_v24 = vld [vmem:[#allocation364_spill] sm:$0xff] }
 0x593   : > { %v4923_v57 = vld [vmem:[%s5628_s27 + $0xcf0] sm:$0xff]  ;;  %v3160_v38 = vadd.f32 %v3144_v44, %v3047_v12  ;;  %v3257_v16 = vmul.f32 %v4907_v29, %v9488_v48  ;;  %v3371_v18 = vmul.f32 %v4924_v22, %v9489_v24  ;;  %v4774_v3 = vld [vmem:[%s5628_s27 + $0x848] sm:$0xff]  ;;  %v4940_v44 = vld [vmem:[%s5628_s27 + $0xd78] sm:$0xff] }
 0x594   : > { %5511 = vset.pattern.permute.xlu1 %v9189_v33  ;;  %v9484_v14 = vld [vmem:[#allocation177_spill] sm:$0xff]  ;;  %v3274_v49 = vadd.f32 %v3258_v58, %v3161_v27  ;;  %v3370_v56 = vmul.f32 %v4923_v57, %v7818_v25  ;;  %v4596_v25 = vld [vmem:[%s5628_s27 + $0x2b8] sm:$0xff]  ;;  %v4806_v48 = vld [vmem:[%s5628_s27 + $0x948] sm:$0xff] }
 0x595   : > { %4007 = vperm.xlu1 %5511, %v5891_v8   ;;  %v2009_v53 = vmul.f32 %v4726_v4, %v9484_v14  ;;  %v9485_v8 = vld [vmem:[#allocation222_spill] sm:$0xff]  ;;  %v9486_v31 = vld [vmem:[#allocation37_spill] sm:$0xff]  ;;  %v3273_v4 = vadd.f32 %v3257_v16, %v3160_v38  ;;  %v9495_v24 = vld [vmem:[#allocation79_spill] sm:$0xff] }
 0x596   : > { %v2122_v43 = vmul.f32 %v4742_v30, %v9485_v8  ;;  %v877_v21 = vmul.f32 %v4564_v17, %v9486_v31  ;;  %v4939_v45 = vld [vmem:[%s5628_s27 + $0xd70] sm:$0xff]  ;;  %v3387_v47 = vadd.f32 %v3371_v18, %v3274_v49  ;;  %v3919_v17 = vpop.permute.xlu1 %3918  ;;  %v4972_v8 = vld [vmem:[%s5628_s27 + $0xe78] sm:$0xff] }
 0x597   : > { %v2025_v42 = vadd.f32 %v2009_v53, %v1912_v20  ;;  %v9490_v13 = vld [vmem:[#allocation45_spill] sm:$0xff]  ;;  %v3483_v30 = vmul.f32 %v4939_v45, %v7993_v35  ;;  %v9491_v20 = vld [vmem:[#allocation207_spill] sm:$0xff]  ;;  %v4956_v35 = vld [vmem:[%s5628_s27 + $0xdf8] sm:$0xff] }
 0x598   : > { %v893_v15 = vadd.f32 %v877_v21, %v780_v23  ;;  %v990_v51 = vmul.f32 %v4580_v41, %v9490_v13  ;;  %v4955_v46 = vld [vmem:[%s5628_s27 + $0xdf0] sm:$0xff]  ;;  %v2235_v12 = vmul.f32 %v4758_v28, %v9491_v20  ;;  %v9492_v23 = vld [vmem:[#allocation256_spill] sm:$0xff]  ;;  %v3386_v41 = vadd.f32 %v3370_v56, %v3273_v4  ;;  %v9494_v45 = vld [vmem:[#allocation38_spill] sm:$0xff] }
 0x599   : > { %5512 = vset.pattern.permute.xlu1 %v9219_v26  ;;  %v2138_v58 = vadd.f32 %v2122_v43, %v2025_v42  ;;  %v4971_v27 = vld [vmem:[%s5628_s27 + $0xe70] sm:$0xff]  ;;  %v2348_v29 = vmul.f32 %v4774_v3, %v9492_v23  ;;  %v3596_v14 = vmul.f32 %v4955_v46, %v8009_v63  ;;  %v4612_v43 = vld [vmem:[%s5628_s27 + $0x338] sm:$0xff]  ;;  %v1103_v28 = vmul.f32 %v4596_v25, %v9494_v45  ;;  %v4790_v42 = vld [vmem:[%s5628_s27 + $0x8c8] sm:$0xff] }
 0x59a   : > { %3535 = vperm.xlu1 %5512, %v9487_v5   ;;  %v9493_v22 = vld [vmem:[#allocation65_spill] sm:$0xff]  ;;  %v1006_v53 = vadd.f32 %v990_v51, %v893_v15  ;;  %v3499_v49 = vadd.f32 %v3483_v30, %v3386_v41  ;;  %v3709_v21 = vmul.f32 %v4971_v27, %v8033_v40  ;;  %v8102_v16 = vpop.permute.xlu1 %3680  ;;  %v3597_v18 = vmul.f32 %v4956_v35, %v9495_v24  ;;  %v9496_v40 = vld [vmem:[#allocation47_spill] sm:$0xff]  ;;  %v4988_v20 = vld [vmem:[%s5628_s27 + $0xef8] sm:$0xff] }
 0x59b   : > { %v3484_v57 = vmul.f32 %v4940_v44, %v9493_v22  ;;  %v2251_v38 = vadd.f32 %v2235_v12, %v2138_v58  ;;  %v3710_v15 = vmul.f32 %v4972_v8, %v8024_v1  ;;  %v1216_v51 = vmul.f32 %v4612_v43, %v9496_v40  ;;  %v4987_v3 = vld [vmem:[%s5628_s27 + $0xef0] sm:$0xff]  ;;  %v5004_v12 = vld [vmem:[%s5628_s27 + $0xf78] sm:$0xff]  ;;  %v4822_v41 = vld [vmem:[%s5628_s27 + $0x9c8] sm:$0xff] }
 0x59c   : > { %v3612_v56 = vadd.f32 %v3596_v14, %v3499_v49  ;;  %v1119_v13 = vadd.f32 %v1103_v28, %v1006_v53  ;;  %v9497_v44 = vld [vmem:[#allocation237_spill] sm:$0xff]  ;;  %v4628_v1 = vld [vmem:[%s5628_s27 + $0x3b8] sm:$0xff]  ;;  %v3822_v23 = vmul.f32 %v4987_v3, %v7720_v54  ;;  %v4838_v14 = vld [vmem:[%s5628_s27 + $0xa48] sm:$0xff]  ;;  %v3823_v8 = vmul.f32 %v4988_v20, %v7700_v37 }
 0x59d   : > { %v3500_v31 = vadd.f32 %v3484_v57, %v3387_v47  ;;  %v2364_v63 = vadd.f32 %v2348_v29, %v2251_v38  ;;  %v2461_v46 = vmul.f32 %v4790_v42, %v9497_v44  ;;  %v9498_v58 = vld [vmem:[#allocation289_spill] sm:$0xff]  ;;  %v4644_v27 = vld [vmem:[%s5628_s27 + $0x438] sm:$0xff]  ;;  %v3936_v38 = vmul.f32 %v5004_v12, %v3919_v17  ;;  %v9500_v54 = vld [vmem:[#allocation39_spill] sm:$0xff] }
 0x59e   : > { %5513 = vset.pattern.permute.xlu1 %v9305_v2  ;;  %v2574_v47 = vmul.f32 %v4806_v48, %v9498_v58  ;;  %v3725_v30 = vadd.f32 %v3709_v21, %v3612_v56  ;;  %v8117_v22 = vpop.permute.xlu1 %3797  ;;  %v1232_v57 = vadd.f32 %v1216_v51, %v1119_v13  ;;  %v5003_v53 = vld [vmem:[%s5628_s27 + $0xf70] sm:$0xff]  ;;  %v9501_v21 = vld [vmem:[#allocation118_spill] sm:$0xff]  ;;  %v9502_v42 = vld [vmem:[#allocation267_spill] sm:$0xff] }
 0x59f   : > { %3769 = vperm.xlu1 %5513, %v9448_v9   ;;  %v3613_v4 = vadd.f32 %v3597_v18, %v3500_v31  ;;  %v2477_v25 = vadd.f32 %v2461_v46, %v2364_v63  ;;  %v9499_v49 = vld [vmem:[#allocation5_spill] sm:$0xff]  ;;  %v1329_v31 = vmul.f32 %v4628_v1, %v9500_v54  ;;  %v1442_v45 = vmul.f32 %v4644_v27, %v9501_v21  ;;  %v5020_v28 = vld [vmem:[%s5628_s27 + $0xff8] sm:$0xff]  ;;  %v9503_v63 = vld [vmem:[#allocation323_spill] sm:$0xff] }
 0x5a0   : > { %v3838_v43 = vadd.f32 %v3822_v23, %v3725_v30  ;;  %v2687_v48 = vmul.f32 %v4822_v41, %v9502_v42  ;;  %v2800_v24 = vmul.f32 %v4838_v14, %v9503_v63  ;;  %v9504_v18 = vld [vmem:[#allocation44_spill] sm:$0xff]  ;;  %v5019_v37 = vld [vmem:[%s5628_s27 + $0xff0] sm:$0xff]  ;;  %v4660_v40 = vld [vmem:[%s5628_s27 + $0x4b8] sm:$0xff] }
 0x5a1   : > { %v3726_v29 = vadd.f32 %v3710_v15, %v3613_v4  ;;  %v2590_v35 = vadd.f32 %v2574_v47, %v2477_v25  ;;  %v3935_v56 = vmul.f32 %v5003_v53, %v9504_v18  ;;  %v1345_v13 = vadd.f32 %v1329_v31, %v1232_v57  ;;  %v4676_v51 = vld [vmem:[%s5628_s27 + $0x538] sm:$0xff]  ;;  %v4854_v4 = vld [vmem:[%s5628_s27 + $0xac8] sm:$0xff]  ;;  %v9505_v12 = vld [vmem:[#allocation71_spill] sm:$0xff] }
 0x5a2   : > { %v4032_v17 = vpop.permute.xlu1 %4031  ;;  %v4870_v30 = vld [vmem:[%s5628_s27 + $0xb48] sm:$0xff]  ;;  %v4048_v1 = vmul.f32 %v5019_v37, %v9505_v12  ;;  %v4951_v27 = vld [vmem:[%s5628_s27 + $0xdd0] sm:$0xff]  ;;  %v9506_v23 = vld [vmem:[#allocation115_spill] sm:$0xff] }
 0x5a3   : > { %5514 = vset.pattern.permute.xlu1 %v9283_v34  ;;  %v3839_v15 = vadd.f32 %v3823_v8, %v3726_v29  ;;  %v2703_v3 = vadd.f32 %v2687_v48, %v2590_v35  ;;  %v4049_v46 = vmul.f32 %v5020_v28, %v4032_v17  ;;  %v3951_v58 = vadd.f32 %v3935_v56, %v3838_v43  ;;  %v9507_v57 = vld [vmem:[#allocation152_spill] sm:$0xff]  ;;  %v9508_v14 = vld [vmem:[#allocation297_spill] sm:$0xff]  ;;  %v4692_v21 = vld [vmem:[%s5628_s27 + $0x5b8] sm:$0xff] }
 0x5a4   : > { %3886 = vperm.xlu1 %5514, %v9421_v11   ;;  %v1458_v47 = vadd.f32 %v1442_v45, %v1345_v13  ;;  %v1555_v29 = vmul.f32 %v4660_v40, %v9506_v23  ;;  %v1668_v41 = vmul.f32 %v4676_v51, %v9507_v57  ;;  %v2913_v53 = vmul.f32 %v4854_v4, %v9508_v14  ;;  %v9509_v35 = vld [vmem:[#allocation357_spill] sm:$0xff]  ;;  %v4708_v45 = vld [vmem:[%s5628_s27 + $0x638] sm:$0xff]  ;;  %v4886_v48 = vld [vmem:[%s5628_s27 + $0xbc8] sm:$0xff] }
 0x5a5   : > { %v3952_v44 = vadd.f32 %v3936_v38, %v3839_v15  ;;  %v2816_v20 = vadd.f32 %v2800_v24, %v2703_v3  ;;  %v3026_v8 = vmul.f32 %v4870_v30, %v9509_v35  ;;  %v4064_v38 = vadd.f32 %v4048_v1, %v3951_v58  ;;  %v4902_v63 = vld [vmem:[%s5628_s27 + $0xc48] sm:$0xff]  ;;  %v9510_v56 = vld [vmem:[#allocation145_spill] sm:$0xff]  ;;  %v9511_v13 = vld [vmem:[#allocation186_spill] sm:$0xff] }
 0x5a6   : > { %v3560_v43 = vpop.permute.xlu1 %3559  ;;  %v1571_v54 = vadd.f32 %v1555_v29, %v1458_v47  ;;  %v1781_v15 = vmul.f32 %v4692_v21, %v9510_v56  ;;  %v1894_v37 = vmul.f32 %v4708_v45, %v9511_v13  ;;  %v9512_v40 = vld [vmem:[#allocation328_spill] sm:$0xff]  ;;  %v9513_v3 = vld [vmem:[#allocation90_spill] sm:$0xff]  ;;  %v9517_v45 = vld [vmem:[#allocation205_spill] sm:$0xff] }
 0x5a7   : > { %v4065_v25 = vadd.f32 %v4049_v46, %v3952_v44  ;;  %v3592_v31 = vmul.f32 %v4951_v27, %v3560_v43  ;;  %v2929_v28 = vadd.f32 %v2913_v53, %v2816_v20  ;;  %v3139_v51 = vmul.f32 %v4886_v48, %v9512_v40  ;;  %v4740_v58 = vld [vmem:[%s5628_s27 + $0x738] sm:$0xff]  ;;  %v4918_v30 = vld [vmem:[%s5628_s27 + $0xcc8] sm:$0xff]  ;;  %v9514_v27 = vld [vmem:[#allocation175_spill] sm:$0xff] }
 0x5a8   : > { %5515 = vset.pattern.permute.xlu1 %v9219_v26  ;;  %v1684_v42 = vadd.f32 %v1668_v41, %v1571_v54  ;;  %v3252_v44 = vmul.f32 %v4902_v63, %v9513_v3  ;;  %v4934_v20 = vld [vmem:[%s5628_s27 + $0xd48] sm:$0xff]  ;;  %v9516_v57 = vld [vmem:[#allocation358_spill] sm:$0xff] }
 0x5a9   : > { %3531 = vperm.xlu1 %5515, %v9499_v49   ;;  %5183 = vmatprep.subr.mxu1 %v4065_v25  ;;  %v8151_v24 = vadd.f32 %v3592_v31, %v7799_v61  ;;  %v3042_v18 = vadd.f32 %v3026_v8, %v2929_v28  ;;  %v4724_v61 = vld [vmem:[%s5628_s27 + $0x6b8] sm:$0xff]  ;;  %v9515_v23 = vld [vmem:[#allocation220_spill] sm:$0xff]  ;;  %v3365_v41 = vmul.f32 %v4918_v30, %v9516_v57 }
 0x5aa   : > { %5184 = vmatpush3.msra.mxu1 %v4065_v25  ;;  %v8155_v17 = vpop.permute.xlu1 %3793  ;;  %v1797_v46 = vadd.f32 %v1781_v15, %v1684_v42  ;;  %v2007_v25 = vmul.f32 %v4724_v61, %v9514_v27  ;;  %v2120_v29 = vmul.f32 %v4740_v58, %v9515_v23  ;;  %v4950_v53 = vld [vmem:[%s5628_s27 + $0xdc8] sm:$0xff]  ;;  %v4756_v35 = vld [vmem:[%s5628_s27 + $0x7b8] sm:$0xff]  ;;  %v9521_v23 = vld [vmem:[#allocation3_spill] sm:$0xff] }
 0x5ab   : > { %5185 = vmatprep.subr.mxu1 %v4064_v38  ;;  %v3155_v47 = vadd.f32 %v3139_v51, %v3042_v18  ;;  %v4772_v8 = vld [vmem:[%s5628_s27 + $0x838] sm:$0xff]  ;;  %v2233_v28 = vmul.f32 %v4756_v35, %v9517_v45  ;;  %v4970_v15 = vld [vmem:[%s5628_s27 + $0xe68] sm:$0xff]  ;;  %v9519_v51 = vld [vmem:[#allocation235_spill] sm:$0xff] }
 0x5ac   : > { %5186 = vmatpush3.msra.mxu1 %v4064_v38  ;;  %v1910_v4 = vadd.f32 %v1894_v37, %v1797_v46  ;;  %v4788_v18 = vld [vmem:[%s5628_s27 + $0x8b8] sm:$0xff]  ;;  %v4986_v40 = vld [vmem:[%s5628_s27 + $0xee8] sm:$0xff]  ;;  %v3708_v61 = vmul.f32 %v4970_v15, %v8069_v39  ;;  %v9522_v39 = vld [vmem:[#allocation265_spill] sm:$0xff] }
 0x5ad   : > { %5516 = vset.pattern.permute.xlu1 %v9233_v19  ;;  %v3268_v12 = vadd.f32 %v3252_v44, %v3155_v47  ;;  %v4804_v56 = vld [vmem:[%s5628_s27 + $0x938] sm:$0xff]  ;;  %v2459_v3 = vmul.f32 %v4788_v18, %v9519_v51  ;;  %v9520_v44 = vld [vmem:[#allocation288_spill] sm:$0xff]  ;;  %v9525_v45 = vld [vmem:[#allocation355_spill] sm:$0xff] }
 0x5ae   : > { %3648 = vperm.xlu1 %5516, %v9487_v5   ;;  %v3911_v1 = vpop.permute.xlu1 %3910  ;;  %v2023_v14 = vadd.f32 %v2007_v25, %v1910_v4  ;;  %v2572_v46 = vmul.f32 %v4804_v56, %v9520_v44  ;;  %v5002_v58 = vld [vmem:[%s5628_s27 + $0xf68] sm:$0xff]  ;;  %v3821_v4 = vmul.f32 %v4986_v40, %v8117_v22  ;;  %v4985_v56 = vld [vmem:[%s5628_s27 + $0xee0] sm:$0xff]  ;;  %v4884_v15 = vld [vmem:[%s5628_s27 + $0xbb8] sm:$0xff] }
 0x5af   : > { %v3381_v43 = vadd.f32 %v3365_v41, %v3268_v12  ;;  %v4836_v12 = vld [vmem:[%s5628_s27 + $0xa38] sm:$0xff]  ;;  %v3934_v25 = vmul.f32 %v5002_v58, %v3911_v1  ;;  %v9523_v41 = vld [vmem:[#allocation321_spill] sm:$0xff]  ;;  %v5001_v44 = vld [vmem:[%s5628_s27 + $0xf60] sm:$0xff] }
 0x5b0   : > { %v2136_v38 = vadd.f32 %v2120_v29, %v2023_v14  ;;  %v5018_v29 = vld [vmem:[%s5628_s27 + $0xfe8] sm:$0xff]  ;;  %v2798_v22 = vmul.f32 %v4836_v12, %v9523_v41  ;;  %v9526_v58 = vld [vmem:[#allocation326_spill] sm:$0xff] }
 0x5b1   : > { %v5016_v41 = vld [vmem:[%s5628_s27 + $0xfd8] sm:$0xff] }
 0x5b2   : > { %5517 = vset.pattern.permute.xlu1 %v9283_v34  ;;  %v3556_v54 = vpop.permute.xlu1 %3555  ;;  %v2249_v63 = vadd.f32 %v2233_v28, %v2136_v38  ;;  %v4953_v38 = vld [vmem:[%s5628_s27 + $0xde0] sm:$0xff] }
 0x5b3   : > { %3882 = vperm.xlu1 %5517, %v9448_v9   ;;  %v3591_v21 = vmul.f32 %v4950_v53, %v3556_v54 }
 0x5b6   : > { %v8183_v13 = vpop.permute.xlu1 %3672 }
 0x5b7   : > { %5518 = vset.pattern.permute.xlu1 %v9189_v33 }
 0x5b8   : > { %3999 = vperm.xlu1 %5518, %v9421_v11   ;;  %v3478_v11 = vmul.f32 %v4934_v20, %v7947_v10  ;;  %v9518_v10 = vld [vmem:[#allocation254_spill] sm:$0xff] }
 0x5b9   : > { %v2346_v42 = vmul.f32 %v4772_v8, %v9518_v10  ;;  %v4820_v20 = vld [vmem:[%s5628_s27 + $0x9b8] sm:$0xff]  ;;  %v4969_v10 = vld [vmem:[%s5628_s27 + $0xe60] sm:$0xff] }
 0x5ba   : > { %v3494_v31 = vadd.f32 %v3478_v11, %v3381_v43  ;;  %v3907_v30 = vpop.permute.xlu1 %3906  ;;  %v2685_v57 = vmul.f32 %v4820_v20, %v9522_v39  ;;  %v4852_v43 = vld [vmem:[%s5628_s27 + $0xab8] sm:$0xff]  ;;  %v3707_v40 = vmul.f32 %v4969_v10, %v8102_v16  ;;  %v9528_v16 = vld [vmem:[#allocation4_spill] sm:$0xff] }
 0x5bb   : > { %v2362_v37 = vadd.f32 %v2346_v42, %v2249_v63  ;;  %v3594_v63 = vmul.f32 %v4953_v38, %v8054_v52  ;;  %v4932_v39 = vld [vmem:[%s5628_s27 + $0xd38] sm:$0xff] }
 0x5bc   : > { %5520 = vset.pattern.permute.xlu1 %v9233_v19  ;;  %v8178_v48 = vadd.f32 %v3591_v21, %v3494_v31  ;;  %v9524_v31 = vld [vmem:[#allocation296_spill] sm:$0xff] }
 0x5bd   : > { %3644 = vperm.xlu1 %5520, %v9499_v49   ;;  %v2475_v47 = vadd.f32 %v2459_v3, %v2362_v37  ;;  %v2911_v21 = vmul.f32 %v4852_v43, %v9524_v31  ;;  %v4900_v37 = vld [vmem:[%s5628_s27 + $0xc38] sm:$0xff]  ;;  %v8218_v3 = vpop.permute.xlu0 %3632  ;;  %v3610_v52 = vadd.f32 %v3594_v63, %v7826_v6  ;;  %v4967_v63 = vld [vmem:[%s5628_s27 + $0xe50] sm:$0xff] }
 0x5be   : > { %v4024_v14 = vpop.permute.xlu1 %4023  ;;  %v4948_v43 = vld [vmem:[%s5628_s27 + $0xdb8] sm:$0xff] }
 0x5bf   : > { %v2588_v27 = vadd.f32 %v2572_v46, %v2475_v47  ;;  %v4047_v8 = vmul.f32 %v5018_v29, %v4024_v14  ;;  %v3820_v46 = vmul.f32 %v4985_v56, %v8155_v17  ;;  %v3137_v47 = vmul.f32 %v4884_v15, %v9526_v58  ;;  %v4916_v29 = vld [vmem:[%s5628_s27 + $0xcb8] sm:$0xff]  ;;  %v4999_v15 = vld [vmem:[%s5628_s27 + $0xf50] sm:$0xff]  ;;  %v451_v58 = vld [vmem:[%s5628_s27] sm:$0xff] }
 0x5c0   : > { %v3723_v12 = vadd.f32 %v3707_v40, %v3610_v52  ;;  %v3705_v56 = vmul.f32 %v4967_v63, %v8183_v13  ;;  %v4525_v52 = vld [vmem:[%s5628_s27 + $0x80] sm:$0xff] }
 0x5c1   : > { %5521 = vset.pattern.permute.xlu1 %v9305_v2  ;;  %v2701_v53 = vadd.f32 %v2685_v57, %v2588_v27  ;;  %v3933_v27 = vmul.f32 %v5001_v44, %v3907_v30  ;;  %v4016_v17 = vpop.permute.xlu0 %4015  ;;  %v3476_v30 = vmul.f32 %v4932_v39, %v7928_v0  ;;  %v5015_v44 = vld [vmem:[%s5628_s27 + $0xfd0] sm:$0xff]  ;;  %v4557_v39 = vld [vmem:[%s5628_s27 + $0x180] sm:$0xff] }
 0x5c2   : > { %3761 = vperm.xlu1 %5521, %v9487_v5   ;;  %v3836_v57 = vadd.f32 %v3820_v46, %v3723_v12  ;;  %v4541_v12 = vld [vmem:[%s5628_s27 + $0x100] sm:$0xff] }
 0x5c3   : > { %v2814_v1 = vadd.f32 %v2798_v22, %v2701_v53  ;;  %v8209_v42 = vpop.permute.xlu1 %3668  ;;  %v9529_v53 = vld [vmem:[#allocation356_spill] sm:$0xff]  ;;  %v4589_v63 = vld [vmem:[%s5628_s27 + $0x280] sm:$0xff] }
 0x5c5   : > { %v2927_v18 = vadd.f32 %v2911_v21, %v2814_v1  ;;  %v4947_v21 = vld [vmem:[%s5628_s27 + $0xdb0] sm:$0xff] }
 0x5c6   : > { %5523 = vset.pattern.permute.xlu1 %v9189_v33 }
 0x5c7   : > { %3995 = vperm.xlu1 %5523, %v9448_v9   ;;  %v3724_v9 = vadd.f32 %v3708_v61, %v7997_v50  ;;  %v4868_v50 = vld [vmem:[%s5628_s27 + $0xb38] sm:$0xff] }
 0x5c8   : > { %v3024_v28 = vmul.f32 %v4868_v50, %v9525_v45  ;;  %v3786_v61 = vpop.permute.xlu1 %3785 }
 0x5c9   : > { %v3837_v11 = vadd.f32 %v3821_v4, %v3724_v9  ;;  %v9527_v4 = vld [vmem:[#allocation63_spill] sm:$0xff] }
 0x5ca   : > { %v3040_v51 = vadd.f32 %v3024_v28, %v2927_v18  ;;  %v3250_v20 = vmul.f32 %v4900_v37, %v9527_v4  ;;  %v9530_v28 = vld [vmem:[#allocation6_spill] sm:$0xff]  ;;  %v4983_v18 = vld [vmem:[%s5628_s27 + $0xed0] sm:$0xff] }
 0x5cb   : > { %5524 = vset.pattern.permute.xlu1 %v9219_v26  ;;  %v3950_v35 = vadd.f32 %v3934_v25, %v3837_v11  ;;  %v5017_v25 = vld [vmem:[%s5628_s27 + $0xfe0] sm:$0xff]  ;;  %v3949_v11 = vadd.f32 %v3933_v27, %v3836_v57  ;;  %v3818_v37 = vmul.f32 %v4983_v18, %v3786_v61  ;;  %v9531_v61 = vld [vmem:[#allocation21_spill] sm:$0xff]  ;;  %v4982_v57 = vld [vmem:[%s5628_s27 + $0xec8] sm:$0xff] }
 0x5cc   : > { %3523 = vperm.xlu1 %5524, %v9521_v23   ;;  %v3153_v9 = vadd.f32 %v3137_v47, %v3040_v51 }
 0x5cd   : > { %v4063_v54 = vadd.f32 %v4047_v8, %v3950_v35  ;;  %v4020_v22 = vpop.permute.xlu1 %4019  ;;  %v4045_v35 = vmul.f32 %v5016_v41, %v4016_v17  ;;  %v454_v41 = vld [vmem:[%s5628_s27 + $0x18] sm:$0xff] }
 0x5ce   : > { %v3266_v6 = vadd.f32 %v3250_v20, %v3153_v9  ;;  %v4046_v14 = vmul.f32 %v5017_v25, %v4020_v22  ;;  %v9532_v20 = vld [vmem:[#allocation19_spill] sm:$0xff]  ;;  %v4528_v25 = vld [vmem:[%s5628_s27 + $0x98] sm:$0xff]  ;;  %v9534_v22 = vld [vmem:[#allocation28_spill] sm:$0xff] }
 0x5cf   : > { %5187 = vmatprep.subr.mxu1 %v4063_v54  ;;  %v4061_v38 = vadd.f32 %v4045_v35, %v8005_v36 }
 0x5d0   : > { %5525 = vset.pattern.permute.xlu1 %v9305_v2  ;;  %5188 = vmatpush3.msra.mxu1 %v4063_v54  ;;  %v4062_v8 = vadd.f32 %v4046_v14, %v3949_v11  ;;  %v647_v11 = vmul.f32 %v4528_v25, %v9534_v22  ;;  %v4621_v25 = vld [vmem:[%s5628_s27 + $0x380] sm:$0xff] }
 0x5d1   : > { %3757 = vperm.xlu1 %5525, %v9499_v49  }
 0x5d2   : > { %5189 = vmatprep.subr.mxu1 %v4062_v8 }
 0x5d3   : > { %5190 = vmatpush3.msra.mxu1 %v4062_v8  ;;  %v9536_v8 = vld [vmem:[#allocation25_spill] sm:$0xff] }
 0x5d4   : > { %5191 = vmatprep.subr.mxu1 %v4061_v38 }
 0x5d5   : > { %5526 = vset.pattern.permute.xlu1 %v9283_v34  ;;  %5192 = vmatpush3.msra.mxu1 %v4061_v38 }
 0x5d6   : > { %3874 = vperm.xlu1 %5526, %v9487_v5  }
 0x5da   : > { %5527 = vset.pattern.permute.xlu1 %v9219_v26  ;;  %v3363_v26 = vmul.f32 %v4916_v29, %v9529_v53  ;;  %v4066_v29 = vld [vmem:[%s8743_s2] sm:$0xff] }
 0x5db   : > { %3519 = vperm.xlu1 %5527, %v9528_v16   ;;  %5215 = vmatprep.mubr.f32.mxu1 %v4066_v29  ;;  %v9535_v53 = vld [vmem:[#allocation23_spill] sm:$0xff]  ;;  %v9541_v29 = vld [vmem:[#allocation29_spill] sm:$0xff] }
 0x5dc   : > { %v3379_v50 = vadd.f32 %v3363_v26, %v3266_v6  ;;  %v9533_v6 = vld [vmem:[#allocation18_spill] sm:$0xff]  ;;  %v870_v26 = vmul.f32 %v4557_v39, %v9535_v53 }
 0x5dd   : > { %v9545_v53 = vld [vmem:[#allocation26_spill] sm:$0xff] }
 0x5de   : > { %v3492_v54 = vadd.f32 %v3476_v30, %v3379_v50  ;;  %v4544_v50 = vld [vmem:[%s5628_s27 + $0x118] sm:$0xff] }
 0x5df   : > { %5528 = vset.pattern.permute.xlu1 %v9233_v19 }
 0x5e0   : > { %3636 = vperm.xlu1 %5528, %v9521_v23  }
 0x5e2   : > { %v3548_v1 = vpop.permute.xlu1 %3547 }
 0x5e3   : > { %v3589_v31 = vmul.f32 %v4948_v43, %v3548_v1  ;;  %v550_v43 = vmul.f32 %v9536_v8, %v454_v41  ;;  %v452_v8 = vld [vmem:[%s5628_s27 + $0x8] sm:$0xff] }
 0x5e4   : > { %5530 = vset.pattern.permute.xlu1 %v9283_v34 }
 0x5e5   : > { %3870 = vperm.xlu1 %5530, %v9499_v49   ;;  %v8239_v19 = vadd.f32 %v3589_v31, %v3492_v54  ;;  %v4573_v54 = vld [vmem:[%s5628_s27 + $0x200] sm:$0xff]  ;;  %v663_v31 = vadd.f32 %v647_v11, %v550_v43  ;;  %v4608_v43 = vld [vmem:[%s5628_s27 + $0x318] sm:$0xff] }
 0x5e6   : > { %v4637_v11 = vld [vmem:[%s5628_s27 + $0x400] sm:$0xff] }
 0x5e7   : > { %v3782_v0 = vpop.permute.xlu1 %3781 }
 0x5e8   : > { %v3817_v30 = vmul.f32 %v4982_v57, %v3782_v0  ;;  %v9537_v0 = vld [vmem:[#allocation27_spill] sm:$0xff] }
 0x5e9   : > { %5531 = vset.pattern.permute.xlu1 %v9189_v33  ;;  %v760_v18 = vmul.f32 %v4544_v50, %v9537_v0  ;;  %v9542_v57 = vld [vmem:[#allocation99_spill] sm:$0xff]  ;;  %v9546_v50 = vld [vmem:[#allocation110_spill] sm:$0xff] }
 0x5ea   : > { %3987 = vperm.xlu1 %5531, %v9487_v5  }
 0x5ec   : > { %v3899_v36 = vpop.permute.xlu1 %3898 }
 0x5ed   : > { %v3931_v51 = vmul.f32 %v4999_v15, %v3899_v36  ;;  %v4004_v36 = vpop.permute.xlu0 %4003  ;;  %v9538_v15 = vld [vmem:[#allocation20_spill] sm:$0xff] }
 0x5ee   : > { %5533 = vset.pattern.permute.xlu1 %v9305_v2 }
 0x5ef   : > { %3749 = vperm.xlu1 %5533, %v9521_v23  }
 0x5f2   : > { %v3544_v45 = vpop.permute.xlu1 %3543 }
 0x5f3   : > { %v3588_v49 = vmul.f32 %v4947_v21, %v3544_v45  ;;  %5534 = vset.pattern.permute.xlu1 %v9283_v34  ;;  %v5014_v21 = vld [vmem:[%s5628_s27 + $0xfc8] sm:$0xff] }
 0x5f4   : > { %3866 = vperm.xlu1 %5534, %v9530_v28  }
 0x5f5   : > { %v8249_v10 = vadd.f32 %v3588_v49, %v7760_v32  ;;  %v3721_v32 = vadd.f32 %v3705_v56, %v8151_v24  ;;  %v547_v24 = vmul.f32 %v9532_v20, %v451_v58  ;;  %v4560_v49 = vld [vmem:[%s5628_s27 + $0x198] sm:$0xff]  ;;  %v4605_v20 = vld [vmem:[%s5628_s27 + $0x300] sm:$0xff] }
 0x5f7   : > { %v8252_v5 = vpop.permute.xlu1 %3660 }
 0x5f8   : > { %5535 = vset.pattern.permute.xlu1 %v9305_v2  ;;  %v3834_v2 = vadd.f32 %v3818_v37, %v3721_v32  ;;  %v983_v37 = vmul.f32 %v4573_v54, %v9538_v15  ;;  %v4542_v54 = vld [vmem:[%s5628_s27 + $0x108] sm:$0xff] }
 0x5f9   : > { %3745 = vperm.xlu1 %5535, %v9528_v16  }
 0x5fa   : > { %v3947_v47 = vadd.f32 %v3931_v51, %v3834_v2  ;;  %v776_v51 = vadd.f32 %v760_v18, %v663_v31  ;;  %v4653_v18 = vld [vmem:[%s5628_s27 + $0x480] sm:$0xff] }
 0x5fc   : > { %v3895_v40 = vpop.permute.xlu1 %3894 }
 0x5fd   : > { %5536 = vset.pattern.permute.xlu1 %v9283_v34  ;;  %v644_v34 = vmul.f32 %v4525_v52, %v9531_v61  ;;  %v4576_v61 = vld [vmem:[%s5628_s27 + $0x218] sm:$0xff] }
 0x5fe   : > { %3862 = vperm.xlu1 %5536, %v9521_v23   ;;  %v4966_v23 = vld [vmem:[%s5628_s27 + $0xe48] sm:$0xff]  ;;  %v986_v39 = vmul.f32 %v4576_v61, %v9541_v29  ;;  %v4656_v29 = vld [vmem:[%s5628_s27 + $0x498] sm:$0xff] }
 0x5ff   : > { %v660_v9 = vadd.f32 %v644_v34, %v547_v24  ;;  %v3704_v17 = vmul.f32 %v4966_v23, %v8209_v42  ;;  %v5013_v42 = vld [vmem:[%s5628_s27 + $0xfc0] sm:$0xff] }
 0x600   : > { %v4042_v32 = vmul.f32 %v5013_v42, %v4004_v36  ;;  %v4624_v42 = vld [vmem:[%s5628_s27 + $0x398] sm:$0xff] }
 0x601   : > { %v4012_v46 = vpop.permute.xlu1 %4011  ;;  %v3720_v1 = vadd.f32 %v3704_v17, %v8178_v48  ;;  %v9544_v17 = vld [vmem:[#allocation32_spill] sm:$0xff] }
 0x602   : > { %v4044_v13 = vmul.f32 %v5015_v44, %v4012_v46  ;;  %3858 = vperm.xlu1 %5536, %v9528_v16   ;;  %v9539_v44 = vld [vmem:[#allocation30_spill] sm:$0xff]  ;;  %v9540_v46 = vld [vmem:[#allocation24_spill] sm:$0xff]  ;;  %v4058_v34 = vadd.f32 %v4042_v32, %v7895_v7  ;;  %v9550_v32 = vld [vmem:[#allocation13_spill] sm:$0xff] }
 0x603   : > { %v3833_v28 = vadd.f32 %v3817_v30, %v3720_v1  ;;  %v873_v52 = vmul.f32 %v4560_v49, %v9539_v44  ;;  %v1096_v58 = vmul.f32 %v4589_v63, %v9540_v46  ;;  %v9543_v7 = vld [vmem:[#allocation22_spill] sm:$0xff]  ;;  %v4526_v30 = vld [vmem:[%s5628_s27 + $0x88] sm:$0xff]  ;;  %v1435_v1 = vmul.f32 %v4637_v11, %v9546_v50  ;;  %v9548_v49 = vld [vmem:[#allocation11_spill] sm:$0xff] }
 0x604   : > { %v4060_v4 = vadd.f32 %v4044_v13, %v3947_v47  ;;  %v4945_v13 = vld [vmem:[%s5628_s27 + $0xda0] sm:$0xff]  ;;  %v9553_v46 = vld [vmem:[#allocation144_spill] sm:$0xff]  ;;  %v9557_v11 = vld [vmem:[#allocation178_spill] sm:$0xff] }
 0x605   : > { %v889_v24 = vadd.f32 %v873_v52, %v776_v51  ;;  %v9549_v63 = vld [vmem:[#allocation31_spill] sm:$0xff]  ;;  %v9551_v51 = vld [vmem:[#allocation33_spill] sm:$0xff] }
 0x606   : > { %5537 = vset.pattern.permute.xlu1 %v9189_v33  ;;  %v8271_v27 = vpop.permute.xlu1 %3656  ;;  %5193 = vmatprep.subr.mxu1 %v4060_v4  ;;  %v757_v33 = vmul.f32 %v4541_v12, %v9533_v6  ;;  %v1212_v0 = vmul.f32 %v4608_v43, %v9549_v63  ;;  %v1325_v44 = vmul.f32 %v4624_v42, %v9551_v51  ;;  %v9552_v52 = vld [vmem:[#allocation109_spill] sm:$0xff]  ;;  %v9559_v50 = vld [vmem:[#allocation111_spill] sm:$0xff]  ;;  %v4980_v42 = vld [vmem:[%s5628_s27 + $0xeb8] sm:$0xff] }
 0x607   : > { %3971 = vperm.xlu1 %5537, %v9528_v16   ;;  %5194 = vmatpush3.msra.mxu1 %v4060_v4  ;;  %v4998_v16 = vld [vmem:[%s5628_s27 + $0xf48] sm:$0xff]  ;;  %v1002_v41 = vadd.f32 %v986_v39, %v889_v24  ;;  %v9561_v51 = vld [vmem:[#allocation14_spill] sm:$0xff] }
 0x608   : > { %v773_v14 = vadd.f32 %v757_v33, %v660_v9  ;;  %v3930_v38 = vmul.f32 %v4998_v16, %v3895_v40  ;;  %v4592_v9 = vld [vmem:[%s5628_s27 + $0x298] sm:$0xff]  ;;  %v1209_v33 = vmul.f32 %v4605_v20, %v9543_v7  ;;  %v9555_v7 = vld [vmem:[#allocation12_spill] sm:$0xff] }
 0x609   : > { %v1099_v22 = vmul.f32 %v4592_v9, %v9544_v17  ;;  %v4701_v9 = vld [vmem:[%s5628_s27 + $0x600] sm:$0xff] }
 0x60a   : > { %v886_v45 = vadd.f32 %v870_v26, %v773_v14  ;;  %v3946_v48 = vadd.f32 %v3930_v38, %v3833_v28  ;;  %v1322_v26 = vmul.f32 %v4621_v25, %v9545_v53  ;;  %v548_v28 = vmul.f32 %v9548_v49, %v452_v8  ;;  %v4574_v25 = vld [vmem:[%s5628_s27 + $0x208] sm:$0xff]  ;;  %v9556_v17 = vld [vmem:[#allocation139_spill] sm:$0xff]  ;;  %v4964_v53 = vld [vmem:[%s5628_s27 + $0xe38] sm:$0xff] }
 0x60b   : > { %v8286_v35 = vpop.permute.xlu1 %3773  ;;  %v1115_v38 = vadd.f32 %v1099_v22, %v1002_v41  ;;  %v9558_v8 = vld [vmem:[#allocation15_spill] sm:$0xff]  ;;  %v3702_v63 = vmul.f32 %v4964_v53, %v8252_v5  ;;  %v9563_v5 = vld [vmem:[#allocation212_spill] sm:$0xff] }
 0x60c   : > { %v999_v2 = vadd.f32 %v983_v37, %v886_v45  ;;  %v4640_v37 = vld [vmem:[%s5628_s27 + $0x418] sm:$0xff]  ;;  %v984_v43 = vmul.f32 %v4574_v25, %v9558_v8  ;;  %v4717_v49 = vld [vmem:[%s5628_s27 + $0x680] sm:$0xff]  ;;  %v4638_v53 = vld [vmem:[%s5628_s27 + $0x408] sm:$0xff] }
 0x60e   : > { %v1112_v23 = vadd.f32 %v1096_v58, %v999_v2  ;;  %v1548_v2 = vmul.f32 %v4653_v18, %v9552_v52  ;;  %v4606_v52 = vld [vmem:[%s5628_s27 + $0x308] sm:$0xff] }
 0x610   : > { %v4008_v56 = vpop.permute.xlu1 %4007  ;;  %v1225_v14 = vadd.f32 %v1209_v33, %v1112_v23  ;;  %v4685_v23 = vld [vmem:[%s5628_s27 + $0x580] sm:$0xff] }
 0x611   : > { %v4043_v40 = vmul.f32 %v5014_v21, %v4008_v56  ;;  %v9547_v21 = vld [vmem:[#allocation10_spill] sm:$0xff]  ;;  %v4669_v56 = vld [vmem:[%s5628_s27 + $0x500] sm:$0xff]  ;;  %v1774_v22 = vmul.f32 %v4685_v23, %v9556_v17 }
 0x612   : > { %v1338_v31 = vadd.f32 %v1322_v26, %v1225_v14  ;;  %v645_v45 = vmul.f32 %v4526_v30, %v9547_v21  ;;  %v1661_v58 = vmul.f32 %v4669_v56, %v9553_v46  ;;  %v1887_v14 = vmul.f32 %v4701_v9, %v9557_v11  ;;  %v4590_v21 = vld [vmem:[%s5628_s27 + $0x288] sm:$0xff]  ;;  %v4704_v56 = vld [vmem:[%s5628_s27 + $0x618] sm:$0xff]  ;;  %v9566_v9 = vld [vmem:[#allocation17_spill] sm:$0xff] }
 0x613   : > { %v4059_v47 = vadd.f32 %v4043_v40, %v3946_v48  ;;  %v758_v48 = vmul.f32 %v4542_v54, %v9550_v32  ;;  %v1228_v40 = vadd.f32 %v1212_v0, %v1115_v38  ;;  %v9560_v38 = vld [vmem:[#allocation148_spill] sm:$0xff]  ;;  %v4688_v0 = vld [vmem:[%s5628_s27 + $0x598] sm:$0xff]  ;;  %v1210_v25 = vmul.f32 %v4606_v52, %v9566_v9 }
 0x614   : > { %v1451_v15 = vadd.f32 %v1435_v1, %v1338_v31  ;;  %v1551_v1 = vmul.f32 %v4656_v29, %v9559_v50  ;;  %v4736_v17 = vld [vmem:[%s5628_s27 + $0x718] sm:$0xff] }
 0x615   : > { %v3536_v4 = vpop.permute.xlu1 %3535  ;;  %5195 = vmatprep.subr.mxu1 %v4059_v47  ;;  %v4768_v52 = vld [vmem:[%s5628_s27 + $0x818] sm:$0xff] }
 0x616   : > { %v3586_v12 = vmul.f32 %v4945_v13, %v3536_v4  ;;  %5196 = vmatpush3.msra.mxu1 %v4059_v47  ;;  %v661_v47 = vadd.f32 %v645_v45, %v548_v28  ;;  %v9554_v13 = vld [vmem:[#allocation114_spill] sm:$0xff]  ;;  %v4558_v4 = vld [vmem:[%s5628_s27 + $0x188] sm:$0xff]  ;;  %v1564_v20 = vadd.f32 %v1548_v2, %v1451_v15  ;;  %v4733_v28 = vld [vmem:[%s5628_s27 + $0x700] sm:$0xff] }
 0x617   : > { %5197 = vmatprep.subr.mxu1 %v4058_v34  ;;  %v1438_v61 = vmul.f32 %v4640_v37, %v9554_v13  ;;  %v871_v33 = vmul.f32 %v4558_v4, %v9555_v7  ;;  %v4996_v15 = vld [vmem:[%s5628_s27 + $0xf38] sm:$0xff]  ;;  %v9562_v2 = vld [vmem:[#allocation169_spill] sm:$0xff] }
 0x618   : > { %v8308_v6 = vadd.f32 %v3586_v12, %v9542_v57  ;;  %5198 = vmatpush3.msra.mxu1 %v4058_v34  ;;  %v774_v24 = vadd.f32 %v758_v48, %v661_v47  ;;  %v1341_v12 = vadd.f32 %v1325_v44, %v1228_v40  ;;  %v1677_v39 = vadd.f32 %v1661_v58, %v1564_v20  ;;  %v4672_v57 = vld [vmem:[%s5628_s27 + $0x518] sm:$0xff]  ;;  %v9564_v47 = vld [vmem:[#allocation141_spill] sm:$0xff] }
 0x619   : > { %v1664_v54 = vmul.f32 %v4672_v57, %v9560_v38  ;;  %v3815_v48 = vmul.f32 %v4980_v42, %v8286_v35  ;;  %v1097_v44 = vmul.f32 %v4590_v21, %v9561_v51  ;;  %v2000_v46 = vmul.f32 %v4717_v49, %v9562_v2  ;;  %v4765_v57 = vld [vmem:[%s5628_s27 + $0x800] sm:$0xff]  ;;  %v4752_v51 = vld [vmem:[%s5628_s27 + $0x798] sm:$0xff] }
 0x61a   : > { %v8313_v16 = vpop.permute.xlu1 %3769  ;;  %v1454_v41 = vadd.f32 %v1438_v61, %v1341_v12  ;;  %v887_v30 = vadd.f32 %v871_v33, %v774_v24  ;;  %v1790_v31 = vadd.f32 %v1774_v22, %v1677_v39  ;;  %v2113_v58 = vmul.f32 %v4733_v28, %v9563_v5  ;;  %v9565_v61 = vld [vmem:[#allocation182_spill] sm:$0xff]  ;;  %v4749_v39 = vld [vmem:[%s5628_s27 + $0x780] sm:$0xff]  ;;  %v9571_v28 = vld [vmem:[#allocation16_spill] sm:$0xff] }
 0x61b   : > { %v1777_v13 = vmul.f32 %v4688_v0, %v9564_v47  ;;  %v1890_v4 = vmul.f32 %v4704_v56, %v9565_v61  ;;  %v3718_v20 = vadd.f32 %v3702_v63, %v8239_v19  ;;  %v5012_v12 = vld [vmem:[%s5628_s27 + $0xfb8] sm:$0xff]  ;;  %v9569_v38 = vld [vmem:[#allocation171_spill] sm:$0xff]  ;;  %v9572_v0 = vld [vmem:[#allocation96_spill] sm:$0xff] }
 0x61c   : > { %v1567_v45 = vadd.f32 %v1551_v1, %v1454_v41  ;;  %v1903_v18 = vadd.f32 %v1887_v14, %v1790_v31  ;;  %v1000_v37 = vadd.f32 %v984_v43, %v887_v30  ;;  %v4720_v33 = vld [vmem:[%s5628_s27 + $0x698] sm:$0xff]  ;;  %v4622_v14 = vld [vmem:[%s5628_s27 + $0x388] sm:$0xff]  ;;  %v9567_v30 = vld [vmem:[#allocation199_spill] sm:$0xff] }
 0x61d   : > { %v3831_v7 = vadd.f32 %v3815_v48, %v3718_v20  ;;  %v2226_v8 = vmul.f32 %v4749_v39, %v9567_v30  ;;  %v9568_v43 = vld [vmem:[#allocation246_spill] sm:$0xff]  ;;  %v9570_v31 = vld [vmem:[#allocation216_spill] sm:$0xff]  ;;  %v1323_v63 = vmul.f32 %v4622_v14, %v9571_v28  ;;  %v4979_v47 = vld [vmem:[%s5628_s27 + $0xeb0] sm:$0xff] }
 0x61e   : > { %v1680_v32 = vadd.f32 %v1664_v54, %v1567_v45  ;;  %v2016_v35 = vadd.f32 %v2000_v46, %v1903_v18  ;;  %v1113_v23 = vadd.f32 %v1097_v44, %v1000_v37  ;;  %v2339_v50 = vmul.f32 %v4765_v57, %v9568_v43  ;;  %v4654_v45 = vld [vmem:[%s5628_s27 + $0x488] sm:$0xff]  ;;  %v4797_v37 = vld [vmem:[%s5628_s27 + $0x900] sm:$0xff]  ;;  %v9577_v9 = vld [vmem:[#allocation250_spill] sm:$0xff] }
 0x61f   : > { %v3887_v36 = vpop.permute.xlu1 %3886  ;;  %v2003_v54 = vmul.f32 %v4720_v33, %v9569_v38  ;;  %v2116_v42 = vmul.f32 %v4736_v17, %v9570_v31  ;;  %v1436_v18 = vmul.f32 %v4638_v53, %v9572_v0  ;;  %v9573_v46 = vld [vmem:[#allocation128_spill] sm:$0xff]  ;;  %v4800_v14 = vld [vmem:[%s5628_s27 + $0x918] sm:$0xff]  ;;  %v5011_v38 = vld [vmem:[%s5628_s27 + $0xfb0] sm:$0xff] }
 0x620   : > { %v3928_v24 = vmul.f32 %v4996_v15, %v3887_v36  ;;  %v1793_v29 = vadd.f32 %v1777_v13, %v1680_v32  ;;  %v2129_v41 = vadd.f32 %v2113_v58, %v2016_v35  ;;  %v1226_v1 = vadd.f32 %v1210_v25, %v1113_v23  ;;  %v4781_v15 = vld [vmem:[%s5628_s27 + $0x880] sm:$0xff]  ;;  %v4963_v32 = vld [vmem:[%s5628_s27 + $0xe30] sm:$0xff]  ;;  %v4670_v39 = vld [vmem:[%s5628_s27 + $0x508] sm:$0xff] }
 0x621   : > { %v1549_v5 = vmul.f32 %v4654_v45, %v9573_v46  ;;  %v9574_v13 = vld [vmem:[#allocation229_spill] sm:$0xff]  ;;  %v2342_v25 = vmul.f32 %v4768_v52, %v9577_v9  ;;  %v4686_v17 = vld [vmem:[%s5628_s27 + $0x588] sm:$0xff]  ;;  %v9581_v45 = vld [vmem:[#allocation314_spill] sm:$0xff] }
 0x622   : > { %v1906_v11 = vadd.f32 %v1890_v4, %v1793_v29  ;;  %v3944_v19 = vadd.f32 %v3928_v24, %v3831_v7  ;;  %v2242_v49 = vadd.f32 %v2226_v8, %v2129_v41  ;;  %v1339_v2 = vadd.f32 %v1323_v63, %v1226_v1  ;;  %v9575_v4 = vld [vmem:[#allocation280_spill] sm:$0xff]  ;;  %v4995_v29 = vld [vmem:[%s5628_s27 + $0xf30] sm:$0xff]  ;;  %v3992_v1 = vpop.permute.xlu0 %3991  ;;  %v9582_v63 = vld [vmem:[#allocation231_spill] sm:$0xff] }
 0x623   : > { %v2452_v61 = vmul.f32 %v4781_v15, %v9574_v13  ;;  %v2565_v20 = vmul.f32 %v4797_v37, %v9575_v4  ;;  %v3701_v24 = vmul.f32 %v4963_v32, %v8271_v27  ;;  %v3814_v7 = vmul.f32 %v4979_v47, %v8313_v16  ;;  %v4829_v27 = vld [vmem:[%s5628_s27 + $0xa00] sm:$0xff]  ;;  %v9578_v8 = vld [vmem:[#allocation125_spill] sm:$0xff]  ;;  %v5010_v16 = vld [vmem:[%s5628_s27 + $0xfa8] sm:$0xff] }
 0x624   : > { %v8333_v34 = vpop.permute.xlu1 %3531  ;;  %v2019_v56 = vadd.f32 %v2003_v54, %v1906_v11  ;;  %v2355_v44 = vadd.f32 %v2339_v50, %v2242_v49  ;;  %v1452_v35 = vadd.f32 %v1436_v18, %v1339_v2  ;;  %v4813_v11 = vld [vmem:[%s5628_s27 + $0x980] sm:$0xff]  ;;  %v1662_v43 = vmul.f32 %v4670_v39, %v9578_v8  ;;  %v9579_v54 = vld [vmem:[#allocation162_spill] sm:$0xff]  ;;  %v9583_v0 = vld [vmem:[#allocation284_spill] sm:$0xff] }
 0x625   : > { %v3717_v53 = vadd.f32 %v3701_v24, %v8249_v10  ;;  %v1775_v31 = vmul.f32 %v4686_v17, %v9579_v54  ;;  %v2791_v49 = vmul.f32 %v4829_v27, %v9581_v45  ;;  %v2568_v18 = vmul.f32 %v4800_v14, %v9583_v0  ;;  %v4702_v15 = vld [vmem:[%s5628_s27 + $0x608] sm:$0xff]  ;;  %v4845_v46 = vld [vmem:[%s5628_s27 + $0xa80] sm:$0xff]  ;;  %v4816_v47 = vld [vmem:[%s5628_s27 + $0x998] sm:$0xff] }
 0x626   : > { %v2132_v58 = vadd.f32 %v2116_v42, %v2019_v56  ;;  %v2468_v57 = vadd.f32 %v2452_v61, %v2355_v44  ;;  %v1565_v41 = vadd.f32 %v1549_v5, %v1452_v35  ;;  %v9580_v42 = vld [vmem:[#allocation260_spill] sm:$0xff]  ;;  %v4039_v32 = vmul.f32 %v5010_v16, %v3992_v1  ;;  %v4861_v5 = vld [vmem:[%s5628_s27 + $0xb00] sm:$0xff]  ;;  %v4832_v61 = vld [vmem:[%s5628_s27 + $0xa18] sm:$0xff] }
 0x627   : > { %v3830_v28 = vadd.f32 %v3814_v7, %v3717_v53  ;;  %v4718_v52 = vld [vmem:[%s5628_s27 + $0x688] sm:$0xff]  ;;  %v9586_v9 = vld [vmem:[#allocation290_spill] sm:$0xff]  ;;  %v4893_v8 = vld [vmem:[%s5628_s27 + $0xc00] sm:$0xff] }
 0x628   : > { %v1678_v10 = vadd.f32 %v1662_v43, %v1565_v41  ;;  %v9588_v41 = vld [vmem:[#allocation262_spill] sm:$0xff]  ;;  %v4734_v27 = vld [vmem:[%s5628_s27 + $0x708] sm:$0xff]  ;;  %v9590_v54 = vld [vmem:[#allocation185_spill] sm:$0xff] }
 0x629   : > { %v8345_v26 = vpop.permute.xlu1 %3648  ;;  %v2681_v17 = vmul.f32 %v4816_v47, %v9588_v41  ;;  %v4750_v14 = vld [vmem:[%s5628_s27 + $0x788] sm:$0xff]  ;;  %v4848_v43 = vld [vmem:[%s5628_s27 + $0xa98] sm:$0xff]  ;;  %v9595_v0 = vld [vmem:[#allocation351_spill] sm:$0xff] }
 0x62a   : > { %v4864_v16 = vld [vmem:[%s5628_s27 + $0xb18] sm:$0xff]  ;;  %v9592_v45 = vld [vmem:[#allocation320_spill] sm:$0xff] }
 0x62e   : > { %v8359_v40 = vpop.permute.xlu1 %3882 }
 0x62f   : > { %v3927_v30 = vmul.f32 %v4995_v29, %v8359_v40  ;;  %v9587_v29 = vld [vmem:[#allocation348_spill] sm:$0xff] }
 0x630   : > { %v3017_v39 = vmul.f32 %v4861_v5, %v9587_v29  ;;  %v9600_v29 = vld [vmem:[#allocation59_spill] sm:$0xff] }
 0x633   : > { %v4000_v22 = vpop.permute.xlu1 %3999 }
 0x634   : > { %v4041_v36 = vmul.f32 %v5012_v12, %v4000_v22  ;;  %v9576_v12 = vld [vmem:[#allocation201_spill] sm:$0xff] }
 0x635   : > { %v2229_v23 = vmul.f32 %v4752_v51, %v9576_v12  ;;  %v3943_v51 = vadd.f32 %v3927_v30, %v3830_v28  ;;  %v9585_v12 = vld [vmem:[#allocation196_spill] sm:$0xff]  ;;  %v4877_v30 = vld [vmem:[%s5628_s27 + $0xb80] sm:$0xff]  ;;  %v9593_v28 = vld [vmem:[#allocation70_spill] sm:$0xff] }
 0x636   : > { %v4057_v21 = vadd.f32 %v4041_v36, %v3944_v19  ;;  %v4784_v19 = vld [vmem:[%s5628_s27 + $0x898] sm:$0xff]  ;;  %v2581_v36 = vadd.f32 %v2565_v20, %v2468_v57  ;;  %v9584_v20 = vld [vmem:[#allocation155_spill] sm:$0xff]  ;;  %v4055_v57 = vadd.f32 %v4039_v32, %v7960_v60  ;;  %v4782_v32 = vld [vmem:[%s5628_s27 + $0x888] sm:$0xff] }
 0x637   : > { %v2245_v22 = vadd.f32 %v2229_v23, %v2132_v58  ;;  %v2455_v40 = vmul.f32 %v4784_v19, %v9582_v63  ;;  %v1791_v58 = vadd.f32 %v1775_v31, %v1678_v10  ;;  %v1888_v24 = vmul.f32 %v4702_v15, %v9584_v20  ;;  %v9594_v63 = vld [vmem:[#allocation292_spill] sm:$0xff] }
 0x638   : > { %v8386_v48 = vpop.permute.xlu1 %3644  ;;  %5199 = vmatprep.subr.mxu1 %v4057_v21  ;;  %v2001_v23 = vmul.f32 %v4718_v52, %v9585_v12  ;;  %v2114_v31 = vmul.f32 %v4734_v27, %v9590_v54  ;;  %v3243_v10 = vmul.f32 %v4893_v8, %v9593_v28  ;;  %v4925_v52 = vld [vmem:[%s5628_s27 + $0xd00] sm:$0xff]  ;;  %v9597_v20 = vld [vmem:[#allocation264_spill] sm:$0xff] }
 0x639   : > { %5200 = vmatpush3.msra.mxu1 %v4057_v21  ;;  %v2358_v50 = vadd.f32 %v2342_v25, %v2245_v22  ;;  %v2678_v21 = vmul.f32 %v4813_v11, %v9580_v42  ;;  %v2904_v25 = vmul.f32 %v4845_v46, %v9586_v9  ;;  %v9589_v22 = vld [vmem:[#allocation318_spill] sm:$0xff]  ;;  %v1904_v19 = vadd.f32 %v1888_v24, %v1791_v58 }
 0x63a   : > { %v2794_v11 = vmul.f32 %v4832_v61, %v9589_v22  ;;  %v9591_v42 = vld [vmem:[#allocation230_spill] sm:$0xff]  ;;  %v9596_v61 = vld [vmem:[#allocation215_spill] sm:$0xff]  ;;  %v2453_v24 = vmul.f32 %v4782_v32, %v9597_v20  ;;  %v4798_v22 = vld [vmem:[%s5628_s27 + $0x908] sm:$0xff] }
 0x63b   : > { %v2694_v37 = vadd.f32 %v2678_v21, %v2581_v36  ;;  %v2471_v2 = vadd.f32 %v2455_v40, %v2358_v50  ;;  %v2017_v60 = vadd.f32 %v2001_v23, %v1904_v19  ;;  %v2227_v21 = vmul.f32 %v4750_v14, %v9591_v42  ;;  %v4880_v46 = vld [vmem:[%s5628_s27 + $0xb98] sm:$0xff]  ;;  %v4957_v19 = vld [vmem:[%s5628_s27 + $0xe00] sm:$0xff] }
 0x63c   : > { %v2907_v40 = vmul.f32 %v4848_v43, %v9594_v63  ;;  %v4896_v58 = vld [vmem:[%s5628_s27 + $0xc18] sm:$0xff]  ;;  %v3469_v23 = vmul.f32 %v4925_v52, %v7850_v62  ;;  %v9601_v43 = vld [vmem:[#allocation245_spill] sm:$0xff]  ;;  %v3695_v54 = vmul.f32 %v4957_v19, %v8218_v3  ;;  %v4977_v32 = vld [vmem:[%s5628_s27 + $0xea0] sm:$0xff] }
 0x63d   : > { %v8400_v33 = vpop.permute.xlu1 %3761  ;;  %v2807_v13 = vadd.f32 %v2791_v49, %v2694_v37  ;;  %v2584_v35 = vadd.f32 %v2568_v18, %v2471_v2  ;;  %v3130_v49 = vmul.f32 %v4877_v30, %v9592_v45  ;;  %v3020_v18 = vmul.f32 %v4864_v16, %v9595_v0  ;;  %v9599_v9 = vld [vmem:[#allocation322_spill] sm:$0xff] }
 0x63e   : > { %v2130_v15 = vadd.f32 %v2114_v31, %v2017_v60  ;;  %v4928_v62 = vld [vmem:[%s5628_s27 + $0xd18] sm:$0xff] }
 0x63f   : > { %v2920_v36 = vadd.f32 %v2904_v25, %v2807_v13  ;;  %v2697_v53 = vadd.f32 %v2681_v17, %v2584_v35  ;;  %v9598_v35 = vld [vmem:[#allocation350_spill] sm:$0xff]  ;;  %v3133_v25 = vmul.f32 %v4880_v46, %v9599_v9 }
 0x640   : > { %v2243_v2 = vadd.f32 %v2227_v21, %v2130_v15  ;;  %v9602_v16 = vld [vmem:[#allocation298_spill] sm:$0xff]  ;;  %v9603_v21 = vld [vmem:[#allocation352_spill] sm:$0xff] }
 0x641   : > { %v3033_v50 = vadd.f32 %v3017_v39, %v2920_v36  ;;  %v2810_v1 = vadd.f32 %v2794_v11, %v2697_v53  ;;  %v3246_v39 = vmul.f32 %v4896_v58, %v9600_v29  ;;  %v4814_v11 = vld [vmem:[%s5628_s27 + $0x988] sm:$0xff]  ;;  %v4912_v53 = vld [vmem:[%s5628_s27 + $0xc98] sm:$0xff]  ;;  %v5009_v29 = vld [vmem:[%s5628_s27 + $0xfa0] sm:$0xff] }
 0x642   : > { %v3996_v56 = vpop.permute.xlu1 %3995  ;;  %v4944_v31 = vld [vmem:[%s5628_s27 + $0xd98] sm:$0xff]  ;;  %v3359_v45 = vmul.f32 %v4912_v53, %v9603_v21 }
 0x643   : > { %v4040_v44 = vmul.f32 %v5011_v38, %v3996_v56  ;;  %v4766_v56 = vld [vmem:[%s5628_s27 + $0x808] sm:$0xff]  ;;  %v3146_v37 = vadd.f32 %v3130_v49, %v3033_v50  ;;  %v2566_v50 = vmul.f32 %v4798_v22, %v9601_v43  ;;  %v3472_v49 = vmul.f32 %v4928_v62, %v7889_v59  ;;  %v4960_v63 = vld [vmem:[%s5628_s27 + $0xe18] sm:$0xff] }
 0x644   : > { %v3585_v3 = vmul.f32 %v4944_v31, %v8333_v34  ;;  %v3698_v52 = vmul.f32 %v4960_v63, %v8386_v48  ;;  %v4992_v58 = vld [vmem:[%s5628_s27 + $0xf18] sm:$0xff]  ;;  %v3812_v34 = vmul.f32 %v4977_v32, %v8400_v33  ;;  %v4894_v62 = vld [vmem:[%s5628_s27 + $0xc08] sm:$0xff] }
 0x645   : > { %v4056_v4 = vadd.f32 %v4040_v44, %v3943_v51  ;;  %v4909_v51 = vld [vmem:[%s5628_s27 + $0xc80] sm:$0xff]  ;;  %v2923_v44 = vadd.f32 %v2907_v40, %v2810_v1  ;;  %v3259_v5 = vadd.f32 %v3243_v10, %v3146_v37  ;;  %v2679_v1 = vmul.f32 %v4814_v11, %v9602_v16  ;;  %v4846_v37 = vld [vmem:[%s5628_s27 + $0xa88] sm:$0xff]  ;;  %v5008_v33 = vld [vmem:[%s5628_s27 + $0xf98] sm:$0xff]  ;;  %v3984_v11 = vpop.permute.xlu0 %3983 }
 0x646   : > { %v3356_v12 = vmul.f32 %v4909_v51, %v9598_v35  ;;  %v4961_v10 = vld [vmem:[%s5628_s27 + $0xe20] sm:$0xff]  ;;  %v4976_v51 = vld [vmem:[%s5628_s27 + $0xe98] sm:$0xff]  ;;  %v4037_v53 = vmul.f32 %v5008_v33, %v3984_v11  ;;  %v9608_v16 = vld [vmem:[#allocation336_spill] sm:$0xff] }
 0x647   : > { %v8428_v7 = vpop.permute.xlu1 %3523  ;;  %5201 = vmatprep.subr.mxu1 %v4056_v4  ;;  %v3036_v13 = vadd.f32 %v3020_v18, %v2923_v44  ;;  %v4830_v18 = vld [vmem:[%s5628_s27 + $0xa08] sm:$0xff]  ;;  %v3699_v59 = vmul.f32 %v4961_v10, %v8345_v26  ;;  %v4068_v11 = vld [vmem:[%s8743_s2 + $0x10] sm:$0xff] }
 0x648   : > { %5202 = vmatpush3.msra.mxu1 %v4056_v4  ;;  %v2340_v4 = vmul.f32 %v4766_v56, %v9596_v61  ;;  %v3372_v17 = vadd.f32 %v3356_v12, %v3259_v5  ;;  %v4993_v5 = vld [vmem:[%s5628_s27 + $0xf20] sm:$0xff]  ;;  %v4862_v12 = vld [vmem:[%s5628_s27 + $0xb08] sm:$0xff] }
 0x649   : > { %5203 = vmatprep.subr.mxu1 %v4055_v57  ;;  %v3149_v27 = vadd.f32 %v3133_v25, %v3036_v13  ;;  %v9605_v13 = vld [vmem:[#allocation332_spill] sm:$0xff]  ;;  %v3715_v26 = vadd.f32 %v3699_v59, %v8308_v6 }
 0x64a   : > { %5204 = vmatpush3.msra.mxu1 %v4055_v57  ;;  %v4941_v57 = vld [vmem:[%s5628_s27 + $0xd80] sm:$0xff]  ;;  %v2356_v41 = vadd.f32 %v2340_v4, %v2243_v2  ;;  %v3485_v30 = vadd.f32 %v3469_v23, %v3372_v17  ;;  %v9604_v2 = vld [vmem:[#allocation276_spill] sm:$0xff]  ;;  %v2905_v61 = vmul.f32 %v4846_v37, %v9605_v13  ;;  %v9606_v17 = vld [vmem:[#allocation306_spill] sm:$0xff] }
 0x64b   : > { %v3262_v60 = vadd.f32 %v3246_v39, %v3149_v27  ;;  %v2792_v46 = vmul.f32 %v4830_v18, %v9604_v2  ;;  %v4878_v25 = vld [vmem:[%s5628_s27 + $0xb88] sm:$0xff]  ;;  %v3018_v22 = vmul.f32 %v4862_v12, %v9606_v17  ;;  %v9607_v27 = vld [vmem:[#allocation365_spill] sm:$0xff] }
 0x64c   : > { %v8438_v38 = vpop.permute.xlu1 %3757  ;;  %v2469_v14 = vadd.f32 %v2453_v24, %v2356_v41  ;;  %v3131_v19 = vmul.f32 %v4878_v25, %v9607_v27  ;;  %v4942_v10 = vld [vmem:[%s5628_s27 + $0xd88] sm:$0xff] }
 0x64d   : > { %v3375_v56 = vadd.f32 %v3359_v45, %v3262_v60  ;;  %v3811_v20 = vmul.f32 %v4976_v51, %v8438_v38  ;;  %v4926_v45 = vld [vmem:[%s5628_s27 + $0xd08] sm:$0xff]  ;;  %v3583_v51 = vmul.f32 %v4942_v10, %v8428_v7 }
 0x64e   : > { %v2582_v28 = vadd.f32 %v2566_v50, %v2469_v14  ;;  %v4974_v59 = vld [vmem:[%s5628_s27 + $0xe88] sm:$0xff] }
 0x64f   : > { %v3488_v44 = vadd.f32 %v3472_v49, %v3375_v56  ;;  %v5007_v49 = vld [vmem:[%s5628_s27 + $0xf90] sm:$0xff]  ;;  %v4067_v33 = vld [vmem:[%s8743_s2 + $0x8] sm:$0xff] }
 0x650   : > { %v2695_v15 = vadd.f32 %v2679_v1, %v2582_v28  ;;  %v3244_v1 = vmul.f32 %v4894_v62, %v9608_v16  ;;  %v3980_v28 = vpop.permute.xlu0 %3979  ;;  %v4071_v27 = vld [vmem:[%s8743_s2 + $0x28] sm:$0xff] }
 0x651   : > { %v3875_v47 = vpop.permute.xlu1 %3874  ;;  %v3601_v4 = vadd.f32 %v3585_v3, %v3488_v44  ;;  %v4958_v3 = vld [vmem:[%s5628_s27 + $0xe08] sm:$0xff]  ;;  %v4036_v32 = vmul.f32 %v5007_v49, %v3980_v28 }
 0x652   : > { %v2808_v35 = vadd.f32 %v2792_v46, %v2695_v15  ;;  %v3925_v48 = vmul.f32 %v4993_v5, %v3875_v47  ;;  %v9610_v15 = vld [vmem:[#allocation366_spill] sm:$0xff]  ;;  %v4079_v62 = vld [vmem:[%s8743_s2 + $0x68] sm:$0xff] }
 0x653   : > { %v3714_v23 = vadd.f32 %v3698_v52, %v3601_v4  ;;  %v3470_v37 = vmul.f32 %v4926_v45, %v9610_v15 }
 0x654   : > { %v2921_v39 = vadd.f32 %v2905_v61, %v2808_v35  ;;  %v4990_v61 = vld [vmem:[%s5628_s27 + $0xf08] sm:$0xff] }
 0x655   : > { %v3827_v41 = vadd.f32 %v3811_v20, %v3714_v23  ;;  %v3976_v20 = vpop.permute.xlu0 %3975  ;;  %v4989_v23 = vld [vmem:[%s5628_s27 + $0xf00] sm:$0xff] }
 0x656   : > { %v3520_v36 = vpop.permute.xlu1 %3519  ;;  %v3034_v47 = vadd.f32 %v3018_v22, %v2921_v39 }
 0x657   : > { %v3582_v8 = vmul.f32 %v4941_v57, %v3520_v36  ;;  %v3828_v57 = vadd.f32 %v3812_v34, %v3715_v26  ;;  %v5006_v34 = vld [vmem:[%s5628_s27 + $0xf88] sm:$0xff] }
 0x658   : > { %v3147_v60 = vadd.f32 %v3131_v19, %v3034_v47  ;;  %v4035_v12 = vmul.f32 %v5006_v34, %v3976_v20  ;;  %v4072_v19 = vld [vmem:[%s8743_s2 + $0x30] sm:$0xff] }
 0x659   : > { %v3598_v42 = vadd.f32 %v3582_v8, %v3485_v30  ;;  %v3941_v36 = vadd.f32 %v3925_v48, %v3828_v57  ;;  %v4910_v8 = vld [vmem:[%s5628_s27 + $0xc88] sm:$0xff]  ;;  %v4076_v47 = vld [vmem:[%s8743_s2 + $0x50] sm:$0xff] }
 0x65a   : > { %v3260_v21 = vadd.f32 %v3244_v1, %v3147_v60  ;;  %v4081_v60 = vld [vmem:[%s8743_s2 + $0x78] sm:$0xff] }
 0x65b   : > { %v8472_v40 = vpop.permute.xlu1 %3636  ;;  %v8474_v0 = vadd.f32 %v3695_v54, %v3598_v42  ;;  %v9609_v54 = vld [vmem:[#allocation73_spill] sm:$0xff] }
 0x65c   : > { %v3357_v31 = vmul.f32 %v4910_v8, %v9609_v54  ;;  %v4991_v42 = vld [vmem:[%s5628_s27 + $0xf10] sm:$0xff]  ;;  %v3696_v2 = vmul.f32 %v4958_v3, %v8472_v40 }
 0x65d   : > { %v4080_v8 = vld [vmem:[%s8743_s2 + $0x70] sm:$0xff] }
 0x65e   : > { %v3373_v18 = vadd.f32 %v3357_v31, %v3260_v21 }
 0x660   : > { %v3871_v24 = vpop.permute.xlu1 %3870  ;;  %v3486_v52 = vadd.f32 %v3470_v37, %v3373_v18 }
 0x661   : > { %v3924_v9 = vmul.f32 %v4992_v58, %v3871_v24 }
 0x662   : > { %v3599_v58 = vadd.f32 %v3583_v51, %v3486_v52 }
 0x663   : > { %v3940_v14 = vadd.f32 %v3924_v9, %v3827_v41 }
 0x664   : > { %v3712_v4 = vadd.f32 %v3696_v2, %v3599_v58 }
 0x665   : > { %v3988_v38 = vpop.permute.xlu1 %3987  ;;  %v4053_v50 = vadd.f32 %v4037_v53, %v3940_v14  ;;  %v4074_v14 = vld [vmem:[%s8743_s2 + $0x40] sm:$0xff]  ;;  %v4077_v53 = vld [vmem:[%s8743_s2 + $0x58] sm:$0xff] }
 0x666   : > { %v4038_v6 = vmul.f32 %v5009_v29, %v3988_v38  ;;  %v5005_v29 = vld [vmem:[%s5628_s27 + $0xf80] sm:$0xff] }
 0x667   : > { %v4070_v38 = vld [vmem:[%s8743_s2 + $0x20] sm:$0xff] }
 0x668   : > { %v4054_v30 = vadd.f32 %v4038_v6, %v3941_v36  ;;  %v4073_v36 = vld [vmem:[%s8743_s2 + $0x38] sm:$0xff]  ;;  %v4075_v6 = vld [vmem:[%s8743_s2 + $0x48] sm:$0xff] }
 0x66a   : > { %v3750_v43 = vpop.permute.xlu1 %3749  ;;  %5205 = vmatprep.subr.mxu1 %v4054_v30 }
 0x66b   : > { %5206 = vmatpush3.msra.mxu1 %v4054_v30  ;;  %v3809_v13 = vmul.f32 %v4974_v59, %v3750_v43  ;;  %v4078_v30 = vld [vmem:[%s8743_s2 + $0x60] sm:$0xff] }
 0x66c   : > { %5207 = vmatprep.subr.mxu1 %v4053_v50 }
 0x66d   : > { %5208 = vmatpush3.msra.mxu1 %v4053_v50  ;;  %v3825_v24 = vadd.f32 %v3809_v13, %v3712_v4 }
 0x66f   : > { %v3867_v63 = vpop.permute.xlu1 %3866 }
 0x670   : > { %v3923_v56 = vmul.f32 %v4991_v42, %v3867_v63 }
 0x672   : > { %v3939_v44 = vadd.f32 %v3923_v56, %v7921_v55  ;;  %v4973_v55 = vld [vmem:[%s5628_s27 + $0xe80] sm:$0xff] }
 0x674   : > { %v3746_v46 = vpop.permute.xlu1 %3745  ;;  %v4052_v5 = vadd.f32 %v4036_v32, %v3939_v44 }
 0x675   : > { %v3808_v40 = vmul.f32 %v4973_v55, %v3746_v46 }
 0x676   : > { %5209 = vmatprep.subr.mxu1 %v4052_v5 }
 0x677   : > { %5210 = vmatpush3.msra.mxu1 %v4052_v5  ;;  %v3824_v39 = vadd.f32 %v3808_v40, %v8474_v0  ;;  %v4069_v0 = vld [vmem:[%s8743_s2 + $0x18] sm:$0xff] }
 0x679   : > { %v3863_v7 = vpop.permute.xlu1 %3862 }
 0x67a   : > { %v3922_v35 = vmul.f32 %v4990_v61, %v3863_v7 }
 0x67c   : > { %v3938_v26 = vadd.f32 %v3922_v35, %v3825_v24 }
 0x67d   : > { %v3859_v48 = vpop.permute.xlu1 %3858 }
 0x67e   : > { %v4051_v9 = vadd.f32 %v4035_v12, %v3938_v26  ;;  %v3921_v25 = vmul.f32 %v4989_v23, %v3859_v48 }
 0x680   : > { %5211 = vmatprep.subr.mxu1 %v4051_v9  ;;  %v3937_v41 = vadd.f32 %v3921_v25, %v3824_v39 }
 0x681   : > { %5212 = vmatpush3.msra.mxu1 %v4051_v9 }
 0x682   : > { %v3972_v57 = vpop.permute.xlu1 %3971 }
 0x683   : > { %v4034_v17 = vmul.f32 %v5005_v29, %v3972_v57 }
 0x685   : > { %v4050_v22 = vadd.f32 %v4034_v17, %v3937_v41 }
 0x687   : > { %5213 = vmatprep.subr.mxu1 %v4050_v22 }
 0x688   : > { %5214 = vmatpush3.msra.mxu1 %v4050_v22 }
 0x689   : > { %5216 = vmatmul.mubr.f32.vlgmr.msra.gmra.mxu1 %v4067_v33 }
 0x68a   : > { %5218 = vmatprep.mubr.f32.mxu1 %v4068_v11 }
 0x68d   : > { %5219 = vmatmul.mubr.f32.gmra.mxu1 %v4069_v0 }
 0x68e   : > { %5221 = vmatprep.mubr.f32.mxu1 %v4070_v38 }
 0x691   : > { %5222 = vmatmul.mubr.f32.gmra.mxu1 %v4071_v27 }
 0x692   : > { %5224 = vmatprep.mubr.f32.mxu1 %v4072_v19 }
 0x695   : > { %5225 = vmatmul.mubr.f32.gmra.mxu1 %v4073_v36 }
 0x696   : > { %5227 = vmatprep.mubr.f32.mxu1 %v4074_v14 }
 0x699   : > { %5228 = vmatmul.mubr.f32.gmra.mxu1 %v4075_v6 }
 0x69a   : > { %5230 = vmatprep.mubr.f32.mxu1 %v4076_v47 }
 0x69d   : > { %5231 = vmatmul.mubr.f32.gmra.mxu1 %v4077_v53 }
 0x69e   : > { %5233 = vmatprep.mubr.f32.mxu1 %v4078_v30 }
 0x6a1   : > { %5234 = vmatmul.mubr.f32.gmra.mxu1 %v4079_v62 }
 0x6a2   : > { %5236 = vmatprep.mubr.f32.mxu1 %v4080_v8 }
 0x6a5   : > { %5237 = vmatmul.mubr.f32.gmra.mxu1 %v4081_v60 }
 0x749   : > { %v8561_v43 = vpop.f32.mrf.mxu1 }
 0x74b   : > { %v8563_v50 = vpop.f32.mrf.mxu1 }
 0x74d   : > { %v8565_v16 = vpop.f32.mrf.mxu1 }
 0x74f   : > { %v8567_v1 = vpop.f32.mrf.mxu1 }
 0x751   : > { %v8569_v54 = vpop.f32.mrf.mxu1 }
 0x753   : > { %v8571_v31 = vpop.f32.mrf.mxu1 }
 0x755   : > { %v8573_v42 = vpop.f32.mrf.mxu1 }
 0x757   : > { %v8575_v21 = vpop.f32.mrf.mxu1 }
 0x759   : > { %v8577_v45 = vpop.f32.mrf.mxu1 }
 0x75b   : > { %v8579_v49 = vpop.f32.mrf.mxu1 }
 0x75d   : > { %v8581_v28 = vpop.f32.mrf.mxu1 }
 0x75f   : > { %v8583_v10 = vpop.f32.mrf.mxu1 }
 0x761   : > { %v8585_v63 = vpop.f32.mrf.mxu1 }
 0x763   : > { %v8587_v18 = vpop.f32.mrf.mxu1  ;;  %4230 = sbr.rel (%p5021_p5) target bundleno = 1906 (0x772), region = 52 }
 0x765   : > { %v8589_v56 = vpop.f32.mrf.mxu1 }
 0x767   : > { %v8591_v3 = vpop.f32.mrf.mxu1 }
 0x768   : > { %v4231_v15 = vmax.f32 %v8563_v50, 0.0  ;;  %vm4247_vm1 = vcmask 261120   ;;  %v4232_v37 = vmax.f32 %v8561_v43, 0.0  ;;  %v4233_v32 = vmax.f32 %v8567_v1, 0.0 }
 0x769   : > { %v4234_v51 = vmax.f32 %v8565_v16, 0.0  ;;  %v4235_v44 = vmax.f32 %v8571_v31, 0.0  ;;  %v4236_v59 = vmax.f32 %v8569_v54, 0.0  ;;  %v4237_v52 = vmax.f32 %v8575_v21, 0.0 }
 0x76a   : > { %4248 = vst.msk [vmem:[#allocation2] sm:$0xff] %vm4247_vm1, %v4231_v15  ;;  %4249 = vst.msk [vmem:[#allocation2 + $0x8] sm:$0xff] %vm4247_vm1, %v4232_v37  ;;  %v4238_v2 = vmax.f32 %v8573_v42, 0.0  ;;  %v4239_v46 = vmax.f32 %v8579_v49, 0.0  ;;  %v4240_v5 = vmax.f32 %v8577_v45, 0.0  ;;  %v4241_v58 = vmax.f32 %v8583_v10, 0.0 }
 0x76b   : > { %4250 = vst.msk [vmem:[#allocation2 + $0x10] sm:$0xff] %vm4247_vm1, %v4233_v32  ;;  %4251 = vst.msk [vmem:[#allocation2 + $0x18] sm:$0xff] %vm4247_vm1, %v4234_v51  ;;  %v4242_v13 = vmax.f32 %v8581_v28, 0.0  ;;  %v4243_v61 = vmax.f32 %v8587_v18, 0.0  ;;  %v4244_v4 = vmax.f32 %v8585_v63, 0.0  ;;  %v4245_v34 = vmax.f32 %v8591_v3, 0.0 }
 0x76c   : > { %4252 = vst.msk [vmem:[#allocation2 + $0x20] sm:$0xff] %vm4247_vm1, %v4235_v44  ;;  %4253 = vst.msk [vmem:[#allocation2 + $0x28] sm:$0xff] %vm4247_vm1, %v4236_v59  ;;  %v4246_v20 = vmax.f32 %v8589_v56, 0.0 }
 0x76d   : > { %4254 = vst.msk [vmem:[#allocation2 + $0x30] sm:$0xff] %vm4247_vm1, %v4237_v52  ;;  %4255 = vst.msk [vmem:[#allocation2 + $0x38] sm:$0xff] %vm4247_vm1, %v4238_v2 }
 0x76e   : > { %4256 = vst.msk [vmem:[#allocation2 + $0x40] sm:$0xff] %vm4247_vm1, %v4239_v46  ;;  %4257 = vst.msk [vmem:[#allocation2 + $0x48] sm:$0xff] %vm4247_vm1, %v4240_v5 }
 0x76f   : > { %4258 = vst.msk [vmem:[#allocation2 + $0x50] sm:$0xff] %vm4247_vm1, %v4241_v58  ;;  %4259 = vst.msk [vmem:[#allocation2 + $0x58] sm:$0xff] %vm4247_vm1, %v4242_v13 }
 0x770   : > { %4260 = vst.msk [vmem:[#allocation2 + $0x60] sm:$0xff] %vm4247_vm1, %v4243_v61  ;;  %4261 = vst.msk [vmem:[#allocation2 + $0x68] sm:$0xff] %vm4247_vm1, %v4244_v4 }
 0x771   : > { %4262 = vst.msk [vmem:[#allocation2 + $0x70] sm:$0xff] %vm4247_vm1, %v4245_v34  ;;  %4263 = vst.msk [vmem:[#allocation2 + $0x78] sm:$0xff] %vm4247_vm1, %v4246_v20 }
 0x772 PF: > { %p5022_p6 = scmp.ne.s32.totalorder %s5619_s22, 2 }
 0x774   : > { %4267 = sbr.rel (%p5022_p6) target bundleno = 2133 (0x855), region = 56 }
 0x779   : > { %v4271_v7 = vld [vmem:[%s8745_s4 + $0x18] sm:$0xff]  ;;  %v4270_v24 = vld [vmem:[%s8745_s4 + $0x10] sm:$0xff]  ;;  %v4269_v55 = vld [vmem:[%s8745_s4 + $0x8] sm:$0xff]  ;;  %vm4279_vm2 = vcmask 261120   ;;  %vm4473_vm3 = vcmask 15360  }
 0x77a   : > { %5239 = vmatprep.subr.mxu0 %v4271_v7  ;;  %5271 = vmatprep.subr.mxu1 %v4271_v7  ;;  %v4268_v35 = vld [vmem:[%s8745_s4] sm:$0xff] }
 0x77b   : > { %5240 = vmatpush3.msra.mxu0 %v4271_v7  ;;  %5275 = vmatpush3.msra.mxu1 %v4271_v7  ;;  %v5023_v12 = vld [vmem:[%s8746_s5] ss:$0 sm:$0xff] }
 0x77c   : > { %5241 = vmatprep.subr.mxu0 %v4270_v24  ;;  %5272 = vmatprep.subr.mxu1 %v4270_v24 }
 0x77d   : > { %5242 = vmatpush3.msra.mxu0 %v4270_v24  ;;  %5276 = vmatpush3.msra.mxu1 %v4270_v24 }
 0x77e   : > { %5243 = vmatprep.subr.mxu0 %v4269_v55  ;;  %5273 = vmatprep.subr.mxu1 %v4269_v55 }
 0x77f   : > { %5244 = vmatpush3.msra.mxu0 %v4269_v55  ;;  %5277 = vmatpush3.msra.mxu1 %v4269_v55 }
 0x780   : > { %5245 = vmatprep.subr.mxu0 %v4268_v35  ;;  %5274 = vmatprep.subr.mxu1 %v4268_v35 }
 0x781   : > { %5246 = vmatpush3.msra.mxu0 %v4268_v35  ;;  %5278 = vmatpush3.msra.mxu1 %v4268_v35 }
 0x782   : > { %5247 = vmatprep.mubr.msk.f32.mxu0 %vm4279_vm2, %v8563_v50  ;;  %5259 = vmatprep.mubr.msk.f32.mxu1 %vm4279_vm2, %v8579_v49 }
 0x783   : > { %5248 = vmatmul.mubr.msk.f32.vlgmr.msra.gmra.mxu0 %vm4279_vm2, %v8561_v43  ;;  %5260 = vmatmul.mubr.msk.f32.vlgmr.msra.gmra.mxu1 %vm4279_vm2, %v8577_v45 }
 0x784   : > { %5250 = vmatprep.mubr.msk.f32.mxu0 %vm4279_vm2, %v8567_v1  ;;  %5262 = vmatprep.mubr.msk.f32.mxu1 %vm4279_vm2, %v8583_v10 }
 0x787   : > { %5251 = vmatmul.mubr.msk.f32.gmra.mxu0 %vm4279_vm2, %v8565_v16  ;;  %5263 = vmatmul.mubr.msk.f32.gmra.mxu1 %vm4279_vm2, %v8581_v28 }
 0x788   : > { %5253 = vmatprep.mubr.msk.f32.mxu0 %vm4279_vm2, %v8571_v31  ;;  %5265 = vmatprep.mubr.msk.f32.mxu1 %vm4279_vm2, %v8587_v18 }
 0x78b   : > { %5254 = vmatmul.mubr.msk.f32.gmra.mxu0 %vm4279_vm2, %v8569_v54  ;;  %5266 = vmatmul.mubr.msk.f32.gmra.mxu1 %vm4279_vm2, %v8585_v63 }
 0x78c   : > { %5256 = vmatprep.mubr.msk.f32.mxu0 %vm4279_vm2, %v8575_v21  ;;  %5268 = vmatprep.mubr.msk.f32.mxu1 %vm4279_vm2, %v8591_v3 }
 0x78f   : > { %5257 = vmatmul.mubr.msk.f32.gmra.mxu0 %vm4279_vm2, %v8573_v42  ;;  %5269 = vmatmul.mubr.msk.f32.gmra.mxu1 %vm4279_vm2, %v8589_v56 }
 0x843   : > { %v5249_v26 = vpop.f32.mrf.mxu0  ;;  %v5261_v23 = vpop.f32.mrf.mxu1 }
 0x844   : > { %v4400_v40 = vadd.f32 %v5249_v26, %v5023_v12  ;;  %v4440_v48 = vadd.f32 %v5261_v23, %v5023_v12 }
 0x845   : > { %v4394_v9 = vpop.f32.mrf.mxu0  ;;  %v4434_v25 = vpop.f32.mrf.mxu1 }
 0x846   : > { %4475 = vst.msk [vmem:[%s8747_s6 + $0x8] sm:$0xff] %vm4473_vm3, %v4400_v40  ;;  %4483 = vst.msk [vmem:[%s8747_s6 + $0x48] sm:$0xff] %vm4473_vm3, %v4440_v48  ;;  %v4395_v29 = vadd.f32 %v5023_v12, %v4394_v9  ;;  %v4435_v39 = vadd.f32 %v5023_v12, %v4434_v25 }
 0x847   : > { %v5252_v57 = vpop.f32.mrf.mxu0  ;;  %v5264_v41 = vpop.f32.mrf.mxu1 }
 0x848   : > { %4474 = vst.msk [vmem:[%s8747_s6] sm:$0xff] %vm4473_vm3, %v4395_v29  ;;  %4482 = vst.msk [vmem:[%s8747_s6 + $0x40] sm:$0xff] %vm4473_vm3, %v4435_v39  ;;  %v4410_v17 = vadd.f32 %v5252_v57, %v5023_v12  ;;  %v4450_v22 = vadd.f32 %v5264_v41, %v5023_v12 }
 0x849   : > { %v4404_v33 = vpop.f32.mrf.mxu0  ;;  %v4444_v11 = vpop.f32.mrf.mxu1 }
 0x84a   : > { %4477 = vst.msk [vmem:[%s8747_s6 + $0x18] sm:$0xff] %vm4473_vm3, %v4410_v17  ;;  %4485 = vst.msk [vmem:[%s8747_s6 + $0x58] sm:$0xff] %vm4473_vm3, %v4450_v22  ;;  %v4405_v0 = vadd.f32 %v5023_v12, %v4404_v33  ;;  %v4445_v38 = vadd.f32 %v5023_v12, %v4444_v11 }
 0x84b   : > { %v5255_v27 = vpop.f32.mrf.mxu0  ;;  %v5267_v19 = vpop.f32.mrf.mxu1 }
 0x84c   : > { %4476 = vst.msk [vmem:[%s8747_s6 + $0x10] sm:$0xff] %vm4473_vm3, %v4405_v0  ;;  %4484 = vst.msk [vmem:[%s8747_s6 + $0x50] sm:$0xff] %vm4473_vm3, %v4445_v38  ;;  %v4420_v36 = vadd.f32 %v5255_v27, %v5023_v12  ;;  %v4460_v14 = vadd.f32 %v5267_v19, %v5023_v12 }
 0x84d   : > { %v4414_v6 = vpop.f32.mrf.mxu0  ;;  %v4454_v47 = vpop.f32.mrf.mxu1 }
 0x84e   : > { %4479 = vst.msk [vmem:[%s8747_s6 + $0x28] sm:$0xff] %vm4473_vm3, %v4420_v36  ;;  %4487 = vst.msk [vmem:[%s8747_s6 + $0x68] sm:$0xff] %vm4473_vm3, %v4460_v14  ;;  %v4415_v53 = vadd.f32 %v5023_v12, %v4414_v6  ;;  %v4455_v30 = vadd.f32 %v5023_v12, %v4454_v47 }
 0x84f   : > { %v5258_v62 = vpop.f32.mrf.mxu0  ;;  %v5270_v8 = vpop.f32.mrf.mxu1 }
 0x850   : > { %4478 = vst.msk [vmem:[%s8747_s6 + $0x20] sm:$0xff] %vm4473_vm3, %v4415_v53  ;;  %4486 = vst.msk [vmem:[%s8747_s6 + $0x60] sm:$0xff] %vm4473_vm3, %v4455_v30  ;;  %v4430_v60 = vadd.f32 %v5258_v62, %v5023_v12  ;;  %v4470_v43 = vadd.f32 %v5270_v8, %v5023_v12 }
 0x851   : > { %v4424_v50 = vpop.f32.mrf.mxu0  ;;  %v4464_v16 = vpop.f32.mrf.mxu1 }
 0x852   : > { %4481 = vst.msk [vmem:[%s8747_s6 + $0x38] sm:$0xff] %vm4473_vm3, %v4430_v60  ;;  %4489 = vst.msk [vmem:[%s8747_s6 + $0x78] sm:$0xff] %vm4473_vm3, %v4470_v43  ;;  %v4425_v1 = vadd.f32 %v5023_v12, %v4424_v50  ;;  %v4465_v54 = vadd.f32 %v5023_v12, %v4464_v16 }
 0x854   : > { %4480 = vst.msk [vmem:[%s8747_s6 + $0x30] sm:$0xff] %vm4473_vm3, %v4425_v1  ;;  %4488 = vst.msk [vmem:[%s8747_s6 + $0x70] sm:$0xff] %vm4473_vm3, %v4465_v54 }
 0x855 PF: > { %s16_s21 = sadd.s32 1, %s5544_s21  }
 0x856   : > { %p13_p7 = scmp.ge.s32.totalorder %s16_s21, 5  }
 0x858   :  { %15 = sbr.rel (!%p13_p7) target bundleno = 1 (0x1), region = 113 }

</bundles_post_ra>
